<compile_context>
chip_gen: v6e
topology: v6e:2x2x1
jax: 0.10.0
libtpu: 0.0.40
codegen_flags: <defaults>
</compile_context>

<pallas_src>
import jax
import jax.numpy as jnp
from jax.experimental import pallas as pl
from jax.experimental.pallas import tpu as pltpu

EPS = 1e-5


def _fused_kernel(x1_ref, x2_ref, w_ref, g1_ref, b1_ref, g2_ref, b2_ref, o_ref):
    # x1_ref, x2_ref : (Cin, P)      f32
    # w_ref          : (Cb, Cin)     bf16  (1x1 conv weight block, Cb = Cout/nblk)
    # g1/b1          : (Cin, 1)      f32   BN1 affine params
    # g2/b2          : (Cb, 1)       f32   BN2 affine params (block)
    # o_ref          : (Cb, P)       f32
    x1 = x1_ref[...]
    inv_p = 1.0 / x1.shape[1]

    # ---- BatchNorm2d #1: per-channel stats over the P lanes, one pass ----
    mean1 = jnp.sum(x1, axis=1, keepdims=True) * inv_p
    ex2_1 = jnp.sum(x1 * x1, axis=1, keepdims=True) * inv_p
    var1 = ex2_1 - mean1 * mean1
    xn = (x1 - mean1) * jax.lax.rsqrt(var1 + EPS) * g1_ref[...] + b1_ref[...]

    # ---- residual add ----
    s = x2_ref[...] + xn                                   # (Cin, P) f32

    # ---- 1x1 convolution == matmul: bf16 x bf16 on the MXU, f32 accumulation ----
    z = jnp.dot(w_ref[...], s.astype(jnp.bfloat16),
                preferred_element_type=jnp.float32)        # (Cb, P) f32

    # ---- BatchNorm2d #2: per-output-channel stats, one pass ----
    mean2 = jnp.sum(z, axis=1, keepdims=True) * inv_p
    ex2_2 = jnp.sum(z * z, axis=1, keepdims=True) * inv_p
    var2 = ex2_2 - mean2 * mean2
    o_ref[...] = (z - mean2) * jax.lax.rsqrt(var2 + EPS) * g2_ref[...] + b2_ref[...]


def _cout_split():
    """Returns (num Cout blocks, use core-parallel grid semantics).

    2-way Cout split across the two TensorCores only on v7x; single block on
    v5e/v6e (1 TC per chip -> extra grid steps are pure overhead).
    """
    try:
        kind = jax.devices()[0].device_kind.lower()
    except Exception:
        return 1, False
    if "v7" in kind and getattr(pltpu, "CORE_PARALLEL", None) is not None:
        return 2, True
    return 1, False


def fused_bn_add_conv_bn(x321, x336, w, g1, b1, g2, b2):
    """x321, x336: NCHW f32; w: (Cout, Cin, 1, 1) f32; returns NCHW f32."""
    N, Cin, H, W = x321.shape
    Cout = w.shape[0]
    P = N * H * W

    # NCHW -> (Cin, P). Pure reshape when N == 1 (the module's shape).
    if N == 1:
        x1 = x321.reshape(Cin, P)
        x2 = x336.reshape(Cin, P)
    else:
        # TODO(synk): N>1 with NCHW input requires one transpose; module uses N=1.
        x1 = jnp.transpose(x321, (1, 0, 2, 3)).reshape(Cin, P)
        x2 = jnp.transpose(x336, (1, 0, 2, 3)).reshape(Cin, P)

    # bf16 weight halves the dominant HBM->VMEM DMA; MXU runs bf16 natively and
    # the kernel keeps f32 accumulation.
    w2d = w.reshape(Cout, Cin).astype(jnp.bfloat16)        # (Cout, Cin)
    g1r = g1.reshape(Cin, 1)
    b1r = b1.reshape(Cin, 1)
    g2r = g2.reshape(Cout, 1)
    b2r = b2.reshape(Cout, 1)

    nblk, core_parallel = _cout_split()
    if Cout % nblk != 0:
        nblk, core_parallel = 1, False
    Cb = Cout // nblk

    def _call(dim_sem):
        out = pl.pallas_call(
            _fused_kernel,
            out_shape=jax.ShapeDtypeStruct((Cout, P), jnp.float32),
            grid=(nblk,),
            in_specs=[
                pl.BlockSpec((Cin, P), lambda j: (0, 0)),
                pl.BlockSpec((Cin, P), lambda j: (0, 0)),
                pl.BlockSpec((Cb, Cin), lambda j: (j, 0)),
                pl.BlockSpec((Cin, 1), lambda j: (0, 0)),
                pl.BlockSpec((Cin, 1), lambda j: (0, 0)),
                pl.BlockSpec((Cb, 1), lambda j: (j, 0)),
                pl.BlockSpec((Cb, 1), lambda j: (j, 0)),
            ],
            out_specs=pl.BlockSpec((Cb, P), lambda j: (j, 0)),
            compiler_params=pltpu.CompilerParams(dimension_semantics=dim_sem),
        )(x1, x2, w2d, g1r, b1r, g2r, b2r)
        return jax.block_until_ready(out)

    if core_parallel:
        try:
            out2d = _call((pltpu.CORE_PARALLEL,))
        except Exception:
            # Environment does not accept CORE_PARALLEL here; fall back to a
            # (correct, just serial) 2-step loop on one core.
            out2d = _call(("arbitrary",))
    else:
        out2d = _call(("arbitrary",))

    # (Cout, P) -> NCHW. Pure reshape when N == 1.
    if N == 1:
        return out2d.reshape(1, Cout, H, W)
    return jnp.transpose(out2d.reshape(Cout, N, H, W), (1, 0, 2, 3))


def _reference(x321, x336, w, g1, b1, g2, b2, *, quantize_bf16=False):
    """Pure-JAX reference mirroring the PyTorch training-mode forward.

    quantize_bf16=True applies the same bf16 rounding of the conv operands
    that the kernel uses (f32 accumulation), for a tight kernel-math check.
    """
    def bn(x, g, b):
        m = jnp.mean(x, axis=(0, 2, 3), keepdims=True)
        v = jnp.mean((x - m) ** 2, axis=(0, 2, 3), keepdims=True)
        return (x - m) * jax.lax.rsqrt(v + EPS) * g.reshape(1, -1, 1, 1) + b.reshape(1, -1, 1, 1)

    y = bn(x321, g1, b1)
    s = x336 + y
    if quantize_bf16:
        s = s.astype(jnp.bfloat16)
        w = w.astype(jnp.bfloat16)
    z = jax.lax.conv_general_dilated(
        s, w, window_strides=(1, 1), padding="VALID",
        dimension_numbers=("NCHW", "OIHW", "NCHW"),
        preferred_element_type=jnp.float32).astype(jnp.float32)
    return bn(z, g2, b2)


if __name__ == "__main__":
    # Module-implied shapes: N=1, Cin=320, H=W=7, Cout=1280.
    N, Cin, H, W, Cout = 1, 320, 7, 7, 1280

    key = jax.random.PRNGKey(0)
    k1, k2, k3, k4, k5, k6, k7 = jax.random.split(key, 7)

    x321 = jax.random.normal(k1, (N, Cin, H, W), dtype=jnp.float32)
    x336 = jax.random.normal(k2, (N, Cin, H, W), dtype=jnp.float32)

    # Deterministic parameter init (synthetic, not a checkpoint load).
    conv_w = jax.random.normal(k3, (Cout, Cin, 1, 1), dtype=jnp.float32) * 0.05
    gamma1 = 1.0 + 0.1 * jax.random.normal(k4, (Cin,), dtype=jnp.float32)
    beta1 = 0.1 * jax.random.normal(k5, (Cin,), dtype=jnp.float32)
    gamma2 = 1.0 + 0.1 * jax.random.normal(k6, (Cout,), dtype=jnp.float32)
    beta2 = 0.1 * jax.random.normal(k7, (Cout,), dtype=jnp.float32)

    out = fused_bn_add_conv_bn(x321, x336, conv_w, gamma1, beta1, gamma2, beta2)
    out = jax.block_until_ready(out)
    assert out.shape == (N, Cout, H, W), out.shape

    # Tight check: same bf16 rounding of the conv operands as the kernel
    # (verifies the fused BN/add/matmul/BN math).
    ref_q = jax.block_until_ready(
        _reference(x321, x336, conv_w, gamma1, beta1, gamma2, beta2, quantize_bf16=True))
    assert jnp.allclose(out, ref_q, atol=1e-3, rtol=1e-3), float(jnp.max(jnp.abs(out - ref_q)))

    # Loose check vs the pure-f32 module semantics: bounds the bf16-weight
    # quantization impact (BN2's batch stats absorb per-channel scale error;
    # only elementwise noise remains).
    ref_f32 = jax.block_until_ready(
        _reference(x321, x336, conv_w, gamma1, beta1, gamma2, beta2, quantize_bf16=False))
    assert jnp.allclose(out, ref_f32, atol=2e-2, rtol=2e-2), float(jnp.max(jnp.abs(out - ref_f32)))

    print("KERNEL_OK")
</pallas_src>

<mosaic_0001>
module attributes {stable_mosaic.version = 11 : i64} {
  func.func @_fused_kernel(%arg0: i32, %arg1: memref<320x49xf32, #tpu.memory_space<vmem>>, %arg2: memref<320x49xf32, #tpu.memory_space<vmem>>, %arg3: memref<1280x320xbf16, #tpu.memory_space<vmem>>, %arg4: memref<320x1xf32, #tpu.memory_space<vmem>>, %arg5: memref<320x1xf32, #tpu.memory_space<vmem>>, %arg6: memref<1280x1xf32, #tpu.memory_space<vmem>>, %arg7: memref<1280x1xf32, #tpu.memory_space<vmem>>, %arg8: memref<1280x49xf32, #tpu.memory_space<vmem>>) attributes {dimension_semantics = [#tpu.dimension_semantics<arbitrary>], iteration_bounds = array<i64: 1>, scalar_prefetch = 0 : i64, scratch_operands = 0 : i64, tpu.core_type = #tpu.core_type<tc>, window_params = [{pipeline_mode = #tpu.pipeline_mode<synchronous>, transform_indices = @transform_0, window_bounds = array<i64: 320, 49>}, {pipeline_mode = #tpu.pipeline_mode<synchronous>, transform_indices = @transform_1, window_bounds = array<i64: 320, 49>}, {transform_indices = @transform_2, window_bounds = array<i64: 1280, 320>}, {pipeline_mode = #tpu.pipeline_mode<synchronous>, transform_indices = @transform_3, window_bounds = array<i64: 320, 1>}, {pipeline_mode = #tpu.pipeline_mode<synchronous>, transform_indices = @transform_4, window_bounds = array<i64: 320, 1>}, {transform_indices = @transform_5, window_bounds = array<i64: 1280, 1>}, {transform_indices = @transform_6, window_bounds = array<i64: 1280, 1>}, {transform_indices = @transform_7, window_bounds = array<i64: 1280, 49>}]} {
    %c0 = arith.constant 0 : index
    %c0_0 = arith.constant 0 : index
    %0 = vector.load %arg1[%c0, %c0_0] : memref<320x49xf32, #tpu.memory_space<vmem>>, vector<320x49xf32>
    %cst = arith.constant dense<0.000000e+00> : vector<320xf32>
    %1 = vector.multi_reduction <add>, %0, %cst [1] : vector<320x49xf32> to vector<320xf32>
    %2 = vector.shape_cast %1 : vector<320xf32> to vector<320x1xf32>
    %cst_1 = arith.constant 0.0204081628 : f32
    %3 = vector.broadcast %cst_1 : f32 to vector<320x1xf32>
    %4 = arith.mulf %2, %3 : vector<320x1xf32>
    %5 = arith.mulf %0, %0 : vector<320x49xf32>
    %cst_2 = arith.constant dense<0.000000e+00> : vector<320xf32>
    %6 = vector.multi_reduction <add>, %5, %cst_2 [1] : vector<320x49xf32> to vector<320xf32>
    %7 = vector.shape_cast %6 : vector<320xf32> to vector<320x1xf32>
    %cst_3 = arith.constant 0.0204081628 : f32
    %8 = vector.broadcast %cst_3 : f32 to vector<320x1xf32>
    %9 = arith.mulf %7, %8 : vector<320x1xf32>
    %10 = arith.mulf %4, %4 : vector<320x1xf32>
    %11 = arith.subf %9, %10 : vector<320x1xf32>
    %12 = vector.broadcast %4 : vector<320x1xf32> to vector<320x49xf32>
    %13 = arith.subf %0, %12 : vector<320x49xf32>
    %cst_4 = arith.constant 9.99999974E-6 : f32
    %14 = vector.broadcast %cst_4 : f32 to vector<320x1xf32>
    %15 = arith.addf %11, %14 : vector<320x1xf32>
    %16 = math.rsqrt %15 : vector<320x1xf32>
    %17 = vector.broadcast %16 : vector<320x1xf32> to vector<320x49xf32>
    %18 = arith.mulf %13, %17 : vector<320x49xf32>
    %c0_5 = arith.constant 0 : index
    %c0_6 = arith.constant 0 : index
    %19 = vector.load %arg4[%c0_5, %c0_6] : memref<320x1xf32, #tpu.memory_space<vmem>>, vector<320x1xf32>
    %20 = vector.broadcast %19 : vector<320x1xf32> to vector<320x49xf32>
    %21 = arith.mulf %18, %20 : vector<320x49xf32>
    %c0_7 = arith.constant 0 : index
    %c0_8 = arith.constant 0 : index
    %22 = vector.load %arg5[%c0_7, %c0_8] : memref<320x1xf32, #tpu.memory_space<vmem>>, vector<320x1xf32>
    %23 = vector.broadcast %22 : vector<320x1xf32> to vector<320x49xf32>
    %24 = arith.addf %21, %23 : vector<320x49xf32>
    %c0_9 = arith.constant 0 : index
    %c0_10 = arith.constant 0 : index
    %25 = vector.load %arg2[%c0_9, %c0_10] : memref<320x49xf32, #tpu.memory_space<vmem>>, vector<320x49xf32>
    %26 = arith.addf %25, %24 : vector<320x49xf32>
    %c0_11 = arith.constant 0 : index
    %c0_12 = arith.constant 0 : index
    %27 = vector.load %arg3[%c0_11, %c0_12] : memref<1280x320xbf16, #tpu.memory_space<vmem>>, vector<1280x320xbf16>
    %28 = arith.truncf %26 : vector<320x49xf32> to vector<320x49xbf16>
    %cst_13 = arith.constant dense<0.000000e+00> : vector<1280x49xf32>
    %29 = tpu.matmul %27, %28, %cst_13 {dimension_numbers = #tpu.dot_dimension_numbers<[1], [0], [0], [1], [0, 0, 1, 1], [], []>} : vector<1280x320xbf16>, vector<320x49xbf16>, vector<1280x49xf32> -> vector<1280x49xf32>
    %cst_14 = arith.constant dense<0.000000e+00> : vector<1280xf32>
    %30 = vector.multi_reduction <add>, %29, %cst_14 [1] : vector<1280x49xf32> to vector<1280xf32>
    %31 = vector.shape_cast %30 : vector<1280xf32> to vector<1280x1xf32>
    %cst_15 = arith.constant 0.0204081628 : f32
    %32 = vector.broadcast %cst_15 : f32 to vector<1280x1xf32>
    %33 = arith.mulf %31, %32 : vector<1280x1xf32>
    %34 = arith.mulf %29, %29 : vector<1280x49xf32>
    %cst_16 = arith.constant dense<0.000000e+00> : vector<1280xf32>
    %35 = vector.multi_reduction <add>, %34, %cst_16 [1] : vector<1280x49xf32> to vector<1280xf32>
    %36 = vector.shape_cast %35 : vector<1280xf32> to vector<1280x1xf32>
    %cst_17 = arith.constant 0.0204081628 : f32
    %37 = vector.broadcast %cst_17 : f32 to vector<1280x1xf32>
    %38 = arith.mulf %36, %37 : vector<1280x1xf32>
    %39 = arith.mulf %33, %33 : vector<1280x1xf32>
    %40 = arith.subf %38, %39 : vector<1280x1xf32>
    %41 = vector.broadcast %33 : vector<1280x1xf32> to vector<1280x49xf32>
    %42 = arith.subf %29, %41 : vector<1280x49xf32>
    %cst_18 = arith.constant 9.99999974E-6 : f32
    %43 = vector.broadcast %cst_18 : f32 to vector<1280x1xf32>
    %44 = arith.addf %40, %43 : vector<1280x1xf32>
    %45 = math.rsqrt %44 : vector<1280x1xf32>
    %46 = vector.broadcast %45 : vector<1280x1xf32> to vector<1280x49xf32>
    %47 = arith.mulf %42, %46 : vector<1280x49xf32>
    %c0_19 = arith.constant 0 : index
    %c0_20 = arith.constant 0 : index
    %48 = vector.load %arg6[%c0_19, %c0_20] : memref<1280x1xf32, #tpu.memory_space<vmem>>, vector<1280x1xf32>
    %49 = vector.broadcast %48 : vector<1280x1xf32> to vector<1280x49xf32>
    %50 = arith.mulf %47, %49 : vector<1280x49xf32>
    %c0_21 = arith.constant 0 : index
    %c0_22 = arith.constant 0 : index
    %51 = vector.load %arg7[%c0_21, %c0_22] : memref<1280x1xf32, #tpu.memory_space<vmem>>, vector<1280x1xf32>
    %52 = vector.broadcast %51 : vector<1280x1xf32> to vector<1280x49xf32>
    %53 = arith.addf %50, %52 : vector<1280x49xf32>
    %c0_23 = arith.constant 0 : index
    %c0_24 = arith.constant 0 : index
    %54 = vector.load %arg8[%c0_23, %c0_24] : memref<1280x49xf32, #tpu.memory_space<vmem>>, vector<1280x49xf32>
    tpu.vector_store %arg8[%c0_23, %c0_24], %53 {strides = array<i32>} : memref<1280x49xf32, #tpu.memory_space<vmem>>, vector<1280x49xf32>,
    return
  }
  func.func @transform_0(%arg0: i32) -> (i32, i32) {
    %c0_i32 = arith.constant 0 : i32
    %c0_i32_0 = arith.constant 0 : i32
    %c0_i32_1 = arith.constant 0 : i32
    return %c0_i32, %c0_i32_0 : i32, i32
  }
  func.func @transform_1(%arg0: i32) -> (i32, i32) {
    %c0_i32 = arith.constant 0 : i32
    %c0_i32_0 = arith.constant 0 : i32
    %c0_i32_1 = arith.constant 0 : i32
    return %c0_i32, %c0_i32_0 : i32, i32
  }
  func.func @transform_2(%arg0: i32) -> (i32, i32) {
    %c0_i32 = arith.constant 0 : i32
    %c0_i32_0 = arith.constant 0 : i32
    return %arg0, %c0_i32 : i32, i32
  }
  func.func @transform_3(%arg0: i32) -> (i32, i32) {
    %c0_i32 = arith.constant 0 : i32
    %c0_i32_0 = arith.constant 0 : i32
    %c0_i32_1 = arith.constant 0 : i32
    return %c0_i32, %c0_i32_0 : i32, i32
  }
  func.func @transform_4(%arg0: i32) -> (i32, i32) {
    %c0_i32 = arith.constant 0 : i32
    %c0_i32_0 = arith.constant 0 : i32
    %c0_i32_1 = arith.constant 0 : i32
    return %c0_i32, %c0_i32_0 : i32, i32
  }
  func.func @transform_5(%arg0: i32) -> (i32, i32) {
    %c0_i32 = arith.constant 0 : i32
    %c0_i32_0 = arith.constant 0 : i32
    return %arg0, %c0_i32 : i32, i32
  }
  func.func @transform_6(%arg0: i32) -> (i32, i32) {
    %c0_i32 = arith.constant 0 : i32
    %c0_i32_0 = arith.constant 0 : i32
    return %arg0, %c0_i32 : i32, i32
  }
  func.func @transform_7(%arg0: i32) -> (i32, i32) {
    %c0_i32 = arith.constant 0 : i32
    %c0_i32_0 = arith.constant 0 : i32
    return %arg0, %c0_i32 : i32, i32
  }
}

</mosaic_0001>

<bundles_post_ra>
// kernel: tpu_custom_call.1
= control target key start
LH: loop header
LB: loop body
LE: loop exit
PB: predicated region body
PF: predicated region fallthrough
CT: control target
= control target key end

     0   :  { %vm67_vm0 = vcmask 400384   ;;  %v19498_v52 = vmov 0   ;;  %vm2848_vm1 = vcmask 523264   ;;  %s19490_s0 = inlined_call_operand.vmem [shape: f32[320,49], index: 0, kind: input, shape index: {}]   ;;  %s19491_s3 = inlined_call_operand.vmem [shape: f32[320,1], index: 3, kind: input, shape index: {}]   ;;  %s19492_s4 = inlined_call_operand.vmem [shape: f32[320,1], index: 4, kind: input, shape index: {}]   ;;  %s19493_s2 = inlined_call_operand.vmem [shape: bf16[1280,320], index: 2, kind: input, shape index: {}]   ;;  %s19494_s1 = inlined_call_operand.vmem [shape: f32[320,49], index: 1, kind: input, shape index: {}]   ;;  %s19495_s5 = inlined_call_operand.vmem [shape: f32[1280,1], index: 5, kind: input, shape index: {}]   ;;  %s19496_s6 = inlined_call_operand.vmem [shape: f32[1280,1], index: 6, kind: input, shape index: {}]   ;;  %s19497_s7 = inlined_call_operand.vmem [shape: f32[1280,49], index: 7, kind: output, shape index: {}]  }
   0x1   :  { %v10650_v0 = vld [vmem:[%s19490_s0 + $0x10] sm:$0xff]  ;;  %v10655_v1 = vld [vmem:[%s19490_s0] sm:$0xff]  ;;  %v10660_v2 = vld [vmem:[%s19490_s0 + $0x18] sm:$0xff]  ;;  %9845 = vset.pattern.permute.xlu1 %v19498_v52  ;;  %9844 = vset.pattern.permute.xlu0 %v19498_v52 }
   0x2   :  { %v74_v3 = vsel %vm67_vm0, %v10650_v0, 0.0  ;;  %v68_v4 = vsel %vm67_vm0, %v10655_v1, 0.0  ;;  %v10669_v5 = vld [vmem:[%s19490_s0 + $0x8] sm:$0xff]  ;;  %v77_v6 = vsel %vm67_vm0, %v10660_v2, 0.0  ;;  %v10683_v9 = vld [vmem:[%s19490_s0 + $0x20] sm:$0xff]  ;;  %v10692_v12 = vld [vmem:[%s19490_s0 + $0x38] sm:$0xff]  ;;  %3089 = vmatprep.subr.bf16.mxu0 %v19498_v52  ;;  %9811 = vmatprep.subr.bf16.mxu1 %v19498_v52 }
   0x3   :  { %75 = vadd.xlane.f32.xlu1 %v74_v3  ;;  %69 = vadd.xlane.f32.xlu0 %v68_v4  ;;  %v71_v7 = vsel %vm67_vm0, %v10669_v5, 0.0  ;;  %v10678_v8 = vld [vmem:[%s19490_s0 + $0x28] sm:$0xff]  ;;  %v80_v11 = vsel %vm67_vm0, %v10683_v9, 0.0  ;;  %v10697_v13 = vld [vmem:[%s19490_s0 + $0x30] sm:$0xff]  ;;  %v89_v14 = vsel %vm67_vm0, %v10692_v12, 0.0  ;;  %v10711_v17 = vld [vmem:[%s19490_s0 + $0x40] sm:$0xff] }
   0x4   :  { %v83_v10 = vsel %vm67_vm0, %v10678_v8, 0.0  ;;  %v86_v15 = vsel %vm67_vm0, %v10697_v13, 0.0  ;;  %v10706_v16 = vld [vmem:[%s19490_s0 + $0x48] sm:$0xff]  ;;  %v92_v19 = vsel %vm67_vm0, %v10711_v17, 0.0  ;;  %v10720_v20 = vld [vmem:[%s19490_s0 + $0x58] sm:$0xff]  ;;  %v10725_v21 = vld [vmem:[%s19490_s0 + $0x50] sm:$0xff] }
   0x5   :  { %v95_v18 = vsel %vm67_vm0, %v10706_v16, 0.0  ;;  %v101_v22 = vsel %vm67_vm0, %v10720_v20, 0.0  ;;  %v98_v23 = vsel %vm67_vm0, %v10725_v21, 0.0  ;;  %v10734_v24 = vld [vmem:[%s19490_s0 + $0x68] sm:$0xff]  ;;  %v10739_v25 = vld [vmem:[%s19490_s0 + $0x60] sm:$0xff]  ;;  %v10748_v28 = vld [vmem:[%s19490_s0 + $0x78] sm:$0xff] }
   0x6   :  { %v107_v26 = vsel %vm67_vm0, %v10734_v24, 0.0  ;;  %v104_v27 = vsel %vm67_vm0, %v10739_v25, 0.0  ;;  %v10753_v29 = vld [vmem:[%s19490_s0 + $0x70] sm:$0xff]  ;;  %v113_v30 = vsel %vm67_vm0, %v10748_v28, 0.0  ;;  %v10762_v32 = vld [vmem:[%s19490_s0 + $0x88] sm:$0xff]  ;;  %v10767_v33 = vld [vmem:[%s19490_s0 + $0x80] sm:$0xff] }
   0x7   :  { %78 = vadd.xlane.f32.xlu1 %v77_v6  ;;  %72 = vadd.xlane.f32.xlu0 %v71_v7  ;;  %v110_v31 = vsel %vm67_vm0, %v10753_v29, 0.0  ;;  %v119_v34 = vsel %vm67_vm0, %v10762_v32, 0.0  ;;  %v116_v35 = vsel %vm67_vm0, %v10767_v33, 0.0  ;;  %v10776_v36 = vld [vmem:[%s19490_s0 + $0x98] sm:$0xff]  ;;  %v10781_v37 = vld [vmem:[%s19490_s0 + $0x90] sm:$0xff]  ;;  %v10790_v40 = vld [vmem:[%s19490_s0 + $0xa8] sm:$0xff] }
   0x8   :  { %v125_v38 = vsel %vm67_vm0, %v10776_v36, 0.0  ;;  %v122_v39 = vsel %vm67_vm0, %v10781_v37, 0.0  ;;  %v10795_v41 = vld [vmem:[%s19490_s0 + $0xa0] sm:$0xff]  ;;  %v131_v42 = vsel %vm67_vm0, %v10790_v40, 0.0  ;;  %v10804_v44 = vld [vmem:[%s19490_s0 + $0xb8] sm:$0xff]  ;;  %v10809_v45 = vld [vmem:[%s19490_s0 + $0xb0] sm:$0xff] }
   0x9   :  { %v128_v43 = vsel %vm67_vm0, %v10795_v41, 0.0  ;;  %v137_v46 = vsel %vm67_vm0, %v10804_v44, 0.0  ;;  %v134_v47 = vsel %vm67_vm0, %v10809_v45, 0.0  ;;  %v10818_v48 = vld [vmem:[%s19490_s0 + $0xc8] sm:$0xff]  ;;  %v10823_v49 = vld [vmem:[%s19490_s0 + $0xc0] sm:$0xff]  ;;  %v10834_v53 = vld [vmem:[%s19490_s0 + $0xd8] sm:$0xff] }
   0xa   :  { %v143_v50 = vsel %vm67_vm0, %v10818_v48, 0.0  ;;  %v140_v51 = vsel %vm67_vm0, %v10823_v49, 0.0  ;;  %v10839_v54 = vld [vmem:[%s19490_s0 + $0xd0] sm:$0xff]  ;;  %v149_v55 = vsel %vm67_vm0, %v10834_v53, 0.0  ;;  %v10850_v57 = vld [vmem:[%s19490_s0 + $0xe8] sm:$0xff]  ;;  %v10855_v58 = vld [vmem:[%s19490_s0 + $0xe0] sm:$0xff] }
   0xb   :  { %84 = vadd.xlane.f32.xlu1 %v83_v10  ;;  %81 = vadd.xlane.f32.xlu0 %v80_v11  ;;  %v146_v56 = vsel %vm67_vm0, %v10839_v54, 0.0  ;;  %v155_v59 = vsel %vm67_vm0, %v10850_v57, 0.0  ;;  %v152_v60 = vsel %vm67_vm0, %v10855_v58, 0.0  ;;  %v10864_v61 = vld [vmem:[%s19490_s0 + $0xf8] sm:$0xff]  ;;  %v10869_v62 = vld [vmem:[%s19490_s0 + $0xf0] sm:$0xff]  ;;  %v10878_v4 = vld [vmem:[%s19490_s0 + $0x108] sm:$0xff] }
   0xc   :  { %v161_v63 = vsel %vm67_vm0, %v10864_v61, 0.0  ;;  %v158_v3 = vsel %vm67_vm0, %v10869_v62, 0.0  ;;  %v10883_v6 = vld [vmem:[%s19490_s0 + $0x100] sm:$0xff]  ;;  %v167_v7 = vsel %vm67_vm0, %v10878_v4, 0.0  ;;  %v10892_v11 = vld [vmem:[%s19490_s0 + $0x118] sm:$0xff] }
   0xd   :  { %v164_v10 = vsel %vm67_vm0, %v10883_v6, 0.0 }
   0xf   :  { %90 = vadd.xlane.f32.xlu1 %v89_v14  ;;  %87 = vadd.xlane.f32.xlu0 %v86_v15  ;;  %v10897_v14 = vld [vmem:[%s19490_s0 + $0x110] sm:$0xff]  ;;  %v173_v15 = vsel %vm67_vm0, %v10892_v11, 0.0 }
  0x13   :  { %96 = vadd.xlane.f32.xlu1 %v95_v18  ;;  %93 = vadd.xlane.f32.xlu0 %v92_v19  ;;  %v170_v18 = vsel %vm67_vm0, %v10897_v14, 0.0  ;;  %v10906_v19 = vld [vmem:[%s19490_s0 + $0x128] sm:$0xff] }
  0x17   :  { %102 = vadd.xlane.f32.xlu1 %v101_v22  ;;  %99 = vadd.xlane.f32.xlu0 %v98_v23  ;;  %v10911_v22 = vld [vmem:[%s19490_s0 + $0x120] sm:$0xff]  ;;  %v179_v23 = vsel %vm67_vm0, %v10906_v19, 0.0 }
  0x1b   :  { %108 = vadd.xlane.f32.xlu1 %v107_v26  ;;  %105 = vadd.xlane.f32.xlu0 %v104_v27  ;;  %v176_v26 = vsel %vm67_vm0, %v10911_v22, 0.0  ;;  %v10920_v27 = vld [vmem:[%s19490_s0 + $0x138] sm:$0xff] }
  0x1f   :  { %114 = vadd.xlane.f32.xlu1 %v113_v30  ;;  %111 = vadd.xlane.f32.xlu0 %v110_v31  ;;  %v10925_v30 = vld [vmem:[%s19490_s0 + $0x130] sm:$0xff]  ;;  %v185_v31 = vsel %vm67_vm0, %v10920_v27, 0.0 }
  0x23   :  { %120 = vadd.xlane.f32.xlu1 %v119_v34  ;;  %117 = vadd.xlane.f32.xlu0 %v116_v35  ;;  %v182_v34 = vsel %vm67_vm0, %v10925_v30, 0.0  ;;  %v229_v35 = vmul.f32 %v10669_v5, %v10669_v5 }
  0x27   :  { %126 = vadd.xlane.f32.xlu1 %v125_v38  ;;  %123 = vadd.xlane.f32.xlu0 %v122_v39  ;;  %v228_v38 = vmul.f32 %v10655_v1, %v10655_v1  ;;  %v271_v39 = vsel %vm67_vm0, %v229_v35, 0.0  ;;  %v233_v1 = vmul.f32 %v10678_v8, %v10678_v8  ;;  %v248_v35 = vmul.f32 %v10795_v41, %v10795_v41 }
  0x28   :  { %v253_v41 = vmul.f32 %v10818_v48, %v10818_v48 }
  0x2b   :  { %132 = vadd.xlane.f32.xlu1 %v131_v42  ;;  %129 = vadd.xlane.f32.xlu0 %v128_v43  ;;  %v268_v42 = vsel %vm67_vm0, %v228_v38, 0.0  ;;  %v231_v43 = vmul.f32 %v10660_v2, %v10660_v2 }
  0x2f   :  { %138 = vadd.xlane.f32.xlu1 %v137_v46  ;;  %135 = vadd.xlane.f32.xlu0 %v134_v47  ;;  %v230_v46 = vmul.f32 %v10650_v0, %v10650_v0  ;;  %v277_v47 = vsel %vm67_vm0, %v231_v43, 0.0  ;;  %v235_v0 = vmul.f32 %v10692_v12, %v10692_v12  ;;  %v252_v43 = vmul.f32 %v10823_v49, %v10823_v49 }
  0x30   :  { %v257_v49 = vmul.f32 %v10850_v57, %v10850_v57 }
  0x31   :  { %v274_v5 = vsel %vm67_vm0, %v230_v46, 0.0  ;;  %v343_v46 = vsel %vm67_vm0, %v253_v41, 0.0 }
  0x33   :  { %144 = vadd.xlane.f32.xlu1 %v143_v50  ;;  %141 = vadd.xlane.f32.xlu0 %v140_v51  ;;  %v232_v50 = vmul.f32 %v10683_v9, %v10683_v9  ;;  %v283_v51 = vsel %vm67_vm0, %v233_v1, 0.0  ;;  %v237_v9 = vmul.f32 %v10706_v16, %v10706_v16  ;;  %v256_v1 = vmul.f32 %v10855_v58, %v10855_v58 }
  0x35   :  { %v280_v2 = vsel %vm67_vm0, %v232_v50, 0.0  ;;  %v355_v50 = vsel %vm67_vm0, %v257_v49, 0.0 }
  0x37   :  { %150 = vadd.xlane.f32.xlu1 %v149_v55  ;;  %147 = vadd.xlane.f32.xlu0 %v146_v56  ;;  %v234_v55 = vmul.f32 %v10697_v13, %v10697_v13  ;;  %v289_v56 = vsel %vm67_vm0, %v235_v0, 0.0  ;;  %v239_v13 = vmul.f32 %v10720_v20, %v10720_v20  ;;  %v261_v0 = vmul.f32 %v10878_v4, %v10878_v4 }
  0x38   :  { %v262_v4 = vmul.f32 %v10897_v14, %v10897_v14 }
  0x39   :  { %v286_v8 = vsel %vm67_vm0, %v234_v55, 0.0 }
  0x3b   :  { %156 = vadd.xlane.f32.xlu1 %v155_v59  ;;  %153 = vadd.xlane.f32.xlu0 %v152_v60  ;;  %v236_v59 = vmul.f32 %v10711_v17, %v10711_v17  ;;  %v295_v60 = vsel %vm67_vm0, %v237_v9, 0.0  ;;  %v241_v17 = vmul.f32 %v10734_v24, %v10734_v24  ;;  %v263_v9 = vmul.f32 %v10892_v11, %v10892_v11 }
  0x3c   :  { %v264_v11 = vmul.f32 %v10911_v22, %v10911_v22 }
  0x3d   :  { %v292_v12 = vsel %vm67_vm0, %v236_v59, 0.0 }
  0x3f   :  { %162 = vadd.xlane.f32.xlu1 %v161_v63  ;;  %159 = vadd.xlane.f32.xlu0 %v158_v3  ;;  %v238_v63 = vmul.f32 %v10725_v21, %v10725_v21  ;;  %v301_v3 = vsel %vm67_vm0, %v239_v13, 0.0  ;;  %v243_v21 = vmul.f32 %v10748_v28, %v10748_v28  ;;  %v265_v13 = vmul.f32 %v10906_v19, %v10906_v19 }
  0x40   :  { %v266_v19 = vmul.f32 %v10925_v30, %v10925_v30 }
  0x41   :  { %v298_v16 = vsel %vm67_vm0, %v238_v63, 0.0  ;;  %v370_v63 = vsel %vm67_vm0, %v262_v4, 0.0 }
  0x43   :  { %168 = vadd.xlane.f32.xlu1 %v167_v7  ;;  %165 = vadd.xlane.f32.xlu0 %v164_v10  ;;  %v240_v7 = vmul.f32 %v10739_v25, %v10739_v25  ;;  %v307_v10 = vsel %vm67_vm0, %v241_v17, 0.0  ;;  %v245_v25 = vmul.f32 %v10762_v32, %v10762_v32  ;;  %v267_v17 = vmul.f32 %v10920_v27, %v10920_v27 }
  0x45   :  { %v304_v20 = vsel %vm67_vm0, %v240_v7, 0.0  ;;  %v376_v7 = vsel %vm67_vm0, %v264_v11, 0.0 }
  0x47   :  { %174 = vadd.xlane.f32.xlu1 %v173_v15  ;;  %171 = vadd.xlane.f32.xlu0 %v170_v18  ;;  %v242_v15 = vmul.f32 %v10753_v29, %v10753_v29  ;;  %v313_v18 = vsel %vm67_vm0, %v243_v21, 0.0  ;;  %v247_v29 = vmul.f32 %v10776_v36, %v10776_v36  ;;  %v328_v36 = vsel %vm67_vm0, %v248_v35, 0.0 }
  0x48   :  { %v382_v21 = vsel %vm67_vm0, %v266_v19, 0.0 }
  0x49   :  { %v310_v24 = vsel %vm67_vm0, %v242_v15, 0.0 }
  0x4b   :  { %180 = vadd.xlane.f32.xlu1 %v179_v23  ;;  %177 = vadd.xlane.f32.xlu0 %v176_v26  ;;  %v244_v23 = vmul.f32 %v10767_v33, %v10767_v33  ;;  %v319_v26 = vsel %vm67_vm0, %v245_v25, 0.0  ;;  %v249_v33 = vmul.f32 %v10790_v40, %v10790_v40 }
  0x4d   :  { %v316_v28 = vsel %vm67_vm0, %v244_v23, 0.0  ;;  %v331_v38 = vsel %vm67_vm0, %v249_v33, 0.0 }
  0x4f   :  { %186 = vadd.xlane.f32.xlu1 %v185_v31  ;;  %183 = vadd.xlane.f32.xlu0 %v182_v34  ;;  %v246_v31 = vmul.f32 %v10781_v37, %v10781_v37  ;;  %v325_v34 = vsel %vm67_vm0, %v247_v29, 0.0  ;;  %v251_v37 = vmul.f32 %v10804_v44, %v10804_v44  ;;  %v340_v44 = vsel %vm67_vm0, %v252_v43, 0.0 }
  0x51   :  { %v322_v32 = vsel %vm67_vm0, %v246_v31, 0.0 }
  0x53   :  { %272 = vadd.xlane.f32.xlu1 %v271_v39  ;;  %269 = vadd.xlane.f32.xlu0 %v268_v42  ;;  %v250_v39 = vmul.f32 %v10809_v45, %v10809_v45  ;;  %v337_v42 = vsel %vm67_vm0, %v251_v37, 0.0  ;;  %v255_v45 = vmul.f32 %v10834_v53, %v10834_v53  ;;  %v352_v53 = vsel %vm67_vm0, %v256_v1, 0.0 }
  0x55   :  { %v334_v40 = vsel %vm67_vm0, %v250_v39, 0.0 }
  0x57   :  { %278 = vadd.xlane.f32.xlu1 %v277_v47  ;;  %275 = vadd.xlane.f32.xlu0 %v274_v5  ;;  %v254_v47 = vmul.f32 %v10839_v54, %v10839_v54  ;;  %v349_v5 = vsel %vm67_vm0, %v255_v45, 0.0  ;;  %v259_v54 = vmul.f32 %v10864_v61, %v10864_v61 }
  0x59   :  { %v346_v48 = vsel %vm67_vm0, %v254_v47, 0.0  ;;  %v361_v58 = vsel %vm67_vm0, %v259_v54, 0.0 }
  0x5b   :  { %284 = vadd.xlane.f32.xlu1 %v283_v51  ;;  %281 = vadd.xlane.f32.xlu0 %v280_v2  ;;  %v258_v51 = vmul.f32 %v10869_v62, %v10869_v62 }
  0x5d   :  { %v358_v55 = vsel %vm67_vm0, %v258_v51, 0.0 }
  0x5f   :  { %290 = vadd.xlane.f32.xlu1 %v289_v56  ;;  %287 = vadd.xlane.f32.xlu0 %v286_v8  ;;  %v260_v56 = vmul.f32 %v10883_v6, %v10883_v6  ;;  %v367_v8 = vsel %vm67_vm0, %v261_v0, 0.0  ;;  %v687_v0 = vld [vmem:[%s19491_s3 + $0x98] sm:$0xff] }
  0x61   :  { %v364_v59 = vsel %vm67_vm0, %v260_v56, 0.0 }
  0x63   :  { %296 = vadd.xlane.f32.xlu1 %v295_v60  ;;  %293 = vadd.xlane.f32.xlu0 %v292_v12  ;;  %v373_v12 = vsel %vm67_vm0, %v263_v9, 0.0  ;;  %v689_v9 = vld [vmem:[%s19491_s3 + $0xa8] sm:$0xff] }
  0x67   :  { %302 = vadd.xlane.f32.xlu1 %v301_v3  ;;  %299 = vadd.xlane.f32.xlu0 %v298_v16  ;;  %v379_v16 = vsel %vm67_vm0, %v265_v13, 0.0  ;;  %v691_v13 = vld [vmem:[%s19491_s3 + $0xb8] sm:$0xff] }
  0x6b   :  { %308 = vadd.xlane.f32.xlu1 %v307_v10  ;;  %305 = vadd.xlane.f32.xlu0 %v304_v20  ;;  %v385_v20 = vsel %vm67_vm0, %v267_v17, 0.0  ;;  %v693_v17 = vld [vmem:[%s19491_s3 + $0xc8] sm:$0xff] }
  0x6f   :  { %314 = vadd.xlane.f32.xlu1 %v313_v18  ;;  %311 = vadd.xlane.f32.xlu0 %v310_v24 }
  0x73   :  { %320 = vadd.xlane.f32.xlu1 %v319_v26  ;;  %317 = vadd.xlane.f32.xlu0 %v316_v28  ;;  %v669_v28 = vld [vmem:[%s19491_s3 + $0x8] sm:$0xff] }
  0x77   :  { %326 = vadd.xlane.f32.xlu1 %v325_v34  ;;  %323 = vadd.xlane.f32.xlu0 %v322_v32  ;;  %v670_v34 = vld [vmem:[%s19491_s3 + $0x10] sm:$0xff]  ;;  %v668_v32 = vld [vmem:[%s19491_s3] sm:$0xff] }
  0x7b   :  { %332 = vadd.xlane.f32.xlu1 %v331_v38  ;;  %329 = vadd.xlane.f32.xlu0 %v328_v36  ;;  %v671_v38 = vld [vmem:[%s19491_s3 + $0x18] sm:$0xff]  ;;  %v677_v36 = vld [vmem:[%s19491_s3 + $0x48] sm:$0xff] }
  0x7f   :  { %338 = vadd.xlane.f32.xlu1 %v337_v42  ;;  %335 = vadd.xlane.f32.xlu0 %v334_v40  ;;  %v672_v42 = vld [vmem:[%s19491_s3 + $0x20] sm:$0xff]  ;;  %v679_v40 = vld [vmem:[%s19491_s3 + $0x58] sm:$0xff] }
  0x83   :  { %344 = vadd.xlane.f32.xlu1 %v343_v46  ;;  %341 = vadd.xlane.f32.xlu0 %v340_v44  ;;  %v673_v46 = vld [vmem:[%s19491_s3 + $0x28] sm:$0xff] }
  0x84   :  { %v681_v44 = vld [vmem:[%s19491_s3 + $0x68] sm:$0xff] }
  0x87   :  { %350 = vadd.xlane.f32.xlu1 %v349_v5  ;;  %347 = vadd.xlane.f32.xlu0 %v346_v48  ;;  %v674_v5 = vld [vmem:[%s19491_s3 + $0x30] sm:$0xff]  ;;  %v683_v48 = vld [vmem:[%s19491_s3 + $0x78] sm:$0xff] }
  0x8b   :  { %356 = vadd.xlane.f32.xlu1 %v355_v50  ;;  %353 = vadd.xlane.f32.xlu0 %v352_v53  ;;  %v675_v50 = vld [vmem:[%s19491_s3 + $0x38] sm:$0xff]  ;;  %v685_v53 = vld [vmem:[%s19491_s3 + $0x88] sm:$0xff] }
  0x8c   :  { %v11025_v2 = vpop.xlane.xlu1 %75  ;;  %v11027_v57 = vpop.xlane.xlu0 %69 }
  0x8f   :  { %362 = vadd.xlane.f32.xlu1 %v361_v58  ;;  %359 = vadd.xlane.f32.xlu0 %v358_v55  ;;  %v676_v58 = vld [vmem:[%s19491_s3 + $0x40] sm:$0xff] }
  0x90   :  { %v11035_v61 = vpop.xlane.xlu1 %78  ;;  %v11037_v62 = vpop.xlane.xlu0 %72 }
  0x93   :  { %368 = vadd.xlane.f32.xlu1 %v367_v8  ;;  %365 = vadd.xlane.f32.xlu0 %v364_v59  ;;  %v678_v8 = vld [vmem:[%s19491_s3 + $0x50] sm:$0xff] }
  0x94   :  { %v11045_v60 = vpop.xlane.xlu1 %84  ;;  %v11047_v6 = vpop.xlane.xlu0 %81 }
  0x97   :  { %374 = vadd.xlane.f32.xlu1 %v373_v12  ;;  %371 = vadd.xlane.f32.xlu0 %v370_v63  ;;  %v680_v12 = vld [vmem:[%s19491_s3 + $0x60] sm:$0xff] }
  0x98   :  { %v11055_v3 = vpop.xlane.xlu1 %90  ;;  %v11057_v14 = vpop.xlane.xlu0 %87 }
  0x9b   :  { %380 = vadd.xlane.f32.xlu1 %v379_v16  ;;  %377 = vadd.xlane.f32.xlu0 %v376_v7  ;;  %v682_v16 = vld [vmem:[%s19491_s3 + $0x70] sm:$0xff] }
  0x9c   :  { %v11065_v10 = vpop.xlane.xlu1 %96  ;;  %v11067_v22 = vpop.xlane.xlu0 %93 }
  0x9f   :  { %386 = vadd.xlane.f32.xlu1 %v385_v20  ;;  %383 = vadd.xlane.f32.xlu0 %v382_v21  ;;  %v684_v20 = vld [vmem:[%s19491_s3 + $0x80] sm:$0xff]  ;;  %v695_v21 = vld [vmem:[%s19491_s3 + $0xd8] sm:$0xff] }
  0xa0   :  { %v11071_v15 = vpop.xlane.xlu1 %102  ;;  %v11073_v27 = vpop.xlane.xlu0 %99 }
  0xa4   :  { %v11075_v18 = vpop.xlane.xlu1 %108  ;;  %v11077_v24 = vpop.xlane.xlu0 %105 }
  0xa8   :  { %v11079_v30 = vpop.xlane.xlu1 %114  ;;  %v11081_v25 = vpop.xlane.xlu0 %111 }
  0xac   :  { %v11083_v23 = vpop.xlane.xlu1 %120  ;;  %v11085_v26 = vpop.xlane.xlu0 %117 }
  0xb0   :  { %v11090_v29 = vpop.xlane.xlu1 %126  ;;  %715 = vperm.xlu1 %9845, %v669_v28   ;;  %v11092_v31 = vpop.xlane.xlu0 %123 }
  0xb4   :  { %v11100_v33 = vpop.xlane.xlu1 %132  ;;  %720 = vperm.xlu1 %9845, %v670_v34   ;;  %v11102_v35 = vpop.xlane.xlu0 %129 }
  0xb5   :  { %710 = vperm.xlu0 %9844, %v668_v32   ;;  %v686_v32 = vld [vmem:[%s19491_s3 + $0x90] sm:$0xff] }
  0xb8   :  { %v11110_v37 = vpop.xlane.xlu1 %138  ;;  %725 = vperm.xlu1 %9845, %v671_v38   ;;  %v11112_v39 = vpop.xlane.xlu0 %135  ;;  %v697_v38 = vld [vmem:[%s19491_s3 + $0xe8] sm:$0xff] }
  0xb9   :  { %755 = vperm.xlu0 %9844, %v677_v36  }
  0xbc   :  { %v11120_v41 = vpop.xlane.xlu1 %144  ;;  %730 = vperm.xlu1 %9845, %v672_v42   ;;  %v11122_v43 = vpop.xlane.xlu0 %141 }
  0xbd   :  { %765 = vperm.xlu0 %9844, %v679_v40   ;;  %v688_v40 = vld [vmem:[%s19491_s3 + $0xa0] sm:$0xff] }
  0xc0   :  { %v11130_v45 = vpop.xlane.xlu1 %150  ;;  %735 = vperm.xlu1 %9845, %v673_v46   ;;  %v11132_v47 = vpop.xlane.xlu0 %147  ;;  %v699_v46 = vld [vmem:[%s19491_s3 + $0xf8] sm:$0xff] }
  0xc1   :  { %775 = vperm.xlu0 %9844, %v681_v44  }
  0xc4   :  { %v11140_v49 = vpop.xlane.xlu1 %156  ;;  %740 = vperm.xlu1 %9845, %v674_v5   ;;  %v11142_v1 = vpop.xlane.xlu0 %153 }
  0xc5   :  { %785 = vperm.xlu0 %9844, %v683_v48   ;;  %v690_v48 = vld [vmem:[%s19491_s3 + $0xb0] sm:$0xff] }
  0xc8   :  { %v11150_v54 = vpop.xlane.xlu1 %162  ;;  %745 = vperm.xlu1 %9845, %v675_v50   ;;  %v11152_v51 = vpop.xlane.xlu0 %159  ;;  %v701_v50 = vld [vmem:[%s19491_s3 + $0x108] sm:$0xff] }
  0xc9   :  { %795 = vperm.xlu0 %9844, %v685_v53  }
  0xcc   :  { %v11160_v55 = vpop.xlane.xlu1 %168  ;;  %750 = vperm.xlu1 %9845, %v676_v58   ;;  %v11162_v56 = vpop.xlane.xlu0 %165 }
  0xcd   :  { %805 = vperm.xlu0 %9844, %v687_v0   ;;  %v692_v0 = vld [vmem:[%s19491_s3 + $0xc0] sm:$0xff] }
  0xd0   :  { %v11170_v59 = vpop.xlane.xlu1 %174  ;;  %760 = vperm.xlu1 %9845, %v678_v8   ;;  %v11172_v4 = vpop.xlane.xlu0 %171  ;;  %v703_v8 = vld [vmem:[%s19491_s3 + $0x118] sm:$0xff] }
  0xd1   :  { %815 = vperm.xlu0 %9844, %v689_v9  }
  0xd4   :  { %v11180_v63 = vpop.xlane.xlu1 %180  ;;  %770 = vperm.xlu1 %9845, %v680_v12   ;;  %v11182_v11 = vpop.xlane.xlu0 %177 }
  0xd5   :  { %825 = vperm.xlu0 %9844, %v691_v13   ;;  %v694_v13 = vld [vmem:[%s19491_s3 + $0xd0] sm:$0xff] }
  0xd8   :  { %v11190_v7 = vpop.xlane.xlu1 %186  ;;  %780 = vperm.xlu1 %9845, %v682_v16   ;;  %v11192_v19 = vpop.xlane.xlu0 %183  ;;  %v705_v16 = vld [vmem:[%s19491_s3 + $0x128] sm:$0xff] }
  0xd9   :  { %835 = vperm.xlu0 %9844, %v693_v17  }
  0xdc   :  { %790 = vperm.xlu1 %9845, %v684_v20   ;;  %v11200_v28 = vpop.xlane.xlu1 %272  ;;  %v11202_v34 = vpop.xlane.xlu0 %269 }
  0xdd   :  { %845 = vperm.xlu0 %9844, %v695_v21   ;;  %v696_v21 = vld [vmem:[%s19491_s3 + $0xe0] sm:$0xff] }
  0xe0   :  { %800 = vperm.xlu1 %9845, %v686_v32   ;;  %v11210_v36 = vpop.xlane.xlu1 %278  ;;  %v11212_v42 = vpop.xlane.xlu0 %275  ;;  %v707_v32 = vld [vmem:[%s19491_s3 + $0x138] sm:$0xff] }
  0xe1   :  { %855 = vperm.xlu0 %9844, %v697_v38  }
  0xe4   :  { %810 = vperm.xlu1 %9845, %v688_v40   ;;  %v11220_v44 = vpop.xlane.xlu1 %284  ;;  %v11222_v5 = vpop.xlane.xlu0 %281 }
  0xe5   :  { %865 = vperm.xlu0 %9844, %v699_v46   ;;  %v698_v46 = vld [vmem:[%s19491_s3 + $0xf0] sm:$0xff] }
  0xe8   :  { %820 = vperm.xlu1 %9845, %v690_v48   ;;  %v11230_v53 = vpop.xlane.xlu1 %290  ;;  %v11232_v58 = vpop.xlane.xlu0 %287  ;;  %v949_v48 = vld [vmem:[%s19492_s4 + $0x8] sm:$0xff] }
  0xe9   :  { %875 = vperm.xlu0 %9844, %v701_v50  }
  0xec   :  { %830 = vperm.xlu1 %9845, %v692_v0   ;;  %v11240_v9 = vpop.xlane.xlu1 %296  ;;  %v11242_v12 = vpop.xlane.xlu0 %293 }
  0xed   :  { %885 = vperm.xlu0 %9844, %v703_v8   ;;  %v700_v8 = vld [vmem:[%s19491_s3 + $0x100] sm:$0xff] }
  0xf0   :  { %840 = vperm.xlu1 %9845, %v694_v13   ;;  %v11250_v17 = vpop.xlane.xlu1 %302  ;;  %v11252_v20 = vpop.xlane.xlu0 %299  ;;  %v951_v13 = vld [vmem:[%s19492_s4 + $0x18] sm:$0xff] }
  0xf1   :  { %895 = vperm.xlu0 %9844, %v705_v16  }
  0xf4   :  { %850 = vperm.xlu1 %9845, %v696_v21   ;;  %v11260_v38 = vpop.xlane.xlu1 %308  ;;  %v11262_v40 = vpop.xlane.xlu0 %305 }
  0xf5   :  { %905 = vperm.xlu0 %9844, %v707_v32   ;;  %v702_v32 = vld [vmem:[%s19491_s3 + $0x110] sm:$0xff] }
  0xf8   :  { %860 = vperm.xlu1 %9845, %v698_v46   ;;  %v11270_v50 = vpop.xlane.xlu1 %314  ;;  %v11272_v0 = vpop.xlane.xlu0 %311  ;;  %v953_v46 = vld [vmem:[%s19492_s4 + $0x28] sm:$0xff] }
  0xf9   :  { %995 = vperm.xlu0 %9844, %v949_v48  }
  0xfc   :  { %870 = vperm.xlu1 %9845, %v700_v8   ;;  %v11280_v16 = vpop.xlane.xlu1 %320  ;;  %v11282_v21 = vpop.xlane.xlu0 %317  ;;  %v704_v8 = vld [vmem:[%s19491_s3 + $0x120] sm:$0xff] }
  0xfd   :  { %19822 = vst [vmem:[#allocation2_spill] sm:$0xff] %v11280_v16  ;;  %19823 = vst [vmem:[#allocation3_spill] sm:$0xff] %v11282_v21  ;;  %1005 = vperm.xlu0 %9844, %v951_v13   ;;  %v955_v21 = vld [vmem:[%s19492_s4 + $0x38] sm:$0xff] }
 0x100   :  { %880 = vperm.xlu1 %9845, %v702_v32   ;;  %v11290_v48 = vpop.xlane.xlu1 %326  ;;  %v11292_v52 = vpop.xlane.xlu0 %323  ;;  %v706_v32 = vld [vmem:[%s19491_s3 + $0x130] sm:$0xff] }
 0x101   :  { %19824 = vst [vmem:[#allocation4_spill] sm:$0xff] %v11290_v48  ;;  %19825 = vst [vmem:[#allocation5_spill] sm:$0xff] %v11292_v52  ;;  %1015 = vperm.xlu0 %9844, %v953_v46   ;;  %v957_v52 = vld [vmem:[%s19492_s4 + $0x48] sm:$0xff] }
 0x104   :  { %890 = vperm.xlu1 %9845, %v704_v8   ;;  %v11300_v13 = vpop.xlane.xlu1 %332  ;;  %v11302_v16 = vpop.xlane.xlu0 %329  ;;  %v948_v8 = vld [vmem:[%s19492_s4] sm:$0xff] }
 0x105   :  { %19826 = vst [vmem:[#allocation6_spill] sm:$0xff] %v11300_v13  ;;  %19827 = vst [vmem:[#allocation7_spill] sm:$0xff] %v11302_v16  ;;  %1025 = vperm.xlu0 %9844, %v955_v21   ;;  %v959_v16 = vld [vmem:[%s19492_s4 + $0x58] sm:$0xff] }
 0x108   :  { %900 = vperm.xlu1 %9845, %v706_v32   ;;  %v11310_v46 = vpop.xlane.xlu1 %338  ;;  %v11312_v48 = vpop.xlane.xlu0 %335  ;;  %v950_v32 = vld [vmem:[%s19492_s4 + $0x10] sm:$0xff] }
 0x109   :  { %19828 = vst [vmem:[#allocation8_spill] sm:$0xff] %v11310_v46  ;;  %19829 = vst [vmem:[#allocation9_spill] sm:$0xff] %v11312_v48  ;;  %1035 = vperm.xlu0 %9844, %v957_v52   ;;  %v961_v48 = vld [vmem:[%s19492_s4 + $0x68] sm:$0xff] }
 0x10c   :  { %990 = vperm.xlu1 %9845, %v948_v8   ;;  %v11320_v21 = vpop.xlane.xlu1 %344  ;;  %v11322_v13 = vpop.xlane.xlu0 %341  ;;  %v952_v8 = vld [vmem:[%s19492_s4 + $0x20] sm:$0xff] }
 0x10d   :  { %19830 = vst [vmem:[#allocation10_spill] sm:$0xff] %v11320_v21  ;;  %19831 = vst [vmem:[#allocation11_spill] sm:$0xff] %v11322_v13  ;;  %1045 = vperm.xlu0 %9844, %v959_v16   ;;  %v963_v13 = vld [vmem:[%s19492_s4 + $0x78] sm:$0xff] }
 0x110   :  { %1000 = vperm.xlu1 %9845, %v950_v32   ;;  %v11330_v52 = vpop.xlane.xlu1 %350  ;;  %v11332_v46 = vpop.xlane.xlu0 %347  ;;  %v954_v32 = vld [vmem:[%s19492_s4 + $0x30] sm:$0xff] }
 0x111   :  { %19832 = vst [vmem:[#allocation12_spill] sm:$0xff] %v11330_v52  ;;  %19833 = vst [vmem:[#allocation13_spill] sm:$0xff] %v11332_v46  ;;  %1055 = vperm.xlu0 %9844, %v961_v48   ;;  %v965_v46 = vld [vmem:[%s19492_s4 + $0x88] sm:$0xff] }
 0x114   :  { %1010 = vperm.xlu1 %9845, %v952_v8   ;;  %v11340_v16 = vpop.xlane.xlu1 %356  ;;  %v11342_v21 = vpop.xlane.xlu0 %353  ;;  %v956_v8 = vld [vmem:[%s19492_s4 + $0x40] sm:$0xff] }
 0x115   :  { %19834 = vst [vmem:[#allocation14_spill] sm:$0xff] %v11340_v16  ;;  %19835 = vst [vmem:[#allocation15_spill] sm:$0xff] %v11342_v21  ;;  %1065 = vperm.xlu0 %9844, %v963_v13   ;;  %v967_v21 = vld [vmem:[%s19492_s4 + $0x98] sm:$0xff] }
 0x118   :  { %1020 = vperm.xlu1 %9845, %v954_v32   ;;  %v11350_v48 = vpop.xlane.xlu1 %362  ;;  %v11352_v52 = vpop.xlane.xlu0 %359  ;;  %v958_v32 = vld [vmem:[%s19492_s4 + $0x50] sm:$0xff] }
 0x119   :  { %19836 = vst [vmem:[#allocation16_spill] sm:$0xff] %v11350_v48  ;;  %19837 = vst [vmem:[#allocation17_spill] sm:$0xff] %v11352_v52  ;;  %1075 = vperm.xlu0 %9844, %v965_v46   ;;  %v969_v52 = vld [vmem:[%s19492_s4 + $0xa8] sm:$0xff] }
 0x11c   :  { %1030 = vperm.xlu1 %9845, %v956_v8   ;;  %v11360_v13 = vpop.xlane.xlu1 %368  ;;  %v11362_v16 = vpop.xlane.xlu0 %365  ;;  %v960_v8 = vld [vmem:[%s19492_s4 + $0x60] sm:$0xff] }
 0x11d   :  { %19838 = vst [vmem:[#allocation18_spill] sm:$0xff] %v11360_v13  ;;  %19839 = vst [vmem:[#allocation19_spill] sm:$0xff] %v11362_v16  ;;  %1085 = vperm.xlu0 %9844, %v967_v21   ;;  %v971_v16 = vld [vmem:[%s19492_s4 + $0xb8] sm:$0xff] }
 0x120   :  { %1040 = vperm.xlu1 %9845, %v958_v32   ;;  %v11370_v46 = vpop.xlane.xlu1 %374  ;;  %v11372_v48 = vpop.xlane.xlu0 %371  ;;  %v962_v32 = vld [vmem:[%s19492_s4 + $0x70] sm:$0xff] }
 0x121   :  { %19840 = vst [vmem:[#allocation20_spill] sm:$0xff] %v11370_v46  ;;  %19841 = vst [vmem:[#allocation21_spill] sm:$0xff] %v11372_v48  ;;  %1095 = vperm.xlu0 %9844, %v969_v52   ;;  %v973_v48 = vld [vmem:[%s19492_s4 + $0xc8] sm:$0xff] }
 0x124   :  { %1050 = vperm.xlu1 %9845, %v960_v8   ;;  %v11380_v21 = vpop.xlane.xlu1 %380  ;;  %v11385_v46 = vpop.xlane.xlu0 %377  ;;  %v964_v8 = vld [vmem:[%s19492_s4 + $0x80] sm:$0xff] }
 0x125   :  { %19842 = vst [vmem:[#allocation22_spill] sm:$0xff] %v11380_v21  ;;  %1105 = vperm.xlu0 %9844, %v971_v16   ;;  %19843 = vst [vmem:[#allocation23_spill] sm:$0xff] %v11385_v46  ;;  %v975_v21 = vld [vmem:[%s19492_s4 + $0xd8] sm:$0xff] }
 0x128   :  { %1060 = vperm.xlu1 %9845, %v962_v32   ;;  %v11390_v52 = vpop.xlane.xlu1 %386  ;;  %v11400_v46 = vpop.xlane.xlu0 %383  ;;  %v966_v32 = vld [vmem:[%s19492_s4 + $0x90] sm:$0xff] }
 0x129   :  { %19844 = vst [vmem:[#allocation24_spill] sm:$0xff] %v11390_v52  ;;  %1115 = vperm.xlu0 %9844, %v973_v48   ;;  %19846 = vst [vmem:[#allocation26_spill] sm:$0xff] %v11400_v46  ;;  %v977_v52 = vld [vmem:[%s19492_s4 + $0xe8] sm:$0xff] }
 0x12c   :  { %1070 = vperm.xlu1 %9845, %v964_v8   ;;  %v11398_v16 = vpop.permute.xlu1 %715  ;;  %v968_v8 = vld [vmem:[%s19492_s4 + $0xa0] sm:$0xff] }
 0x12d   :  { %19845 = vst [vmem:[#allocation25_spill] sm:$0xff] %v11398_v16  ;;  %1125 = vperm.xlu0 %9844, %v975_v21   ;;  %v979_v16 = vld [vmem:[%s19492_s4 + $0xf8] sm:$0xff] }
 0x130   :  { %1080 = vperm.xlu1 %9845, %v966_v32   ;;  %v11408_v48 = vpop.permute.xlu1 %720  ;;  %v11410_v13 = vpop.permute.xlu0 %710  ;;  %v970_v32 = vld [vmem:[%s19492_s4 + $0xb0] sm:$0xff] }
 0x131   :  { %19847 = vst [vmem:[#allocation27_spill] sm:$0xff] %v11408_v48  ;;  %19848 = vst [vmem:[#allocation28_spill] sm:$0xff] %v11410_v13  ;;  %1135 = vperm.xlu0 %9844, %v977_v52   ;;  %v981_v13 = vld [vmem:[%s19492_s4 + $0x108] sm:$0xff] }
 0x134   :  { %1090 = vperm.xlu1 %9845, %v968_v8   ;;  %v11418_v21 = vpop.permute.xlu1 %725  ;;  %v11420_v46 = vpop.permute.xlu0 %755  ;;  %v972_v8 = vld [vmem:[%s19492_s4 + $0xc0] sm:$0xff] }
 0x135   :  { %19849 = vst [vmem:[#allocation29_spill] sm:$0xff] %v11418_v21  ;;  %19850 = vst [vmem:[#allocation30_spill] sm:$0xff] %v11420_v46  ;;  %1145 = vperm.xlu0 %9844, %v979_v16   ;;  %v983_v21 = vld [vmem:[%s19492_s4 + $0x118] sm:$0xff] }
 0x138   :  { %1100 = vperm.xlu1 %9845, %v970_v32   ;;  %v11428_v52 = vpop.permute.xlu1 %730  ;;  %v11430_v48 = vpop.permute.xlu0 %765  ;;  %v974_v32 = vld [vmem:[%s19492_s4 + $0xd0] sm:$0xff] }
 0x139   :  { %19851 = vst [vmem:[#allocation31_spill] sm:$0xff] %v11428_v52  ;;  %19852 = vst [vmem:[#allocation32_spill] sm:$0xff] %v11430_v48  ;;  %1155 = vperm.xlu0 %9844, %v981_v13   ;;  %v985_v52 = vld [vmem:[%s19492_s4 + $0x128] sm:$0xff] }
 0x13c   :  { %1110 = vperm.xlu1 %9845, %v972_v8   ;;  %v11438_v16 = vpop.permute.xlu1 %735  ;;  %v11440_v46 = vpop.permute.xlu0 %775  ;;  %v976_v8 = vld [vmem:[%s19492_s4 + $0xe0] sm:$0xff] }
 0x13d   :  { %19853 = vst [vmem:[#allocation33_spill] sm:$0xff] %v11438_v16  ;;  %19854 = vst [vmem:[#allocation34_spill] sm:$0xff] %v11440_v46  ;;  %1165 = vperm.xlu0 %9844, %v983_v21   ;;  %v987_v16 = vld [vmem:[%s19492_s4 + $0x138] sm:$0xff] }
 0x140   :  { %1120 = vperm.xlu1 %9845, %v974_v32   ;;  %v11448_v13 = vpop.permute.xlu1 %740  ;;  %v11450_v48 = vpop.permute.xlu0 %785  ;;  %v978_v32 = vld [vmem:[%s19492_s4 + $0xf0] sm:$0xff] }
 0x141   :  { %19855 = vst [vmem:[#allocation35_spill] sm:$0xff] %v11448_v13  ;;  %19856 = vst [vmem:[#allocation36_spill] sm:$0xff] %v11450_v48  ;;  %1175 = vperm.xlu0 %9844, %v985_v52   ;;  %v980_v52 = vld [vmem:[%s19492_s4 + $0x100] sm:$0xff] }
 0x144   :  { %1130 = vperm.xlu1 %9845, %v976_v8   ;;  %v11458_v21 = vpop.permute.xlu1 %745  ;;  %v11460_v46 = vpop.permute.xlu0 %795 }
 0x145   :  { %19857 = vst [vmem:[#allocation37_spill] sm:$0xff] %v11458_v21  ;;  %19858 = vst [vmem:[#allocation38_spill] sm:$0xff] %v11460_v46  ;;  %1185 = vperm.xlu0 %9844, %v987_v16   ;;  %v982_v46 = vld [vmem:[%s19492_s4 + $0x110] sm:$0xff] }
 0x148   :  { %1140 = vperm.xlu1 %9845, %v978_v32   ;;  %v11465_v13 = vpop.permute.xlu1 %750  ;;  %v11467_v48 = vpop.permute.xlu0 %805 }
 0x149   :  { %19859 = vst [vmem:[#allocation39_spill] sm:$0xff] %v11465_v13  ;;  %19860 = vst [vmem:[#allocation40_spill] sm:$0xff] %v11467_v48  ;;  %v984_v48 = vld [vmem:[%s19492_s4 + $0x120] sm:$0xff]  ;;  %v11487_v13 = vmul.f32 0.020408163, %v11025_v2 }
 0x14a   :  { %v11506_v2 = vmul.f32 0.020408163, %v11045_v60  ;;  %v11528_v60 = vmul.f32 0.020408163, %v11071_v15  ;;  %v11547_v15 = vmul.f32 0.020408163, %v11081_v25 }
 0x14b   :  { %19865 = vst [vmem:[#allocation45_spill] sm:$0xff] %v11487_v13  ;;  %v11565_v25 = vmul.f32 0.020408163, %v11092_v31 }
 0x14c   :  { %1150 = vperm.xlu1 %9845, %v980_v52   ;;  %v11472_v8 = vpop.permute.xlu1 %760  ;;  %v11474_v21 = vpop.permute.xlu0 %815  ;;  %v11490_v52 = vmul.f32 0.020408163, %v11027_v57  ;;  %19871 = vst [vmem:[#allocation51_spill] sm:$0xff] %v11506_v2  ;;  %v11509_v57 = vmul.f32 0.020408163, %v11047_v6 }
 0x14d   :  { %19861 = vst [vmem:[#allocation41_spill] sm:$0xff] %v11472_v8  ;;  %19862 = vst [vmem:[#allocation42_spill] sm:$0xff] %v11474_v21  ;;  %v11495_v8 = vmul.f32 0.020408163, %v11035_v61  ;;  %v11515_v61 = vmul.f32 0.020408163, %v11057_v14 }
 0x14e   :  { %19866 = vst [vmem:[#allocation46_spill] sm:$0xff] %v11490_v52  ;;  %19872 = vst [vmem:[#allocation52_spill] sm:$0xff] %v11509_v57  ;;  %v11531_v6 = vmul.f32 0.020408163, %v11073_v27 }
 0x14f   :  { %19868 = vst [vmem:[#allocation48_spill] sm:$0xff] %v11495_v8  ;;  %19874 = vst [vmem:[#allocation54_spill] sm:$0xff] %v11515_v61 }
 0x150   :  { %1160 = vperm.xlu1 %9845, %v982_v46   ;;  %v11479_v16 = vpop.permute.xlu1 %770  ;;  %v11481_v32 = vpop.permute.xlu0 %825  ;;  %v11498_v46 = vmul.f32 0.020408163, %v11037_v62  ;;  %v11518_v62 = vmul.f32 0.020408163, %v11065_v10  ;;  %v428_v10 = vmul.f32 %v11490_v52, %v11490_v52  ;;  %19882 = vst [vmem:[#allocation62_spill] sm:$0xff] %v11565_v25 }
 0x151   :  { %19863 = vst [vmem:[#allocation43_spill] sm:$0xff] %v11479_v16  ;;  %19864 = vst [vmem:[#allocation44_spill] sm:$0xff] %v11481_v32  ;;  %v986_v16 = vld [vmem:[%s19492_s4 + $0x130] sm:$0xff]  ;;  %v11592_v52 = vmul.f32 0.020408163, %v11130_v45 }
 0x152   :  { %19869 = vst [vmem:[#allocation49_spill] sm:$0xff] %v11498_v46  ;;  %19875 = vst [vmem:[#allocation55_spill] sm:$0xff] %v11518_v62  ;;  %v391_v45 = vmul.f32 0.020408163, %v11210_v36 }
 0x154   :  { %1170 = vperm.xlu1 %9845, %v984_v48   ;;  %v11492_v21 = vpop.permute.xlu1 %780  ;;  %v11500_v32 = vpop.permute.xlu0 %835  ;;  %v11512_v48 = vmul.f32 0.020408163, %v11055_v3  ;;  %v11534_v3 = vmul.f32 0.020408163, %v11075_v18  ;;  %v431_v18 = vmul.f32 %v11495_v8, %v11495_v8  ;;  %v11571_v8 = vmul.f32 0.020408163, %v11102_v35 }
 0x155   :  { %19867 = vst [vmem:[#allocation47_spill] sm:$0xff] %v11492_v21  ;;  %19870 = vst [vmem:[#allocation50_spill] sm:$0xff] %v11500_v32  ;;  %v11521_v32 = vmul.f32 0.020408163, %v11067_v22  ;;  %v11525_v21 = vmul.f32 %v11487_v13, %v11487_v13  ;;  %v11541_v22 = vmul.f32 0.020408163, %v11077_v24 }
 0x156   :  { %19873 = vst [vmem:[#allocation53_spill] sm:$0xff] %v11512_v48  ;;  %v11544_v13 = vmul.f32 0.020408163, %v11079_v30  ;;  %v11560_v24 = vmul.f32 0.020408163, %v11090_v29  ;;  %v429_v30 = vmul.f32 %v11498_v46, %v11498_v46  ;;  %19884 = vst [vmem:[#allocation64_spill] sm:$0xff] %v11571_v8 }
 0x157   :  { %19876 = vst [vmem:[#allocation56_spill] sm:$0xff] %v11521_v32  ;;  %v11579_v29 = vmul.f32 0.020408163, %v11112_v39  ;;  %v11582_v46 = vmul.f32 0.020408163, %v11120_v41  ;;  %v435_v39 = vmul.f32 %v11512_v48, %v11512_v48  ;;  %v436_v36 = vmul.f32 %v11521_v32, %v11521_v32 }
 0x158   :  { %1180 = vperm.xlu1 %9845, %v986_v16   ;;  %v11536_v14 = vpop.permute.xlu1 %790  ;;  %v11549_v27 = vpop.permute.xlu0 %845  ;;  %v11554_v16 = vmul.f32 0.020408163, %v11083_v23  ;;  %19881 = vst [vmem:[#allocation61_spill] sm:$0xff] %v11560_v24  ;;  %v433_v23 = vmul.f32 %v11506_v2, %v11506_v2  ;;  %v11589_v35 = vmul.f32 0.020408163, %v11122_v43  ;;  %v434_v43 = vmul.f32 %v11515_v61, %v11515_v61 }
 0x159   :  { %19877 = vst [vmem:[#allocation57_spill] sm:$0xff] %v11536_v14  ;;  %19878 = vst [vmem:[#allocation58_spill] sm:$0xff] %v11549_v27  ;;  %v11557_v14 = vmul.f32 0.020408163, %v11085_v26  ;;  %v11568_v27 = vmul.f32 0.020408163, %v11100_v33  ;;  %v432_v33 = vmul.f32 %v11509_v57, %v11509_v57 }
 0x15a   :  { %19879 = vst [vmem:[#allocation59_spill] sm:$0xff] %v11554_v16  ;;  %v11576_v26 = vmul.f32 0.020408163, %v11110_v37  ;;  %v11595_v37 = vmul.f32 0.020408163, %v11132_v47 }
 0x15b   :  { %19880 = vst [vmem:[#allocation60_spill] sm:$0xff] %v11557_v14  ;;  %19883 = vst [vmem:[#allocation63_spill] sm:$0xff] %v11568_v27  ;;  %v11602_v41 = vmul.f32 0.020408163, %v11140_v49  ;;  %v388_v57 = vmul.f32 0.020408163, %v11202_v34 }
 0x15c   :  { %v11584_v31 = vpop.permute.xlu1 %800  ;;  %19886 = vst [vmem:[#allocation66_spill] sm:$0xff] %v11595_v37  ;;  %v11597_v2 = vpop.permute.xlu0 %855  ;;  %v390_v47 = vmul.f32 0.020408163, %v11212_v42  ;;  %v393_v37 = vmul.f32 0.020408163, %v11220_v44 }
 0x15d   :  { %19885 = vst [vmem:[#allocation65_spill] sm:$0xff] %v11584_v31  ;;  %19887 = vst [vmem:[#allocation67_spill] sm:$0xff] %v11597_v2  ;;  %v389_v31 = vmul.f32 0.020408163, %v11200_v28  ;;  %v437_v2 = vmul.f32 %v11518_v62, %v11518_v62  ;;  %v11614_v48 = vmul.f32 0.020408163, %v11142_v1 }
 0x15e   :  { %19888 = vst [vmem:[#allocation68_spill] sm:$0xff] %v11602_v41  ;;  %v11617_v49 = vmul.f32 0.020408163, %v11150_v54  ;;  %v392_v28 = vmul.f32 0.020408163, %v11222_v5  ;;  %v468_v5 = vsub.f32 %v388_v57, %v428_v10  ;;  %v470_v32 = vsub.f32 %v390_v47, %v11525_v21 }
 0x15f   :  { %19889 = vst [vmem:[#allocation69_spill] sm:$0xff] %v11614_v48  ;;  %v11625_v42 = vmul.f32 0.020408163, %v11152_v51  ;;  %v11628_v44 = vmul.f32 0.020408163, %v11160_v55  ;;  %v469_v62 = vsub.f32 %v389_v31, %v429_v30  ;;  %v473_v48 = vsub.f32 %v393_v37, %v433_v23 }
 0x160   :  { %19890 = vst [vmem:[#allocation70_spill] sm:$0xff] %v11617_v49  ;;  %v11620_v34 = vpop.permute.xlu1 %810  ;;  %v395_v61 = vmul.f32 0.020408163, %v11230_v53  ;;  %v11631_v1 = vpop.permute.xlu0 %865  ;;  %v11634_v54 = vmul.f32 0.020408163, %v11162_v56  ;;  %v471_v49 = vsub.f32 %v391_v45, %v431_v18  ;;  %v472_v56 = vsub.f32 %v392_v28, %v432_v33 }
 0x161   :  { %19891 = vst [vmem:[#allocation71_spill] sm:$0xff] %v11620_v34  ;;  %19892 = vst [vmem:[#allocation72_spill] sm:$0xff] %v11625_v42  ;;  %v394_v34 = vmul.f32 0.020408163, %v11232_v58  ;;  %v397_v51 = vmul.f32 0.020408163, %v11240_v9  ;;  %v438_v28 = vmul.f32 %v11531_v6, %v11531_v6 }
 0x162   :  { %19893 = vst [vmem:[#allocation73_spill] sm:$0xff] %v11628_v44  ;;  %19894 = vst [vmem:[#allocation74_spill] sm:$0xff] %v11631_v1  ;;  %v11640_v55 = vmul.f32 0.020408163, %v11170_v59  ;;  %v11643_v53 = vmul.f32 0.020408163, %v11172_v4  ;;  %v475_v57 = vsub.f32 %v395_v61, %v435_v39 }
 0x163   :  { %19895 = vst [vmem:[#allocation75_spill] sm:$0xff] %v11634_v54  ;;  %v11646_v1 = vmul.f32 0.020408163, %v11180_v63  ;;  %v11651_v58 = vmul.f32 0.020408163, %v11182_v11  ;;  %v474_v18 = vsub.f32 %v394_v34, %v434_v43 }
 0x164   :  { %19896 = vst [vmem:[#allocation76_spill] sm:$0xff] %v11640_v55  ;;  %19897 = vst [vmem:[#allocation77_spill] sm:$0xff] %v11643_v53  ;;  %v11648_v30 = vpop.permute.xlu1 %820  ;;  %v11654_v21 = vmul.f32 0.020408163, %v11190_v7  ;;  %v396_v9 = vmul.f32 0.020408163, %v11242_v12  ;;  %v11657_v59 = vpop.permute.xlu0 %875  ;;  %v477_v7 = vsub.f32 %v397_v51, %v437_v2 }
 0x165   :  { %19898 = vst [vmem:[#allocation78_spill] sm:$0xff] %v11646_v1  ;;  %19899 = vst [vmem:[#allocation79_spill] sm:$0xff] %v11648_v30  ;;  %v11660_v4 = vmul.f32 0.020408163, %v11192_v19  ;;  %v11662_v10 = vadd.f32 1e-05, %v469_v62 }
 0x166   :  { %19900 = vst [vmem:[#allocation80_spill] sm:$0xff] %v11654_v21  ;;  %19901 = vst [vmem:[#allocation81_spill] sm:$0xff] %v11657_v59  ;;  %v11664_v63 = vadd.f32 1e-05, %v468_v5  ;;  %v11666_v23 = vadd.f32 1e-05, %v471_v49  ;;  %v476_v62 = vsub.f32 %v396_v9, %v436_v36  ;;  %v440_v9 = vmul.f32 %v11541_v22, %v11541_v22 }
 0x167   :  { %v11668_v11 = vadd.f32 1e-05, %v470_v32  ;;  %v11670_v31 = vadd.f32 1e-05, %v473_v48  ;;  %v11672_v61 = vadd.f32 1e-05, %v472_v56  ;;  %v439_v32 = vmul.f32 %v11528_v60, %v11528_v60 }
 0x168   :  { %v399_v12 = vmul.f32 0.020408163, %v11250_v17  ;;  %v11675_v33 = vpop.permute.xlu1 %830  ;;  %v11677_v19 = vadd.f32 1e-05, %v475_v57  ;;  %v11679_v37 = vpop.permute.xlu0 %885  ;;  %v9848_v39 = vld [vmem:[%s19493_s2 + $0x5a4] ss:$12 sps:$4 sm:$0xff]  }
 0x169   :  { %19902 = vst [vmem:[#allocation82_spill] sm:$0xff] %v11675_v33  ;;  %19903 = vst [vmem:[#allocation83_spill] sm:$0xff] %v11679_v37  ;;  %v11686_v48 = vadd.f32 1e-05, %v474_v18  ;;  %v11688_v2 = vadd.f32 1e-05, %v477_v7  ;;  %3601 = vmatprep.mubr.bf16.mxu1 %v9848_v39  ;;  %v444_v37 = vmul.f32 %v11557_v14, %v11557_v14 }
 0x16a   :  { %v479_v17 = vsub.f32 %v399_v12, %v439_v32  ;;  %v398_v43 = vmul.f32 0.020408163, %v11252_v20  ;;  %v11693_v47 = vadd.f32 1e-05, %v476_v62  ;;  %v401_v34 = vmul.f32 0.020408163, %v11260_v38 }
 0x16b   :  { %v400_v36 = vmul.f32 0.020408163, %v11262_v40  ;;  %v403_v56 = vmul.f32 0.020408163, %v11270_v50  ;;  %v441_v20 = vmul.f32 %v11534_v3, %v11534_v3  ;;  %v402_v18 = vmul.f32 0.020408163, %v11272_v0 }
 0x16c   :  { %v11691_v45 = vpop.permute.xlu1 %840  ;;  %v11695_v49 = vpop.permute.xlu0 %895  ;;  %v11701_v5 = vadd.f32 1e-05, %v479_v17  ;;  %v478_v51 = vsub.f32 %v398_v43, %v438_v28  ;;  %v443_v38 = vmul.f32 %v11544_v13, %v11544_v13  ;;  %v19908_v40 = vld [vmem:[#allocation2_spill] sm:$0xff]  ;;  %v19909_v50 = vld [vmem:[#allocation3_spill] sm:$0xff]  ;;  %v442_v17 = vmul.f32 %v11547_v15, %v11547_v15 }
 0x16d   :  { %19904 = vst [vmem:[#allocation84_spill] sm:$0xff] %v11691_v45  ;;  %19905 = vst [vmem:[#allocation85_spill] sm:$0xff] %v11695_v49  ;;  %v405_v12 = vmul.f32 0.020408163, %v19908_v40  ;;  %v481_v62 = vsub.f32 %v401_v34, %v441_v20  ;;  %v480_v39 = vsub.f32 %v400_v36, %v440_v9  ;;  %v404_v32 = vmul.f32 0.020408163, %v19909_v50 }
 0x16e   :  { %v445_v43 = vmul.f32 %v11554_v16, %v11554_v16  ;;  %v11721_v28 = vadd.f32 1e-05, %v478_v51  ;;  %v483_v0 = vsub.f32 %v403_v56, %v443_v38  ;;  %v19911_v49 = vld [vmem:[#allocation4_spill] sm:$0xff]  ;;  %v482_v36 = vsub.f32 %v402_v18, %v442_v17  ;;  %v19913_v9 = vld [vmem:[#allocation5_spill] sm:$0xff]  ;;  %v19933_v1 = vld [vmem:[#allocation14_spill] sm:$0xff] }
 0x16f   :  { %v407_v40 = vmul.f32 0.020408163, %v19911_v49  ;;  %v406_v50 = vmul.f32 0.020408163, %v19913_v9  ;;  %v561_v16 = vadd.f32 1e-05, %v481_v62  ;;  %v484_v30 = vsub.f32 %v404_v32, %v444_v37 }
 0x170   :  { %v11704_v57 = vpop.permute.xlu1 %850  ;;  %v11711_v7 = vpop.permute.xlu0 %905  ;;  %v485_v20 = vsub.f32 %v405_v12, %v445_v43  ;;  %v560_v51 = vadd.f32 1e-05, %v480_v39  ;;  %v446_v56 = vmul.f32 %v11565_v25, %v11565_v25  ;;  %v563_v38 = vadd.f32 1e-05, %v483_v0  ;;  %v19915_v49 = vld [vmem:[#allocation6_spill] sm:$0xff]  ;;  %v19917_v37 = vld [vmem:[#allocation7_spill] sm:$0xff] }
 0x171   :  { %19906 = vst [vmem:[#allocation86_spill] sm:$0xff] %v11704_v57  ;;  %19907 = vst [vmem:[#allocation87_spill] sm:$0xff] %v11711_v7  ;;  %v447_v7 = vmul.f32 %v11560_v24, %v11560_v24  ;;  %v409_v54 = vmul.f32 0.020408163, %v19915_v49  ;;  %v562_v18 = vadd.f32 1e-05, %v482_v36  ;;  %v449_v62 = vmul.f32 %v11568_v27, %v11568_v27 }
 0x172   :  { %v11740_v12 = vadd.f32 1e-05, %v485_v20  ;;  %v486_v17 = vsub.f32 %v406_v50, %v446_v56  ;;  %v11744_v39 = vadd.f32 1e-05, %v484_v30  ;;  %v408_v32 = vmul.f32 0.020408163, %v19917_v37 }
 0x173   :  { %v487_v14 = vsub.f32 %v407_v40, %v447_v7  ;;  %v19918_v43 = vld [vmem:[#allocation8_spill] sm:$0xff]  ;;  %v448_v7 = vmul.f32 %v11571_v8, %v11571_v8  ;;  %v489_v36 = vsub.f32 %v409_v54, %v449_v62  ;;  %v451_v50 = vmul.f32 %v11576_v26, %v11576_v26  ;;  %v19922_v49 = vld [vmem:[#allocation9_spill] sm:$0xff]  ;;  %v19925_v54 = vld [vmem:[#allocation10_spill] sm:$0xff] }
 0x174   :  { %v11723_v59 = vpop.permute.xlu1 %860  ;;  %v11728_v34 = vpop.permute.xlu0 %995  ;;  %19916 = vst [vmem:[#allocation5_spill] sm:$0xff] %v11744_v39  ;;  %v411_v0 = vmul.f32 0.020408163, %v19918_v43  ;;  %v11758_v56 = vadd.f32 1e-05, %v486_v17  ;;  %v453_v17 = vmul.f32 %v11582_v46, %v11582_v46  ;;  %v19930_v39 = vld [vmem:[#allocation12_spill] sm:$0xff]  ;;  %10166 = vrsqrt.f32 %v563_v38 }
 0x175   :  { %19910 = vst [vmem:[#allocation2_spill] sm:$0xff] %v11723_v59  ;;  %19912 = vst [vmem:[#allocation3_spill] sm:$0xff] %v11728_v34  ;;  %v11752_v40 = vadd.f32 1e-05, %v487_v14  ;;  %v488_v30 = vsub.f32 %v408_v32, %v448_v7  ;;  %v410_v37 = vmul.f32 0.020408163, %v19922_v49  ;;  %v450_v14 = vmul.f32 %v11579_v29, %v11579_v29 }
 0x176   :  { %19921 = vst [vmem:[#allocation8_spill] sm:$0xff] %v11758_v56  ;;  %v413_v62 = vmul.f32 0.020408163, %v19925_v54  ;;  %v19929_v49 = vld [vmem:[#allocation11_spill] sm:$0xff]  ;;  %v415_v45 = vmul.f32 0.020408163, %v19930_v39  ;;  %10168 = vrsqrt.f32 %v560_v51 }
 0x177   :  { %19920 = vst [vmem:[#allocation7_spill] sm:$0xff] %v11752_v40  ;;  %v11770_v25 = vadd.f32 1e-05, %v488_v30  ;;  %v490_v7 = vsub.f32 %v410_v37, %v450_v14  ;;  %v452_v37 = vmul.f32 %v11589_v35, %v11589_v35  ;;  %10170 = vrsqrt.f32 %v562_v18  ;;  %v19932_v39 = vld [vmem:[#allocation66_spill] sm:$0xff]  ;;  %v19935_v59 = vld [vmem:[#allocation16_spill] sm:$0xff] }
 0x178   :  { %v11735_v33 = vpop.permute.xlu1 %870  ;;  %v11738_v53 = vpop.permute.xlu0 %1005  ;;  %10172 = vrsqrt.f32 %v561_v16  ;;  %v417_v55 = vmul.f32 0.020408163, %v19933_v1  ;;  %v419_v57 = vmul.f32 0.020408163, %v19935_v59 }
 0x179   :  { %19914 = vst [vmem:[#allocation4_spill] sm:$0xff] %v11735_v33  ;;  %v491_v33 = vsub.f32 %v411_v0, %v451_v50  ;;  %19926 = vst [vmem:[#allocation10_spill] sm:$0xff] %v11770_v25  ;;  %v11781_v27 = vadd.f32 1e-05, %v490_v7  ;;  %10174 = vrsqrt.f32 %v11721_v28  ;;  %v19936_v25 = vld [vmem:[#allocation69_spill] sm:$0xff] }
 0x17a   :  { %10176 = vrsqrt.f32 %v11701_v5 }
 0x17b   :  { %v11774_v32 = vadd.f32 1e-05, %v491_v33  ;;  %v19931_v33 = vld [vmem:[#allocation13_spill] sm:$0xff]  ;;  %10178 = vrsqrt.f32 %v11693_v47 }
 0x17c   :  { %v11748_v9 = vpop.permute.xlu1 %880  ;;  %v11754_v20 = vpop.permute.xlu0 %1015  ;;  %v414_v40 = vmul.f32 0.020408163, %v19931_v33  ;;  %v454_v33 = vmul.f32 %v19932_v39, %v19932_v39  ;;  %10180 = vrsqrt.f32 %v11688_v2  ;;  %v10566_v2 = vld [vmem:[%s19490_s0 + $0x78] sm:$0xff] }
 0x17d   :  { %19919 = vst [vmem:[#allocation6_spill] sm:$0xff] %v11748_v9  ;;  %v11763_v9 = vadd.f32 1e-05, %v489_v36  ;;  %19927 = vst [vmem:[#allocation89_spill] sm:$0xff] %v11774_v32  ;;  %v493_v36 = vsub.f32 %v413_v62, %v453_v17  ;;  %10182 = vrsqrt.f32 %v11686_v48 }
 0x17e   :  { %v494_v18 = vsub.f32 %v414_v40, %v454_v33  ;;  %v19939_v33 = vld [vmem:[#allocation17_spill] sm:$0xff]  ;;  %10184 = vrsqrt.f32 %v11677_v19  ;;  %v19941_v19 = vld [vmem:[#allocation18_spill] sm:$0xff] }
 0x17f   :  { %19924 = vst [vmem:[#allocation88_spill] sm:$0xff] %v11763_v9  ;;  %v11787_v30 = vadd.f32 1e-05, %v493_v36  ;;  %v455_v36 = vmul.f32 %v11592_v52, %v11592_v52  ;;  %v418_v5 = vmul.f32 0.020408163, %v19939_v33  ;;  %v10568_v33 = vld [vmem:[%s19490_s0 + $0x70] sm:$0xff]  ;;  %10186 = vrsqrt.f32 %v11672_v61 }
 0x180   :  { %v11761_v43 = vpop.permute.xlu1 %890  ;;  %v11765_v24 = vpop.permute.xlu0 %1025  ;;  %v11827_v40 = vadd.f32 1e-05, %v494_v18  ;;  %10188 = vrsqrt.f32 %v11670_v31  ;;  %v1242_v31 = vld [vmem:[%s19494_s1 + $0x70] sm:$0xff] }
 0x181   :  { %19923 = vst [vmem:[#allocation9_spill] sm:$0xff] %v11761_v43  ;;  %v412_v43 = vmul.f32 0.020408163, %v19929_v49  ;;  %v495_v56 = vsub.f32 %v415_v45, %v455_v36  ;;  %v19938_v36 = vld [vmem:[#allocation70_spill] sm:$0xff]  ;;  %10190 = vrsqrt.f32 %v11668_v11 }
 0x182   :  { %10192 = vrsqrt.f32 %v11666_v23 }
 0x183   :  { %v492_v17 = vsub.f32 %v412_v43, %v452_v37  ;;  %v19934_v43 = vld [vmem:[#allocation15_spill] sm:$0xff]  ;;  %v457_v37 = vmul.f32 %v11602_v41, %v11602_v41  ;;  %v11820_v1 = vadd.f32 1e-05, %v495_v56  ;;  %v10167_v56 = vpop.eup %10166  ;;  %10194 = vrsqrt.f32 %v11664_v63  ;;  %v10574_v63 = vld [vmem:[%s19490_s0 + $0x30] sm:$0xff] }
 0x184   :  { %v11776_v0 = vpop.permute.xlu1 %900  ;;  %v11778_v50 = vpop.permute.xlu0 %1035  ;;  %v416_v38 = vmul.f32 0.020408163, %v19934_v43  ;;  %v459_v43 = vmul.f32 %v19938_v36, %v19938_v36  ;;  %10196 = vrsqrt.f32 %v11662_v10  ;;  %v11938_v10 = vld [vmem:[%s19490_s0 + $0x10] sm:$0xff] }
 0x185   :  { %19928 = vst [vmem:[#allocation90_spill] sm:$0xff] %v11776_v0  ;;  %v11805_v0 = vadd.f32 1e-05, %v492_v17  ;;  %v456_v17 = vmul.f32 %v19936_v25, %v19936_v25  ;;  %v497_v45 = vsub.f32 %v417_v55, %v457_v37  ;;  %v458_v55 = vmul.f32 %v11625_v42, %v11625_v42  ;;  %v10169_v18 = vpop.eup %10168  ;;  %v19950_v42 = vld [vmem:[#allocation41_spill] sm:$0xff] }
 0x186   :  { %v499_v59 = vsub.f32 %v419_v57, %v459_v43  ;;  %v523_v57 = vsub.f32 %v10566_v2, %v11544_v13 }
 0x187   :  { %v496_v21 = vsub.f32 %v416_v38, %v456_v17  ;;  %v11831_v41 = vadd.f32 1e-05, %v497_v45  ;;  %v10171_v17 = vpop.eup %10170  ;;  %v498_v43 = vsub.f32 %v418_v5, %v458_v55  ;;  %v10569_v5 = vld [vmem:[%s19490_s0 + $0x68] sm:$0xff] }
 0x188   :  { %v11783_v8 = vpop.permute.xlu1 %990  ;;  %v11785_v54 = vpop.permute.xlu0 %1045  ;;  %v11847_v45 = vadd.f32 1e-05, %v499_v59  ;;  %v421_v59 = vmul.f32 0.020408163, %v19941_v19  ;;  %v521_v55 = vsub.f32 %v10569_v5, %v11534_v3  ;;  %v1243_v3 = vld [vmem:[%s19494_s1 + $0x78] sm:$0xff] }
 0x189   :  { %v11836_v37 = vadd.f32 1e-05, %v496_v21  ;;  %v10567_v21 = vld [vmem:[%s19490_s0 + $0x60] sm:$0xff]  ;;  %v10173_v13 = vpop.eup %10172 }
 0x18a   :  { %v520_v48 = vsub.f32 %v10567_v21, %v11541_v22  ;;  %v19942_v22 = vld [vmem:[#allocation36_spill] sm:$0xff]  ;;  %v10175_v32 = vpop.eup %10174 }
 0x18b   :  { %10198 = vrsqrt.f32 %v11836_v37  ;;  %v11959_v37 = vld [vmem:[%s19490_s0] sm:$0xff] }
 0x18c   :  { %v11793_v14 = vpop.permute.xlu1 %1000  ;;  %v11795_v62 = vpop.permute.xlu0 %1055  ;;  %v640_v34 = vmul.f32 %v10169_v18, %v520_v48  ;;  %v19946_v18 = vld [vmem:[#allocation43_spill] sm:$0xff]  ;;  %10200 = vrsqrt.f32 %v11847_v45  ;;  %v10579_v45 = vld [vmem:[%s19490_s0 + $0x18] sm:$0xff] }
 0x18d   :  { %v19947_v48 = vld [vmem:[#allocation47_spill] sm:$0xff] }
 0x190   :  { %v11797_v7 = vpop.permute.xlu1 %1010  ;;  %v11801_v49 = vpop.permute.xlu0 %1065 }
 0x194   :  { %v11809_v51 = vpop.permute.xlu1 %1020  ;;  %v11818_v16 = vpop.permute.xlu0 %1075 }
 0x195   :  { %19937 = vst [vmem:[#allocation11_spill] sm:$0xff] %v11818_v16  ;;  %v522_v16 = vsub.f32 %v10568_v33, %v11547_v15  ;;  %v10570_v15 = vld [vmem:[%s19490_s0 + $0x50] sm:$0xff] }
 0x196   :  { %v518_v61 = vsub.f32 %v10570_v15, %v11531_v6  ;;  %v461_v15 = vmul.f32 %v11628_v44, %v11628_v44 }
 0x197   :  { %v642_v9 = vmul.f32 %v10171_v17, %v522_v16  ;;  %v10177_v16 = vpop.eup %10176  ;;  %v920_v17 = vmul.f32 %v19946_v18, %v640_v34  ;;  %v1240_v34 = vld [vmem:[%s19494_s1 + $0x60] sm:$0xff] }
 0x198   :  { %v11825_v28 = vpop.permute.xlu1 %1030  ;;  %v11838_v47 = vpop.permute.xlu0 %1085  ;;  %v501_v11 = vsub.f32 %v421_v59, %v461_v15  ;;  %v1238_v59 = vld [vmem:[%s19494_s1 + $0x50] sm:$0xff] }
 0x199   :  { %19940 = vst [vmem:[#allocation12_spill] sm:$0xff] %v11838_v47  ;;  %v643_v47 = vmul.f32 %v10167_v56, %v523_v57  ;;  %v11869_v56 = vadd.f32 1e-05, %v498_v43  ;;  %v19943_v57 = vld [vmem:[#allocation19_spill] sm:$0xff]  ;;  %v922_v5 = vmul.f32 %v19947_v48, %v642_v9  ;;  %v10571_v43 = vld [vmem:[%s19490_s0 + $0x58] sm:$0xff]  ;;  %v19949_v48 = vld [vmem:[#allocation56_spill] sm:$0xff] }
 0x19a   :  { %v11872_v33 = vmul.f32 0.020408163, %v19943_v57 }
 0x19b   :  { %v923_v21 = vmul.f32 %v19942_v22, %v643_v47  ;;  %v641_v47 = vmul.f32 %v10173_v13, %v521_v55  ;;  %v519_v22 = vsub.f32 %v10571_v43, %v11528_v60  ;;  %v19948_v13 = vld [vmem:[#allocation34_spill] sm:$0xff]  ;;  %10202 = vrsqrt.f32 %v11869_v56  ;;  %v11999_v56 = vld [vmem:[%s19490_s0 + $0x8] sm:$0xff] }
 0x19c   :  { %v11840_v38 = vpop.permute.xlu1 %1040  ;;  %19944 = vst [vmem:[#allocation13_spill] sm:$0xff] %v11872_v33  ;;  %v11874_v19 = vpop.permute.xlu0 %1095  ;;  %v10572_v60 = vld [vmem:[%s19490_s0 + $0x40] sm:$0xff]  ;;  %10204 = vrsqrt.f32 %v11831_v41 }
 0x19d   :  { %19945 = vst [vmem:[#allocation66_spill] sm:$0xff] %v11874_v19  ;;  %v1203_v6 = vadd.f32 %v11801_v49, %v923_v21  ;;  %v10179_v49 = vpop.eup %10178  ;;  %v921_v55 = vmul.f32 %v19948_v13, %v641_v47  ;;  %v638_v21 = vmul.f32 %v10175_v32, %v518_v61  ;;  %v516_v43 = vsub.f32 %v10572_v60, %v19949_v48  ;;  %v1241_v19 = vld [vmem:[%s19494_s1 + $0x68] sm:$0xff]  ;;  %v19955_v60 = vld [vmem:[#allocation20_spill] sm:$0xff] }
 0x19e   :  { %v639_v44 = vmul.f32 %v10177_v16, %v519_v22  ;;  %v10181_v33 = vpop.eup %10180  ;;  %v11928_v48 = vmul.f32 0.020408163, %v19955_v60  ;;  %v9880_v41 = vld [vmem:[%s19493_s2 + $0x4] ss:$12 sps:$4 sm:$0xff]   ;;  %10206 = vrsqrt.f32 %v11827_v40 }
 0x19f   :  { %v918_v47 = vmul.f32 %v19950_v42, %v638_v21  ;;  %v1201_v32 = vadd.f32 %v11795_v62, %v921_v55  ;;  %v1283_v61 = vadd.f32 %v1243_v3, %v1203_v6  ;;  %v636_v23 = vmul.f32 %v10179_v49, %v516_v43  ;;  %v10183_v62 = vpop.eup %10182  ;;  %v19954_v49 = vld [vmem:[#allocation54_spill] sm:$0xff]  ;;  %3121 = vmatprep.mubr.bf16.mxu0 %v9880_v41 }
 0x1a0   :  { %v1051_v2 = vpop.permute.xlu1 %1050  ;;  %v11914_v16 = vpop.permute.xlu0 %1105  ;;  %v514_v13 = vsub.f32 %v10574_v63, %v19954_v49  ;;  %v11925_v55 = vadd.f32 1e-05, %v501_v11  ;;  %v10578_v49 = vld [vmem:[%s19490_s0 + $0x20] sm:$0xff]  ;;  %10208 = vrsqrt.f32 %v11820_v1 }
 0x1a1   :  { %v1200_v57 = vadd.f32 %v1051_v2, %v920_v17  ;;  %v10573_v17 = vld [vmem:[%s19490_s0 + $0x48] sm:$0xff]  ;;  %v1198_v6 = vadd.f32 %v11840_v38, %v918_v47  ;;  %v1239_v38 = vld [vmem:[%s19494_s1 + $0x58] sm:$0xff]  ;;  %10210 = vrsqrt.f32 %v11740_v12 }
 0x1a2   :  { %v10576_v47 = vld [vmem:[%s19490_s0 + $0x38] sm:$0xff]  ;;  %10212 = vrsqrt.f32 %v11805_v0 }
 0x1a3   :  { %v1280_v22 = vadd.f32 %v1240_v34, %v1200_v57  ;;  %v1281_v57 = vadd.f32 %v1241_v19, %v1201_v32  ;;  %v1236_v19 = vld [vmem:[%s19494_s1 + $0x40] sm:$0xff]  ;;  %10214 = vrsqrt.f32 %v11787_v30 }
 0x1a4   :  { %v1061_v9 = vpop.permute.xlu1 %1060 }
 0x1a5   :  { %v1202_v18 = vadd.f32 %v1061_v9, %v922_v5  ;;  %v19951_v5 = vld [vmem:[#allocation55_spill] sm:$0xff] }
 0x1a6   :  { %v517_v9 = vsub.f32 %v10573_v17, %v19951_v5  ;;  %v19959_v17 = vmov 0  }
 0x1a7   :  { %v1282_v2 = vadd.f32 %v1242_v31, %v1202_v18  ;;  %v19953_v31 = vld [vmem:[#allocation32_spill] sm:$0xff]  ;;  %v10185_v18 = vpop.eup %10184  ;;  %10216 = vrsqrt.f32 %v11781_v27 }
 0x1a8   :  { %v11916_v42 = vpop.permute.xlu1 %1070  ;;  %v919_v3 = vmul.f32 %v19953_v31, %v639_v44  ;;  %v637_v21 = vmul.f32 %v10181_v33, %v517_v9  ;;  %v19956_v44 = vld [vmem:[#allocation39_spill] sm:$0xff]  ;;  %v19957_v33 = vld [vmem:[#allocation45_spill] sm:$0xff]  ;;  %v10187_v5 = vpop.eup %10186  ;;  %v19960_v9 = vld [vmem:[#allocation30_spill] sm:$0xff] }
 0x1a9   :  { %19952 = vst [vmem:[#allocation14_spill] sm:$0xff] %v11916_v42  ;;  %v1635_v15 = vpack.c.bf16 %v1283_v61, %v1282_v2  ;;  %v916_v43 = vmul.f32 %v19956_v44, %v636_v23  ;;  %v510_v11 = vsub.f32 %v11938_v10, %v19957_v33  ;;  %v19958_v2 = vld [vmem:[#allocation53_spill] sm:$0xff]  ;;  %v12050_v33 = vld [vmem:[%s19490_s0 + $0xc8] sm:$0xff]  ;;  %v10590_v27 = vld [vmem:[%s19490_s0 + $0xf0] sm:$0xff] }
 0x1aa   :  { %v1199_v34 = vadd.f32 %v11785_v54, %v919_v3  ;;  %v515_v61 = vsub.f32 %v10576_v47, %v19958_v2  ;;  %v634_v54 = vmul.f32 %v10183_v62, %v514_v13  ;;  %v917_v23 = vmul.f32 %v19960_v9, %v637_v21  ;;  %v19961_v62 = vld [vmem:[#allocation46_spill] sm:$0xff]  ;;  %v19962_v13 = vld [vmem:[#allocation52_spill] sm:$0xff]  ;;  %v10580_v9 = vld [vmem:[%s19490_s0 + $0x28] sm:$0xff] }
 0x1ab   :  { %3090 = vmatpush1.bf16.msra.mxu0 %v1635_v15  ;;  %9827 = vmatpush1.bf16.msra.mxu1 %v1635_v15  ;;  %v1196_v31 = vadd.f32 %v11825_v28, %v916_v43  ;;  %v1278_v3 = vadd.f32 %v1238_v59, %v1198_v6  ;;  %v1634_v15 = vpack.c.bf16 %v1281_v57, %v1280_v22  ;;  %v1237_v28 = vld [vmem:[%s19494_s1 + $0x48] sm:$0xff]  ;;  %v11971_v59 = vpop.permute.xlu0 %1115  ;;  %v10189_v6 = vpop.eup %10188  ;;  %v19963_v22 = vld [vmem:[#allocation21_spill] sm:$0xff] }
 0x1ac   :  { %v11950_v32 = vpop.permute.xlu1 %1080  ;;  %3091 = vmatprep.subr.bf16.mxu0 %v19959_v17  ;;  %9812 = vmatprep.subr.bf16.mxu1 %v19959_v17  ;;  %v512_v60 = vsub.f32 %v10578_v49, %v19962_v13  ;;  %v635_v21 = vmul.f32 %v10185_v18, %v515_v61  ;;  %v11974_v44 = vmul.f32 0.020408163, %v19963_v22  ;;  %v19964_v43 = vld [vmem:[#allocation35_spill] sm:$0xff]  ;;  %v1197_v47 = vadd.f32 %v11778_v50, %v917_v23  ;;  %v19965_v18 = vld [vmem:[#allocation48_spill] sm:$0xff]  ;;  %v19967_v23 = vld [vmem:[#allocation37_spill] sm:$0xff] }
 0x1ad   :  { %v914_v57 = vmul.f32 %v19964_v43, %v634_v54  ;;  %v1279_v2 = vadd.f32 %v1239_v38, %v1199_v34  ;;  %v511_v61 = vsub.f32 %v10579_v45, %v19965_v18  ;;  %v19966_v49 = vld [vmem:[#allocation51_spill] sm:$0xff]  ;;  %v1234_v50 = vld [vmem:[%s19494_s1 + $0x30] sm:$0xff]  ;;  %v10191_v34 = vpop.eup %10190  ;;  %v1276_v43 = vadd.f32 %v1236_v19, %v1196_v31  ;;  %v19969_v18 = vld [vmem:[#allocation22_spill] sm:$0xff] }
 0x1ae   :  { %v513_v13 = vsub.f32 %v10580_v9, %v19966_v49  ;;  %v632_v54 = vmul.f32 %v10187_v5, %v512_v60  ;;  %v19968_v5 = vld [vmem:[#allocation49_spill] sm:$0xff]  ;;  %v12005_v9 = vmul.f32 0.020408163, %v19969_v18  ;;  %v10193_v63 = vpop.eup %10192 }
 0x1af   :  { %3092 = vmatpush1.bf16.msra.mxu0 %v1634_v15  ;;  %9828 = vmatpush1.bf16.msra.mxu1 %v1634_v15  ;;  %v915_v15 = vmul.f32 %v19967_v23, %v635_v21  ;;  %v1194_v22 = vadd.f32 %v11809_v51, %v914_v57  ;;  %v1633_v45 = vpack.c.bf16 %v1279_v2, %v1278_v3  ;;  %v19970_v21 = vld [vmem:[#allocation23_spill] sm:$0xff]  ;;  %v1235_v31 = vld [vmem:[%s19494_s1 + $0x38] sm:$0xff] }
 0x1b0   :  { %v11990_v38 = vpop.permute.xlu1 %1090  ;;  %3093 = vmatprep.subr.bf16.mxu0 %v19959_v17  ;;  %9813 = vmatprep.subr.bf16.mxu1 %v19959_v17  ;;  %v509_v60 = vsub.f32 %v11999_v56, %v19968_v5  ;;  %v633_v49 = vmul.f32 %v10189_v6, %v513_v13  ;;  %v12008_v23 = vmul.f32 0.020408163, %v19970_v21  ;;  %v19971_v51 = vld [vmem:[#allocation31_spill] sm:$0xff]  ;;  %v1277_v57 = vadd.f32 %v1237_v28, %v1197_v47  ;;  %v12021_v6 = vld [vmem:[%s19490_s0 + $0xb8] sm:$0xff]  ;;  %v12028_v13 = vld [vmem:[%s19490_s0 + $0xb0] sm:$0xff] }
 0x1b1   :  { %v912_v19 = vmul.f32 %v19971_v51, %v632_v54  ;;  %v1195_v3 = vadd.f32 %v11765_v24, %v915_v15  ;;  %v630_v28 = vmul.f32 %v10191_v34, %v510_v11  ;;  %v1232_v47 = vld [vmem:[%s19494_s1 + $0x20] sm:$0xff]  ;;  %v12039_v54 = vpop.permute.xlu0 %1125  ;;  %v19972_v18 = vld [vmem:[#allocation33_spill] sm:$0xff]  ;;  %v1274_v51 = vadd.f32 %v1234_v50, %v1194_v22  ;;  %v1233_v50 = vld [vmem:[%s19494_s1 + $0x28] sm:$0xff] }
 0x1b2   :  { %v913_v21 = vmul.f32 %v19972_v18, %v633_v49  ;;  %v1632_v10 = vpack.c.bf16 %v1277_v57, %v1276_v43  ;;  %v12057_v34 = vld [vmem:[%s19490_s0 + $0xc0] sm:$0xff]  ;;  %v19973_v43 = vld [vmem:[#allocation27_spill] sm:$0xff]  ;;  %v12071_v18 = vld [vmem:[%s19490_s0 + $0xd8] sm:$0xff] }
 0x1b3   :  { %3094 = vmatpush1.bf16.msra.mxu0 %v1633_v45  ;;  %9829 = vmatpush1.bf16.msra.mxu1 %v1633_v45  ;;  %v10195_v45 = vpop.eup %10194  ;;  %v1192_v40 = vadd.f32 %v11797_v7, %v912_v19  ;;  %v631_v7 = vmul.f32 %v10193_v63, %v511_v61  ;;  %v910_v19 = vmul.f32 %v19973_v43, %v630_v28  ;;  %v12078_v63 = vld [vmem:[%s19490_s0 + $0xd0] sm:$0xff]  ;;  %v10589_v56 = vld [vmem:[%s19490_s0 + $0xf8] sm:$0xff]  ;;  %v19989_v49 = vld [vmem:[#allocation2_spill] sm:$0xff] }
 0x1b4   :  { %v12041_v15 = vpop.permute.xlu1 %1100  ;;  %3095 = vmatprep.subr.bf16.mxu0 %v19959_v17  ;;  %9814 = vmatprep.subr.bf16.mxu1 %v19959_v17  ;;  %v10197_v22 = vpop.eup %10196  ;;  %v1193_v57 = vadd.f32 %v11754_v20, %v913_v21  ;;  %v1275_v41 = vadd.f32 %v1235_v31, %v1195_v3  ;;  %v19974_v20 = vsub.f32 %v11959_v37, %v19961_v62  ;;  %v1230_v31 = vld [vmem:[%s19494_s1 + $0x10] sm:$0xff]  ;;  %v19975_v21 = vld [vmem:[#allocation29_spill] sm:$0xff]  ;;  %v10588_v37 = vld [vmem:[%s19490_s0 + $0xe0] sm:$0xff] }
 0x1b5   :  { %v10199_v28 = vpop.eup %10198  ;;  %v1190_v43 = vadd.f32 %v11793_v14, %v910_v19  ;;  %v1272_v0 = vadd.f32 %v1232_v47, %v1192_v40  ;;  %v536_v62 = vsub.f32 %v10588_v37, %v19936_v25  ;;  %v629_v24 = vmul.f32 %v10197_v22, %v509_v60  ;;  %v12104_v11 = vpop.permute.xlu0 %1135  ;;  %v19977_v14 = vld [vmem:[#allocation24_spill] sm:$0xff]  ;;  %v1231_v25 = vld [vmem:[%s19494_s1 + $0x18] sm:$0xff] }
 0x1b6   :  { %v628_v61 = vmul.f32 %v10195_v45, %v19974_v20  ;;  %v1631_v2 = vpack.c.bf16 %v1275_v41, %v1274_v51  ;;  %v19976_v45 = vld [vmem:[#allocation26_spill] sm:$0xff]  ;;  %v12107_v47 = vmul.f32 0.020408163, %v19977_v14  ;;  %v19978_v40 = vld [vmem:[#allocation28_spill] sm:$0xff]  ;;  %v1273_v19 = vadd.f32 %v1233_v50, %v1193_v57  ;;  %v1259_v42 = vld [vmem:[%s19494_s1 + $0xf8] sm:$0xff] }
 0x1b7   :  { %3096 = vmatpush1.bf16.msra.mxu0 %v1632_v10  ;;  %9830 = vmatpush1.bf16.msra.mxu1 %v1632_v10  ;;  %v911_v10 = vmul.f32 %v19975_v21, %v631_v7  ;;  %v426_v20 = vmul.f32 0.020408163, %v19976_v45  ;;  %v10201_v7 = vpop.eup %10200  ;;  %v539_v5 = vsub.f32 %v10589_v56, %v19938_v36  ;;  %v464_v60 = vmul.f32 %v11651_v58, %v11651_v58  ;;  %v19979_v36 = vld [vmem:[#allocation25_spill] sm:$0xff]  ;;  %v1229_v56 = vld [vmem:[%s19494_s1 + $0x8] sm:$0xff] }
 0x1b8   :  { %v12089_v3 = vpop.permute.xlu1 %1110  ;;  %3097 = vmatprep.subr.bf16.mxu0 %v19959_v17  ;;  %9815 = vmatprep.subr.bf16.mxu1 %v19959_v17  ;;  %v908_v51 = vmul.f32 %v19978_v40, %v628_v61  ;;  %v466_v22 = vmul.f32 %v11660_v4, %v11660_v4  ;;  %v909_v57 = vmul.f32 %v19979_v36, %v629_v24  ;;  %v19981_v45 = vld [vmem:[#allocation89_spill] sm:$0xff]  ;;  %v19982_v36 = vld [vmem:[#allocation88_spill] sm:$0xff] }
 0x1b9   :  { %v1191_v30 = vadd.f32 %v11738_v53, %v911_v10  ;;  %v1228_v53 = vld [vmem:[%s19494_s1] sm:$0xff]  ;;  %v1270_v61 = vadd.f32 %v1230_v31, %v1190_v43  ;;  %v1630_v21 = vpack.c.bf16 %v1273_v19, %v1272_v0  ;;  %v19980_v10 = vld [vmem:[#allocation72_spill] sm:$0xff]  ;;  %10218 = vrsqrt.f32 %v19981_v45  ;;  %v19983_v31 = vld [vmem:[#allocation3_spill] sm:$0xff] }
 0x1ba   :  { %v1188_v41 = vadd.f32 %v11783_v8, %v908_v51  ;;  %v538_v37 = vsub.f32 %v10590_v27, %v19980_v10  ;;  %v504_v14 = vsub.f32 %v12008_v23, %v464_v60  ;;  %v506_v40 = vsub.f32 %v426_v20, %v466_v22  ;;  %v10591_v51 = vld [vmem:[%s19490_s0 + $0xe8] sm:$0xff]  ;;  %v19984_v19 = vld [vmem:[#allocation68_spill] sm:$0xff]  ;;  %v19986_v22 = vld [vmem:[#allocation10_spill] sm:$0xff]  ;;  %v1146_v10 = vpop.permute.xlu0 %1145 }
 0x1bb   :  { %3098 = vmatpush1.bf16.msra.mxu0 %v1631_v2  ;;  %9831 = vmatpush1.bf16.msra.mxu1 %v1631_v2  ;;  %v10203_v2 = vpop.eup %10202  ;;  %10220 = vrsqrt.f32 %v19982_v36  ;;  %v659_v8 = vmul.f32 %v10201_v7, %v539_v5  ;;  %v1189_v43 = vadd.f32 %v19983_v31, %v909_v57  ;;  %v1271_v0 = vadd.f32 %v1231_v25, %v1191_v30  ;;  %v19985_v20 = vld [vmem:[#allocation80_spill] sm:$0xff]  ;;  %v19987_v25 = vld [vmem:[#allocation74_spill] sm:$0xff] }
 0x1bc   :  { %v12126_v50 = vpop.permute.xlu1 %1120  ;;  %3099 = vmatprep.subr.bf16.mxu0 %v19959_v17  ;;  %9816 = vmatprep.subr.bf16.mxu1 %v19959_v17  ;;  %v10205_v24 = vpop.eup %10204  ;;  %v537_v23 = vsub.f32 %v10591_v51, %v19984_v19  ;;  %v467_v60 = vmul.f32 %v19985_v20, %v19985_v20  ;;  %10222 = vrsqrt.f32 %v19986_v22  ;;  %v656_v27 = vmul.f32 %v10199_v28, %v536_v62  ;;  %v19988_v19 = vld [vmem:[#allocation86_spill] sm:$0xff] }
 0x1bd   :  { %v10207_v7 = vpop.eup %10206  ;;  %v939_v30 = vmul.f32 %v19987_v25, %v659_v8  ;;  %v658_v5 = vmul.f32 %v10203_v2, %v538_v37  ;;  %v1268_v57 = vadd.f32 %v1228_v53, %v1188_v41  ;;  %v12153_v36 = vadd.f32 1e-05, %v504_v14  ;;  %v1258_v53 = vld [vmem:[%s19494_s1 + $0xf0] sm:$0xff]  ;;  %v19995_v25 = vld [vmem:[#allocation7_spill] sm:$0xff] }
 0x1be   :  { %v507_v31 = vsub.f32 %v12107_v47, %v467_v60  ;;  %v657_v51 = vmul.f32 %v10205_v24, %v537_v23  ;;  %v936_v22 = vmul.f32 %v19988_v19, %v656_v27  ;;  %v10209_v28 = vpop.eup %10208  ;;  %v586_v62 = vadd.f32 1e-05, %v506_v40  ;;  %v19990_v2 = vld [vmem:[#allocation76_spill] sm:$0xff] }
 0x1bf   :  { %3100 = vmatpush1.bf16.msra.mxu0 %v1630_v21  ;;  %9832 = vmatpush1.bf16.msra.mxu1 %v1630_v21  ;;  %v1629_v21 = vpack.c.bf16 %v1271_v0, %v1270_v61  ;;  %v938_v1 = vmul.f32 %v19989_v49, %v658_v5  ;;  %v1269_v12 = vadd.f32 %v1229_v56, %v1189_v43  ;;  %v12164_v47 = vpop.eup %10210  ;;  %v19991_v61 = vld [vmem:[#allocation78_spill] sm:$0xff]  ;;  %v19992_v37 = vld [vmem:[#allocation8_spill] sm:$0xff]  ;;  %v19994_v0 = vld [vmem:[#allocation67_spill] sm:$0xff] }
 0x1c0   :  { %v1131_v45 = vpop.permute.xlu1 %1130  ;;  %3101 = vmatprep.subr.bf16.mxu0 %v19959_v17  ;;  %9817 = vmatprep.subr.bf16.mxu1 %v19959_v17  ;;  %v1219_v8 = vadd.f32 %v1146_v10, %v939_v30  ;;  %v463_v41 = vmul.f32 %v19990_v2, %v19990_v2  ;;  %v465_v49 = vmul.f32 %v19991_v61, %v19991_v61  ;;  %10224 = vrsqrt.f32 %v19992_v37  ;;  %v1256_v56 = vld [vmem:[%s19494_s1 + $0xe0] sm:$0xff]  ;;  %v10213_v43 = vpop.eup %10212  ;;  %v19997_v30 = vld [vmem:[#allocation84_spill] sm:$0xff] }
 0x1c1   :  { %v19993_v14 = vsub.f32 %v12078_v63, %v19932_v39  ;;  %v937_v23 = vmul.f32 %v19994_v0, %v657_v51  ;;  %v1216_v60 = vadd.f32 %v1131_v45, %v936_v22  ;;  %v1628_v10 = vpack.c.bf16 %v1269_v12, %v1268_v57  ;;  %v10215_v19 = vpop.eup %10214  ;;  %v19998_v57 = vld [vmem:[#allocation77_spill] sm:$0xff] }
 0x1c2   :  { %10226 = vrsqrt.f32 %v19995_v25  ;;  %v503_v39 = vsub.f32 %v11928_v48, %v463_v41  ;;  %v19996_v63 = vsub.f32 %v12071_v18, %v11592_v52  ;;  %v587_v37 = vadd.f32 1e-05, %v507_v31  ;;  %v19999_v51 = vld [vmem:[#allocation5_spill] sm:$0xff] }
 0x1c3   :  { %3102 = vmatpush1.bf16.msra.mxu0 %v1629_v21  ;;  %9833 = vmatpush1.bf16.msra.mxu1 %v1629_v21  ;;  %v654_v40 = vmul.f32 %v10207_v7, %v19993_v14  ;;  %v1257_v21 = vld [vmem:[%s19494_s1 + $0xe8] sm:$0xff]  ;;  %v1217_v45 = vadd.f32 %v12104_v11, %v937_v23  ;;  %v462_v48 = vmul.f32 %v19998_v57, %v19998_v57  ;;  %10228 = vrsqrt.f32 %v19999_v51  ;;  %v10217_v11 = vpop.eup %10216  ;;  %v1255_v0 = vld [vmem:[%s19494_s1 + $0xd8] sm:$0xff] }
 0x1c4   :  { %v1141_v24 = vpop.permute.xlu1 %1140  ;;  %3103 = vmatprep.subr.bf16.mxu0 %v19959_v17  ;;  %9818 = vmatprep.subr.bf16.mxu1 %v19959_v17  ;;  %v655_v7 = vmul.f32 %v10209_v28, %v19996_v63  ;;  %v505_v52 = vsub.f32 %v12005_v9, %v465_v49  ;;  %v20000_v18 = vsub.f32 %v12057_v34, %v11589_v35  ;;  %v20002_v14 = vld [vmem:[#allocation75_spill] sm:$0xff]  ;;  %10230 = vrsqrt.f32 %v586_v62  ;;  %v12217_v62 = vpop.permute.xlu0 %1155  ;;  %v20007_v63 = vld [vmem:[#allocation50_spill] sm:$0xff] }
 0x1c5   :  { %v1218_v27 = vadd.f32 %v1141_v24, %v938_v1  ;;  %v934_v5 = vmul.f32 %v19997_v30, %v654_v40  ;;  %v1299_v1 = vadd.f32 %v1259_v42, %v1219_v8  ;;  %v20001_v42 = vld [vmem:[#allocation58_spill] sm:$0xff]  ;;  %v1296_v8 = vadd.f32 %v1256_v56, %v1216_v60  ;;  %v1254_v40 = vld [vmem:[%s19494_s1 + $0xd0] sm:$0xff] }
 0x1c6   :  { %v652_v22 = vmul.f32 %v10213_v43, %v20000_v18  ;;  %v935_v31 = vmul.f32 %v20001_v42, %v655_v7  ;;  %v460_v9 = vmul.f32 %v20002_v14, %v20002_v14  ;;  %v502_v49 = vsub.f32 %v11974_v44, %v462_v48  ;;  %v10219_v24 = vpop.eup %10218  ;;  %v20004_v56 = vld [vmem:[#allocation82_spill] sm:$0xff] }
 0x1c7   :  { %v1298_v12 = vadd.f32 %v1258_v53, %v1218_v27  ;;  %3104 = vmatpush1.bf16.msra.mxu0 %v1628_v10  ;;  %9834 = vmatpush1.bf16.msra.mxu1 %v1628_v10  ;;  %v1214_v28 = vadd.f32 %v12126_v50, %v934_v5  ;;  %v20003_v35 = vsub.f32 %v12050_v33, %v11582_v46  ;;  %v583_v50 = vadd.f32 1e-05, %v503_v39  ;;  %v20005_v33 = vld [vmem:[#allocation13_spill] sm:$0xff]  ;;  %v1252_v39 = vld [vmem:[%s19494_s1 + $0xc0] sm:$0xff] }
 0x1c8   :  { %3105 = vmatprep.subr.bf16.mxu0 %v19959_v17  ;;  %9819 = vmatprep.subr.bf16.mxu1 %v19959_v17  ;;  %v12201_v53 = vpop.permute.xlu1 %1150  ;;  %v932_v43 = vmul.f32 %v20004_v56, %v652_v22  ;;  %v1215_v23 = vadd.f32 %v12039_v54, %v935_v31  ;;  %v1297_v44 = vadd.f32 %v1257_v21, %v1217_v45  ;;  %v10221_v46 = vpop.eup %10220  ;;  %v585_v27 = vadd.f32 1e-05, %v505_v52  ;;  %v20011_v22 = vld [vmem:[#allocation63_spill] sm:$0xff] }
 0x1c9   :  { %v1643_v41 = vpack.c.bf16 %v1299_v1, %v1298_v12  ;;  %v653_v34 = vmul.f32 %v10215_v19, %v20003_v35  ;;  %v500_v60 = vsub.f32 %v20005_v33, %v460_v9  ;;  %10232 = vrsqrt.f32 %v587_v37  ;;  %v10223_v54 = vpop.eup %10222  ;;  %v1253_v12 = vld [vmem:[%s19494_s1 + $0xc8] sm:$0xff]  ;;  %v20013_v35 = vld [vmem:[#allocation62_spill] sm:$0xff]  ;;  %v20015_v33 = vld [vmem:[#allocation61_spill] sm:$0xff] }
 0x1ca   :  { %v20006_v10 = vsub.f32 %v12028_v13, %v11579_v29  ;;  %v1212_v30 = vadd.f32 %v12089_v3, %v932_v43  ;;  %v1294_v5 = vadd.f32 %v1254_v40, %v1214_v28  ;;  %v1642_v21 = vpack.c.bf16 %v1297_v44, %v1296_v8  ;;  %v10592_v29 = vld [vmem:[%s19490_s0 + $0xa0] sm:$0xff]  ;;  %v20008_v13 = vld [vmem:[#allocation64_spill] sm:$0xff]  ;;  %v20010_v3 = vld [vmem:[#allocation79_spill] sm:$0xff] }
 0x1cb   :  { %3106 = vmatpush2.bf16.msra.mxu0 %v1643_v41  ;;  %9835 = vmatpush2.bf16.msra.mxu1 %v1643_v41  ;;  %v933_v7 = vmul.f32 %v20007_v63, %v653_v34  ;;  %v528_v19 = vsub.f32 %v10592_v29, %v20008_v13  ;;  %v582_v37 = vadd.f32 1e-05, %v502_v49  ;;  %10234 = vrsqrt.f32 %v12153_v36  ;;  %v10593_v36 = vld [vmem:[%s19490_s0 + $0xa8] sm:$0xff]  ;;  %v12253_v41 = vpop.permute.xlu0 %1165  ;;  %v10594_v49 = vld [vmem:[%s19490_s0 + $0x90] sm:$0xff] }
 0x1cc   :  { %v650_v25 = vmul.f32 %v10217_v11, %v20006_v10  ;;  %3107 = vmatprep.subr.bf16.mxu0 %v19959_v17  ;;  %9820 = vmatprep.subr.bf16.mxu1 %v19959_v17  ;;  %v20009_v45 = vsub.f32 %v12021_v6, %v11576_v26  ;;  %v1295_v52 = vadd.f32 %v1255_v0, %v1215_v23  ;;  %v12243_v18 = vpop.permute.xlu1 %1160  ;;  %v580_v6 = vadd.f32 1e-05, %v500_v60  ;;  %v20014_v43 = vld [vmem:[#allocation71_spill] sm:$0xff]  ;;  %v1251_v0 = vld [vmem:[%s19494_s1 + $0xb8] sm:$0xff]  ;;  %v20016_v10 = vld [vmem:[#allocation42_spill] sm:$0xff] }
 0x1cd   :  { %v1213_v51 = vadd.f32 %v11971_v59, %v933_v7  ;;  %v529_v26 = vsub.f32 %v10593_v36, %v20011_v22  ;;  %10236 = vrsqrt.f32 %v585_v27  ;;  %v648_v11 = vmul.f32 %v10223_v54, %v528_v19  ;;  %v10225_v42 = vpop.eup %10224  ;;  %v20012_v59 = vld [vmem:[#allocation44_spill] sm:$0xff]  ;;  %v1249_v13 = vld [vmem:[%s19494_s1 + $0xa8] sm:$0xff] }
 0x1ce   :  { %v651_v1 = vmul.f32 %v10219_v24, %v20009_v45  ;;  %v930_v48 = vmul.f32 %v20010_v3, %v650_v25  ;;  %v1292_v8 = vadd.f32 %v1252_v39, %v1212_v30  ;;  %v1641_v9 = vpack.c.bf16 %v1295_v52, %v1294_v5  ;;  %v1250_v24 = vld [vmem:[%s19494_s1 + $0xb0] sm:$0xff]  ;;  %v10596_v30 = vld [vmem:[%s19490_s0 + $0x80] sm:$0xff] }
 0x1cf   :  { %3108 = vmatpush2.bf16.msra.mxu0 %v1642_v21  ;;  %9836 = vmatpush2.bf16.msra.mxu1 %v1642_v21  ;;  %v526_v34 = vsub.f32 %v10594_v49, %v20013_v35  ;;  %10238 = vrsqrt.f32 %v582_v37  ;;  %v649_v40 = vmul.f32 %v10221_v46, %v529_v26  ;;  %v10227_v56 = vpop.eup %10226  ;;  %v1293_v44 = vadd.f32 %v1253_v12, %v1213_v51  ;;  %v10595_v46 = vld [vmem:[%s19490_s0 + $0x98] sm:$0xff]  ;;  %v20017_v5 = vld [vmem:[#allocation60_spill] sm:$0xff]  ;;  %v20019_v45 = vld [vmem:[#allocation66_spill] sm:$0xff]  ;;  %v12290_v3 = vpop.permute.xlu0 %1175 }
 0x1d0   :  { %3109 = vmatprep.subr.bf16.mxu0 %v19959_v17  ;;  %9821 = vmatprep.subr.bf16.mxu1 %v19959_v17  ;;  %v931_v31 = vmul.f32 %v20012_v59, %v651_v1  ;;  %v1210_v28 = vadd.f32 %v12041_v15, %v930_v48  ;;  %10240 = vrsqrt.f32 %v583_v50  ;;  %v928_v15 = vmul.f32 %v20014_v43, %v648_v11  ;;  %v1248_v50 = vld [vmem:[%s19494_s1 + $0xa0] sm:$0xff]  ;;  %v12278_v63 = vpop.permute.xlu1 %1170  ;;  %v20018_v37 = vld [vmem:[#allocation65_spill] sm:$0xff]  ;;  %v10597_v48 = vld [vmem:[%s19490_s0 + $0x88] sm:$0xff] }
 0x1d1   :  { %v527_v60 = vsub.f32 %v10595_v46, %v20015_v33  ;;  %10242 = vrsqrt.f32 %v580_v6  ;;  %v646_v27 = vmul.f32 %v10225_v42, %v526_v34  ;;  %v929_v25 = vmul.f32 %v20016_v10, %v649_v40  ;;  %v20020_v51 = vld [vmem:[#allocation59_spill] sm:$0xff]  ;;  %v10598_v36 = vld [vmem:[%s19490_s0 + $0x130] sm:$0xff]  ;;  %v20022_v34 = vld [vmem:[#allocation57_spill] sm:$0xff] }
 0x1d2   :  { %v1211_v23 = vadd.f32 %v11914_v16, %v931_v31  ;;  %v10229_v16 = vpop.eup %10228  ;;  %v1208_v39 = vadd.f32 %v11990_v38, %v928_v15  ;;  %v1290_v54 = vadd.f32 %v1250_v24, %v1210_v28  ;;  %v1640_v7 = vpack.c.bf16 %v1293_v44, %v1292_v8  ;;  %v20021_v6 = vld [vmem:[#allocation40_spill] sm:$0xff]  ;;  %v10599_v28 = vld [vmem:[%s19490_s0 + $0x138] sm:$0xff]  ;;  %v1244_v46 = vld [vmem:[%s19494_s1 + $0x80] sm:$0xff] }
 0x1d3   :  { %3110 = vmatpush2.bf16.msra.mxu0 %v1641_v9  ;;  %9837 = vmatpush2.bf16.msra.mxu1 %v1641_v9  ;;  %v524_v21 = vsub.f32 %v10596_v30, %v20017_v5  ;;  %v647_v29 = vmul.f32 %v10227_v56, %v527_v60  ;;  %v10231_v19 = vpop.eup %10230  ;;  %10244 = vrsqrt.f32 %v11925_v55  ;;  %v926_v38 = vmul.f32 %v20018_v37, %v646_v27  ;;  %v1246_v49 = vld [vmem:[%s19494_s1 + $0x90] sm:$0xff]  ;;  %v20025_v60 = vld [vmem:[#allocation38_spill] sm:$0xff]  ;;  %v20027_v30 = vld [vmem:[#allocation87_spill] sm:$0xff] }
 0x1d4   :  { %3111 = vmatprep.subr.bf16.mxu0 %v19959_v17  ;;  %9822 = vmatprep.subr.bf16.mxu1 %v19959_v17  ;;  %v1209_v1 = vadd.f32 %v20019_v45, %v929_v25  ;;  %v1291_v12 = vadd.f32 %v1251_v0, %v1211_v23  ;;  %v525_v52 = vsub.f32 %v10597_v48, %v20020_v51  ;;  %v20023_v24 = vld [vmem:[#allocation12_spill] sm:$0xff]  ;;  %v1181_v15 = vpop.permute.xlu1 %1180  ;;  %v20024_v23 = vld [vmem:[#allocation90_spill] sm:$0xff]  ;;  %v1186_v25 = vpop.permute.xlu0 %1185  ;;  %v20028_v45 = vld [vmem:[#allocation11_spill] sm:$0xff] }
 0x1d5   :  { %v546_v55 = vsub.f32 %v10598_v36, %v11660_v4  ;;  %v644_v22 = vmul.f32 %v10229_v16, %v524_v21  ;;  %v927_v11 = vmul.f32 %v20021_v6, %v647_v29  ;;  %v1206_v42 = vadd.f32 %v11950_v32, %v926_v38  ;;  %v1247_v32 = vld [vmem:[%s19494_s1 + $0x98] sm:$0xff]  ;;  %v1245_v29 = vld [vmem:[%s19494_s1 + $0x88] sm:$0xff]  ;;  %v10602_v37 = vld [vmem:[%s19490_s0 + $0x110] sm:$0xff] }
 0x1d6   :  { %v10233_v26 = vpop.eup %10232  ;;  %v1288_v59 = vadd.f32 %v1248_v50, %v1208_v39  ;;  %v1639_v31 = vpack.c.bf16 %v1291_v12, %v1290_v54  ;;  %v547_v8 = vsub.f32 %v10599_v28, %v19985_v20  ;;  %v645_v4 = vmul.f32 %v12164_v47, %v525_v52  ;;  %v10600_v20 = vld [vmem:[%s19490_s0 + $0x120] sm:$0xff]  ;;  %v10601_v54 = vld [vmem:[%s19490_s0 + $0x128] sm:$0xff]  ;;  %v20029_v51 = vld [vmem:[#allocation9_spill] sm:$0xff] }
 0x1d7   :  { %3112 = vmatpush2.bf16.msra.mxu0 %v1640_v7  ;;  %9838 = vmatpush2.bf16.msra.mxu1 %v1640_v7  ;;  %v666_v9 = vmul.f32 %v10231_v19, %v546_v55  ;;  %v924_v40 = vmul.f32 %v20022_v34, %v644_v22  ;;  %v1207_v56 = vadd.f32 %v20023_v24, %v927_v11  ;;  %v20026_v50 = vld [vmem:[#allocation14_spill] sm:$0xff]  ;;  %v10603_v22 = vld [vmem:[%s19490_s0 + $0x118] sm:$0xff] }
 0x1d8   :  { %3113 = vmatprep.subr.bf16.mxu0 %v19959_v17  ;;  %9823 = vmatprep.subr.bf16.mxu1 %v19959_v17  ;;  %v10235_v35 = vpop.eup %10234  ;;  %v1289_v43 = vadd.f32 %v1249_v13, %v1209_v1  ;;  %v544_v47 = vsub.f32 %v10600_v20, %v11651_v58  ;;  %v667_v0 = vmul.f32 %v10233_v26, %v547_v8  ;;  %v1266_v58 = vld [vmem:[%s19494_s1 + $0x130] sm:$0xff]  ;;  %v1267_v6 = vld [vmem:[%s19494_s1 + $0x138] sm:$0xff]  ;;  %v1265_v20 = vld [vmem:[%s19494_s1 + $0x128] sm:$0xff] }
 0x1d9   :  { %v946_v44 = vmul.f32 %v20024_v23, %v666_v9  ;;  %v925_v27 = vmul.f32 %v20025_v60, %v645_v4  ;;  %v1204_v16 = vadd.f32 %v20026_v50, %v924_v40  ;;  %v1286_v10 = vadd.f32 %v1246_v49, %v1206_v42  ;;  %v20030_v42 = vld [vmem:[#allocation85_spill] sm:$0xff]  ;;  %v10604_v4 = vld [vmem:[%s19490_s0 + $0x100] sm:$0xff]  ;;  %v20034_v50 = vld [vmem:[#allocation4_spill] sm:$0xff] }
 0x1da   :  { %v10237_v33 = vpop.eup %10236  ;;  %v1638_v39 = vpack.c.bf16 %v1289_v43, %v1288_v59  ;;  %v545_v7 = vsub.f32 %v10601_v54, %v19991_v61  ;;  %v947_v5 = vmul.f32 %v20027_v30, %v667_v0  ;;  %v664_v21 = vmul.f32 %v10235_v35, %v544_v47  ;;  %v1264_v35 = vld [vmem:[%s19494_s1 + $0x120] sm:$0xff]  ;;  %v20033_v0 = vld [vmem:[#allocation83_spill] sm:$0xff] }
 0x1db   :  { %3114 = vmatpush2.bf16.msra.mxu0 %v1639_v31  ;;  %9839 = vmatpush2.bf16.msra.mxu1 %v1639_v31  ;;  %v1226_v13 = vadd.f32 %v1181_v15, %v946_v44  ;;  %v542_v38 = vsub.f32 %v10602_v37, %v19998_v57  ;;  %v1205_v1 = vadd.f32 %v20028_v45, %v925_v27  ;;  %v20031_v40 = vld [vmem:[#allocation6_spill] sm:$0xff]  ;;  %v1262_v27 = vld [vmem:[%s19494_s1 + $0x110] sm:$0xff] }
 0x1dc   :  { %3115 = vmatprep.subr.bf16.mxu0 %v19959_v17  ;;  %9824 = vmatprep.subr.bf16.mxu1 %v19959_v17  ;;  %v10239_v19 = vpop.eup %10238  ;;  %v1287_v12 = vadd.f32 %v1247_v32, %v1207_v56  ;;  %v665_v48 = vmul.f32 %v10237_v33, %v545_v7  ;;  %v944_v52 = vmul.f32 %v20029_v51, %v664_v21  ;;  %v20032_v56 = vld [vmem:[#allocation73_spill] sm:$0xff]  ;;  %v9878_v33 = vld [vmem:[%s19493_s2] ss:$12 sps:$4 sm:$0xff]  }
 0x1dd   :  { %v10241_v61 = vpop.eup %10240  ;;  %v1227_v36 = vadd.f32 %v1186_v25, %v947_v5  ;;  %v543_v57 = vsub.f32 %v10603_v22, %v19990_v2  ;;  %v1284_v26 = vadd.f32 %v1244_v46, %v1204_v16  ;;  %v662_v31 = vmul.f32 %v10239_v19, %v542_v38  ;;  %v1263_v7 = vld [vmem:[%s19494_s1 + $0x118] sm:$0xff]  ;;  %v1261_v19 = vld [vmem:[%s19494_s1 + $0x108] sm:$0xff] }
 0x1de   :  { %v10243_v55 = vpop.eup %10242  ;;  %v1637_v11 = vpack.c.bf16 %v1287_v12, %v1286_v10  ;;  %v945_v59 = vmul.f32 %v20030_v42, %v665_v48  ;;  %v1224_v28 = vadd.f32 %v12278_v63, %v944_v52  ;;  %v1306_v8 = vadd.f32 %v1266_v58, %v1226_v13  ;;  %v9884_v58 = vld [vmem:[%s19493_s2 + $0x1c] ss:$12 sps:$4 sm:$0xff]   ;;  %v9851_v38 = vld [vmem:[%s19493_s2 + $0x5b8] ss:$12 sps:$4 sm:$0xff]   ;;  %v9890_v12 = vld [vmem:[%s19493_s2 + $0x34] ss:$12 sps:$4 sm:$0xff]  }
 0x1df   :  { %3116 = vmatpush2.bf16.msra.mxu0 %v1638_v39  ;;  %9840 = vmatpush2.bf16.msra.mxu1 %v1638_v39  ;;  %v540_v9 = vsub.f32 %v10604_v4, %v20002_v14  ;;  %v663_v49 = vmul.f32 %v10241_v61, %v543_v57  ;;  %v1285_v2 = vadd.f32 %v1245_v29, %v1205_v1  ;;  %v10605_v14 = vld [vmem:[%s19490_s0 + $0x108] sm:$0xff]  ;;  %v20035_v39 = vld [vmem:[#allocation81_spill] sm:$0xff]  ;;  %v9858_v57 = vld [vmem:[%s19493_s2 + $0x604] ss:$12 sps:$4 sm:$0xff]  }
 0x1e0   :  { %3117 = vmatprep.subr.bf16.mxu0 %v19959_v17  ;;  %9825 = vmatprep.subr.bf16.mxu1 %v19959_v17  ;;  %v10245_v34 = vpop.eup %10244  ;;  %v942_v32 = vmul.f32 %v20031_v40, %v662_v31  ;;  %v1225_v63 = vadd.f32 %v12290_v3, %v945_v59  ;;  %v1307_v24 = vadd.f32 %v1267_v6, %v1227_v36  ;;  %v9887_v45 = vld [vmem:[%s19493_s2 + $0x18] ss:$12 sps:$4 sm:$0xff]   ;;  %v9854_v48 = vld [vmem:[%s19493_s2 + $0x5d0] ss:$12 sps:$4 sm:$0xff]   ;;  %v9899_v22 = vld [vmem:[%s19493_s2 + $0x48] ss:$12 sps:$4 sm:$0xff]  }
 0x1e1   :  { %v541_v43 = vsub.f32 %v10605_v14, %v20032_v56  ;;  %v660_v15 = vmul.f32 %v10243_v55, %v540_v9  ;;  %v1636_v47 = vpack.c.bf16 %v1285_v2, %v1284_v26  ;;  %v943_v23 = vmul.f32 %v20033_v0, %v663_v49  ;;  %v9893_v51 = vld [vmem:[%s19493_s2 + $0x30] ss:$12 sps:$4 sm:$0xff]   ;;  %v9855_v52 = vld [vmem:[%s19493_s2 + $0x5ec] ss:$12 sps:$4 sm:$0xff]   ;;  %v9857_v55 = vld [vmem:[%s19493_s2 + $0x5e8] ss:$12 sps:$4 sm:$0xff]  }
 0x1e2   :  { %v1222_v3 = vadd.f32 %v12243_v18, %v942_v32  ;;  %v1304_v44 = vadd.f32 %v1264_v35, %v1224_v28  ;;  %v1647_v46 = vpack.c.bf16 %v1307_v24, %v1306_v8  ;;  %v9849_v18 = vld [vmem:[%s19493_s2 + $0x5bc] ss:$12 sps:$4 sm:$0xff]   ;;  %v1305_v25 = vadd.f32 %v1265_v20, %v1225_v63  ;;  %v9896_v36 = vld [vmem:[%s19493_s2 + $0x4c] ss:$12 sps:$4 sm:$0xff]   ;;  %v9902_v26 = vld [vmem:[%s19493_s2 + $0x64] ss:$12 sps:$4 sm:$0xff]  }
 0x1e3   :  { %3118 = vmatpush2.bf16.msra.mxu0 %v1637_v11  ;;  %9841 = vmatpush2.bf16.msra.mxu1 %v1637_v11  ;;  %v661_v60 = vmul.f32 %v10245_v34, %v541_v43  ;;  %v940_v16 = vmul.f32 %v20034_v50, %v660_v15  ;;  %v1223_v10 = vadd.f32 %v12253_v41, %v943_v23  ;;  %v1260_v41 = vld [vmem:[%s19494_s1 + $0x100] sm:$0xff]  ;;  %v9861_v42 = vld [vmem:[%s19493_s2 + $0x61c] ss:$12 sps:$4 sm:$0xff]   ;;  %v9867_v2 = vld [vmem:[%s19493_s2 + $0x64c] ss:$12 sps:$4 sm:$0xff]  }
 0x1e4   :  { %3119 = vmatprep.subr.bf16.mxu0 %v19959_v17  ;;  %9826 = vmatprep.subr.bf16.mxu1 %v19959_v17  ;;  %v9846_v17 = vld [vmem:[%s19493_s2 + $0x5a0] ss:$12 sps:$4 sm:$0xff]   ;;  %v1302_v5 = vadd.f32 %v1262_v27, %v1222_v3  ;;  %v1646_v21 = vpack.c.bf16 %v1305_v25, %v1304_v44  ;;  %v9908_v59 = vld [vmem:[%s19493_s2 + $0x7c] ss:$12 sps:$4 sm:$0xff]   ;;  %v9863_v31 = vld [vmem:[%s19493_s2 + $0x618] ss:$12 sps:$4 sm:$0xff]  }
 0x1e5   :  { %v941_v54 = vmul.f32 %v20035_v39, %v661_v60  ;;  %v1220_v30 = vadd.f32 %v12201_v53, %v940_v16  ;;  %v1303_v13 = vadd.f32 %v1263_v7, %v1223_v10  ;;  %v9860_v6 = vld [vmem:[%s19493_s2 + $0x600] ss:$12 sps:$4 sm:$0xff]   ;;  %v9911_v28 = vld [vmem:[%s19493_s2 + $0x78] ss:$12 sps:$4 sm:$0xff]   ;;  %v9866_v9 = vld [vmem:[%s19493_s2 + $0x630] ss:$12 sps:$4 sm:$0xff]  }
 0x1e6   :  { %v9905_v11 = vld [vmem:[%s19493_s2 + $0x60] ss:$12 sps:$4 sm:$0xff]   ;;  %v9917_v49 = vld [vmem:[%s19493_s2 + $0x90] ss:$12 sps:$4 sm:$0xff]   ;;  %v9869_v34 = vld [vmem:[%s19493_s2 + $0x648] ss:$12 sps:$4 sm:$0xff]  }
 0x1e7   :  { %3120 = vmatpush2.bf16.msra.mxu0 %v1636_v47  ;;  %9842 = vmatpush2.bf16.msra.mxu1 %v1636_v47  ;;  %v1221_v29 = vadd.f32 %v12217_v62, %v941_v54  ;;  %v1300_v53 = vadd.f32 %v1260_v41, %v1220_v30  ;;  %v1645_v37 = vpack.c.bf16 %v1303_v13, %v1302_v5  ;;  %v9852_v62 = vld [vmem:[%s19493_s2 + $0x5d4] ss:$12 sps:$4 sm:$0xff]   ;;  %v9920_v35 = vld [vmem:[%s19493_s2 + $0xac] ss:$12 sps:$4 sm:$0xff]   ;;  %v9870_v32 = vld [vmem:[%s19493_s2 + $0x664] ss:$12 sps:$4 sm:$0xff]  }
 0x1e8   :  { %9643 = vmatprep.subr.bf16.mxu1 %v1647_v46  ;;  %v9864_v8 = vld [vmem:[%s19493_s2 + $0x634] ss:$12 sps:$4 sm:$0xff]   ;;  %v9926_v63 = vld [vmem:[%s19493_s2 + $0xc4] ss:$12 sps:$4 sm:$0xff]   ;;  %v9873_v56 = vld [vmem:[%s19493_s2 + $0x67c] ss:$12 sps:$4 sm:$0xff]  }
 0x1e9   :  { %v1301_v1 = vadd.f32 %v1261_v19, %v1221_v29  ;;  %v9914_v4 = vld [vmem:[%s19493_s2 + $0x94] ss:$12 sps:$4 sm:$0xff]   ;;  %v9932_v43 = vld [vmem:[%s19493_s2 + $0xdc] ss:$12 sps:$4 sm:$0xff]   ;;  %v9875_v15 = vld [vmem:[%s19493_s2 + $0x678] ss:$12 sps:$4 sm:$0xff]  }
 0x1ea   :  { %3602 = vmatmul.mubr.bf16.vlgmr.msra.gmra.mxu1 %v9846_v17  ;;  %3122 = vmatmul.mubr.bf16.vlgmr.msra.gmra.mxu0 %v9878_v33  ;;  %v9923_v40 = vld [vmem:[%s19493_s2 + $0xa8] ss:$12 sps:$4 sm:$0xff]   ;;  %v9872_v24 = vld [vmem:[%s19493_s2 + $0x660] ss:$12 sps:$4 sm:$0xff]   ;;  %v9935_v20 = vld [vmem:[%s19493_s2 + $0xd8] ss:$12 sps:$4 sm:$0xff]  }
 0x1eb   :  { %9644 = vmatpush3.bf16.msra.mxu1 %v1647_v46  ;;  %3609 = vmatprep.mubr.bf16.mxu1 %v9849_v18  ;;  %v1644_v61 = vpack.c.bf16 %v1301_v1, %v1300_v53  ;;  %v9929_v14 = vld [vmem:[%s19493_s2 + $0xc0] ss:$12 sps:$4 sm:$0xff]   ;;  %v9881_v23 = vld [vmem:[%s19493_s2 + $0x690] ss:$12 sps:$4 sm:$0xff]   ;;  %v9886_v17 = vld [vmem:[%s19493_s2 + $0x6a8] ss:$12 sps:$4 sm:$0xff]  }
 0x1ec   :  { %9645 = vmatprep.subr.bf16.mxu1 %v1646_v21  ;;  %3129 = vmatprep.mubr.bf16.mxu0 %v9884_v58  ;;  %v9876_v47 = vld [vmem:[%s19493_s2 + $0x694] ss:$12 sps:$4 sm:$0xff]   ;;  %v9940_v3 = vld [vmem:[%s19493_s2 + $0xf0] ss:$12 sps:$4 sm:$0xff]   ;;  %v9882_v44 = vld [vmem:[%s19493_s2 + $0x6ac] ss:$12 sps:$4 sm:$0xff]  }
 0x1ed   :  { %v9937_v0 = vld [vmem:[%s19493_s2 + $0xf4] ss:$12 sps:$4 sm:$0xff]   ;;  %v9942_v46 = vld [vmem:[%s19493_s2 + $0x10c] ss:$12 sps:$4 sm:$0xff]   ;;  %v9888_v60 = vld [vmem:[%s19493_s2 + $0x6c4] ss:$12 sps:$4 sm:$0xff]  }
 0x1ee   :  { %v9945_v33 = vld [vmem:[%s19493_s2 + $0x108] ss:$12 sps:$4 sm:$0xff]   ;;  %v9947_v27 = vld [vmem:[%s19493_s2 + $0x124] ss:$12 sps:$4 sm:$0xff]   ;;  %v9892_v18 = vld [vmem:[%s19493_s2 + $0x6c0] ss:$12 sps:$4 sm:$0xff]  }
 0x1ef   :  { %9646 = vmatpush3.bf16.msra.mxu1 %v1646_v21  ;;  %v9950_v50 = vld [vmem:[%s19493_s2 + $0x120] ss:$12 sps:$4 sm:$0xff]   ;;  %v9894_v16 = vld [vmem:[%s19493_s2 + $0x6dc] ss:$12 sps:$4 sm:$0xff]   ;;  %v9898_v25 = vld [vmem:[%s19493_s2 + $0x6d8] ss:$12 sps:$4 sm:$0xff]  }
 0x1f0   :  { %9647 = vmatprep.subr.bf16.mxu1 %v1645_v37  ;;  %v9952_v10 = vld [vmem:[%s19493_s2 + $0x13c] ss:$12 sps:$4 sm:$0xff]   ;;  %v9955_v58 = vld [vmem:[%s19493_s2 + $0x138] ss:$12 sps:$4 sm:$0xff]   ;;  %v9900_v39 = vld [vmem:[%s19493_s2 + $0x6f4] ss:$12 sps:$4 sm:$0xff]  }
 0x1f1   :  { %v9957_v54 = vld [vmem:[%s19493_s2 + $0x154] ss:$12 sps:$4 sm:$0xff]   ;;  %v9904_v7 = vld [vmem:[%s19493_s2 + $0x6f0] ss:$12 sps:$4 sm:$0xff]   ;;  %v9906_v5 = vld [vmem:[%s19493_s2 + $0x70c] ss:$12 sps:$4 sm:$0xff]  }
 0x1f2   :  { %3610 = vmatmul.mubr.bf16.gmra.mxu1 %v9851_v38  ;;  %3130 = vmatmul.mubr.bf16.gmra.mxu0 %v9887_v45  ;;  %v9960_v30 = vld [vmem:[%s19493_s2 + $0x150] ss:$12 sps:$4 sm:$0xff]   ;;  %v9962_v21 = vld [vmem:[%s19493_s2 + $0x16c] ss:$12 sps:$4 sm:$0xff]   ;;  %v9910_v41 = vld [vmem:[%s19493_s2 + $0x708] ss:$12 sps:$4 sm:$0xff]  }
 0x1f3   :  { %9648 = vmatpush3.bf16.msra.mxu1 %v1645_v37  ;;  %3617 = vmatprep.mubr.bf16.mxu1 %v9852_v62  ;;  %v9965_v29 = vld [vmem:[%s19493_s2 + $0x168] ss:$12 sps:$4 sm:$0xff]   ;;  %v9912_v13 = vld [vmem:[%s19493_s2 + $0x724] ss:$12 sps:$4 sm:$0xff]   ;;  %v9916_v53 = vld [vmem:[%s19493_s2 + $0x720] ss:$12 sps:$4 sm:$0xff]  }
 0x1f4   :  { %9649 = vmatprep.subr.bf16.mxu1 %v1644_v61  ;;  %3137 = vmatprep.mubr.bf16.mxu0 %v9890_v12  ;;  %v9967_v19 = vld [vmem:[%s19493_s2 + $0x184] ss:$12 sps:$4 sm:$0xff]   ;;  %v9970_v37 = vld [vmem:[%s19493_s2 + $0x180] ss:$12 sps:$4 sm:$0xff]   ;;  %v9918_v38 = vld [vmem:[%s19493_s2 + $0x73c] ss:$12 sps:$4 sm:$0xff]  }
 0x1f5   :  { %v9972_v45 = vld [vmem:[%s19493_s2 + $0x19c] ss:$12 sps:$4 sm:$0xff]   ;;  %v9922_v62 = vld [vmem:[%s19493_s2 + $0x738] ss:$12 sps:$4 sm:$0xff]   ;;  %v9924_v12 = vld [vmem:[%s19493_s2 + $0x754] ss:$12 sps:$4 sm:$0xff]  }
 0x1f6   :  { %v9975_v1 = vld [vmem:[%s19493_s2 + $0x198] ss:$12 sps:$4 sm:$0xff]  }
 0x1f7   :  { %9650 = vmatpush3.bf16.msra.mxu1 %v1644_v61  ;;  %v9977_v61 = vld [vmem:[%s19493_s2 + $0x1b4] ss:$12 sps:$4 sm:$0xff]  }
 0x1fa   :  { %3618 = vmatmul.mubr.bf16.gmra.mxu1 %v9854_v48  ;;  %3138 = vmatmul.mubr.bf16.gmra.mxu0 %v9893_v51  ;;  %v9928_v48 = vld [vmem:[%s19493_s2 + $0x750] ss:$12 sps:$4 sm:$0xff]  }
 0x1fb   :  { %3625 = vmatprep.mubr.bf16.mxu1 %v9855_v52  ;;  %3145 = vmatprep.mubr.bf16.mxu0 %v9896_v36  ;;  %v9980_v51 = vld [vmem:[%s19493_s2 + $0x1b0] ss:$12 sps:$4 sm:$0xff]   ;;  %v9930_v52 = vld [vmem:[%s19493_s2 + $0x76c] ss:$12 sps:$4 sm:$0xff]  }
 0x1fc   :  { %v9982_v36 = vld [vmem:[%s19493_s2 + $0x1cc] ss:$12 sps:$4 sm:$0xff]  }
 0x202   :  { %3626 = vmatmul.mubr.bf16.gmra.mxu1 %v9857_v55  ;;  %3146 = vmatmul.mubr.bf16.gmra.mxu0 %v9899_v22  ;;  %v9934_v55 = vld [vmem:[%s19493_s2 + $0x768] ss:$12 sps:$4 sm:$0xff]  }
 0x203   :  { %3633 = vmatprep.mubr.bf16.mxu1 %v9858_v57  ;;  %3153 = vmatprep.mubr.bf16.mxu0 %v9902_v26  ;;  %v9985_v22 = vld [vmem:[%s19493_s2 + $0x1c8] ss:$12 sps:$4 sm:$0xff]   ;;  %v9987_v26 = vld [vmem:[%s19493_s2 + $0x1e4] ss:$12 sps:$4 sm:$0xff]  }
 0x204   :  { %v9936_v57 = vld [vmem:[%s19493_s2 + $0x8] ss:$12 sps:$4 sm:$0xff]  }
 0x20a   :  { %3634 = vmatmul.mubr.bf16.gmra.mxu1 %v9860_v6  ;;  %3154 = vmatmul.mubr.bf16.gmra.mxu0 %v9905_v11  ;;  %v9939_v6 = vld [vmem:[%s19493_s2 + $0x20] ss:$12 sps:$4 sm:$0xff]  }
 0x20b   :  { %3641 = vmatprep.mubr.bf16.mxu1 %v9861_v42  ;;  %3161 = vmatprep.mubr.bf16.mxu0 %v9908_v59  ;;  %v9990_v11 = vld [vmem:[%s19493_s2 + $0x1e0] ss:$12 sps:$4 sm:$0xff]   ;;  %v9941_v42 = vld [vmem:[%s19493_s2 + $0x38] ss:$12 sps:$4 sm:$0xff]   ;;  %v9992_v59 = vld [vmem:[%s19493_s2 + $0x1fc] ss:$12 sps:$4 sm:$0xff]  }
 0x212   :  { %3642 = vmatmul.mubr.bf16.gmra.mxu1 %v9863_v31  ;;  %3162 = vmatmul.mubr.bf16.gmra.mxu0 %v9911_v28  ;;  %v9944_v31 = vld [vmem:[%s19493_s2 + $0x50] ss:$12 sps:$4 sm:$0xff]   ;;  %v9995_v28 = vld [vmem:[%s19493_s2 + $0x1f8] ss:$12 sps:$4 sm:$0xff]  }
 0x213   :  { %3649 = vmatprep.mubr.bf16.mxu1 %v9864_v8  ;;  %3169 = vmatprep.mubr.bf16.mxu0 %v9914_v4  ;;  %v9946_v8 = vld [vmem:[%s19493_s2 + $0x68] ss:$12 sps:$4 sm:$0xff]  }
 0x214   :  { %v9997_v4 = vld [vmem:[%s19493_s2 + $0x214] ss:$12 sps:$4 sm:$0xff]  }
 0x21a   :  { %3650 = vmatmul.mubr.bf16.gmra.mxu1 %v9866_v9  ;;  %3170 = vmatmul.mubr.bf16.gmra.mxu0 %v9917_v49  ;;  %v9949_v9 = vld [vmem:[%s19493_s2 + $0x80] ss:$12 sps:$4 sm:$0xff]   ;;  %v10000_v49 = vld [vmem:[%s19493_s2 + $0x210] ss:$12 sps:$4 sm:$0xff]  }
 0x21b   :  { %3657 = vmatprep.mubr.bf16.mxu1 %v9867_v2  ;;  %3177 = vmatprep.mubr.bf16.mxu0 %v9920_v35  ;;  %v9951_v2 = vld [vmem:[%s19493_s2 + $0x98] ss:$12 sps:$4 sm:$0xff]  }
 0x21c   :  { %v10002_v35 = vld [vmem:[%s19493_s2 + $0x22c] ss:$12 sps:$4 sm:$0xff]  }
 0x222   :  { %3658 = vmatmul.mubr.bf16.gmra.mxu1 %v9869_v34  ;;  %3178 = vmatmul.mubr.bf16.gmra.mxu0 %v9923_v40  ;;  %v9954_v34 = vld [vmem:[%s19493_s2 + $0xb0] ss:$12 sps:$4 sm:$0xff]   ;;  %v10005_v40 = vld [vmem:[%s19493_s2 + $0x228] ss:$12 sps:$4 sm:$0xff]  }
 0x223   :  { %3665 = vmatprep.mubr.bf16.mxu1 %v9870_v32  ;;  %3185 = vmatprep.mubr.bf16.mxu0 %v9926_v63  ;;  %v9956_v32 = vld [vmem:[%s19493_s2 + $0xc8] ss:$12 sps:$4 sm:$0xff]   ;;  %v10007_v63 = vld [vmem:[%s19493_s2 + $0x244] ss:$12 sps:$4 sm:$0xff]  }
 0x22a   :  { %3666 = vmatmul.mubr.bf16.gmra.mxu1 %v9872_v24  ;;  %3186 = vmatmul.mubr.bf16.gmra.mxu0 %v9929_v14  ;;  %v9959_v24 = vld [vmem:[%s19493_s2 + $0xe0] ss:$12 sps:$4 sm:$0xff]  }
 0x22b   :  { %3673 = vmatprep.mubr.bf16.mxu1 %v9873_v56  ;;  %3193 = vmatprep.mubr.bf16.mxu0 %v9932_v43  ;;  %v10010_v14 = vld [vmem:[%s19493_s2 + $0x240] ss:$12 sps:$4 sm:$0xff]   ;;  %v9961_v56 = vld [vmem:[%s19493_s2 + $0xf8] ss:$12 sps:$4 sm:$0xff]   ;;  %v10012_v43 = vld [vmem:[%s19493_s2 + $0x25c] ss:$12 sps:$4 sm:$0xff]  }
 0x232   :  { %3674 = vmatmul.mubr.bf16.gmra.mxu1 %v9875_v15  ;;  %3194 = vmatmul.mubr.bf16.gmra.mxu0 %v9935_v20 }
 0x233   :  { %3681 = vmatprep.mubr.bf16.mxu1 %v9876_v47  ;;  %3201 = vmatprep.mubr.bf16.mxu0 %v9937_v0 }
 0x23a   :  { %3682 = vmatmul.mubr.bf16.gmra.mxu1 %v9881_v23  ;;  %3202 = vmatmul.mubr.bf16.gmra.mxu0 %v9940_v3  ;;  %v9964_v3 = vld [vmem:[%s19493_s2 + $0x110] ss:$12 sps:$4 sm:$0xff]  }
 0x23b   :  { %3689 = vmatprep.mubr.bf16.mxu1 %v9882_v44  ;;  %3209 = vmatprep.mubr.bf16.mxu0 %v9942_v46  ;;  %v10015_v46 = vld [vmem:[%s19493_s2 + $0x258] ss:$12 sps:$4 sm:$0xff]  }
 0x242   :  { %3690 = vmatmul.mubr.bf16.gmra.mxu1 %v9886_v17  ;;  %3210 = vmatmul.mubr.bf16.gmra.mxu0 %v9945_v33  ;;  %v9966_v17 = vld [vmem:[%s19493_s2 + $0x128] ss:$12 sps:$4 sm:$0xff]  }
 0x243   :  { %3697 = vmatprep.mubr.bf16.mxu1 %v9888_v60  ;;  %3217 = vmatprep.mubr.bf16.mxu0 %v9947_v27  ;;  %v10017_v33 = vld [vmem:[%s19493_s2 + $0x274] ss:$12 sps:$4 sm:$0xff]  }
 0x24a   :  { %3698 = vmatmul.mubr.bf16.gmra.mxu1 %v9892_v18  ;;  %3218 = vmatmul.mubr.bf16.gmra.mxu0 %v9950_v50 }
 0x24b   :  { %3705 = vmatprep.mubr.bf16.mxu1 %v9894_v16  ;;  %3225 = vmatprep.mubr.bf16.mxu0 %v9952_v10 }
 0x252   :  { %3706 = vmatmul.mubr.bf16.gmra.mxu1 %v9898_v25  ;;  %3226 = vmatmul.mubr.bf16.gmra.mxu0 %v9955_v58  ;;  %v9969_v58 = vld [vmem:[%s19493_s2 + $0x140] ss:$12 sps:$4 sm:$0xff]  }
 0x253   :  { %3713 = vmatprep.mubr.bf16.mxu1 %v9900_v39  ;;  %3233 = vmatprep.mubr.bf16.mxu0 %v9957_v54  ;;  %v10020_v54 = vld [vmem:[%s19493_s2 + $0x270] ss:$12 sps:$4 sm:$0xff]  }
 0x25a   :  { %3714 = vmatmul.mubr.bf16.gmra.mxu1 %v9904_v7  ;;  %3234 = vmatmul.mubr.bf16.gmra.mxu0 %v9960_v30  ;;  %v9971_v7 = vld [vmem:[%s19493_s2 + $0x158] ss:$12 sps:$4 sm:$0xff]  }
 0x25b   :  { %3721 = vmatprep.mubr.bf16.mxu1 %v9906_v5  ;;  %3241 = vmatprep.mubr.bf16.mxu0 %v9962_v21  ;;  %v10022_v30 = vld [vmem:[%s19493_s2 + $0x28c] ss:$12 sps:$4 sm:$0xff]  }
 0x262   :  { %3722 = vmatmul.mubr.bf16.gmra.mxu1 %v9910_v41  ;;  %3242 = vmatmul.mubr.bf16.gmra.mxu0 %v9965_v29 }
 0x263   :  { %3729 = vmatprep.mubr.bf16.mxu1 %v9912_v13  ;;  %3249 = vmatprep.mubr.bf16.mxu0 %v9967_v19 }
 0x26a   :  { %3730 = vmatmul.mubr.bf16.gmra.mxu1 %v9916_v53  ;;  %3250 = vmatmul.mubr.bf16.gmra.mxu0 %v9970_v37  ;;  %v9974_v37 = vld [vmem:[%s19493_s2 + $0x170] ss:$12 sps:$4 sm:$0xff]  }
 0x26b   :  { %3737 = vmatprep.mubr.bf16.mxu1 %v9918_v38  ;;  %3257 = vmatprep.mubr.bf16.mxu0 %v9972_v45  ;;  %v10025_v45 = vld [vmem:[%s19493_s2 + $0x288] ss:$12 sps:$4 sm:$0xff]  }
 0x272   :  { %3738 = vmatmul.mubr.bf16.gmra.mxu1 %v9922_v62  ;;  %3258 = vmatmul.mubr.bf16.gmra.mxu0 %v9975_v1  ;;  %v9976_v62 = vld [vmem:[%s19493_s2 + $0x188] ss:$12 sps:$4 sm:$0xff]   ;;  %v10029_v1 = vld [vmem:[%s19493_s2 + $0x2a4] ss:$12 sps:$4 sm:$0xff]  }
 0x273   :  { %3745 = vmatprep.mubr.bf16.mxu1 %v9924_v12  ;;  %3265 = vmatprep.mubr.bf16.mxu0 %v9977_v61 }
 0x27a   :  { %3746 = vmatmul.mubr.bf16.gmra.mxu1 %v9928_v48  ;;  %3266 = vmatmul.mubr.bf16.gmra.mxu0 %v9980_v51 }
 0x27b   :  { %3753 = vmatprep.mubr.bf16.mxu1 %v9930_v52  ;;  %3273 = vmatprep.mubr.bf16.mxu0 %v9982_v36 }
 0x282   :  { %3754 = vmatmul.mubr.bf16.gmra.mxu1 %v9934_v55  ;;  %3274 = vmatmul.mubr.bf16.gmra.mxu0 %v9985_v22  ;;  %v9979_v22 = vld [vmem:[%s19493_s2 + $0x1a0] ss:$12 sps:$4 sm:$0xff]  }
 0x283   :  { %9651 = vmatprep.mubr.msk.bf16.mxu1 %vm2848_vm1, %v9936_v57  ;;  %3281 = vmatprep.mubr.bf16.mxu0 %v9987_v26  ;;  %v10027_v26 = vld [vmem:[%s19493_s2 + $0x2a0] ss:$12 sps:$4 sm:$0xff]  }
 0x28a   :  { %9652 = vmatmul.mubr.msk.bf16.vlgmr.msra.gmra.mxu1 %vm2848_vm1, %v9939_v6  ;;  %3282 = vmatmul.mubr.bf16.gmra.mxu0 %v9990_v11  ;;  %v9981_v6 = vld [vmem:[%s19493_s2 + $0x1b8] ss:$12 sps:$4 sm:$0xff]   ;;  %v10034_v11 = vld [vmem:[%s19493_s2 + $0x2bc] ss:$12 sps:$4 sm:$0xff]  }
 0x28b   :  { %9655 = vmatprep.mubr.msk.bf16.mxu1 %vm2848_vm1, %v9941_v42  ;;  %3289 = vmatprep.mubr.bf16.mxu0 %v9992_v59 }
 0x292   :  { %9656 = vmatmul.mubr.msk.bf16.gmra.mxu1 %vm2848_vm1, %v9944_v31  ;;  %3290 = vmatmul.mubr.bf16.gmra.mxu0 %v9995_v28 }
 0x293   :  { %9659 = vmatprep.mubr.msk.bf16.mxu1 %vm2848_vm1, %v9946_v8  ;;  %3297 = vmatprep.mubr.bf16.mxu0 %v9997_v4 }
 0x29a   :  { %9660 = vmatmul.mubr.msk.bf16.gmra.mxu1 %vm2848_vm1, %v9949_v9  ;;  %3298 = vmatmul.mubr.bf16.gmra.mxu0 %v10000_v49  ;;  %v9984_v49 = vld [vmem:[%s19493_s2 + $0x1d0] ss:$12 sps:$4 sm:$0xff]  }
 0x29b   :  { %9663 = vmatprep.mubr.msk.bf16.mxu1 %vm2848_vm1, %v9951_v2  ;;  %3305 = vmatprep.mubr.bf16.mxu0 %v10002_v35  ;;  %v10032_v35 = vld [vmem:[%s19493_s2 + $0x2b8] ss:$12 sps:$4 sm:$0xff]  }
 0x2a2   :  { %9664 = vmatmul.mubr.msk.bf16.gmra.mxu1 %vm2848_vm1, %v9954_v34  ;;  %3306 = vmatmul.mubr.bf16.gmra.mxu0 %v10005_v40  ;;  %v9986_v34 = vld [vmem:[%s19493_s2 + $0x1e8] ss:$12 sps:$4 sm:$0xff]  }
 0x2a3   :  { %9667 = vmatprep.mubr.msk.bf16.mxu1 %vm2848_vm1, %v9956_v32  ;;  %3313 = vmatprep.mubr.bf16.mxu0 %v10007_v63  ;;  %v10039_v40 = vld [vmem:[%s19493_s2 + $0x2d4] ss:$12 sps:$4 sm:$0xff]  }
 0x2aa   :  { %v12703_v15 = vpop.f32.mrf.mxu1  ;;  %9668 = vmatmul.mubr.msk.bf16.gmra.mxu1 %vm2848_vm1, %v9959_v24  ;;  %v12706_v20 = vpop.f32.mrf.mxu0  ;;  %3314 = vmatmul.mubr.bf16.gmra.mxu0 %v10010_v14 }
 0x2ab   :  { %20036 = vst [vmem:[#allocation15_spill] sm:$0xff] %v12703_v15  ;;  %9671 = vmatprep.mubr.msk.bf16.mxu1 %vm2848_vm1, %v9961_v56  ;;  %3321 = vmatprep.mubr.bf16.mxu0 %v10012_v43 }
 0x2ac   :  { %v3605_v47 = vpop.f32.mrf.mxu1  ;;  %v3125_v0 = vpop.f32.mrf.mxu0 }
 0x2ad   :  { %v9989_v0 = vld [vmem:[%s19493_s2 + $0x200] ss:$12 sps:$4 sm:$0xff]  }
 0x2ae   :  { %v12709_v23 = vpop.f32.mrf.mxu1  ;;  %v12714_v44 = vpop.f32.mrf.mxu0 }
 0x2af   :  { %20037 = vst [vmem:[#allocation16_spill] sm:$0xff] %v12709_v23 }
 0x2b0   :  { %v3608_v60 = vpop.f32.mrf.mxu1  ;;  %v3128_v27 = vpop.f32.mrf.mxu0 }
 0x2b2   :  { %v12725_v18 = vpop.f32.mrf.mxu1  ;;  %9672 = vmatmul.mubr.msk.bf16.gmra.mxu1 %vm2848_vm1, %v9964_v3  ;;  %v12728_v50 = vpop.f32.mrf.mxu0  ;;  %3322 = vmatmul.mubr.bf16.gmra.mxu0 %v10015_v46  ;;  %v10037_v46 = vld [vmem:[%s19493_s2 + $0x2d0] ss:$12 sps:$4 sm:$0xff]  }
 0x2b3   :  { %20038 = vst [vmem:[#allocation69_spill] sm:$0xff] %v12725_v18  ;;  %9675 = vmatprep.mubr.msk.bf16.mxu1 %vm2848_vm1, %v9966_v17  ;;  %3329 = vmatprep.mubr.bf16.mxu0 %v10017_v33  ;;  %v9991_v17 = vld [vmem:[%s19493_s2 + $0x218] ss:$12 sps:$4 sm:$0xff]   ;;  %v10080_v18 = vld [vmem:[%s19493_s2 + $0x560] ss:$12 sps:$4 sm:$0xff]  }
 0x2b4   :  { %v3613_v16 = vpop.f32.mrf.mxu1  ;;  %v3133_v10 = vpop.f32.mrf.mxu0  ;;  %v10044_v33 = vld [vmem:[%s19493_s2 + $0x2ec] ss:$12 sps:$4 sm:$0xff]  }
 0x2b6   :  { %v12731_v25 = vpop.f32.mrf.mxu1  ;;  %v12736_v39 = vpop.f32.mrf.mxu0 }
 0x2b7   :  { %20039 = vst [vmem:[#allocation70_spill] sm:$0xff] %v12731_v25 }
 0x2b8   :  { %v3616_v5 = vpop.f32.mrf.mxu1  ;;  %v3136_v21 = vpop.f32.mrf.mxu0 }
 0x2b9   :  { %v10042_v21 = vld [vmem:[%s19493_s2 + $0x2e8] ss:$12 sps:$4 sm:$0xff]  }
 0x2ba   :  { %v12747_v41 = vpop.f32.mrf.mxu1  ;;  %9676 = vmatmul.mubr.msk.bf16.gmra.mxu1 %vm2848_vm1, %v9969_v58  ;;  %v12750_v29 = vpop.f32.mrf.mxu0  ;;  %3330 = vmatmul.mubr.bf16.gmra.mxu0 %v10020_v54 }
 0x2bb   :  { %20040 = vst [vmem:[#allocation17_spill] sm:$0xff] %v12747_v41  ;;  %9679 = vmatprep.mubr.msk.bf16.mxu1 %vm2848_vm1, %v9971_v7  ;;  %3337 = vmatprep.mubr.bf16.mxu0 %v10022_v30  ;;  %v9994_v30 = vld [vmem:[%s19493_s2 + $0x230] ss:$12 sps:$4 sm:$0xff]  }
 0x2bc   :  { %v3621_v13 = vpop.f32.mrf.mxu1  ;;  %v3141_v19 = vpop.f32.mrf.mxu0 }
 0x2bd   :  { %v9996_v13 = vld [vmem:[%s19493_s2 + $0x248] ss:$12 sps:$4 sm:$0xff]   ;;  %v10049_v19 = vld [vmem:[%s19493_s2 + $0x304] ss:$12 sps:$4 sm:$0xff]  }
 0x2be   :  { %v12753_v53 = vpop.f32.mrf.mxu1  ;;  %v12758_v38 = vpop.f32.mrf.mxu0 }
 0x2bf   :  { %20041 = vst [vmem:[#allocation18_spill] sm:$0xff] %v12753_v53 }
 0x2c0   :  { %v3624_v12 = vpop.f32.mrf.mxu1  ;;  %v3144_v61 = vpop.f32.mrf.mxu0 }
 0x2c2   :  { %v12769_v48 = vpop.f32.mrf.mxu1  ;;  %9680 = vmatmul.mubr.msk.bf16.gmra.mxu1 %vm2848_vm1, %v9974_v37  ;;  %v12772_v51 = vpop.f32.mrf.mxu0  ;;  %3338 = vmatmul.mubr.bf16.gmra.mxu0 %v10025_v45 }
 0x2c3   :  { %20042 = vst [vmem:[#allocation36_spill] sm:$0xff] %v12769_v48  ;;  %9683 = vmatprep.mubr.msk.bf16.mxu1 %vm2848_vm1, %v9976_v62  ;;  %3345 = vmatprep.mubr.bf16.mxu0 %v10029_v1 }
 0x2c4   :  { %v3629_v52 = vpop.f32.mrf.mxu1  ;;  %v3149_v36 = vpop.f32.mrf.mxu0 }
 0x2c5   :  { %v9999_v36 = vld [vmem:[%s19493_s2 + $0x260] ss:$12 sps:$4 sm:$0xff]  }
 0x2c6   :  { %v12775_v55 = vpop.f32.mrf.mxu1  ;;  %v12780_v57 = vpop.f32.mrf.mxu0 }
 0x2c7   :  { %20043 = vst [vmem:[#allocation19_spill] sm:$0xff] %v12775_v55 }
 0x2c8   :  { %v3632_v42 = vpop.f32.mrf.mxu1  ;;  %v3152_v59 = vpop.f32.mrf.mxu0 }
 0x2ca   :  { %v12791_v31 = vpop.f32.mrf.mxu1  ;;  %9684 = vmatmul.mubr.msk.bf16.gmra.mxu1 %vm2848_vm1, %v9979_v22  ;;  %v12794_v28 = vpop.f32.mrf.mxu0  ;;  %3346 = vmatmul.mubr.bf16.gmra.mxu0 %v10027_v26  ;;  %v10047_v26 = vld [vmem:[%s19493_s2 + $0x300] ss:$12 sps:$4 sm:$0xff]  }
 0x2cb   :  { %20044 = vst [vmem:[#allocation43_spill] sm:$0xff] %v12791_v31  ;;  %9687 = vmatprep.mubr.msk.bf16.mxu1 %vm2848_vm1, %v9981_v6  ;;  %3353 = vmatprep.mubr.bf16.mxu0 %v10034_v11  ;;  %v10001_v6 = vld [vmem:[%s19493_s2 + $0x278] ss:$12 sps:$4 sm:$0xff]   ;;  %v10054_v11 = vld [vmem:[%s19493_s2 + $0x31c] ss:$12 sps:$4 sm:$0xff]  }
 0x2cc   :  { %v3637_v8 = vpop.f32.mrf.mxu1  ;;  %v3157_v4 = vpop.f32.mrf.mxu0 }
 0x2ce   :  { %v12797_v9 = vpop.f32.mrf.mxu1  ;;  %v12802_v2 = vpop.f32.mrf.mxu0 }
 0x2cf   :  { %20045 = vst [vmem:[#allocation47_spill] sm:$0xff] %v12797_v9 }
 0x2d0   :  { %v3640_v32 = vpop.f32.mrf.mxu1  ;;  %v3160_v63 = vpop.f32.mrf.mxu0 }
 0x2d1   :  { %v10052_v63 = vld [vmem:[%s19493_s2 + $0x318] ss:$12 sps:$4 sm:$0xff]  }
 0x2d2   :  { %v12813_v24 = vpop.f32.mrf.mxu1  ;;  %9688 = vmatmul.mubr.msk.bf16.gmra.mxu1 %vm2848_vm1, %v9984_v49  ;;  %v12816_v14 = vpop.f32.mrf.mxu0  ;;  %3354 = vmatmul.mubr.bf16.gmra.mxu0 %v10032_v35 }
 0x2d3   :  { %20046 = vst [vmem:[#allocation34_spill] sm:$0xff] %v12813_v24  ;;  %9691 = vmatprep.mubr.msk.bf16.mxu1 %vm2848_vm1, %v9986_v34  ;;  %3361 = vmatprep.mubr.bf16.mxu0 %v10039_v40  ;;  %v10004_v40 = vld [vmem:[%s19493_s2 + $0x290] ss:$12 sps:$4 sm:$0xff]  }
 0x2d4   :  { %v3645_v56 = vpop.f32.mrf.mxu1  ;;  %v3165_v43 = vpop.f32.mrf.mxu0 }
 0x2d5   :  { %v10006_v56 = vld [vmem:[%s19493_s2 + $0x2a8] ss:$12 sps:$4 sm:$0xff]  }
 0x2d6   :  { %v12819_v47 = vpop.f32.mrf.mxu1  ;;  %v12824_v3 = vpop.f32.mrf.mxu0  ;;  %v10059_v43 = vld [vmem:[%s19493_s2 + $0x334] ss:$12 sps:$4 sm:$0xff]  }
 0x2d7   :  { %20047 = vst [vmem:[#allocation56_spill] sm:$0xff] %v12819_v47 }
 0x2d8   :  { %v3648_v60 = vpop.f32.mrf.mxu1  ;;  %v3168_v27 = vpop.f32.mrf.mxu0 }
 0x2da   :  { %v12835_v16 = vpop.f32.mrf.mxu1  ;;  %9692 = vmatmul.mubr.msk.bf16.gmra.mxu1 %vm2848_vm1, %v9989_v0  ;;  %v12838_v10 = vpop.f32.mrf.mxu0  ;;  %3362 = vmatmul.mubr.bf16.gmra.mxu0 %v10037_v46 }
 0x2db   :  { %20048 = vst [vmem:[#allocation41_spill] sm:$0xff] %v12835_v16  ;;  %9695 = vmatprep.mubr.msk.bf16.mxu1 %vm2848_vm1, %v9991_v17  ;;  %3369 = vmatprep.mubr.bf16.mxu0 %v10044_v33  ;;  %v10060_v16 = vld [vmem:[%s19493_s2 + $0x4a0] ss:$12 sps:$4 sm:$0xff]  }
 0x2dc   :  { %v3653_v58 = vpop.f32.mrf.mxu1  ;;  %v3173_v54 = vpop.f32.mrf.mxu0 }
 0x2dd   :  { %v10009_v54 = vld [vmem:[%s19493_s2 + $0x2c0] ss:$12 sps:$4 sm:$0xff]  }
 0x2de   :  { %v12841_v7 = vpop.f32.mrf.mxu1  ;;  %v12846_v5 = vpop.f32.mrf.mxu0 }
 0x2df   :  { %20049 = vst [vmem:[#allocation55_spill] sm:$0xff] %v12841_v7 }
 0x2e0   :  { %v3656_v37 = vpop.f32.mrf.mxu1  ;;  %v3176_v45 = vpop.f32.mrf.mxu0 }
 0x2e2   :  { %v12857_v62 = vpop.f32.mrf.mxu1  ;;  %9696 = vmatmul.mubr.msk.bf16.gmra.mxu1 %vm2848_vm1, %v9994_v30  ;;  %v12860_v1 = vpop.f32.mrf.mxu0  ;;  %3370 = vmatmul.mubr.bf16.gmra.mxu0 %v10042_v21  ;;  %v10057_v21 = vld [vmem:[%s19493_s2 + $0x330] ss:$12 sps:$4 sm:$0xff]  }
 0x2e3   :  { %20050 = vst [vmem:[#allocation32_spill] sm:$0xff] %v12857_v62  ;;  %9699 = vmatprep.mubr.msk.bf16.mxu1 %vm2848_vm1, %v9996_v13  ;;  %3377 = vmatprep.mubr.bf16.mxu0 %v10049_v19  ;;  %v10011_v13 = vld [vmem:[%s19493_s2 + $0x2d8] ss:$12 sps:$4 sm:$0xff]  }
 0x2e4   :  { %v3661_v12 = vpop.f32.mrf.mxu1  ;;  %v3181_v61 = vpop.f32.mrf.mxu0  ;;  %v10064_v19 = vld [vmem:[%s19493_s2 + $0x34c] ss:$12 sps:$4 sm:$0xff]  }
 0x2e6   :  { %v12863_v52 = vpop.f32.mrf.mxu1  ;;  %v12868_v22 = vpop.f32.mrf.mxu0 }
 0x2e7   :  { %20051 = vst [vmem:[#allocation54_spill] sm:$0xff] %v12863_v52 }
 0x2e8   :  { %v3664_v42 = vpop.f32.mrf.mxu1  ;;  %v3184_v59 = vpop.f32.mrf.mxu0 }
 0x2e9   :  { %v10062_v59 = vld [vmem:[%s19493_s2 + $0x348] ss:$12 sps:$4 sm:$0xff]  }
 0x2ea   :  { %v12879_v8 = vpop.f32.mrf.mxu1  ;;  %9700 = vmatmul.mubr.msk.bf16.gmra.mxu1 %vm2848_vm1, %v9999_v36  ;;  %v12882_v4 = vpop.f32.mrf.mxu0  ;;  %3378 = vmatmul.mubr.bf16.gmra.mxu0 %v10047_v26 }
 0x2eb   :  { %20052 = vst [vmem:[#allocation20_spill] sm:$0xff] %v12879_v8  ;;  %9703 = vmatprep.mubr.msk.bf16.mxu1 %vm2848_vm1, %v10001_v6  ;;  %3385 = vmatprep.mubr.bf16.mxu0 %v10054_v11  ;;  %v10014_v11 = vld [vmem:[%s19493_s2 + $0x2f0] ss:$12 sps:$4 sm:$0xff]   ;;  %v10050_v8 = vld [vmem:[%s19493_s2 + $0x440] ss:$12 sps:$4 sm:$0xff]  }
 0x2ec   :  { %v3669_v49 = vpop.f32.mrf.mxu1  ;;  %v3189_v35 = vpop.f32.mrf.mxu0 }
 0x2ed   :  { %v10016_v49 = vld [vmem:[%s19493_s2 + $0x308] ss:$12 sps:$4 sm:$0xff]   ;;  %v10069_v35 = vld [vmem:[%s19493_s2 + $0x364] ss:$12 sps:$4 sm:$0xff]  }
 0x2ee   :  { %v12885_v34 = vpop.f32.mrf.mxu1  ;;  %v12890_v32 = vpop.f32.mrf.mxu0 }
 0x2ef   :  { %20053 = vst [vmem:[#allocation39_spill] sm:$0xff] %v12885_v34 }
 0x2f0   :  { %v3672_v0 = vpop.f32.mrf.mxu1  ;;  %v3192_v46 = vpop.f32.mrf.mxu0 }
 0x2f2   :  { %v12901_v17 = vpop.f32.mrf.mxu1  ;;  %9704 = vmatmul.mubr.msk.bf16.gmra.mxu1 %vm2848_vm1, %v10004_v40  ;;  %v12904_v33 = vpop.f32.mrf.mxu0  ;;  %3386 = vmatmul.mubr.bf16.gmra.mxu0 %v10052_v63 }
 0x2f3   :  { %20054 = vst [vmem:[#allocation45_spill] sm:$0xff] %v12901_v17  ;;  %9707 = vmatprep.mubr.msk.bf16.mxu1 %vm2848_vm1, %v10006_v56  ;;  %3393 = vmatprep.mubr.bf16.mxu0 %v10059_v43  ;;  %v10055_v17 = vld [vmem:[%s19493_s2 + $0x470] ss:$12 sps:$4 sm:$0xff]  }
 0x2f4   :  { %v3677_v60 = vpop.f32.mrf.mxu1  ;;  %v3197_v27 = vpop.f32.mrf.mxu0 }
 0x2f5   :  { %v10019_v27 = vld [vmem:[%s19493_s2 + $0x320] ss:$12 sps:$4 sm:$0xff]  }
 0x2f6   :  { %v12907_v58 = vpop.f32.mrf.mxu1  ;;  %v12912_v30 = vpop.f32.mrf.mxu0 }
 0x2f7   :  { %20055 = vst [vmem:[#allocation53_spill] sm:$0xff] %v12907_v58 }
 0x2f8   :  { %v3680_v37 = vpop.f32.mrf.mxu1  ;;  %v3200_v45 = vpop.f32.mrf.mxu0 }
 0x2fa   :  { %v12923_v12 = vpop.f32.mrf.mxu1  ;;  %9708 = vmatmul.mubr.msk.bf16.gmra.mxu1 %vm2848_vm1, %v10009_v54  ;;  %v12926_v61 = vpop.f32.mrf.mxu0  ;;  %3394 = vmatmul.mubr.bf16.gmra.mxu0 %v10057_v21  ;;  %v10067_v21 = vld [vmem:[%s19493_s2 + $0x360] ss:$12 sps:$4 sm:$0xff]  }
 0x2fb   :  { %20056 = vst [vmem:[#allocation30_spill] sm:$0xff] %v12923_v12  ;;  %9711 = vmatprep.mubr.msk.bf16.mxu1 %vm2848_vm1, %v10011_v13  ;;  %3401 = vmatprep.mubr.bf16.mxu0 %v10064_v19  ;;  %v10021_v13 = vld [vmem:[%s19493_s2 + $0x338] ss:$12 sps:$4 sm:$0xff]   ;;  %v10074_v19 = vld [vmem:[%s19493_s2 + $0x37c] ss:$12 sps:$4 sm:$0xff]  }
 0x2fc   :  { %v3685_v36 = vpop.f32.mrf.mxu1  ;;  %v3205_v26 = vpop.f32.mrf.mxu0  ;;  %v10040_v12 = vld [vmem:[%s19493_s2 + $0x3e0] ss:$12 sps:$4 sm:$0xff]  }
 0x2fe   :  { %v12929_v6 = vpop.f32.mrf.mxu1  ;;  %v12934_v42 = vpop.f32.mrf.mxu0 }
 0x2ff   :  { %20057 = vst [vmem:[#allocation46_spill] sm:$0xff] %v12929_v6 }
 0x300   :  { %v3688_v40 = vpop.f32.mrf.mxu1  ;;  %v3208_v63 = vpop.f32.mrf.mxu0 }
 0x301   :  { %v10072_v63 = vld [vmem:[%s19493_s2 + $0x378] ss:$12 sps:$4 sm:$0xff]  }
 0x302   :  { %v12945_v56 = vpop.f32.mrf.mxu1  ;;  %9712 = vmatmul.mubr.msk.bf16.gmra.mxu1 %vm2848_vm1, %v10014_v11  ;;  %v12948_v43 = vpop.f32.mrf.mxu0  ;;  %3402 = vmatmul.mubr.bf16.gmra.mxu0 %v10062_v59 }
 0x303   :  { %20058 = vst [vmem:[#allocation52_spill] sm:$0xff] %v12945_v56  ;;  %9715 = vmatprep.mubr.msk.bf16.mxu1 %vm2848_vm1, %v10016_v49  ;;  %3409 = vmatprep.mubr.bf16.mxu0 %v10069_v35  ;;  %v10024_v35 = vld [vmem:[%s19493_s2 + $0x350] ss:$12 sps:$4 sm:$0xff]  }
 0x304   :  { %v3693_v0 = vpop.f32.mrf.mxu1  ;;  %v3213_v46 = vpop.f32.mrf.mxu0  ;;  %v10045_v56 = vld [vmem:[%s19493_s2 + $0x410] ss:$12 sps:$4 sm:$0xff]  }
 0x305   :  { %v10026_v0 = vld [vmem:[%s19493_s2 + $0x368] ss:$12 sps:$4 sm:$0xff]  }
 0x306   :  { %v12951_v60 = vpop.f32.mrf.mxu1  ;;  %v12956_v54 = vpop.f32.mrf.mxu0  ;;  %v10079_v46 = vld [vmem:[%s19493_s2 + $0x394] ss:$12 sps:$4 sm:$0xff]  }
 0x307   :  { %20059 = vst [vmem:[#allocation21_spill] sm:$0xff] %v12951_v60 }
 0x308   :  { %v3696_v37 = vpop.f32.mrf.mxu1  ;;  %v3216_v45 = vpop.f32.mrf.mxu0 }
 0x30a   :  { %v12967_v36 = vpop.f32.mrf.mxu1  ;;  %9716 = vmatmul.mubr.msk.bf16.gmra.mxu1 %vm2848_vm1, %v10019_v27  ;;  %v12970_v26 = vpop.f32.mrf.mxu0  ;;  %3410 = vmatmul.mubr.bf16.gmra.mxu0 %v10067_v21 }
 0x30b   :  { %20060 = vst [vmem:[#allocation35_spill] sm:$0xff] %v12967_v36  ;;  %9719 = vmatprep.mubr.msk.bf16.mxu1 %vm2848_vm1, %v10021_v13  ;;  %3417 = vmatprep.mubr.bf16.mxu0 %v10074_v19 }
 0x30c   :  { %v3701_v11 = vpop.f32.mrf.mxu1  ;;  %v3221_v59 = vpop.f32.mrf.mxu0 }
 0x30d   :  { %v10030_v59 = vld [vmem:[%s19493_s2 + $0x380] ss:$12 sps:$4 sm:$0xff]  }
 0x30e   :  { %v12973_v49 = vpop.f32.mrf.mxu1  ;;  %v12978_v40 = vpop.f32.mrf.mxu0 }
 0x30f   :  { %20061 = vst [vmem:[#allocation48_spill] sm:$0xff] %v12973_v49 }
 0x310   :  { %v3704_v27 = vpop.f32.mrf.mxu1  ;;  %v3224_v21 = vpop.f32.mrf.mxu0 }
 0x312   :  { %v12989_v13 = vpop.f32.mrf.mxu1  ;;  %9720 = vmatmul.mubr.msk.bf16.gmra.mxu1 %vm2848_vm1, %v10024_v35  ;;  %v12992_v19 = vpop.f32.mrf.mxu0  ;;  %3418 = vmatmul.mubr.bf16.gmra.mxu0 %v10072_v63  ;;  %v10077_v35 = vld [vmem:[%s19493_s2 + $0x390] ss:$12 sps:$4 sm:$0xff]   ;;  %v10031_v63 = vld [vmem:[%s19493_s2 + $0x398] ss:$12 sps:$4 sm:$0xff]  }
 0x313   :  { %20062 = vst [vmem:[#allocation51_spill] sm:$0xff] %v12989_v13  ;;  %9723 = vmatprep.mubr.msk.bf16.mxu1 %vm2848_vm1, %v10026_v0  ;;  %3425 = vmatprep.mubr.bf16.mxu0 %v10079_v46  ;;  %v10084_v0 = vld [vmem:[%s19493_s2 + $0x3ac] ss:$12 sps:$4 sm:$0xff]   ;;  %v10035_v13 = vld [vmem:[%s19493_s2 + $0x3b0] ss:$12 sps:$4 sm:$0xff]  }
 0x314   :  { %v3709_v37 = vpop.f32.mrf.mxu1  ;;  %v3229_v45 = vpop.f32.mrf.mxu0 }
 0x316   :  { %v12995_v11 = vpop.f32.mrf.mxu1  ;;  %v13000_v27 = vpop.f32.mrf.mxu0 }
 0x317   :  { %20063 = vst [vmem:[#allocation37_spill] sm:$0xff] %v12995_v11 }
 0x318   :  { %v3712_v46 = vpop.f32.mrf.mxu1  ;;  %v3232_v21 = vpop.f32.mrf.mxu0 }
 0x31a   :  { %v13011_v37 = vpop.f32.mrf.mxu1  ;;  %9724 = vmatmul.mubr.msk.bf16.gmra.mxu1 %vm2848_vm1, %v10030_v59  ;;  %v13014_v45 = vpop.f32.mrf.mxu0  ;;  %3426 = vmatmul.mubr.bf16.gmra.mxu0 %v10077_v35  ;;  %v10082_v59 = vld [vmem:[%s19493_s2 + $0x3a8] ss:$12 sps:$4 sm:$0xff]  }
 0x31b   :  { %20064 = vst [vmem:[#allocation49_spill] sm:$0xff] %v13011_v37  ;;  %9727 = vmatprep.mubr.msk.bf16.mxu1 %vm2848_vm1, %v10031_v63  ;;  %3433 = vmatprep.mubr.bf16.mxu0 %v10084_v0  ;;  %v10036_v35 = vld [vmem:[%s19493_s2 + $0x3c8] ss:$12 sps:$4 sm:$0xff]  }
 0x31c   :  { %v3717_v49 = vpop.f32.mrf.mxu1  ;;  %v3237_v36 = vpop.f32.mrf.mxu0 }
 0x31d   :  { %v10089_v36 = vld [vmem:[%s19493_s2 + $0x3c4] ss:$12 sps:$4 sm:$0xff]  }
 0x31e   :  { %v13017_v11 = vpop.f32.mrf.mxu1  ;;  %v13022_v46 = vpop.f32.mrf.mxu0 }
 0x31f   :  { %20065 = vst [vmem:[#allocation22_spill] sm:$0xff] %v13017_v11 }
 0x320   :  { %v3720_v49 = vpop.f32.mrf.mxu1  ;;  %v3240_v63 = vpop.f32.mrf.mxu0 }
 0x322   :  { %v13033_v0 = vpop.f32.mrf.mxu1  ;;  %9728 = vmatmul.mubr.msk.bf16.gmra.mxu1 %vm2848_vm1, %v10035_v13  ;;  %v13036_v21 = vpop.f32.mrf.mxu0  ;;  %3434 = vmatmul.mubr.bf16.gmra.mxu0 %v10082_v59  ;;  %v10087_v13 = vld [vmem:[%s19493_s2 + $0x3c0] ss:$12 sps:$4 sm:$0xff]   ;;  %v10041_v59 = vld [vmem:[%s19493_s2 + $0x3f8] ss:$12 sps:$4 sm:$0xff]  }
 0x323   :  { %20066 = vst [vmem:[#allocation23_spill] sm:$0xff] %v13033_v0  ;;  %9731 = vmatprep.mubr.msk.bf16.mxu1 %vm2848_vm1, %v10036_v35  ;;  %3441 = vmatprep.mubr.bf16.mxu0 %v10089_v36 }
 0x324   :  { %v3725_v11 = vpop.f32.mrf.mxu1  ;;  %v3245_v37 = vpop.f32.mrf.mxu0 }
 0x325   :  { %v10094_v11 = vld [vmem:[%s19493_s2 + $0x3dc] ss:$12 sps:$4 sm:$0xff]  }
 0x326   :  { %v13039_v6 = vpop.f32.mrf.mxu1  ;;  %v13044_v49 = vpop.f32.mrf.mxu0 }
 0x327   :  { %20067 = vst [vmem:[#allocation31_spill] sm:$0xff] %v13039_v6 }
 0x328   :  { %v3728_v37 = vpop.f32.mrf.mxu1  ;;  %v3248_v35 = vpop.f32.mrf.mxu0 }
 0x32a   :  { %v13055_v36 = vpop.f32.mrf.mxu1  ;;  %9732 = vmatmul.mubr.msk.bf16.gmra.mxu1 %vm2848_vm1, %v10040_v12  ;;  %v13058_v63 = vpop.f32.mrf.mxu0  ;;  %3442 = vmatmul.mubr.bf16.gmra.mxu0 %v10087_v13  ;;  %v10092_v12 = vld [vmem:[%s19493_s2 + $0x3d8] ss:$12 sps:$4 sm:$0xff]   ;;  %v10046_v13 = vld [vmem:[%s19493_s2 + $0x428] ss:$12 sps:$4 sm:$0xff]  }
 0x32b   :  { %20068 = vst [vmem:[#allocation33_spill] sm:$0xff] %v13055_v36  ;;  %9735 = vmatprep.mubr.msk.bf16.mxu1 %vm2848_vm1, %v10041_v59  ;;  %3449 = vmatprep.mubr.bf16.mxu0 %v10094_v11 }
 0x32c   :  { %v3733_v6 = vpop.f32.mrf.mxu1  ;;  %v3253_v0 = vpop.f32.mrf.mxu0 }
 0x32d   :  { %v10099_v6 = vld [vmem:[%s19493_s2 + $0x3f4] ss:$12 sps:$4 sm:$0xff]  }
 0x32e   :  { %v13061_v60 = vpop.f32.mrf.mxu1  ;;  %v13066_v37 = vpop.f32.mrf.mxu0 }
 0x32f   :  { %20069 = vst [vmem:[#allocation27_spill] sm:$0xff] %v13061_v60 }
 0x330   :  { %v3736_v0 = vpop.f32.mrf.mxu1  ;;  %v3256_v59 = vpop.f32.mrf.mxu0 }
 0x332   :  { %v13077_v11 = vpop.f32.mrf.mxu1  ;;  %9736 = vmatmul.mubr.msk.bf16.gmra.mxu1 %vm2848_vm1, %v10045_v56  ;;  %v13080_v35 = vpop.f32.mrf.mxu0  ;;  %3450 = vmatmul.mubr.bf16.gmra.mxu0 %v10092_v12  ;;  %v10097_v56 = vld [vmem:[%s19493_s2 + $0x3f0] ss:$12 sps:$4 sm:$0xff]   ;;  %v10051_v12 = vld [vmem:[%s19493_s2 + $0x458] ss:$12 sps:$4 sm:$0xff]  }
 0x333   :  { %20070 = vst [vmem:[#allocation29_spill] sm:$0xff] %v13077_v11  ;;  %9739 = vmatprep.mubr.msk.bf16.mxu1 %vm2848_vm1, %v10046_v13  ;;  %3457 = vmatprep.mubr.bf16.mxu0 %v10099_v6 }
 0x334   :  { %v3741_v60 = vpop.f32.mrf.mxu1  ;;  %v3261_v36 = vpop.f32.mrf.mxu0 }
 0x335   :  { %v10104_v60 = vld [vmem:[%s19493_s2 + $0x40c] ss:$12 sps:$4 sm:$0xff]  }
 0x336   :  { %v13083_v34 = vpop.f32.mrf.mxu1  ;;  %v13088_v0 = vpop.f32.mrf.mxu0 }
 0x337   :  { %20071 = vst [vmem:[#allocation26_spill] sm:$0xff] %v13083_v34 }
 0x338   :  { %v3744_v36 = vpop.f32.mrf.mxu1  ;;  %v3264_v13 = vpop.f32.mrf.mxu0 }
 0x33a   :  { %v13099_v6 = vpop.f32.mrf.mxu1  ;;  %9740 = vmatmul.mubr.msk.bf16.gmra.mxu1 %vm2848_vm1, %v10050_v8  ;;  %v13102_v59 = vpop.f32.mrf.mxu0  ;;  %3458 = vmatmul.mubr.bf16.gmra.mxu0 %v10097_v56  ;;  %v10102_v8 = vld [vmem:[%s19493_s2 + $0x408] ss:$12 sps:$4 sm:$0xff]  }
 0x33b   :  { %20072 = vst [vmem:[#allocation24_spill] sm:$0xff] %v13099_v6  ;;  %9743 = vmatprep.mubr.msk.bf16.mxu1 %vm2848_vm1, %v10051_v12  ;;  %3465 = vmatprep.mubr.bf16.mxu0 %v10104_v60  ;;  %v10056_v56 = vld [vmem:[%s19493_s2 + $0x488] ss:$12 sps:$4 sm:$0xff]  }
 0x33c   :  { %v3749_v34 = vpop.f32.mrf.mxu1  ;;  %v3269_v11 = vpop.f32.mrf.mxu0 }
 0x33d   :  { %v10109_v34 = vld [vmem:[%s19493_s2 + $0x424] ss:$12 sps:$4 sm:$0xff]  }
 0x33e   :  { %v13105_v58 = vpop.f32.mrf.mxu1  ;;  %v13110_v36 = vpop.f32.mrf.mxu0 }
 0x33f   :  { %20073 = vst [vmem:[#allocation28_spill] sm:$0xff] %v13105_v58 }
 0x340   :  { %v3752_v11 = vpop.f32.mrf.mxu1  ;;  %v3272_v12 = vpop.f32.mrf.mxu0 }
 0x342   :  { %v13121_v60 = vpop.f32.mrf.mxu1  ;;  %9744 = vmatmul.mubr.msk.bf16.gmra.mxu1 %vm2848_vm1, %v10055_v17  ;;  %v13124_v13 = vpop.f32.mrf.mxu0  ;;  %3466 = vmatmul.mubr.bf16.gmra.mxu0 %v10102_v8  ;;  %v10107_v17 = vld [vmem:[%s19493_s2 + $0x420] ss:$12 sps:$4 sm:$0xff]   ;;  %v10061_v8 = vld [vmem:[%s19493_s2 + $0x4b8] ss:$12 sps:$4 sm:$0xff]  }
 0x343   :  { %20074 = vst [vmem:[#allocation25_spill] sm:$0xff] %v13121_v60  ;;  %9747 = vmatprep.mubr.msk.bf16.mxu1 %vm2848_vm1, %v10056_v56  ;;  %3473 = vmatprep.mubr.bf16.mxu0 %v10109_v34 }
 0x344   :  { %v3757_v58 = vpop.f32.mrf.mxu1  ;;  %v3277_v6 = vpop.f32.mrf.mxu0 }
 0x345   :  { %v10114_v58 = vld [vmem:[%s19493_s2 + $0x43c] ss:$12 sps:$4 sm:$0xff]  }
 0x346   :  { %v13127_v7 = vpop.f32.mrf.mxu1  ;;  %v13132_v11 = vpop.f32.mrf.mxu0 }
 0x347   :  { %20075 = vst [vmem:[#allocation72_spill] sm:$0xff] %v13127_v7 }
 0x348   :  { %v3760_v6 = vpop.f32.mrf.mxu1  ;;  %v3280_v56 = vpop.f32.mrf.mxu0 }
 0x34a   :  { %v9653_v34 = vpop.f32.mrf.mxu1  ;;  %9748 = vmatmul.mubr.msk.bf16.gmra.mxu1 %vm2848_vm1, %v10060_v16  ;;  %v13144_v12 = vpop.f32.mrf.mxu0  ;;  %3474 = vmatmul.mubr.bf16.gmra.mxu0 %v10107_v17 }
 0x34b   :  { %v13147_v7 = vadd.f32 %v9653_v34, %v12728_v50  ;;  %9751 = vmatprep.mubr.msk.bf16.mxu1 %vm2848_vm1, %v10061_v8  ;;  %3481 = vmatprep.mubr.bf16.mxu0 %v10114_v58  ;;  %v10065_v50 = vld [vmem:[%s19493_s2 + $0x4d0] ss:$12 sps:$4 sm:$0xff]  }
 0x34c   :  { %v3796_v60 = vpop.f32.mrf.mxu1  ;;  %v3285_v52 = vpop.f32.mrf.mxu0 }
 0x34d   :  { %v13151_v62 = vadd.f32 %v3796_v60, %v12706_v20  ;;  %v4441_v6 = vsel %vm67_vm0, %v13147_v7, 0.0  ;;  %v5077_v16 = vmul.f32 %v13147_v7, %v13147_v7  ;;  %v10066_v52 = vld [vmem:[%s19493_s2 + $0x4e8] ss:$12 sps:$4 sm:$0xff]   ;;  %v10112_v60 = vld [vmem:[%s19493_s2 + $0x438] ss:$12 sps:$4 sm:$0xff]  }
 0x34e   :  { %4442 = vadd.xlane.f32.xlu0 %v4441_v6  ;;  %v9654_v56 = vpop.f32.mrf.mxu1  ;;  %v13160_v17 = vpop.f32.mrf.mxu0  ;;  %v10119_v6 = vld [vmem:[%s19493_s2 + $0x454] ss:$12 sps:$4 sm:$0xff]  }
 0x34f   :  { %v13163_v8 = vadd.f32 %v9654_v56, %v12736_v39  ;;  %v4435_v20 = vsel %vm67_vm0, %v13151_v62, 0.0  ;;  %v5241_v39 = vsel %vm67_vm0, %v5077_v16, 0.0  ;;  %v5075_v56 = vmul.f32 %v13151_v62, %v13151_v62 }
 0x350   :  { %v3799_v58 = vpop.f32.mrf.mxu1  ;;  %4436 = vadd.xlane.f32.xlu1 %v4435_v20  ;;  %v3288_v34 = vpop.f32.mrf.mxu0 }
 0x351   :  { %v13183_v47 = vadd.f32 %v3799_v58, %v12714_v44  ;;  %v4444_v20 = vsel %vm67_vm0, %v13163_v8, 0.0  ;;  %v5078_v34 = vmul.f32 %v13163_v8, %v13163_v8  ;;  %v10070_v44 = vld [vmem:[%s19493_s2 + $0x500] ss:$12 sps:$4 sm:$0xff]  }
 0x352   :  { %9752 = vmatmul.mubr.msk.bf16.gmra.mxu1 %vm2848_vm1, %v10065_v50  ;;  %5242 = vadd.xlane.f32.xlu0 %v5241_v39  ;;  %v9657_v9 = vpop.f32.mrf.mxu1  ;;  %v13180_v31 = vpop.f32.mrf.mxu0  ;;  %v5235_v50 = vsel %vm67_vm0, %v5075_v56, 0.0 }
 0x353   :  { %9755 = vmatprep.mubr.msk.bf16.mxu1 %vm2848_vm1, %v10066_v52  ;;  %3482 = vmatmul.mubr.bf16.gmra.mxu0 %v10112_v60  ;;  %v13197_v53 = vadd.f32 %v9657_v9, %v12772_v51  ;;  %v5244_v52 = vsel %vm67_vm0, %v5078_v34, 0.0  ;;  %v5076_v60 = vmul.f32 %v13183_v47, %v13183_v47  ;;  %v10124_v51 = vld [vmem:[%s19493_s2 + $0x46c] ss:$12 sps:$4 sm:$0xff]   ;;  %v4438_v9 = vsel %vm67_vm0, %v13183_v47, 0.0 }
 0x354   :  { %v3812_v16 = vpop.f32.mrf.mxu1  ;;  %4445 = vadd.xlane.f32.xlu1 %v4444_v20  ;;  %v3293_v24 = vpop.f32.mrf.mxu0  ;;  %3489 = vmatprep.mubr.bf16.mxu0 %v10119_v6  ;;  %v10117_v6 = vld [vmem:[%s19493_s2 + $0x450] ss:$12 sps:$4 sm:$0xff]  }
 0x355   :  { %20076 = vst [vmem:[#allocation89_spill] sm:$0xff] %v13197_v53  ;;  %v10071_v24 = vld [vmem:[%s19493_s2 + $0x518] ss:$12 sps:$4 sm:$0xff]   ;;  %v5238_v55 = vsel %vm67_vm0, %v5076_v60, 0.0 }
 0x356   :  { %v9658_v39 = vpop.f32.mrf.mxu1  ;;  %5236 = vadd.xlane.f32.xlu0 %v5235_v50  ;;  %v13194_v58 = vpop.f32.mrf.mxu0 }
 0x357   :  { %v13217_v41 = vadd.f32 %v9658_v39, %v12780_v57  ;;  %v10075_v57 = vld [vmem:[%s19493_s2 + $0x530] ss:$12 sps:$4 sm:$0xff]  }
 0x358   :  { %v3815_v56 = vpop.f32.mrf.mxu1  ;;  %5245 = vadd.xlane.f32.xlu1 %v5244_v52  ;;  %v3296_v20 = vpop.f32.mrf.mxu0  ;;  %v4453_v52 = vsel %vm67_vm0, %v13197_v53, 0.0 }
 0x359   :  { %20077 = vst [vmem:[#allocation88_spill] sm:$0xff] %v13217_v41  ;;  %v13232_v60 = vadd.f32 %v3815_v56, %v12758_v38  ;;  %v5081_v56 = vmul.f32 %v13197_v53, %v13197_v53 }
 0x35a   :  { %v9661_v34 = vpop.f32.mrf.mxu1  ;;  %9756 = vmatmul.mubr.msk.bf16.gmra.mxu1 %vm2848_vm1, %v10070_v44  ;;  %4439 = vadd.xlane.f32.xlu0 %v4438_v9  ;;  %v13214_v50 = vpop.f32.mrf.mxu0  ;;  %v13224_v44 = vadd.f32 %v3812_v16, %v12750_v29  ;;  %v10122_v29 = vld [vmem:[%s19493_s2 + $0x468] ss:$12 sps:$4 sm:$0xff]  }
 0x35b   :  { %9759 = vmatprep.mubr.msk.bf16.mxu1 %vm2848_vm1, %v10071_v24  ;;  %3490 = vmatmul.mubr.bf16.gmra.mxu0 %v10117_v6  ;;  %20079 = vst [vmem:[#allocation68_spill] sm:$0xff] %v13232_v60  ;;  %v4456_v24 = vsel %vm67_vm0, %v13217_v41, 0.0  ;;  %v10129_v6 = vld [vmem:[%s19493_s2 + $0x484] ss:$12 sps:$4 sm:$0xff]   ;;  %v5253_v25 = vsel %vm67_vm0, %v5081_v56, 0.0 }
 0x35c   :  { %v3828_v20 = vpop.f32.mrf.mxu1  ;;  %5239 = vadd.xlane.f32.xlu1 %v5238_v55  ;;  %v3301_v48 = vpop.f32.mrf.mxu0  ;;  %3497 = vmatprep.mubr.bf16.mxu0 %v10124_v51  ;;  %20078 = vst [vmem:[#allocation3_spill] sm:$0xff] %v13224_v44  ;;  %v4447_v38 = vsel %vm67_vm0, %v13224_v44, 0.0 }
 0x35d   :  { %v10076_v48 = vld [vmem:[%s19493_s2 + $0x548] ss:$12 sps:$4 sm:$0xff]  }
 0x35e   :  { %v9662_v9 = vpop.f32.mrf.mxu1  ;;  %4454 = vadd.xlane.f32.xlu0 %v4453_v52  ;;  %v13229_v39 = vpop.f32.mrf.mxu0 }
 0x360   :  { %v3831_v55 = vpop.f32.mrf.mxu1  ;;  %4457 = vadd.xlane.f32.xlu1 %v4456_v24  ;;  %v3304_v16 = vpop.f32.mrf.mxu0  ;;  %v4450_v24 = vsel %vm67_vm0, %v13232_v60, 0.0 }
 0x361   :  { %v5082_v16 = vmul.f32 %v13217_v41, %v13217_v41 }
 0x362   :  { %v13249_v51 = vpop.f32.mrf.mxu1  ;;  %9760 = vmatmul.mubr.msk.bf16.gmra.mxu1 %vm2848_vm1, %v10075_v57  ;;  %4448 = vadd.xlane.f32.xlu0 %v4447_v38  ;;  %v13252_v52 = vpop.f32.mrf.mxu0  ;;  %v5079_v57 = vmul.f32 %v13224_v44, %v13224_v44  ;;  %v13295_v44 = vadd.f32 %v9662_v9, %v12824_v3  ;;  %v10085_v3 = vld [vmem:[%s19493_s2 + $0x590] ss:$12 sps:$4 sm:$0xff]  }
 0x363   :  { %9763 = vmatprep.mubr.msk.bf16.mxu1 %vm2848_vm1, %v10076_v48  ;;  %3498 = vmatmul.mubr.bf16.gmra.mxu0 %v10122_v29  ;;  %v13272_v48 = vadd.f32 %v9661_v34, %v12816_v14  ;;  %v5080_v29 = vmul.f32 %v13232_v60, %v13232_v60  ;;  %v10134_v14 = vld [vmem:[%s19493_s2 + $0x49c] ss:$12 sps:$4 sm:$0xff]  }
 0x364   :  { %v13259_v23 = vpop.f32.mrf.mxu1  ;;  %4451 = vadd.xlane.f32.xlu1 %v4450_v24  ;;  %v3309_v15 = vpop.f32.mrf.mxu0  ;;  %3505 = vmatprep.mubr.bf16.mxu0 %v10129_v6  ;;  %v10081_v6 = vld [vmem:[%s19493_s2 + $0x578] ss:$12 sps:$4 sm:$0xff]   ;;  %v5247_v34 = vsel %vm67_vm0, %v5079_v57, 0.0  ;;  %20082 = vst [vmem:[#allocation74_spill] sm:$0xff] %v13295_v44 }
 0x365   :  { %20080 = vst [vmem:[#allocation80_spill] sm:$0xff] %v13272_v48  ;;  %v5256_v15 = vsel %vm67_vm0, %v5082_v16, 0.0  ;;  %v5250_v53 = vsel %vm67_vm0, %v5080_v29, 0.0  ;;  %v13314_v29 = vadd.f32 %v3831_v55, %v12802_v2  ;;  %v10138_v2 = vld [vmem:[%s19493_s2 + $0x4b4] ss:$12 sps:$4 sm:$0xff]  }
 0x366   :  { %v13264_v38 = vpop.f32.mrf.mxu1  ;;  %5254 = vadd.xlane.f32.xlu0 %v5253_v25  ;;  %v13269_v41 = vpop.f32.mrf.mxu0  ;;  %v10127_v25 = vld [vmem:[%s19493_s2 + $0x480] ss:$12 sps:$4 sm:$0xff]  }
 0x367   :  { %20085 = vst [vmem:[#allocation76_spill] sm:$0xff] %v13314_v29 }
 0x368   :  { %v13283_v56 = vpop.f32.mrf.mxu1  ;;  %5257 = vadd.xlane.f32.xlu1 %v5256_v15  ;;  %v3312_v24 = vpop.f32.mrf.mxu0  ;;  %v4465_v15 = vsel %vm67_vm0, %v13272_v48, 0.0 }
 0x36a   :  { %v13289_v16 = vpop.f32.mrf.mxu1  ;;  %9764 = vmatmul.mubr.msk.bf16.gmra.mxu1 %vm2848_vm1, %v10080_v18  ;;  %5248 = vadd.xlane.f32.xlu0 %v5247_v34  ;;  %v13292_v60 = vpop.f32.mrf.mxu0  ;;  %v13304_v18 = vadd.f32 %v3828_v20, %v12794_v28  ;;  %v10086_v28 = vld [vmem:[%s19493_s2 + $0x5a8] ss:$12 sps:$4 sm:$0xff]   ;;  %v10132_v20 = vld [vmem:[%s19493_s2 + $0x498] ss:$12 sps:$4 sm:$0xff]  }
 0x36b   :  { %20081 = vst [vmem:[#allocation10_spill] sm:$0xff] %v13292_v60  ;;  %9767 = vmatprep.mubr.msk.bf16.mxu1 %vm2848_vm1, %v10081_v6  ;;  %3506 = vmatmul.mubr.bf16.gmra.mxu0 %v10127_v25 }
 0x36c   :  { %v13301_v24 = vpop.f32.mrf.mxu1  ;;  %5251 = vadd.xlane.f32.xlu1 %v5250_v53  ;;  %v3317_v57 = vpop.f32.mrf.mxu0  ;;  %3513 = vmatprep.mubr.bf16.mxu0 %v10134_v14  ;;  %20083 = vst [vmem:[#allocation86_spill] sm:$0xff] %v13304_v18  ;;  %v4468_v53 = vsel %vm67_vm0, %v13295_v44, 0.0  ;;  %v4459_v55 = vsel %vm67_vm0, %v13304_v18, 0.0  ;;  %v5085_v14 = vmul.f32 %v13272_v48, %v13272_v48 }
 0x36e   :  { %v13306_v34 = vpop.f32.mrf.mxu1  ;;  %4466 = vadd.xlane.f32.xlu0 %v4465_v15  ;;  %v13311_v9 = vpop.f32.mrf.mxu0  ;;  %v5265_v60 = vsel %vm67_vm0, %v5085_v14, 0.0 }
 0x36f   :  { %20084 = vst [vmem:[#allocation2_spill] sm:$0xff] %v13311_v9 }
 0x370   :  { %v13324_v6 = vpop.f32.mrf.mxu1  ;;  %4469 = vadd.xlane.f32.xlu1 %v4468_v53  ;;  %v3320_v25 = vpop.f32.mrf.mxu0  ;;  %v4462_v53 = vsel %vm67_vm0, %v13314_v29, 0.0 }
 0x371   :  { %v5086_v25 = vmul.f32 %v13295_v44, %v13295_v44  ;;  %v10090_v44 = vld [vmem:[%s19493_s2 + $0x5c0] ss:$12 sps:$4 sm:$0xff]  }
 0x372   :  { %v13333_v15 = vpop.f32.mrf.mxu1  ;;  %9768 = vmatmul.mubr.msk.bf16.gmra.mxu1 %vm2848_vm1, %v10085_v3  ;;  %4460 = vadd.xlane.f32.xlu0 %v4459_v55  ;;  %v13336_v57 = vpop.f32.mrf.mxu0  ;;  %v5083_v3 = vmul.f32 %v13304_v18, %v13304_v18  ;;  %v13381_v18 = vadd.f32 %v13264_v38, %v12868_v22  ;;  %v10095_v22 = vld [vmem:[%s19493_s2 + $0x5f0] ss:$12 sps:$4 sm:$0xff]  }
 0x373   :  { %20086 = vst [vmem:[#allocation78_spill] sm:$0xff] %v13336_v57  ;;  %9771 = vmatprep.mubr.msk.bf16.mxu1 %vm2848_vm1, %v10086_v28  ;;  %3514 = vmatmul.mubr.bf16.gmra.mxu0 %v10132_v20  ;;  %v13357_v28 = vadd.f32 %v13249_v51, %v12860_v1  ;;  %v5084_v20 = vmul.f32 %v13314_v29, %v13314_v29  ;;  %v10141_v1 = vld [vmem:[%s19493_s2 + $0x4cc] ss:$12 sps:$4 sm:$0xff]  }
 0x374   :  { %v13343_v9 = vpop.f32.mrf.mxu1  ;;  %4463 = vadd.xlane.f32.xlu1 %v4462_v53  ;;  %v3325_v48 = vpop.f32.mrf.mxu0  ;;  %3521 = vmatprep.mubr.bf16.mxu0 %v10138_v2  ;;  %v10091_v2 = vld [vmem:[%s19493_s2 + $0x5d8] ss:$12 sps:$4 sm:$0xff]   ;;  %v5259_v51 = vsel %vm67_vm0, %v5083_v3, 0.0  ;;  %20090 = vst [vmem:[#allocation84_spill] sm:$0xff] %v13381_v18 }
 0x375   :  { %20088 = vst [vmem:[#allocation67_spill] sm:$0xff] %v13357_v28  ;;  %v5268_v48 = vsel %vm67_vm0, %v5086_v25, 0.0 }
 0x376   :  { %v13348_v55 = vpop.f32.mrf.mxu1  ;;  %5266 = vadd.xlane.f32.xlu0 %v5265_v60  ;;  %v13353_v57 = vpop.f32.mrf.mxu0  ;;  %v10136_v60 = vld [vmem:[%s19493_s2 + $0x4b0] ss:$12 sps:$4 sm:$0xff]  }
 0x377   :  { %20087 = vst [vmem:[#allocation8_spill] sm:$0xff] %v13353_v57 }
 0x378   :  { %v13368_v14 = vpop.f32.mrf.mxu1  ;;  %5269 = vadd.xlane.f32.xlu1 %v5268_v48  ;;  %v3328_v53 = vpop.f32.mrf.mxu0  ;;  %v5262_v48 = vsel %vm67_vm0, %v5084_v20, 0.0  ;;  %v13402_v20 = vadd.f32 %v13283_v56, %v12846_v5  ;;  %v10144_v5 = vld [vmem:[%s19493_s2 + $0x4e4] ss:$12 sps:$4 sm:$0xff]  }
 0x379   :  { %v4477_v53 = vsel %vm67_vm0, %v13357_v28, 0.0 }
 0x37a   :  { %v13374_v25 = vpop.f32.mrf.mxu1  ;;  %9772 = vmatmul.mubr.msk.bf16.gmra.mxu1 %vm2848_vm1, %v10090_v44  ;;  %5260 = vadd.xlane.f32.xlu0 %v5259_v51  ;;  %v13377_v29 = vpop.f32.mrf.mxu0  ;;  %v13391_v44 = vadd.f32 %v13259_v23, %v12838_v10  ;;  %20093 = vst [vmem:[#allocation58_spill] sm:$0xff] %v13402_v20  ;;  %v10096_v23 = vld [vmem:[%s19493_s2 + $0x608] ss:$12 sps:$4 sm:$0xff]  }
 0x37b   :  { %20089 = vst [vmem:[#allocation7_spill] sm:$0xff] %v13377_v29  ;;  %9775 = vmatprep.mubr.msk.bf16.mxu1 %vm2848_vm1, %v10091_v2  ;;  %3522 = vmatmul.mubr.bf16.gmra.mxu0 %v10136_v60  ;;  %v10139_v10 = vld [vmem:[%s19493_s2 + $0x4c8] ss:$12 sps:$4 sm:$0xff]  }
 0x37c   :  { %v13387_v3 = vpop.f32.mrf.mxu1  ;;  %5263 = vadd.xlane.f32.xlu1 %v5262_v48  ;;  %v3333_v57 = vpop.f32.mrf.mxu0  ;;  %3529 = vmatprep.mubr.bf16.mxu0 %v10141_v1  ;;  %20091 = vst [vmem:[#allocation77_spill] sm:$0xff] %v13391_v44  ;;  %v4471_v56 = vsel %vm67_vm0, %v13391_v44, 0.0  ;;  %v5089_v1 = vmul.f32 %v13357_v28, %v13357_v28 }
 0x37d   :  { %v4480_v57 = vsel %vm67_vm0, %v13381_v18, 0.0 }
 0x37e   :  { %v13393_v51 = vpop.f32.mrf.mxu1  ;;  %4478 = vadd.xlane.f32.xlu0 %v4477_v53  ;;  %v13398_v38 = vpop.f32.mrf.mxu0  ;;  %v5277_v29 = vsel %vm67_vm0, %v5089_v1, 0.0 }
 0x37f   :  { %20092 = vst [vmem:[#allocation5_spill] sm:$0xff] %v13398_v38 }
 0x380   :  { %v13412_v2 = vpop.f32.mrf.mxu1  ;;  %4481 = vadd.xlane.f32.xlu1 %v4480_v57  ;;  %v3336_v60 = vpop.f32.mrf.mxu0  ;;  %v4474_v57 = vsel %vm67_vm0, %v13402_v20, 0.0 }
 0x381   :  { %v5090_v60 = vmul.f32 %v13381_v18, %v13381_v18  ;;  %v10100_v18 = vld [vmem:[%s19493_s2 + $0x620] ss:$12 sps:$4 sm:$0xff]  }
 0x382   :  { %v13421_v48 = vpop.f32.mrf.mxu1  ;;  %9776 = vmatmul.mubr.msk.bf16.gmra.mxu1 %vm2848_vm1, %v10095_v22  ;;  %4472 = vadd.xlane.f32.xlu0 %v4471_v56  ;;  %v13424_v53 = vpop.f32.mrf.mxu0  ;;  %v5087_v22 = vmul.f32 %v13391_v44, %v13391_v44  ;;  %v13469_v44 = vadd.f32 %v13306_v34, %v12912_v30  ;;  %v10105_v30 = vld [vmem:[%s19493_s2 + $0x650] ss:$12 sps:$4 sm:$0xff]  }
 0x383   :  { %20094 = vst [vmem:[#allocation75_spill] sm:$0xff] %v13424_v53  ;;  %9779 = vmatprep.mubr.msk.bf16.mxu1 %vm2848_vm1, %v10096_v23  ;;  %3530 = vmatmul.mubr.bf16.gmra.mxu0 %v10139_v10  ;;  %v13445_v23 = vadd.f32 %v13289_v16, %v12904_v33  ;;  %v5088_v10 = vmul.f32 %v13402_v20, %v13402_v20  ;;  %v10147_v33 = vld [vmem:[%s19493_s2 + $0x4fc] ss:$12 sps:$4 sm:$0xff]  }
 0x384   :  { %v13431_v38 = vpop.f32.mrf.mxu1  ;;  %4475 = vadd.xlane.f32.xlu1 %v4474_v57  ;;  %v3341_v28 = vpop.f32.mrf.mxu0  ;;  %3537 = vmatprep.mubr.bf16.mxu0 %v10144_v5  ;;  %v10101_v5 = vld [vmem:[%s19493_s2 + $0x638] ss:$12 sps:$4 sm:$0xff]   ;;  %v5271_v16 = vsel %vm67_vm0, %v5087_v22, 0.0  ;;  %20098 = vst [vmem:[#allocation64_spill] sm:$0xff] %v13469_v44 }
 0x385   :  { %20096 = vst [vmem:[#allocation13_spill] sm:$0xff] %v13445_v23  ;;  %v5280_v28 = vsel %vm67_vm0, %v5090_v60, 0.0 }
 0x386   :  { %v13436_v56 = vpop.f32.mrf.mxu1  ;;  %5278 = vadd.xlane.f32.xlu0 %v5277_v29  ;;  %v13441_v53 = vpop.f32.mrf.mxu0  ;;  %v10142_v29 = vld [vmem:[%s19493_s2 + $0x4e0] ss:$12 sps:$4 sm:$0xff]  }
 0x387   :  { %20095 = vst [vmem:[#allocation82_spill] sm:$0xff] %v13441_v53 }
 0x388   :  { %v13456_v1 = vpop.f32.mrf.mxu1  ;;  %5281 = vadd.xlane.f32.xlu1 %v5280_v28  ;;  %v3344_v57 = vpop.f32.mrf.mxu0  ;;  %v5274_v28 = vsel %vm67_vm0, %v5088_v10, 0.0  ;;  %v13490_v10 = vadd.f32 %v13324_v6, %v12890_v32  ;;  %v10150_v32 = vld [vmem:[%s19493_s2 + $0x514] ss:$12 sps:$4 sm:$0xff]  }
 0x389   :  { %v4489_v57 = vsel %vm67_vm0, %v13445_v23, 0.0 }
 0x38a   :  { %v13462_v60 = vpop.f32.mrf.mxu1  ;;  %9780 = vmatmul.mubr.msk.bf16.gmra.mxu1 %vm2848_vm1, %v10100_v18  ;;  %5272 = vadd.xlane.f32.xlu0 %v5271_v16  ;;  %v13465_v20 = vpop.f32.mrf.mxu0  ;;  %v13479_v18 = vadd.f32 %v13301_v24, %v12882_v4  ;;  %20101 = vst [vmem:[#allocation44_spill] sm:$0xff] %v13490_v10  ;;  %v10106_v4 = vld [vmem:[%s19493_s2 + $0x668] ss:$12 sps:$4 sm:$0xff]   ;;  %v10145_v24 = vld [vmem:[%s19493_s2 + $0x4f8] ss:$12 sps:$4 sm:$0xff]  }
 0x38b   :  { %20097 = vst [vmem:[#allocation50_spill] sm:$0xff] %v13465_v20  ;;  %9783 = vmatprep.mubr.msk.bf16.mxu1 %vm2848_vm1, %v10101_v5  ;;  %3538 = vmatmul.mubr.bf16.gmra.mxu0 %v10142_v29 }
 0x38c   :  { %v13475_v22 = vpop.f32.mrf.mxu1  ;;  %5275 = vadd.xlane.f32.xlu1 %v5274_v28  ;;  %v3349_v53 = vpop.f32.mrf.mxu0  ;;  %3545 = vmatprep.mubr.bf16.mxu0 %v10147_v33  ;;  %20099 = vst [vmem:[#allocation79_spill] sm:$0xff] %v13479_v18  ;;  %v4483_v6 = vsel %vm67_vm0, %v13479_v18, 0.0  ;;  %v5093_v33 = vmul.f32 %v13445_v23, %v13445_v23 }
 0x38d   :  { %v4492_v53 = vsel %vm67_vm0, %v13469_v44, 0.0 }
 0x38e   :  { %v13481_v16 = vpop.f32.mrf.mxu1  ;;  %4490 = vadd.xlane.f32.xlu0 %v4489_v57  ;;  %v13486_v34 = vpop.f32.mrf.mxu0  ;;  %v5289_v20 = vsel %vm67_vm0, %v5093_v33, 0.0 }
 0x38f   :  { %20100 = vst [vmem:[#allocation63_spill] sm:$0xff] %v13486_v34 }
 0x390   :  { %v13500_v5 = vpop.f32.mrf.mxu1  ;;  %4493 = vadd.xlane.f32.xlu1 %v4492_v53  ;;  %v3352_v29 = vpop.f32.mrf.mxu0  ;;  %v4486_v53 = vsel %vm67_vm0, %v13490_v10, 0.0 }
 0x391   :  { %v5094_v29 = vmul.f32 %v13469_v44, %v13469_v44  ;;  %v10110_v44 = vld [vmem:[%s19493_s2 + $0x680] ss:$12 sps:$4 sm:$0xff]  }
 0x392   :  { %v13509_v28 = vpop.f32.mrf.mxu1  ;;  %9784 = vmatmul.mubr.msk.bf16.gmra.mxu1 %vm2848_vm1, %v10105_v30  ;;  %4484 = vadd.xlane.f32.xlu0 %v4483_v6  ;;  %v13512_v57 = vpop.f32.mrf.mxu0  ;;  %v5091_v30 = vmul.f32 %v13479_v18, %v13479_v18  ;;  %v13557_v18 = vadd.f32 %v13348_v55, %v12956_v54  ;;  %v10115_v54 = vld [vmem:[%s19493_s2 + $0x6b0] ss:$12 sps:$4 sm:$0xff]  }
 0x393   :  { %20102 = vst [vmem:[#allocation62_spill] sm:$0xff] %v13512_v57  ;;  %9787 = vmatprep.mubr.msk.bf16.mxu1 %vm2848_vm1, %v10106_v4  ;;  %3546 = vmatmul.mubr.bf16.gmra.mxu0 %v10145_v24  ;;  %v13533_v4 = vadd.f32 %v13333_v15, %v12948_v43  ;;  %v5092_v24 = vmul.f32 %v13490_v10, %v13490_v10  ;;  %v10153_v43 = vld [vmem:[%s19493_s2 + $0x52c] ss:$12 sps:$4 sm:$0xff]  }
 0x394   :  { %v13519_v34 = vpop.f32.mrf.mxu1  ;;  %4487 = vadd.xlane.f32.xlu1 %v4486_v53  ;;  %v3357_v23 = vpop.f32.mrf.mxu0  ;;  %3553 = vmatprep.mubr.bf16.mxu0 %v10150_v32  ;;  %v10111_v32 = vld [vmem:[%s19493_s2 + $0x698] ss:$12 sps:$4 sm:$0xff]   ;;  %v5283_v15 = vsel %vm67_vm0, %v5091_v30, 0.0  ;;  %20106 = vst [vmem:[#allocation60_spill] sm:$0xff] %v13557_v18 }
 0x395   :  { %20104 = vst [vmem:[#allocation61_spill] sm:$0xff] %v13533_v4  ;;  %v5292_v23 = vsel %vm67_vm0, %v5094_v29, 0.0 }
 0x396   :  { %v13524_v6 = vpop.f32.mrf.mxu1  ;;  %5290 = vadd.xlane.f32.xlu0 %v5289_v20  ;;  %v13529_v57 = vpop.f32.mrf.mxu0  ;;  %v10148_v20 = vld [vmem:[%s19493_s2 + $0x510] ss:$12 sps:$4 sm:$0xff]  }
 0x397   :  { %20103 = vst [vmem:[#allocation71_spill] sm:$0xff] %v13529_v57 }
 0x398   :  { %v13544_v33 = vpop.f32.mrf.mxu1  ;;  %5293 = vadd.xlane.f32.xlu1 %v5292_v23  ;;  %v3360_v53 = vpop.f32.mrf.mxu0  ;;  %v5286_v23 = vsel %vm67_vm0, %v5092_v24, 0.0  ;;  %v13578_v24 = vadd.f32 %v13368_v14, %v12934_v42  ;;  %v10156_v42 = vld [vmem:[%s19493_s2 + $0x544] ss:$12 sps:$4 sm:$0xff]  }
 0x399   :  { %v4501_v53 = vsel %vm67_vm0, %v13533_v4, 0.0 }
 0x39a   :  { %v13550_v29 = vpop.f32.mrf.mxu1  ;;  %9788 = vmatmul.mubr.msk.bf16.gmra.mxu1 %vm2848_vm1, %v10110_v44  ;;  %5284 = vadd.xlane.f32.xlu0 %v5283_v15  ;;  %v13553_v10 = vpop.f32.mrf.mxu0  ;;  %v13567_v44 = vadd.f32 %v13343_v9, %v12926_v61  ;;  %20109 = vst [vmem:[#allocation59_spill] sm:$0xff] %v13578_v24  ;;  %v10116_v61 = vld [vmem:[%s19493_s2 + $0x6c8] ss:$12 sps:$4 sm:$0xff]  }
 0x39b   :  { %20105 = vst [vmem:[#allocation42_spill] sm:$0xff] %v13553_v10  ;;  %9791 = vmatprep.mubr.msk.bf16.mxu1 %vm2848_vm1, %v10111_v32  ;;  %3554 = vmatmul.mubr.bf16.gmra.mxu0 %v10148_v20  ;;  %v10151_v9 = vld [vmem:[%s19493_s2 + $0x528] ss:$12 sps:$4 sm:$0xff]  }
 0x39c   :  { %v13563_v30 = vpop.f32.mrf.mxu1  ;;  %5287 = vadd.xlane.f32.xlu1 %v5286_v23  ;;  %v3365_v57 = vpop.f32.mrf.mxu0  ;;  %3561 = vmatprep.mubr.bf16.mxu0 %v10153_v43  ;;  %20107 = vst [vmem:[#allocation65_spill] sm:$0xff] %v13567_v44  ;;  %v4495_v14 = vsel %vm67_vm0, %v13567_v44, 0.0  ;;  %v5097_v43 = vmul.f32 %v13533_v4, %v13533_v4 }
 0x39d   :  { %v4504_v57 = vsel %vm67_vm0, %v13557_v18, 0.0 }
 0x39e   :  { %v13569_v15 = vpop.f32.mrf.mxu1  ;;  %4502 = vadd.xlane.f32.xlu0 %v4501_v53  ;;  %v13574_v55 = vpop.f32.mrf.mxu0  ;;  %v5301_v10 = vsel %vm67_vm0, %v5097_v43, 0.0 }
 0x39f   :  { %20108 = vst [vmem:[#allocation66_spill] sm:$0xff] %v13574_v55 }
 0x3a0   :  { %v13588_v32 = vpop.f32.mrf.mxu1  ;;  %4505 = vadd.xlane.f32.xlu1 %v4504_v57  ;;  %v3368_v20 = vpop.f32.mrf.mxu0  ;;  %v4498_v57 = vsel %vm67_vm0, %v13578_v24, 0.0 }
 0x3a1   :  { %v5098_v20 = vmul.f32 %v13557_v18, %v13557_v18  ;;  %v10120_v18 = vld [vmem:[%s19493_s2 + $0x6e0] ss:$12 sps:$4 sm:$0xff]  }
 0x3a2   :  { %v13597_v23 = vpop.f32.mrf.mxu1  ;;  %9792 = vmatmul.mubr.msk.bf16.gmra.mxu1 %vm2848_vm1, %v10115_v54  ;;  %4496 = vadd.xlane.f32.xlu0 %v4495_v14  ;;  %v13600_v53 = vpop.f32.mrf.mxu0  ;;  %v5095_v54 = vmul.f32 %v13567_v44, %v13567_v44  ;;  %v13645_v44 = vadd.f32 %v13393_v51, %v13000_v27  ;;  %v10125_v27 = vld [vmem:[%s19493_s2 + $0x710] ss:$12 sps:$4 sm:$0xff]  }
 0x3a3   :  { %20110 = vst [vmem:[#allocation40_spill] sm:$0xff] %v13600_v53  ;;  %9795 = vmatprep.mubr.msk.bf16.mxu1 %vm2848_vm1, %v10116_v61  ;;  %3562 = vmatmul.mubr.bf16.gmra.mxu0 %v10151_v9  ;;  %v13621_v61 = vadd.f32 %v13374_v25, %v12992_v19  ;;  %v5096_v9 = vmul.f32 %v13578_v24, %v13578_v24  ;;  %v10159_v19 = vld [vmem:[%s19493_s2 + $0x55c] ss:$12 sps:$4 sm:$0xff]  }
 0x3a4   :  { %v13607_v55 = vpop.f32.mrf.mxu1  ;;  %4499 = vadd.xlane.f32.xlu1 %v4498_v57  ;;  %v3373_v4 = vpop.f32.mrf.mxu0  ;;  %3569 = vmatprep.mubr.bf16.mxu0 %v10156_v42  ;;  %v10121_v42 = vld [vmem:[%s19493_s2 + $0x6f8] ss:$12 sps:$4 sm:$0xff]   ;;  %v5295_v25 = vsel %vm67_vm0, %v5095_v54, 0.0  ;;  %20114 = vst [vmem:[#allocation38_spill] sm:$0xff] %v13645_v44 }
 0x3a5   :  { %20112 = vst [vmem:[#allocation12_spill] sm:$0xff] %v13621_v61  ;;  %v5304_v4 = vsel %vm67_vm0, %v5098_v20, 0.0 }
 0x3a6   :  { %v13612_v14 = vpop.f32.mrf.mxu1  ;;  %5302 = vadd.xlane.f32.xlu0 %v5301_v10  ;;  %v13617_v53 = vpop.f32.mrf.mxu0  ;;  %v10154_v10 = vld [vmem:[%s19493_s2 + $0x540] ss:$12 sps:$4 sm:$0xff]  }
 0x3a7   :  { %20111 = vst [vmem:[#allocation57_spill] sm:$0xff] %v13617_v53 }
 0x3a8   :  { %v13632_v43 = vpop.f32.mrf.mxu1  ;;  %5305 = vadd.xlane.f32.xlu1 %v5304_v4  ;;  %v3376_v57 = vpop.f32.mrf.mxu0  ;;  %v5298_v4 = vsel %vm67_vm0, %v5096_v9, 0.0  ;;  %v13666_v9 = vadd.f32 %v13412_v2, %v12978_v40  ;;  %v10162_v40 = vld [vmem:[%s19493_s2 + $0x574] ss:$12 sps:$4 sm:$0xff]  }
 0x3a9   :  { %v4513_v57 = vsel %vm67_vm0, %v13621_v61, 0.0 }
 0x3aa   :  { %v13638_v20 = vpop.f32.mrf.mxu1  ;;  %9796 = vmatmul.mubr.msk.bf16.gmra.mxu1 %vm2848_vm1, %v10120_v18  ;;  %5296 = vadd.xlane.f32.xlu0 %v5295_v25  ;;  %v13641_v24 = vpop.f32.mrf.mxu0  ;;  %v13655_v18 = vadd.f32 %v13387_v3, %v12970_v26  ;;  %20117 = vst [vmem:[#allocation11_spill] sm:$0xff] %v13666_v9  ;;  %v10126_v26 = vld [vmem:[%s19493_s2 + $0x728] ss:$12 sps:$4 sm:$0xff]   ;;  %v10157_v3 = vld [vmem:[%s19493_s2 + $0x558] ss:$12 sps:$4 sm:$0xff]  }
 0x3ab   :  { %20113 = vst [vmem:[#allocation90_spill] sm:$0xff] %v13641_v24  ;;  %9799 = vmatprep.mubr.msk.bf16.mxu1 %vm2848_vm1, %v10121_v42  ;;  %3570 = vmatmul.mubr.bf16.gmra.mxu0 %v10154_v10 }
 0x3ac   :  { %v13651_v54 = vpop.f32.mrf.mxu1  ;;  %5299 = vadd.xlane.f32.xlu1 %v5298_v4  ;;  %v3381_v53 = vpop.f32.mrf.mxu0  ;;  %3577 = vmatprep.mubr.bf16.mxu0 %v10159_v19  ;;  %20115 = vst [vmem:[#allocation14_spill] sm:$0xff] %v13655_v18  ;;  %v4507_v2 = vsel %vm67_vm0, %v13655_v18, 0.0  ;;  %v5101_v19 = vmul.f32 %v13621_v61, %v13621_v61 }
 0x3ad   :  { %v4516_v53 = vsel %vm67_vm0, %v13645_v44, 0.0 }
 0x3ae   :  { %v13657_v25 = vpop.f32.mrf.mxu1  ;;  %4514 = vadd.xlane.f32.xlu0 %v4513_v57  ;;  %v13662_v51 = vpop.f32.mrf.mxu0  ;;  %v5313_v24 = vsel %vm67_vm0, %v5101_v19, 0.0 }
 0x3af   :  { %20116 = vst [vmem:[#allocation87_spill] sm:$0xff] %v13662_v51 }
 0x3b0   :  { %v13676_v42 = vpop.f32.mrf.mxu1  ;;  %4517 = vadd.xlane.f32.xlu1 %v4516_v53  ;;  %v3384_v10 = vpop.f32.mrf.mxu0  ;;  %v4510_v53 = vsel %vm67_vm0, %v13666_v9, 0.0 }
 0x3b1   :  { %v5102_v10 = vmul.f32 %v13645_v44, %v13645_v44  ;;  %v10130_v44 = vld [vmem:[%s19493_s2 + $0x740] ss:$12 sps:$4 sm:$0xff]  }
 0x3b2   :  { %v13685_v4 = vpop.f32.mrf.mxu1  ;;  %9800 = vmatmul.mubr.msk.bf16.gmra.mxu1 %vm2848_vm1, %v10125_v27  ;;  %4508 = vadd.xlane.f32.xlu0 %v4507_v2  ;;  %v13688_v57 = vpop.f32.mrf.mxu0  ;;  %v5099_v27 = vmul.f32 %v13655_v18, %v13655_v18  ;;  %v13733_v18 = vadd.f32 %v13436_v56, %v13044_v49  ;;  %v10135_v49 = vld [vmem:[%s19493_s2 + $0x770] ss:$12 sps:$4 sm:$0xff]  }
 0x3b3   :  { %20118 = vst [vmem:[#allocation9_spill] sm:$0xff] %v13688_v57  ;;  %9803 = vmatprep.mubr.msk.bf16.mxu1 %vm2848_vm1, %v10126_v26  ;;  %3578 = vmatmul.mubr.bf16.gmra.mxu0 %v10157_v3  ;;  %v13709_v26 = vadd.f32 %v13421_v48, %v13036_v21  ;;  %v5100_v3 = vmul.f32 %v13666_v9, %v13666_v9  ;;  %v10165_v21 = vld [vmem:[%s19493_s2 + $0x58c] ss:$12 sps:$4 sm:$0xff]  }
 0x3b4   :  { %v13695_v51 = vpop.f32.mrf.mxu1  ;;  %4511 = vadd.xlane.f32.xlu1 %v4510_v53  ;;  %v3389_v61 = vpop.f32.mrf.mxu0  ;;  %3585 = vmatprep.mubr.bf16.mxu0 %v10162_v40  ;;  %v10131_v40 = vld [vmem:[%s19493_s2 + $0x758] ss:$12 sps:$4 sm:$0xff]   ;;  %v5307_v48 = vsel %vm67_vm0, %v5099_v27, 0.0  ;;  %20122 = vst [vmem:[#allocation83_spill] sm:$0xff] %v13733_v18 }
 0x3b5   :  { %20120 = vst [vmem:[#allocation6_spill] sm:$0xff] %v13709_v26  ;;  %v5316_v61 = vsel %vm67_vm0, %v5102_v10, 0.0 }
 0x3b6   :  { %v13700_v2 = vpop.f32.mrf.mxu1  ;;  %5314 = vadd.xlane.f32.xlu0 %v5313_v24  ;;  %v13705_v57 = vpop.f32.mrf.mxu0  ;;  %v10160_v24 = vld [vmem:[%s19493_s2 + $0x570] ss:$12 sps:$4 sm:$0xff]  }
 0x3b7   :  { %20119 = vst [vmem:[#allocation85_spill] sm:$0xff] %v13705_v57 }
 0x3b8   :  { %v13720_v19 = vpop.f32.mrf.mxu1  ;;  %5317 = vadd.xlane.f32.xlu1 %v5316_v61  ;;  %v3392_v53 = vpop.f32.mrf.mxu0  ;;  %v5310_v61 = vsel %vm67_vm0, %v5100_v3, 0.0  ;;  %v13754_v3 = vadd.f32 %v13456_v1, %v13022_v46 }
 0x3b9   :  { %v4525_v53 = vsel %vm67_vm0, %v13709_v26, 0.0 }
 0x3ba   :  { %v13726_v10 = vpop.f32.mrf.mxu1  ;;  %9804 = vmatmul.mubr.msk.bf16.gmra.mxu1 %vm2848_vm1, %v10130_v44  ;;  %5308 = vadd.xlane.f32.xlu0 %v5307_v48  ;;  %v13729_v9 = vpop.f32.mrf.mxu0  ;;  %v13743_v44 = vadd.f32 %v13431_v38, %v13014_v45  ;;  %20125 = vst [vmem:[#allocation91_spill] sm:$0xff] %v13754_v3  ;;  %v10163_v45 = vld [vmem:[%s19493_s2 + $0x588] ss:$12 sps:$4 sm:$0xff]   ;;  %v4522_v1 = vsel %vm67_vm0, %v13754_v3, 0.0 }
 0x3bb   :  { %20121 = vst [vmem:[#allocation73_spill] sm:$0xff] %v13729_v9  ;;  %9807 = vmatprep.mubr.msk.bf16.mxu1 %vm2848_vm1, %v10131_v40  ;;  %3586 = vmatmul.mubr.bf16.gmra.mxu0 %v10160_v24  ;;  %v13787_v9 = vadd.f32 %v13462_v60, %v13080_v35  ;;  %v13801_v35 = vadd.f32 %v13481_v16, %v13088_v0 }
 0x3bc   :  { %v13739_v27 = vpop.f32.mrf.mxu1  ;;  %5311 = vadd.xlane.f32.xlu1 %v5310_v61  ;;  %v3397_v57 = vpop.f32.mrf.mxu0  ;;  %3593 = vmatprep.mubr.bf16.mxu0 %v10165_v21  ;;  %20123 = vst [vmem:[#allocation4_spill] sm:$0xff] %v13743_v44  ;;  %v4519_v24 = vsel %vm67_vm0, %v13743_v44, 0.0  ;;  %v5105_v21 = vmul.f32 %v13709_v26, %v13709_v26  ;;  %v13818_v0 = vadd.f32 %v13500_v5, %v13066_v37 }
 0x3bd   :  { %v4528_v57 = vsel %vm67_vm0, %v13733_v18, 0.0  ;;  %20127 = vst [vmem:[#allocation93_spill] sm:$0xff] %v13787_v9  ;;  %20129 = vst [vmem:[#allocation95_spill] sm:$0xff] %v13801_v35  ;;  %v4540_v16 = vsel %vm67_vm0, %v13801_v35, 0.0  ;;  %v5110_v5 = vmul.f32 %v13801_v35, %v13801_v35 }
 0x3be   :  { %v13745_v48 = vpop.f32.mrf.mxu1  ;;  %4526 = vadd.xlane.f32.xlu0 %v4525_v53  ;;  %v13750_v56 = vpop.f32.mrf.mxu0  ;;  %v5106_v53 = vmul.f32 %v13733_v18, %v13733_v18  ;;  %v5325_v26 = vsel %vm67_vm0, %v5105_v21, 0.0  ;;  %20132 = vst [vmem:[#allocation98_spill] sm:$0xff] %v13818_v0  ;;  %v4534_v37 = vsel %vm67_vm0, %v13818_v0, 0.0 }
 0x3bf   :  { %20124 = vst [vmem:[#allocation81_spill] sm:$0xff] %v13750_v56  ;;  %v5103_v56 = vmul.f32 %v13743_v44, %v13743_v44  ;;  %v5340_v35 = vsel %vm67_vm0, %v5110_v5, 0.0 }
 0x3c0   :  { %v13761_v38 = vpop.f32.mrf.mxu1  ;;  %4529 = vadd.xlane.f32.xlu1 %v4528_v57  ;;  %v3400_v40 = vpop.f32.mrf.mxu0 }
 0x3c1   :  { %v5319_v44 = vsel %vm67_vm0, %v5103_v56, 0.0  ;;  %v13810_v56 = vadd.f32 %v13475_v22, %v13058_v63  ;;  %v5109_v22 = vmul.f32 %v13787_v9, %v13787_v9 }
 0x3c2   :  { %v13767_v61 = vpop.f32.mrf.mxu1  ;;  %9808 = vmatmul.mubr.msk.bf16.gmra.mxu1 %vm2848_vm1, %v10135_v49  ;;  %4520 = vadd.xlane.f32.xlu0 %v4519_v24  ;;  %v13770_v46 = vpop.f32.mrf.mxu0 }
 0x3c3   :  { %3594 = vmatmul.mubr.bf16.gmra.mxu0 %v10163_v45  ;;  %v5328_v45 = vsel %vm67_vm0, %v5106_v53, 0.0  ;;  %v4537_v53 = vsel %vm67_vm0, %v13787_v9, 0.0  ;;  %20130 = vst [vmem:[#allocation96_spill] sm:$0xff] %v13810_v56  ;;  %v4531_v63 = vsel %vm67_vm0, %v13810_v56, 0.0  ;;  %v5107_v9 = vmul.f32 %v13810_v56, %v13810_v56 }
 0x3c4   :  { %v13776_v57 = vpop.f32.mrf.mxu1  ;;  %4523 = vadd.xlane.f32.xlu1 %v4522_v1  ;;  %v3405_v40 = vpop.f32.mrf.mxu0  ;;  %v5104_v1 = vmul.f32 %v13754_v3, %v13754_v3 }
 0x3c6   :  { %v13781_v49 = vpop.f32.mrf.mxu1  ;;  %5326 = vadd.xlane.f32.xlu0 %v5325_v26  ;;  %v13783_v24 = vpop.f32.mrf.mxu0  ;;  %v5322_v60 = vsel %vm67_vm0, %v5104_v1, 0.0 }
 0x3c7   :  { %20126 = vst [vmem:[#allocation92_spill] sm:$0xff] %v13783_v24 }
 0x3c8   :  { %v13792_v40 = vpop.f32.mrf.mxu1  ;;  %5329 = vadd.xlane.f32.xlu1 %v5328_v45  ;;  %v3408_v21 = vpop.f32.mrf.mxu0 }
 0x3ca   :  { %v13795_v18 = vpop.f32.mrf.mxu1  ;;  %5320 = vadd.xlane.f32.xlu0 %v5319_v44  ;;  %v13797_v26 = vpop.f32.mrf.mxu0 }
 0x3cb   :  { %20128 = vst [vmem:[#allocation94_spill] sm:$0xff] %v13797_v26 }
 0x3cc   :  { %v13806_v3 = vpop.f32.mrf.mxu1  ;;  %5323 = vadd.xlane.f32.xlu1 %v5322_v60  ;;  %v3413_v45 = vpop.f32.mrf.mxu0 }
 0x3ce   :  { %v13812_v44 = vpop.f32.mrf.mxu1  ;;  %4538 = vadd.xlane.f32.xlu0 %v4537_v53  ;;  %v13814_v21 = vpop.f32.mrf.mxu0 }
 0x3cf   :  { %20131 = vst [vmem:[#allocation97_spill] sm:$0xff] %v13814_v21 }
 0x3d0   :  { %v13822_v1 = vpop.f32.mrf.mxu1  ;;  %4541 = vadd.xlane.f32.xlu1 %v4540_v16  ;;  %v3416_v60 = vpop.f32.mrf.mxu0 }
 0x3d1   :  { %v5337_v60 = vsel %vm67_vm0, %v5109_v22, 0.0 }
 0x3d2   :  { %v13828_v53 = vpop.f32.mrf.mxu1  ;;  %4532 = vadd.xlane.f32.xlu0 %v4531_v63  ;;  %v13830_v45 = vpop.f32.mrf.mxu0 }
 0x3d3   :  { %20133 = vst [vmem:[#allocation99_spill] sm:$0xff] %v13828_v53  ;;  %20134 = vst [vmem:[#allocation100_spill] sm:$0xff] %v13830_v45  ;;  %v13847_v45 = vadd.f32 %v13509_v28, %v13124_v13  ;;  %v13863_v28 = vadd.f32 %v13524_v6, %v13132_v11  ;;  %v13876_v11 = vadd.f32 %v13519_v34, %v13102_v59 }
 0x3d4   :  { %v13836_v21 = vpop.f32.mrf.mxu1  ;;  %4535 = vadd.xlane.f32.xlu1 %v4534_v37  ;;  %v3421_v16 = vpop.f32.mrf.mxu0  ;;  %v5108_v37 = vmul.f32 %v13818_v0, %v13818_v0 }
 0x3d5   :  { %20135 = vst [vmem:[#allocation101_spill] sm:$0xff] %v13836_v21  ;;  %20138 = vst [vmem:[#allocation104_spill] sm:$0xff] %v13847_v45  ;;  %v4549_v0 = vsel %vm67_vm0, %v13847_v45, 0.0 }
 0x3d6   :  { %v13841_v26 = vpop.f32.mrf.mxu1  ;;  %5338 = vadd.xlane.f32.xlu0 %v5337_v60  ;;  %v13843_v63 = vpop.f32.mrf.mxu0  ;;  %v5331_v60 = vsel %vm67_vm0, %v5107_v9, 0.0  ;;  %20142 = vst [vmem:[#allocation108_spill] sm:$0xff] %v13863_v28  ;;  %20144 = vst [vmem:[#allocation110_spill] sm:$0xff] %v13876_v11 }
 0x3d7   :  { %20136 = vst [vmem:[#allocation102_spill] sm:$0xff] %v13841_v26  ;;  %20137 = vst [vmem:[#allocation103_spill] sm:$0xff] %v13843_v63  ;;  %v4443_v24 = vpop.xlane.xlu0 %4442 }
 0x3d8   :  { %v13852_v16 = vmul.f32 0.020408163, %v4443_v24  ;;  %v13854_v22 = vpop.f32.mrf.mxu1  ;;  %5341 = vadd.xlane.f32.xlu1 %v5340_v35  ;;  %v3424_v56 = vpop.f32.mrf.mxu0  ;;  %v5334_v24 = vsel %vm67_vm0, %v5108_v37, 0.0 }
 0x3d9   :  { %20139 = vst [vmem:[#allocation105_spill] sm:$0xff] %v13854_v22  ;;  %v4437_v21 = vpop.xlane.xlu1 %4436 }
 0x3da   :  { %v13857_v63 = vpop.f32.mrf.mxu1  ;;  %5332 = vadd.xlane.f32.xlu0 %v5331_v60  ;;  %v13859_v13 = vpop.f32.mrf.mxu0  ;;  %v5877_v35 = vmul.f32 %v13852_v16, %v13852_v16  ;;  %v13870_v56 = vmul.f32 0.020408163, %v4437_v21  ;;  %v13886_v21 = vadd.f32 %v13544_v33, %v13110_v36  ;;  %v5113_v36 = vmul.f32 %v13847_v45, %v13847_v45 }
 0x3db   :  { %20140 = vst [vmem:[#allocation106_spill] sm:$0xff] %v13857_v63  ;;  %20141 = vst [vmem:[#allocation107_spill] sm:$0xff] %v13859_v13  ;;  %v5243_v5 = vpop.xlane.xlu0 %5242 }
 0x3dc   :  { %v5717_v9 = vmul.f32 0.020408163, %v5243_v5  ;;  %v13872_v63 = vpop.f32.mrf.mxu1  ;;  %5335 = vadd.xlane.f32.xlu1 %v5334_v24  ;;  %v3429_v60 = vpop.f32.mrf.mxu0  ;;  %20147 = vst [vmem:[#allocation113_spill] sm:$0xff] %v13886_v21  ;;  %v4552_v24 = vsel %vm67_vm0, %v13863_v28, 0.0  ;;  %v5875_v59 = vmul.f32 %v13870_v56, %v13870_v56 }
 0x3dd   :  { %20143 = vst [vmem:[#allocation109_spill] sm:$0xff] %v13872_v63  ;;  %v4446_v6 = vpop.xlane.xlu1 %4445 }
 0x3de   :  { %v6037_v13 = vsub.f32 %v5717_v9, %v5877_v35  ;;  %v13878_v37 = vmul.f32 0.020408163, %v4446_v6  ;;  %v13880_v22 = vpop.f32.mrf.mxu1  ;;  %4550 = vadd.xlane.f32.xlu0 %v4549_v0  ;;  %v13882_v26 = vpop.f32.mrf.mxu0  ;;  %v4543_v6 = vsel %vm67_vm0, %v13876_v11, 0.0 }
 0x3df   :  { %20145 = vst [vmem:[#allocation111_spill] sm:$0xff] %v13880_v22  ;;  %20146 = vst [vmem:[#allocation112_spill] sm:$0xff] %v13882_v26  ;;  %v5237_v5 = vpop.xlane.xlu0 %5236 }
 0x3e0   :  { %v6357_v34 = vadd.f32 1e-05, %v6037_v13  ;;  %v5715_v35 = vmul.f32 0.020408163, %v5237_v5  ;;  %v13892_v9 = vpop.f32.mrf.mxu1  ;;  %4553 = vadd.xlane.f32.xlu1 %v4552_v24  ;;  %v3432_v60 = vpop.f32.mrf.mxu0  ;;  %v5878_v33 = vmul.f32 %v13878_v37, %v13878_v37  ;;  %v4546_v24 = vsel %vm67_vm0, %v13886_v21, 0.0 }
 0x3e1   :  { %20148 = vst [vmem:[#allocation114_spill] sm:$0xff] %v13892_v9  ;;  %v5246_v0 = vpop.xlane.xlu1 %5245  ;;  %v5114_v60 = vmul.f32 %v13863_v28, %v13863_v28 }
 0x3e2   :  { %10246 = vrsqrt.f32 %v6357_v34  ;;  %v6035_v26 = vsub.f32 %v5715_v35, %v5875_v59  ;;  %v5718_v63 = vmul.f32 0.020408163, %v5246_v0  ;;  %v13900_v22 = vpop.f32.mrf.mxu1  ;;  %4544 = vadd.xlane.f32.xlu0 %v4543_v6  ;;  %v13902_v13 = vpop.f32.mrf.mxu0  ;;  %v5349_v0 = vsel %vm67_vm0, %v5113_v36, 0.0 }
 0x3e3   :  { %20149 = vst [vmem:[#allocation115_spill] sm:$0xff] %v13900_v22  ;;  %20150 = vst [vmem:[#allocation116_spill] sm:$0xff] %v13902_v13  ;;  %v4440_v5 = vpop.xlane.xlu0 %4439  ;;  %v5111_v6 = vmul.f32 %v13876_v11, %v13876_v11  ;;  %v5352_v36 = vsel %vm67_vm0, %v5114_v60, 0.0 }
 0x3e4   :  { %v6355_v9 = vadd.f32 1e-05, %v6035_v26  ;;  %v6038_v45 = vsub.f32 %v5718_v63, %v5878_v33  ;;  %v13908_v34 = vmul.f32 0.020408163, %v4440_v5  ;;  %v13910_v53 = vpop.f32.mrf.mxu1  ;;  %4547 = vadd.xlane.f32.xlu1 %v4546_v24  ;;  %v3437_v59 = vpop.f32.mrf.mxu0  ;;  %v13923_v63 = vadd.f32 %v13550_v29, %v13180_v31 }
 0x3e5   :  { %v5240_v35 = vpop.xlane.xlu1 %5239  ;;  %v5343_v11 = vsel %vm67_vm0, %v5111_v6, 0.0  ;;  %v13937_v29 = vadd.f32 %v13569_v15, %v13194_v58  ;;  %v6197_v15 = vsub.f32 %v13147_v7, %v13852_v16 }
 0x3e6   :  { %10248 = vrsqrt.f32 %v6355_v9  ;;  %v6358_v22 = vadd.f32 1e-05, %v6038_v45  ;;  %v5876_v13 = vmul.f32 %v13908_v34, %v13908_v34  ;;  %v13917_v28 = vpop.f32.mrf.mxu1  ;;  %5350 = vadd.xlane.f32.xlu0 %v5349_v0  ;;  %v13919_v26 = vpop.f32.mrf.mxu0  ;;  %20152 = vst [vmem:[#allocation118_spill] sm:$0xff] %v13923_v63  ;;  %v5716_v33 = vmul.f32 0.020408163, %v5240_v35 }
 0x3e7   :  { %20151 = vst [vmem:[#allocation117_spill] sm:$0xff] %v13917_v28  ;;  %v4455_v5 = vpop.xlane.xlu0 %4454  ;;  %v5112_v9 = vmul.f32 %v13886_v21, %v13886_v21  ;;  %20155 = vst [vmem:[#allocation121_spill] sm:$0xff] %v13937_v29 }
 0x3e8   :  { %v13928_v45 = vpop.f32.mrf.mxu1  ;;  %5353 = vadd.xlane.f32.xlu1 %v5352_v36  ;;  %v3440_v24 = vpop.f32.mrf.mxu0  ;;  %10250 = vrsqrt.f32 %v6358_v22  ;;  %v6036_v59 = vsub.f32 %v5716_v33, %v5876_v13  ;;  %v4561_v22 = vsel %vm67_vm0, %v13923_v63, 0.0  ;;  %v13942_v13 = vmul.f32 0.020408163, %v4455_v5 }
 0x3e9   :  { %v4458_v0 = vpop.xlane.xlu1 %4457  ;;  %v5346_v21 = vsel %vm67_vm0, %v5112_v9, 0.0 }
 0x3ea   :  { %v13931_v28 = vpop.f32.mrf.mxu1  ;;  %5344 = vadd.xlane.f32.xlu0 %v5343_v11  ;;  %v13933_v31 = vpop.f32.mrf.mxu0  ;;  %v6356_v60 = vadd.f32 1e-05, %v6036_v59  ;;  %v13948_v11 = vadd.f32 %v13563_v30, %v13144_v12  ;;  %v13952_v36 = vmul.f32 0.020408163, %v4458_v0  ;;  %v4564_v30 = vsel %vm67_vm0, %v13937_v29, 0.0 }
 0x3eb   :  { %20153 = vst [vmem:[#allocation119_spill] sm:$0xff] %v13931_v28  ;;  %20154 = vst [vmem:[#allocation120_spill] sm:$0xff] %v13933_v31  ;;  %v4449_v35 = vpop.xlane.xlu0 %4448  ;;  %v5881_v7 = vmul.f32 %v13942_v13, %v13942_v13 }
 0x3ec   :  { %v13944_v33 = vpop.f32.mrf.mxu1  ;;  %5347 = vadd.xlane.f32.xlu1 %v5346_v21  ;;  %v3445_v6 = vpop.f32.mrf.mxu0  ;;  %20157 = vst [vmem:[#allocation123_spill] sm:$0xff] %v13948_v11  ;;  %10252 = vrsqrt.f32 %v6356_v60  ;;  %v13960_v21 = vadd.f32 %v13588_v32, %v13160_v17  ;;  %v13962_v59 = vmul.f32 0.020408163, %v4449_v35  ;;  %v4555_v32 = vsel %vm67_vm0, %v13948_v11, 0.0 }
 0x3ed   :  { %20156 = vst [vmem:[#allocation122_spill] sm:$0xff] %v13944_v33  ;;  %v4452_v58 = vpop.xlane.xlu1 %4451  ;;  %v5117_v35 = vmul.f32 %v13923_v63, %v13923_v63 }
 0x3ee   :  { %v13954_v9 = vpop.f32.mrf.mxu1  ;;  %4562 = vadd.xlane.f32.xlu0 %v4561_v22  ;;  %v13956_v5 = vpop.f32.mrf.mxu0  ;;  %20160 = vst [vmem:[#allocation126_spill] sm:$0xff] %v13960_v21  ;;  %v13972_v6 = vmul.f32 0.020408163, %v4452_v58  ;;  %v4558_v63 = vsel %vm67_vm0, %v13960_v21, 0.0 }
 0x3ef   :  { %20158 = vst [vmem:[#allocation124_spill] sm:$0xff] %v13954_v9  ;;  %20159 = vst [vmem:[#allocation125_spill] sm:$0xff] %v13956_v5  ;;  %v10247_v24 = vpop.eup %10246  ;;  %v5255_v12 = vpop.xlane.xlu0 %5254  ;;  %v6195_v9 = vsub.f32 %v13151_v62, %v13870_v56  ;;  %v5118_v62 = vmul.f32 %v13937_v29, %v13937_v29  ;;  %v5115_v5 = vmul.f32 %v13948_v11, %v13948_v11 }
 0x3f0   :  { %v5721_v16 = vmul.f32 0.020408163, %v5255_v12  ;;  %v13968_v0 = vpop.f32.mrf.mxu1  ;;  %4565 = vadd.xlane.f32.xlu1 %v4564_v30  ;;  %v3448_v60 = vpop.f32.mrf.mxu0  ;;  %v13970_v22 = vmul.f32 %v10247_v24, %v6197_v15  ;;  %v5882_v12 = vmul.f32 %v13952_v36, %v13952_v36  ;;  %v5879_v24 = vmul.f32 %v13962_v59, %v13962_v59 }
 0x3f1   :  { %20161 = vst [vmem:[#allocation127_spill] sm:$0xff] %v13968_v0  ;;  %v5258_v17 = vpop.xlane.xlu1 %5257 }
 0x3f2   :  { %20162 = vst [vmem:[#allocation128_spill] sm:$0xff] %v13970_v22  ;;  %v6041_v28 = vsub.f32 %v5721_v16, %v5881_v7  ;;  %v5722_v30 = vmul.f32 0.020408163, %v5258_v17  ;;  %v13982_v60 = vpop.f32.mrf.mxu1  ;;  %4556 = vadd.xlane.f32.xlu0 %v4555_v32  ;;  %v13984_v58 = vpop.f32.mrf.mxu0  ;;  %v5880_v32 = vmul.f32 %v13972_v6, %v13972_v6 }
 0x3f3   :  { %20163 = vst [vmem:[#allocation129_spill] sm:$0xff] %v13982_v60  ;;  %20164 = vst [vmem:[#allocation130_spill] sm:$0xff] %v13984_v58  ;;  %v10249_v15 = vpop.eup %10248  ;;  %v5249_v22 = vpop.xlane.xlu0 %5248  ;;  %v5361_v58 = vsel %vm67_vm0, %v5117_v35, 0.0  ;;  %v6198_v35 = vsub.f32 %v13163_v8, %v13878_v37 }
 0x3f4   :  { %v6361_v56 = vadd.f32 1e-05, %v6041_v28  ;;  %v6042_v0 = vsub.f32 %v5722_v30, %v5882_v12  ;;  %v5719_v7 = vmul.f32 0.020408163, %v5249_v22  ;;  %4559 = vadd.xlane.f32.xlu1 %v4558_v63  ;;  %v3453_v16 = vpop.f32.mrf.mxu0  ;;  %v13992_v17 = vmul.f32 %v10249_v15, %v6195_v9  ;;  %v13999_v28 = vpop.f32.mrf.mxu1 }
 0x3f5   :  { %v5252_v60 = vpop.xlane.xlu1 %5251  ;;  %v10251_v33 = vpop.eup %10250  ;;  %v14005_v9 = vadd.f32 %v13597_v23, %v13252_v52  ;;  %v5364_v30 = vsel %vm67_vm0, %v5118_v62, 0.0  ;;  %v5355_v52 = vsel %vm67_vm0, %v5115_v5, 0.0 }
 0x3f6   :  { %20165 = vst [vmem:[#allocation131_spill] sm:$0xff] %v13992_v17  ;;  %10254 = vrsqrt.f32 %v6361_v56  ;;  %v6362_v31 = vadd.f32 1e-05, %v6042_v0  ;;  %v6039_v29 = vsub.f32 %v5719_v7, %v5879_v24  ;;  %v5720_v22 = vmul.f32 0.020408163, %v5252_v60  ;;  %5362 = vadd.xlane.f32.xlu0 %v5361_v58  ;;  %v14001_v63 = vpop.f32.mrf.mxu0  ;;  %v14017_v62 = vpop.f32.mrf.mxu1 }
 0x3f7   :  { %20166 = vst [vmem:[#allocation132_spill] sm:$0xff] %v14005_v9  ;;  %v4467_v12 = vpop.xlane.xlu0 %4466  ;;  %v5116_v0 = vmul.f32 %v13960_v21, %v13960_v21  ;;  %v6196_v58 = vsub.f32 %v13183_v47, %v13908_v34  ;;  %v14015_v23 = vmul.f32 %v10251_v33, %v6198_v35  ;;  %v4573_v34 = vsel %vm67_vm0, %v14005_v9, 0.0 }
 0x3f8   :  { %10256 = vrsqrt.f32 %v6362_v31  ;;  %v6359_v15 = vadd.f32 1e-05, %v6039_v29  ;;  %v6040_v24 = vsub.f32 %v5720_v22, %v5880_v32  ;;  %5365 = vadd.xlane.f32.xlu1 %v5364_v30  ;;  %v3456_v60 = vpop.f32.mrf.mxu0  ;;  %v14023_v31 = vadd.f32 %v13612_v14, %v13269_v41  ;;  %v14036_v41 = vpop.f32.mrf.mxu1 }
 0x3f9   :  { %v4470_v56 = vpop.xlane.xlu1 %4469  ;;  %20167 = vst [vmem:[#allocation133_spill] sm:$0xff] %v14015_v23  ;;  %v10253_v8 = vpop.eup %10252  ;;  %v5358_v47 = vsel %vm67_vm0, %v5116_v0, 0.0  ;;  %v14030_v5 = vmul.f32 0.020408163, %v4467_v12  ;;  %v14034_v32 = vadd.f32 %v13607_v55, %v13214_v50  ;;  %v14044_v30 = vadd.f32 %v13632_v43, %v13229_v39  ;;  %v20172_v43 = vld [vmem:[#allocation89_spill] sm:$0xff] }
 0x3fa   :  { %10258 = vrsqrt.f32 %v6359_v15  ;;  %v6360_v37 = vadd.f32 1e-05, %v6040_v24  ;;  %5356 = vadd.xlane.f32.xlu0 %v5355_v52  ;;  %v14019_v7 = vpop.f32.mrf.mxu0  ;;  %20168 = vst [vmem:[#allocation134_spill] sm:$0xff] %v14023_v31  ;;  %v14028_v33 = vmul.f32 %v10253_v8, %v6196_v58  ;;  %v14038_v14 = vmul.f32 0.020408163, %v4470_v56 }
 0x3fb   :  { %v4461_v29 = vpop.xlane.xlu0 %4460  ;;  %20170 = vst [vmem:[#allocation136_spill] sm:$0xff] %v14034_v32  ;;  %20171 = vst [vmem:[#allocation137_spill] sm:$0xff] %v14044_v30  ;;  %v4576_v15 = vsel %vm67_vm0, %v14023_v31, 0.0  ;;  %v5121_v50 = vmul.f32 %v14005_v9, %v14005_v9  ;;  %v5885_v55 = vmul.f32 %v14030_v5, %v14030_v5  ;;  %v4567_v39 = vsel %vm67_vm0, %v14034_v32, 0.0 }
 0x3fc   :  { %20169 = vst [vmem:[#allocation135_spill] sm:$0xff] %v14028_v33  ;;  %10260 = vrsqrt.f32 %v6360_v37  ;;  %5359 = vadd.xlane.f32.xlu1 %v5358_v47  ;;  %v3461_v16 = vpop.f32.mrf.mxu0  ;;  %v14046_v12 = vmul.f32 0.020408163, %v4461_v29  ;;  %v6201_v52 = vsub.f32 %v20172_v43, %v13942_v13  ;;  %v5886_v8 = vmul.f32 %v14038_v14, %v14038_v14  ;;  %v14062_v37 = vpop.f32.mrf.mxu1  ;;  %v20175_v33 = vld [vmem:[#allocation88_spill] sm:$0xff] }
 0x3fd   :  { %v4464_v22 = vpop.xlane.xlu1 %4463  ;;  %20173 = vst [vmem:[#allocation89_spill] sm:$0xff] %v14062_v37  ;;  %v5373_v13 = vsel %vm67_vm0, %v5121_v50, 0.0  ;;  %v6202_v17 = vsub.f32 %v20175_v33, %v13952_v36  ;;  %v5119_v50 = vmul.f32 %v14034_v32, %v14034_v32  ;;  %v20176_v33 = vld [vmem:[#allocation78_spill] sm:$0xff] }
 0x3fe   :  { %4574 = vadd.xlane.f32.xlu0 %v4573_v34  ;;  %v14040_v35 = vpop.f32.mrf.mxu0  ;;  %v14054_v58 = vmul.f32 0.020408163, %v4464_v22  ;;  %v5883_v22 = vmul.f32 %v14046_v12, %v14046_v12 }
 0x3ff   :  { %v5267_v0 = vpop.xlane.xlu0 %5266 }
 0x400   :  { %v5725_v24 = vmul.f32 0.020408163, %v5267_v0  ;;  %4577 = vadd.xlane.f32.xlu1 %v4576_v15  ;;  %v3464_v60 = vpop.f32.mrf.mxu0  ;;  %v4570_v15 = vsel %vm67_vm0, %v14044_v30, 0.0  ;;  %v5884_v9 = vmul.f32 %v14054_v58, %v14054_v58 }
 0x401   :  { %v5270_v56 = vpop.xlane.xlu1 %5269  ;;  %v5122_v60 = vmul.f32 %v14023_v31, %v14023_v31 }
 0x402   :  { %v6045_v29 = vsub.f32 %v5725_v24, %v5885_v55  ;;  %v5726_v47 = vmul.f32 0.020408163, %v5270_v56  ;;  %4568 = vadd.xlane.f32.xlu0 %v4567_v39  ;;  %v14064_v34 = vpop.f32.mrf.mxu0 }
 0x403   :  { %v10255_v16 = vpop.eup %10254  ;;  %v5261_v0 = vpop.xlane.xlu0 %5260 }
 0x404   :  { %v6365_v43 = vadd.f32 1e-05, %v6045_v29  ;;  %v6046_v23 = vsub.f32 %v5726_v47, %v5886_v8  ;;  %v5723_v55 = vmul.f32 0.020408163, %v5261_v0  ;;  %4571 = vadd.xlane.f32.xlu1 %v4570_v15  ;;  %v3469_v24 = vpop.f32.mrf.mxu0  ;;  %v14073_v56 = vmul.f32 %v10255_v16, %v6201_v52  ;;  %v14083_v8 = vpop.f32.mrf.mxu1 }
 0x405   :  { %v10257_v39 = vpop.eup %10256  ;;  %v5264_v21 = vpop.xlane.xlu1 %5263  ;;  %v5120_v29 = vmul.f32 %v14044_v30, %v14044_v30  ;;  %v14089_v15 = vadd.f32 %v13638_v20, %v20176_v33  ;;  %v20178_v24 = vld [vmem:[#allocation3_spill] sm:$0xff]  ;;  %v5376_v30 = vsel %vm67_vm0, %v5122_v60, 0.0  ;;  %v5367_v20 = vsel %vm67_vm0, %v5119_v50, 0.0 }
 0x406   :  { %20174 = vst [vmem:[#allocation138_spill] sm:$0xff] %v14073_v56  ;;  %10262 = vrsqrt.f32 %v6365_v43  ;;  %v6366_v47 = vadd.f32 1e-05, %v6046_v23  ;;  %v6043_v52 = vsub.f32 %v5723_v55, %v5883_v22  ;;  %v5724_v16 = vmul.f32 0.020408163, %v5264_v21  ;;  %5374 = vadd.xlane.f32.xlu0 %v5373_v13  ;;  %v14085_v0 = vpop.f32.mrf.mxu0  ;;  %v20180_v43 = vld [vmem:[#allocation68_spill] sm:$0xff] }
 0x407   :  { %v10259_v36 = vpop.eup %10258  ;;  %20177 = vst [vmem:[#allocation88_spill] sm:$0xff] %v14089_v15  ;;  %v6199_v56 = vsub.f32 %v20178_v24, %v13962_v59  ;;  %v4479_v32 = vpop.xlane.xlu0 %4478  ;;  %v14094_v31 = vmul.f32 %v10257_v39, %v6202_v17  ;;  %v6200_v55 = vsub.f32 %v20180_v43, %v13972_v6  ;;  %v5370_v17 = vsel %vm67_vm0, %v5120_v29, 0.0 }
 0x408   :  { %10264 = vrsqrt.f32 %v6366_v47  ;;  %v6363_v23 = vadd.f32 1e-05, %v6043_v52  ;;  %v6044_v22 = vsub.f32 %v5724_v16, %v5884_v9  ;;  %5377 = vadd.xlane.f32.xlu1 %v5376_v30  ;;  %v3472_v21 = vpop.f32.mrf.mxu0  ;;  %v14101_v59 = vpop.f32.mrf.mxu1  ;;  %v20183_v9 = vld [vmem:[#allocation8_spill] sm:$0xff]  ;;  %v4585_v6 = vsel %vm67_vm0, %v14089_v15, 0.0  ;;  %v20186_v16 = vld [vmem:[#allocation10_spill] sm:$0xff] }
 0x409   :  { %20179 = vst [vmem:[#allocation78_spill] sm:$0xff] %v14094_v31  ;;  %v10261_v13 = vpop.eup %10260  ;;  %v4482_v11 = vpop.xlane.xlu1 %4481  ;;  %v14099_v33 = vmul.f32 %v10259_v36, %v6199_v56  ;;  %20182 = vst [vmem:[#allocation68_spill] sm:$0xff] %v14101_v59  ;;  %v14108_v30 = vadd.f32 %v13657_v25, %v20183_v9  ;;  %v14114_v56 = vmul.f32 0.020408163, %v4479_v32  ;;  %v14118_v29 = vadd.f32 %v13651_v54, %v20186_v16 }
 0x40a   :  { %10266 = vrsqrt.f32 %v6363_v23  ;;  %5368 = vadd.xlane.f32.xlu0 %v5367_v20  ;;  %v14104_v60 = vpop.f32.mrf.mxu0  ;;  %v6364_v39 = vadd.f32 1e-05, %v6044_v22  ;;  %v14112_v50 = vmul.f32 %v10261_v13, %v6200_v55  ;;  %v14120_v24 = vpop.f32.mrf.mxu1  ;;  %v14122_v25 = vmul.f32 0.020408163, %v4482_v11  ;;  %v20188_v22 = vld [vmem:[#allocation2_spill] sm:$0xff] }
 0x40b   :  { %20181 = vst [vmem:[#allocation3_spill] sm:$0xff] %v14099_v33  ;;  %20184 = vst [vmem:[#allocation8_spill] sm:$0xff] %v14108_v30  ;;  %v4473_v47 = vpop.xlane.xlu0 %4472  ;;  %v14128_v21 = vadd.f32 %v13676_v42, %v20188_v22  ;;  %v4588_v13 = vsel %vm67_vm0, %v14108_v30, 0.0  ;;  %v5125_v54 = vmul.f32 %v14089_v15, %v14089_v15  ;;  %v5889_v43 = vmul.f32 %v14114_v56, %v14114_v56 }
 0x40c   :  { %20185 = vst [vmem:[#allocation139_spill] sm:$0xff] %v14112_v50  ;;  %5371 = vadd.xlane.f32.xlu1 %v5370_v17  ;;  %v3477_v52 = vpop.f32.mrf.mxu0  ;;  %20187 = vst [vmem:[#allocation10_spill] sm:$0xff] %v14118_v29  ;;  %10268 = vrsqrt.f32 %v6364_v39  ;;  %v14136_v11 = vmul.f32 0.020408163, %v4473_v47  ;;  %v4579_v42 = vsel %vm67_vm0, %v14118_v29, 0.0  ;;  %v5126_v9 = vmul.f32 %v14108_v30, %v14108_v30  ;;  %v14142_v39 = vpop.f32.mrf.mxu1  ;;  %v20195_v30 = vld [vmem:[#allocation74_spill] sm:$0xff] }
 0x40d   :  { %v4476_v36 = vpop.xlane.xlu1 %4475  ;;  %20189 = vst [vmem:[#allocation2_spill] sm:$0xff] %v14128_v21  ;;  %20190 = vst [vmem:[#allocation140_spill] sm:$0xff] %v14142_v39  ;;  %v4582_v31 = vsel %vm67_vm0, %v14128_v21, 0.0  ;;  %v5385_v50 = vsel %vm67_vm0, %v5125_v54, 0.0  ;;  %v5123_v33 = vmul.f32 %v14118_v29, %v14118_v29  ;;  %v6206_v54 = vsub.f32 %v20195_v30, %v14038_v14 }
 0x40e   :  { %4586 = vadd.xlane.f32.xlu0 %v4585_v6  ;;  %v14124_v23 = vpop.f32.mrf.mxu0  ;;  %v5890_v6 = vmul.f32 %v14122_v25, %v14122_v25  ;;  %v14146_v52 = vmul.f32 0.020408163, %v4476_v36  ;;  %v5887_v36 = vmul.f32 %v14136_v11, %v14136_v11  ;;  %v5388_v29 = vsel %vm67_vm0, %v5126_v9, 0.0 }
 0x40f   :  { %v5279_v32 = vpop.xlane.xlu0 %5278 }
 0x410   :  { %v5729_v55 = vmul.f32 0.020408163, %v5279_v32  ;;  %4589 = vadd.xlane.f32.xlu1 %v4588_v13  ;;  %v3480_v20 = vpop.f32.mrf.mxu0  ;;  %v20191_v32 = vld [vmem:[#allocation80_spill] sm:$0xff] }
 0x411   :  { %v5282_v17 = vpop.xlane.xlu1 %5281  ;;  %v6205_v13 = vsub.f32 %v20191_v32, %v14030_v5  ;;  %v20193_v5 = vld [vmem:[#allocation75_spill] sm:$0xff] }
 0x412   :  { %v6049_v16 = vsub.f32 %v5729_v55, %v5889_v43  ;;  %v5730_v47 = vmul.f32 0.020408163, %v5282_v17  ;;  %4580 = vadd.xlane.f32.xlu0 %v4579_v42  ;;  %v14161_v32 = vadd.f32 %v13685_v4, %v20193_v5 }
 0x413   :  { %v10263_v22 = vpop.eup %10262  ;;  %v5273_v20 = vpop.xlane.xlu0 %5272 }
 0x414   :  { %v14155_v39 = vpop.f32.mrf.mxu0  ;;  %v6369_v43 = vadd.f32 1e-05, %v6049_v16  ;;  %v6050_v55 = vsub.f32 %v5730_v47, %v5890_v6  ;;  %v5727_v17 = vmul.f32 0.020408163, %v5273_v20  ;;  %4583 = vadd.xlane.f32.xlu1 %v4582_v31  ;;  %20194 = vst [vmem:[#allocation75_spill] sm:$0xff] %v14161_v32  ;;  %v14166_v37 = vmul.f32 %v10263_v22, %v6205_v13  ;;  %v20198_v20 = vld [vmem:[#allocation86_spill] sm:$0xff] }
 0x415   :  { %20192 = vst [vmem:[#allocation80_spill] sm:$0xff] %v14155_v39  ;;  %v10265_v42 = vpop.eup %10264  ;;  %v5276_v59 = vpop.xlane.xlu1 %5275  ;;  %v5888_v6 = vmul.f32 %v14146_v52, %v14146_v52  ;;  %v6203_v5 = vsub.f32 %v20198_v20, %v14046_v12 }
 0x416   :  { %v3485_v15 = vpop.f32.mrf.mxu0  ;;  %20196 = vst [vmem:[#allocation74_spill] sm:$0xff] %v14166_v37  ;;  %v14168_v39 = vpop.f32.mrf.mxu1  ;;  %v6370_v31 = vadd.f32 1e-05, %v6050_v55  ;;  %v6047_v16 = vsub.f32 %v5727_v17, %v5887_v36  ;;  %v5728_v47 = vmul.f32 0.020408163, %v5276_v59  ;;  %5386 = vadd.xlane.f32.xlu0 %v5385_v50  ;;  %10270 = vrsqrt.f32 %v6369_v43  ;;  %v20203_v43 = vld [vmem:[#allocation82_spill] sm:$0xff] }
 0x417   :  { %20197 = vst [vmem:[#allocation141_spill] sm:$0xff] %v14168_v39  ;;  %v10267_v4 = vpop.eup %10266  ;;  %v4491_v14 = vpop.xlane.xlu0 %4490  ;;  %v5124_v15 = vmul.f32 %v14128_v21, %v14128_v21  ;;  %v14178_v9 = vmul.f32 %v10265_v42, %v6206_v54  ;;  %v5379_v59 = vsel %vm67_vm0, %v5123_v33, 0.0  ;;  %v14187_v17 = vadd.f32 %v13700_v2, %v20203_v43  ;;  %v20208_v2 = vld [vmem:[#allocation76_spill] sm:$0xff] }
 0x418   :  { %v14176_v30 = vpop.f32.mrf.mxu0  ;;  %10272 = vrsqrt.f32 %v6370_v31  ;;  %v6367_v22 = vadd.f32 1e-05, %v6047_v16  ;;  %v6048_v13 = vsub.f32 %v5728_v47, %v5888_v6  ;;  %5389 = vadd.xlane.f32.xlu1 %v5388_v29  ;;  %v14181_v55 = vmul.f32 %v10267_v4, %v6203_v5  ;;  %v14183_v12 = vpop.f32.mrf.mxu1  ;;  %v20206_v47 = vld [vmem:[#allocation7_spill] sm:$0xff] }
 0x419   :  { %20199 = vst [vmem:[#allocation86_spill] sm:$0xff] %v14176_v30  ;;  %20200 = vst [vmem:[#allocation142_spill] sm:$0xff] %v14178_v9  ;;  %v4494_v36 = vpop.xlane.xlu1 %4493  ;;  %v5382_v31 = vsel %vm67_vm0, %v5124_v15, 0.0  ;;  %v4597_v29 = vsel %vm67_vm0, %v14161_v32, 0.0  ;;  %v10269_v33 = vpop.eup %10268  ;;  %v14194_v16 = vmul.f32 0.020408163, %v4491_v14  ;;  %v14198_v4 = vadd.f32 %v13695_v51, %v20206_v47 }
 0x41a   :  { %v3488_v50 = vpop.f32.mrf.mxu0  ;;  %20201 = vst [vmem:[#allocation143_spill] sm:$0xff] %v14181_v55  ;;  %20202 = vst [vmem:[#allocation144_spill] sm:$0xff] %v14183_v12  ;;  %10274 = vrsqrt.f32 %v6367_v22  ;;  %5380 = vadd.xlane.f32.xlu0 %v5379_v59  ;;  %v6368_v42 = vadd.f32 1e-05, %v6048_v13  ;;  %v6204_v20 = vsub.f32 %v20208_v2, %v14054_v58  ;;  %v14202_v13 = vpop.f32.mrf.mxu1  ;;  %v14204_v15 = vmul.f32 0.020408163, %v4494_v36 }
 0x41b   :  { %20204 = vst [vmem:[#allocation82_spill] sm:$0xff] %v14187_v17  ;;  %v4485_v54 = vpop.xlane.xlu0 %4484  ;;  %20207 = vst [vmem:[#allocation7_spill] sm:$0xff] %v14198_v4  ;;  %v5129_v59 = vmul.f32 %v14161_v32, %v14161_v32  ;;  %v20210_v14 = vld [vmem:[#allocation5_spill] sm:$0xff]  ;;  %v4600_v43 = vsel %vm67_vm0, %v14187_v17, 0.0  ;;  %v5893_v36 = vmul.f32 %v14194_v16, %v14194_v16  ;;  %v20219_v12 = vld [vmem:[#allocation84_spill] sm:$0xff] }
 0x41c   :  { %v14192_v6 = vpop.f32.mrf.mxu0  ;;  %5383 = vadd.xlane.f32.xlu1 %v5382_v31  ;;  %20209 = vst [vmem:[#allocation76_spill] sm:$0xff] %v14202_v13  ;;  %v14210_v50 = vadd.f32 %v13720_v19, %v20210_v14  ;;  %10276 = vrsqrt.f32 %v6368_v42  ;;  %v14216_v31 = vmul.f32 %v10269_v33, %v6204_v20  ;;  %v4591_v42 = vsel %vm67_vm0, %v14198_v4, 0.0  ;;  %v14228_v9 = vpop.f32.mrf.mxu1 }
 0x41d   :  { %20205 = vst [vmem:[#allocation145_spill] sm:$0xff] %v14192_v6  ;;  %v4488_v5 = vpop.xlane.xlu1 %4487  ;;  %20214 = vst [vmem:[#allocation148_spill] sm:$0xff] %v14228_v9  ;;  %v5894_v33 = vmul.f32 %v14204_v15, %v14204_v15 }
 0x41e   :  { %v3493_v22 = vpop.f32.mrf.mxu0  ;;  %4598 = vadd.xlane.f32.xlu0 %v4597_v29  ;;  %20211 = vst [vmem:[#allocation5_spill] sm:$0xff] %v14210_v50  ;;  %20213 = vst [vmem:[#allocation147_spill] sm:$0xff] %v14216_v31  ;;  %v14220_v29 = vmul.f32 0.020408163, %v4485_v54  ;;  %v14222_v2 = vmul.f32 0.020408163, %v4488_v5 }
 0x41f   :  { %v5291_v51 = vpop.xlane.xlu0 %5290  ;;  %v5130_v22 = vmul.f32 %v14187_v17, %v14187_v17  ;;  %v4594_v37 = vsel %vm67_vm0, %v14210_v50, 0.0  ;;  %v5397_v31 = vsel %vm67_vm0, %v5129_v59, 0.0  ;;  %v6210_v59 = vsub.f32 %v20219_v12, %v14122_v25 }
 0x420   :  { %v14214_v58 = vpop.f32.mrf.mxu0  ;;  %v5733_v47 = vmul.f32 0.020408163, %v5291_v51  ;;  %4601 = vadd.xlane.f32.xlu1 %v4600_v43  ;;  %v20215_v51 = vld [vmem:[#allocation62_spill] sm:$0xff]  ;;  %v5128_v25 = vmul.f32 %v14210_v50, %v14210_v50 }
 0x421   :  { %20212 = vst [vmem:[#allocation146_spill] sm:$0xff] %v14214_v58  ;;  %v5294_v19 = vpop.xlane.xlu1 %5293  ;;  %v14234_v5 = vadd.f32 %v13726_v10, %v20215_v51  ;;  %v20218_v51 = vld [vmem:[#allocation67_spill] sm:$0xff]  ;;  %v14252_v58 = vpop.f32.mrf.mxu1 }
 0x422   :  { %v3496_v14 = vpop.f32.mrf.mxu0  ;;  %v6053_v20 = vsub.f32 %v5733_v47, %v5893_v36  ;;  %v5734_v54 = vmul.f32 0.020408163, %v5294_v19  ;;  %4592 = vadd.xlane.f32.xlu0 %v4591_v42  ;;  %v5891_v36 = vmul.f32 %v14220_v29, %v14220_v29  ;;  %v6209_v17 = vsub.f32 %v20218_v51, %v14114_v56  ;;  %20220 = vst [vmem:[#allocation67_spill] sm:$0xff] %v14252_v58  ;;  %v20221_v56 = vld [vmem:[#allocation77_spill] sm:$0xff] }
 0x423   :  { %20216 = vst [vmem:[#allocation62_spill] sm:$0xff] %v14234_v5  ;;  %v5285_v43 = vpop.xlane.xlu0 %5284  ;;  %v5127_v14 = vmul.f32 %v14198_v4, %v14198_v4  ;;  %v10271_v9 = vpop.eup %10270  ;;  %v5892_v4 = vmul.f32 %v14222_v2, %v14222_v2 }
 0x424   :  { %v14241_v55 = vpop.f32.mrf.mxu0  ;;  %v6373_v47 = vadd.f32 1e-05, %v6053_v20  ;;  %v6054_v19 = vsub.f32 %v5734_v54, %v5894_v33  ;;  %v5731_v42 = vmul.f32 0.020408163, %v5285_v43  ;;  %4595 = vadd.xlane.f32.xlu1 %v4594_v37  ;;  %v6207_v43 = vsub.f32 %v20221_v56, %v14136_v11  ;;  %v14267_v11 = vpop.f32.mrf.mxu1  ;;  %v20227_v56 = vld [vmem:[#allocation71_spill] sm:$0xff] }
 0x425   :  { %20217 = vst [vmem:[#allocation149_spill] sm:$0xff] %v14241_v55  ;;  %v10273_v10 = vpop.eup %10272  ;;  %v5288_v32 = vpop.xlane.xlu1 %5287  ;;  %v5400_v55 = vsel %vm67_vm0, %v5130_v22, 0.0  ;;  %v14260_v21 = vmul.f32 %v10271_v9, %v6209_v17  ;;  %20226 = vst [vmem:[#allocation152_spill] sm:$0xff] %v14267_v11  ;;  %v14271_v9 = vadd.f32 %v13745_v48, %v20227_v56  ;;  %v20233_v48 = vld [vmem:[#allocation58_spill] sm:$0xff] }
 0x426   :  { %v3501_v13 = vpop.f32.mrf.mxu0  ;;  %10278 = vrsqrt.f32 %v6373_v47  ;;  %v6374_v33 = vadd.f32 1e-05, %v6054_v19  ;;  %v6051_v20 = vsub.f32 %v5731_v42, %v5891_v36  ;;  %v5732_v37 = vmul.f32 0.020408163, %v5288_v32  ;;  %5398 = vadd.xlane.f32.xlu0 %v5397_v31 }
 0x427   :  { %v10275_v54 = vpop.eup %10274  ;;  %v4503_v51 = vpop.xlane.xlu0 %4502  ;;  %20223 = vst [vmem:[#allocation77_spill] sm:$0xff] %v14260_v21  ;;  %v14262_v13 = vmul.f32 %v10273_v10, %v6210_v59  ;;  %v5391_v31 = vsel %vm67_vm0, %v5127_v14, 0.0  ;;  %20228 = vst [vmem:[#allocation71_spill] sm:$0xff] %v14271_v9  ;;  %v5394_v10 = vsel %vm67_vm0, %v5128_v25, 0.0  ;;  %v5134_v21 = vmul.f32 %v14271_v9, %v14271_v9 }
 0x428   :  { %v14258_v12 = vpop.f32.mrf.mxu0  ;;  %10280 = vrsqrt.f32 %v6374_v33  ;;  %v6371_v22 = vadd.f32 1e-05, %v6051_v20  ;;  %v6052_v47 = vsub.f32 %v5732_v37, %v5892_v4  ;;  %5401 = vadd.xlane.f32.xlu1 %v5400_v55  ;;  %v14265_v19 = vmul.f32 %v10275_v54, %v6207_v43  ;;  %v20231_v33 = vld [vmem:[#allocation50_spill] sm:$0xff]  ;;  %v14286_v25 = vpop.f32.mrf.mxu1 }
 0x429   :  { %20222 = vst [vmem:[#allocation84_spill] sm:$0xff] %v14258_v12  ;;  %20224 = vst [vmem:[#allocation150_spill] sm:$0xff] %v14262_v13  ;;  %v4506_v32 = vpop.xlane.xlu1 %4505  ;;  %v4609_v55 = vsel %vm67_vm0, %v14234_v5, 0.0  ;;  %v10277_v14 = vpop.eup %10276  ;;  %v14278_v59 = vmul.f32 0.020408163, %v4503_v51  ;;  %v14282_v20 = vadd.f32 %v13739_v27, %v20231_v33  ;;  %v6208_v37 = vsub.f32 %v20233_v48, %v14146_v52 }
 0x42a   :  { %v3504_v36 = vpop.f32.mrf.mxu0  ;;  %20225 = vst [vmem:[#allocation151_spill] sm:$0xff] %v14265_v19  ;;  %10282 = vrsqrt.f32 %v6371_v22  ;;  %v6372_v42 = vadd.f32 1e-05, %v6052_v47  ;;  %5392 = vadd.xlane.f32.xlu0 %v5391_v31  ;;  %20234 = vst [vmem:[#allocation58_spill] sm:$0xff] %v14286_v25  ;;  %v14288_v22 = vmul.f32 0.020408163, %v4506_v32  ;;  %v14312_v48 = vpop.f32.mrf.mxu1 }
 0x42b   :  { %v4497_v17 = vpop.xlane.xlu0 %4496  ;;  %20230 = vst [vmem:[#allocation154_spill] sm:$0xff] %v14278_v59  ;;  %20232 = vst [vmem:[#allocation50_spill] sm:$0xff] %v14282_v20  ;;  %v20236_v47 = vld [vmem:[#allocation63_spill] sm:$0xff]  ;;  %v4612_v36 = vsel %vm67_vm0, %v14271_v9, 0.0  ;;  %v14302_v52 = vmul.f32 %v14278_v59, %v14278_v59  ;;  %v5131_v9 = vmul.f32 %v14282_v20, %v14282_v20 }
 0x42c   :  { %v14276_v4 = vpop.f32.mrf.mxu0  ;;  %10284 = vrsqrt.f32 %v6372_v42  ;;  %5395 = vadd.xlane.f32.xlu1 %v5394_v10  ;;  %20235 = vst [vmem:[#allocation155_spill] sm:$0xff] %v14288_v22  ;;  %v14292_v31 = vadd.f32 %v13761_v38, %v20236_v47  ;;  %v14298_v42 = vmul.f32 %v10277_v14, %v6208_v37  ;;  %v14304_v56 = vmul.f32 0.020408163, %v4497_v17  ;;  %20241 = vst [vmem:[#allocation159_spill] sm:$0xff] %v14312_v48 }
 0x42d   :  { %20229 = vst [vmem:[#allocation153_spill] sm:$0xff] %v14276_v4  ;;  %v4500_v54 = vpop.xlane.xlu1 %4499  ;;  %v4603_v38 = vsel %vm67_vm0, %v14282_v20, 0.0  ;;  %v14316_v14 = vmul.f32 %v14288_v22, %v14288_v22 }
 0x42e   :  { %v3509_v43 = vpop.f32.mrf.mxu0  ;;  %4610 = vadd.xlane.f32.xlu0 %v4609_v55  ;;  %20237 = vst [vmem:[#allocation63_spill] sm:$0xff] %v14292_v31  ;;  %20239 = vst [vmem:[#allocation157_spill] sm:$0xff] %v14298_v42  ;;  %v5133_v55 = vmul.f32 %v14234_v5, %v14234_v5  ;;  %v14318_v37 = vmul.f32 0.020408163, %v4500_v54  ;;  %v14334_v54 = vmul.f32 %v14304_v56, %v14304_v56 }
 0x42f   :  { %v5303_v51 = vpop.xlane.xlu0 %5302  ;;  %20240 = vst [vmem:[#allocation158_spill] sm:$0xff] %v14304_v56 }
 0x430   :  { %v14296_v27 = vpop.f32.mrf.mxu0  ;;  %v14306_v32 = vmul.f32 0.020408163, %v5303_v51  ;;  %4613 = vadd.xlane.f32.xlu1 %v4612_v36  ;;  %20242 = vst [vmem:[#allocation160_spill] sm:$0xff] %v14318_v37  ;;  %v20243_v51 = vld [vmem:[#allocation13_spill] sm:$0xff]  ;;  %v5409_v48 = vsel %vm67_vm0, %v5133_v55, 0.0 }
 0x431   :  { %20238 = vst [vmem:[#allocation156_spill] sm:$0xff] %v14296_v27  ;;  %v5306_v10 = vpop.xlane.xlu1 %5305  ;;  %v6213_v36 = vsub.f32 %v20243_v51, %v14194_v16  ;;  %v20245_v51 = vld [vmem:[#allocation64_spill] sm:$0xff] }
 0x432   :  { %v3512_v33 = vpop.f32.mrf.mxu0  ;;  %v14322_v43 = vmul.f32 0.020408163, %v5306_v10  ;;  %4604 = vadd.xlane.f32.xlu0 %v4603_v38  ;;  %v6214_v17 = vsub.f32 %v20245_v51, %v14204_v15 }
 0x433   :  { %v10279_v47 = vpop.eup %10278  ;;  %v5297_v13 = vpop.xlane.xlu0 %5296  ;;  %v4606_v33 = vsel %vm67_vm0, %v14292_v31, 0.0 }
 0x434   :  { %v14330_v42 = vpop.f32.mrf.mxu0  ;;  %v14338_v38 = vmul.f32 0.020408163, %v5297_v13  ;;  %4607 = vadd.xlane.f32.xlu1 %v4606_v33  ;;  %v14345_v5 = vmul.f32 %v10279_v47, %v6213_v36  ;;  %v14351_v13 = vpop.f32.mrf.mxu1  ;;  %v14355_v33 = vmul.f32 %v14318_v37, %v14318_v37 }
 0x435   :  { %20244 = vst [vmem:[#allocation13_spill] sm:$0xff] %v14330_v42  ;;  %v10281_v16 = vpop.eup %10280  ;;  %v5300_v19 = vpop.xlane.xlu1 %5299  ;;  %v20247_v42 = vld [vmem:[#allocation40_spill] sm:$0xff]  ;;  %20249 = vst [vmem:[#allocation161_spill] sm:$0xff] %v14351_v13  ;;  %v5403_v13 = vsel %vm67_vm0, %v5131_v9, 0.0 }
 0x436   :  { %v3517_v11 = vpop.f32.mrf.mxu0  ;;  %20246 = vst [vmem:[#allocation64_spill] sm:$0xff] %v14345_v5  ;;  %v14349_v25 = vadd.f32 %v13767_v61, %v20247_v42  ;;  %v14359_v55 = vmul.f32 0.020408163, %v5300_v19  ;;  %5410 = vadd.xlane.f32.xlu0 %v5409_v48  ;;  %v5412_v61 = vsel %vm67_vm0, %v5134_v21, 0.0  ;;  %v5132_v42 = vmul.f32 %v14292_v31, %v14292_v31  ;;  %v20255_v21 = vld [vmem:[#allocation44_spill] sm:$0xff] }
 0x437   :  { %v10283_v51 = vpop.eup %10282  ;;  %v20250_v11 = vld [vmem:[#allocation79_spill] sm:$0xff]  ;;  %v4515_v36 = vpop.xlane.xlu0 %4514  ;;  %v14368_v5 = vmul.f32 %v10281_v16, %v6214_v17  ;;  %v6212_v31 = vsub.f32 %v20255_v21, %v14222_v2 }
 0x438   :  { %20248 = vst [vmem:[#allocation40_spill] sm:$0xff] %v14349_v25  ;;  %v6211_v47 = vsub.f32 %v20250_v11, %v14220_v29  ;;  %v14366_v10 = vpop.f32.mrf.mxu0  ;;  %5413 = vadd.xlane.f32.xlu1 %v5412_v61  ;;  %v14375_v11 = vpop.f32.mrf.mxu1  ;;  %v5406_v61 = vsel %vm67_vm0, %v5132_v42, 0.0  ;;  %v4621_v15 = vsel %vm67_vm0, %v14349_v25, 0.0  ;;  %v20265_v42 = vld [vmem:[#allocation66_spill] sm:$0xff] }
 0x439   :  { %20251 = vst [vmem:[#allocation79_spill] sm:$0xff] %v14366_v10  ;;  %20252 = vst [vmem:[#allocation162_spill] sm:$0xff] %v14368_v5  ;;  %v10285_v19 = vpop.eup %10284  ;;  %v4518_v48 = vpop.xlane.xlu1 %4517  ;;  %v20256_v10 = vld [vmem:[#allocation57_spill] sm:$0xff]  ;;  %v14402_v5 = vadd.f32 %v13792_v40, %v20265_v42 }
 0x43a   :  { %v3520_v20 = vpop.f32.mrf.mxu0  ;;  %v14373_v29 = vmul.f32 %v10283_v51, %v6211_v47  ;;  %20254 = vst [vmem:[#allocation164_spill] sm:$0xff] %v14375_v11  ;;  %5404 = vadd.xlane.f32.xlu0 %v5403_v13  ;;  %v14381_v17 = vadd.f32 %v13781_v49, %v20256_v10  ;;  %v14390_v51 = vmul.f32 %v10285_v19, %v6212_v31  ;;  %v20261_v47 = vld [vmem:[#allocation42_spill] sm:$0xff]  ;;  %v14396_v10 = vpop.f32.mrf.mxu1  ;;  %v14398_v21 = vmul.f32 0.020408163, %v4518_v48 }
 0x43b   :  { %v4509_v16 = vpop.xlane.xlu0 %4508  ;;  %v14388_v20 = vmul.f32 0.020408163, %v4515_v36  ;;  %v14394_v2 = vadd.f32 %v13776_v57, %v20261_v47  ;;  %20263 = vst [vmem:[#allocation167_spill] sm:$0xff] %v14396_v10  ;;  %20266 = vst [vmem:[#allocation66_spill] sm:$0xff] %v14402_v5  ;;  %v5137_v48 = vmul.f32 %v14349_v25, %v14349_v25  ;;  %v4618_v11 = vsel %vm67_vm0, %v14402_v5, 0.0 }
 0x43c   :  { %20253 = vst [vmem:[#allocation163_spill] sm:$0xff] %v14373_v29  ;;  %20257 = vst [vmem:[#allocation44_spill] sm:$0xff] %v14381_v17  ;;  %v14386_v9 = vpop.f32.mrf.mxu0  ;;  %5407 = vadd.xlane.f32.xlu1 %v5406_v61  ;;  %v4624_v31 = vsel %vm67_vm0, %v14381_v17, 0.0  ;;  %v14412_v61 = vmul.f32 0.020408163, %v4509_v16  ;;  %v14420_v42 = vpop.f32.mrf.mxu1 }
 0x43d   :  { %20258 = vst [vmem:[#allocation57_spill] sm:$0xff] %v14386_v9  ;;  %20259 = vst [vmem:[#allocation165_spill] sm:$0xff] %v14388_v20  ;;  %v4512_v13 = vpop.xlane.xlu1 %4511  ;;  %v14410_v57 = vmul.f32 %v14388_v20, %v14388_v20  ;;  %v4615_v40 = vsel %vm67_vm0, %v14394_v2, 0.0 }
 0x43e   :  { %20260 = vst [vmem:[#allocation166_spill] sm:$0xff] %v14390_v51  ;;  %20262 = vst [vmem:[#allocation42_spill] sm:$0xff] %v14394_v2  ;;  %v3525_v49 = vpop.f32.mrf.mxu0  ;;  %4622 = vadd.xlane.f32.xlu0 %v4621_v15  ;;  %v14424_v51 = vmul.f32 %v14398_v21, %v14398_v21  ;;  %v14426_v29 = vmul.f32 0.020408163, %v4512_v13  ;;  %v14440_v10 = vmul.f32 %v14412_v61, %v14412_v61 }
 0x43f   :  { %20264 = vst [vmem:[#allocation168_spill] sm:$0xff] %v14398_v21  ;;  %v5315_v36 = vpop.xlane.xlu0 %5314  ;;  %20268 = vst [vmem:[#allocation170_spill] sm:$0xff] %v14412_v61 }
 0x440   :  { %v14406_v19 = vpop.f32.mrf.mxu0  ;;  %v14414_v47 = vmul.f32 0.020408163, %v5315_v36  ;;  %4625 = vadd.xlane.f32.xlu1 %v4624_v31  ;;  %20269 = vst [vmem:[#allocation171_spill] sm:$0xff] %v14426_v29 }
 0x441   :  { %20267 = vst [vmem:[#allocation169_spill] sm:$0xff] %v14406_v19  ;;  %v5318_v15 = vpop.xlane.xlu1 %5317  ;;  %v5135_v19 = vmul.f32 %v14394_v2, %v14394_v2 }
 0x442   :  { %v3528_v49 = vpop.f32.mrf.mxu0  ;;  %v14430_v36 = vmul.f32 0.020408163, %v5318_v15  ;;  %4616 = vadd.xlane.f32.xlu0 %v4615_v40  ;;  %v5421_v40 = vsel %vm67_vm0, %v5137_v48, 0.0 }
 0x443   :  { %v5309_v31 = vpop.xlane.xlu0 %5308  ;;  %v5138_v49 = vmul.f32 %v14381_v17, %v14381_v17  ;;  %v14449_v17 = vpop.f32.mrf.mxu1 }
 0x444   :  { %v14436_v25 = vpop.f32.mrf.mxu0  ;;  %v14444_v16 = vmul.f32 0.020408163, %v5309_v31  ;;  %4619 = vadd.xlane.f32.xlu1 %v4618_v11  ;;  %20271 = vst [vmem:[#allocation173_spill] sm:$0xff] %v14449_v17  ;;  %v20272_v11 = vld [vmem:[#allocation9_spill] sm:$0xff] }
 0x445   :  { %20270 = vst [vmem:[#allocation172_spill] sm:$0xff] %v14436_v25  ;;  %v5312_v15 = vpop.xlane.xlu1 %5311  ;;  %v14453_v25 = vmul.f32 %v14426_v29, %v14426_v29  ;;  %v14461_v31 = vadd.f32 %v13795_v18, %v20272_v11  ;;  %v5424_v2 = vsel %vm67_vm0, %v5138_v49, 0.0  ;;  %v9758_v58 = vpop.f32.mrf.mxu1  ;;  %v20275_v18 = vld [vmem:[#allocation85_spill] sm:$0xff] }
 0x446   :  { %v3533_v9 = vpop.f32.mrf.mxu0  ;;  %v14457_v13 = vmul.f32 0.020408163, %v5312_v15  ;;  %5422 = vadd.xlane.f32.xlu0 %v5421_v40  ;;  %v5415_v15 = vsel %vm67_vm0, %v5135_v19, 0.0  ;;  %v14473_v11 = vadd.f32 %v13812_v44, %v20275_v18 }
 0x447   :  { %20273 = vst [vmem:[#allocation9_spill] sm:$0xff] %v14461_v31  ;;  %v4527_v48 = vpop.xlane.xlu0 %4526  ;;  %v5136_v9 = vmul.f32 %v14402_v5, %v14402_v5  ;;  %v14486_v12 = vpop.f32.mrf.mxu1 }
 0x448   :  { %v14466_v17 = vpop.f32.mrf.mxu0  ;;  %5425 = vadd.xlane.f32.xlu1 %v5424_v2  ;;  %20276 = vst [vmem:[#allocation85_spill] sm:$0xff] %v14473_v11  ;;  %v14480_v50 = vmul.f32 0.020408163, %v4527_v48  ;;  %v20279_v2 = vld [vmem:[#allocation90_spill] sm:$0xff]  ;;  %20281 = vst [vmem:[#allocation177_spill] sm:$0xff] %v14486_v12  ;;  %v4636_v48 = vsel %vm67_vm0, %v14473_v11, 0.0 }
 0x449   :  { %20274 = vst [vmem:[#allocation174_spill] sm:$0xff] %v14466_v17  ;;  %v4530_v27 = vpop.xlane.xlu1 %4529  ;;  %v5418_v4 = vsel %vm67_vm0, %v5136_v9, 0.0  ;;  %v4633_v17 = vsel %vm67_vm0, %v14461_v31, 0.0  ;;  %v14484_v19 = vadd.f32 %v13806_v3, %v20279_v2  ;;  %v20283_v9 = vld [vmem:[#allocation87_spill] sm:$0xff]  ;;  %v14510_v12 = vpop.f32.mrf.mxu1 }
 0x44a   :  { %v3536_v40 = vpop.f32.mrf.mxu0  ;;  %5416 = vadd.xlane.f32.xlu0 %v5415_v15  ;;  %20278 = vst [vmem:[#allocation176_spill] sm:$0xff] %v14480_v50  ;;  %v14488_v44 = vmul.f32 0.020408163, %v4530_v27  ;;  %v14492_v18 = vadd.f32 %v13822_v1, %v20283_v9  ;;  %v14500_v3 = vmul.f32 %v14480_v50, %v14480_v50 }
 0x44b   :  { %v4521_v49 = vpop.xlane.xlu0 %4520  ;;  %20280 = vst [vmem:[#allocation90_spill] sm:$0xff] %v14484_v19  ;;  %v4627_v1 = vsel %vm67_vm0, %v14484_v19, 0.0  ;;  %v4228_v29 = vpop.f32.mrf.mxu1 }
 0x44c   :  { %v14478_v5 = vpop.f32.mrf.mxu0  ;;  %5419 = vadd.xlane.f32.xlu1 %v5418_v4  ;;  %20282 = vst [vmem:[#allocation178_spill] sm:$0xff] %v14488_v44  ;;  %20284 = vst [vmem:[#allocation87_spill] sm:$0xff] %v14492_v18  ;;  %v14502_v2 = vmul.f32 0.020408163, %v4521_v49  ;;  %v4630_v6 = vsel %vm67_vm0, %v14492_v18, 0.0 }
 0x44d   :  { %20277 = vst [vmem:[#allocation175_spill] sm:$0xff] %v14478_v5  ;;  %v4524_v15 = vpop.xlane.xlu1 %4523  ;;  %v14560_v61 = vpop.f32.mrf.mxu1 }
 0x44e   :  { %v3541_v40 = vpop.f32.mrf.mxu0  ;;  %4634 = vadd.xlane.f32.xlu0 %v4633_v17  ;;  %20286 = vst [vmem:[#allocation180_spill] sm:$0xff] %v14502_v2  ;;  %v5141_v17 = vmul.f32 %v14461_v31, %v14461_v31  ;;  %v14516_v5 = vmul.f32 0.020408163, %v4524_v15  ;;  %v14528_v30 = vmul.f32 %v14502_v2, %v14502_v2  ;;  %20292 = vst [vmem:[#allocation184_spill] sm:$0xff] %v14560_v61 }
 0x44f   :  { %v5327_v39 = vpop.xlane.xlu0 %5326 }
 0x450   :  { %v14496_v4 = vpop.f32.mrf.mxu0  ;;  %v14504_v40 = vmul.f32 0.020408163, %v5327_v39  ;;  %4637 = vadd.xlane.f32.xlu1 %v4636_v48  ;;  %20287 = vst [vmem:[#allocation181_spill] sm:$0xff] %v14516_v5  ;;  %v5433_v39 = vsel %vm67_vm0, %v5141_v17, 0.0  ;;  %v14542_v2 = vmul.f32 %v14516_v5, %v14516_v5 }
 0x451   :  { %20285 = vst [vmem:[#allocation179_spill] sm:$0xff] %v14496_v4  ;;  %v5330_v27 = vpop.xlane.xlu1 %5329  ;;  %v14514_v4 = vmul.f32 %v14488_v44, %v14488_v44 }
 0x452   :  { %v3544_v9 = vpop.f32.mrf.mxu0  ;;  %v14520_v49 = vmul.f32 0.020408163, %v5330_v27  ;;  %4628 = vadd.xlane.f32.xlu0 %v4627_v1 }
 0x453   :  { %v5321_v48 = vpop.xlane.xlu0 %5320  ;;  %v5142_v9 = vmul.f32 %v14473_v11, %v14473_v11  ;;  %v5139_v11 = vmul.f32 %v14484_v19, %v14484_v19 }
 0x454   :  { %v3547_v31 = vpop.f32.mrf.mxu0  ;;  %v14532_v44 = vmul.f32 0.020408163, %v5321_v48  ;;  %4631 = vadd.xlane.f32.xlu1 %v4630_v6  ;;  %v20289_v6 = vld [vmem:[#allocation99_spill] sm:$0xff] }
 0x455   :  { %v14535_v27 = vadd.f32 %v14420_v42, %v3547_v31  ;;  %v5324_v1 = vpop.xlane.xlu1 %5323  ;;  %v14550_v42 = vadd.f32 %v20289_v6, %v13770_v46  ;;  %v5436_v17 = vsel %vm67_vm0, %v5142_v9, 0.0  ;;  %v20293_v46 = vld [vmem:[#allocation92_spill] sm:$0xff]  ;;  %v20294_v6 = vld [vmem:[#allocation102_spill] sm:$0xff] }
 0x456   :  { %v3549_v50 = vpop.f32.mrf.mxu0  ;;  %v14546_v15 = vmul.f32 0.020408163, %v5324_v1  ;;  %5434 = vadd.xlane.f32.xlu0 %v5433_v39  ;;  %v5427_v1 = vsel %vm67_vm0, %v5139_v11, 0.0  ;;  %v14564_v9 = vadd.f32 %v20294_v6, %v20293_v46  ;;  %v20298_v11 = vld [vmem:[#allocation73_spill] sm:$0xff]  ;;  %v4231_v46 = vpop.f32.mrf.mxu1 }
 0x457   :  { %20288 = vst [vmem:[#allocation182_spill] sm:$0xff] %v14535_v27  ;;  %20290 = vst [vmem:[#allocation99_spill] sm:$0xff] %v14550_v42  ;;  %v4539_v31 = vpop.xlane.xlu0 %4538  ;;  %v5140_v50 = vmul.f32 %v14492_v18, %v14492_v18  ;;  %v4645_v19 = vsel %vm67_vm0, %v14550_v42, 0.0 }
 0x458   :  { %v3550_v27 = vpop.f32.mrf.mxu0  ;;  %5437 = vadd.xlane.f32.xlu1 %v5436_v17  ;;  %20295 = vst [vmem:[#allocation92_spill] sm:$0xff] %v14564_v9  ;;  %v14569_v20 = vmul.f32 0.020408163, %v4539_v31 }
 0x459   :  { %v4542_v5 = vpop.xlane.xlu1 %4541  ;;  %v14558_v48 = vadd.f32 %v9758_v58, %v3550_v27  ;;  %v5430_v18 = vsel %vm67_vm0, %v5140_v50, 0.0  ;;  %v20299_v27 = vld [vmem:[#allocation101_spill] sm:$0xff] }
 0x45a   :  { %v3552_v39 = vpop.f32.mrf.mxu0  ;;  %5428 = vadd.xlane.f32.xlu0 %v5427_v1  ;;  %20296 = vst [vmem:[#allocation102_spill] sm:$0xff] %v14569_v20  ;;  %v14577_v6 = vmul.f32 0.020408163, %v4542_v5  ;;  %v20302_v50 = vld [vmem:[#allocation81_spill] sm:$0xff]  ;;  %v14587_v31 = vmul.f32 %v14569_v20, %v14569_v20 }
 0x45b   :  { %20291 = vst [vmem:[#allocation183_spill] sm:$0xff] %v14558_v48  ;;  %v4533_v21 = vpop.xlane.xlu0 %4532  ;;  %v14575_v39 = vadd.f32 %v20299_v27, %v20298_v11  ;;  %v20303_v48 = vld [vmem:[#allocation105_spill] sm:$0xff]  ;;  %v5145_v11 = vmul.f32 %v14550_v42, %v14550_v42 }
 0x45c   :  { %v3555_v17 = vpop.f32.mrf.mxu0  ;;  %5431 = vadd.xlane.f32.xlu1 %v5430_v18  ;;  %20301 = vst [vmem:[#allocation101_spill] sm:$0xff] %v14577_v6  ;;  %v14581_v37 = vadd.f32 %v20303_v48, %v20302_v50  ;;  %v4648_v18 = vsel %vm67_vm0, %v14564_v9, 0.0  ;;  %v14599_v50 = vpop.f32.mrf.mxu1 }
 0x45d   :  { %v14571_v58 = vadd.f32 %v4228_v29, %v3555_v17  ;;  %20300 = vst [vmem:[#allocation73_spill] sm:$0xff] %v14575_v39  ;;  %v4536_v1 = vpop.xlane.xlu1 %4535  ;;  %v14589_v17 = vmul.f32 0.020408163, %v4533_v21  ;;  %v4639_v48 = vsel %vm67_vm0, %v14575_v39, 0.0  ;;  %20307 = vst [vmem:[#allocation187_spill] sm:$0xff] %v14599_v50 }
 0x45e   :  { %v3557_v61 = vpop.f32.mrf.mxu0  ;;  %4646 = vadd.xlane.f32.xlu0 %v4645_v19  ;;  %20304 = vst [vmem:[#allocation81_spill] sm:$0xff] %v14581_v37  ;;  %v14605_v21 = vmul.f32 0.020408163, %v4536_v1  ;;  %v4244_v20 = vpop.f32.mrf.mxu1 }
 0x45f   :  { %20297 = vst [vmem:[#allocation185_spill] sm:$0xff] %v14571_v58  ;;  %v5339_v56 = vpop.xlane.xlu0 %5338  ;;  %20305 = vst [vmem:[#allocation105_spill] sm:$0xff] %v14589_v17  ;;  %v14603_v58 = vmul.f32 %v14577_v6, %v14577_v6 }
 0x460   :  { %v3558_v29 = vpop.f32.mrf.mxu0  ;;  %v14591_v61 = vmul.f32 0.020408163, %v5339_v56  ;;  %4649 = vadd.xlane.f32.xlu1 %v4648_v18  ;;  %20309 = vst [vmem:[#allocation189_spill] sm:$0xff] %v14605_v21  ;;  %v5445_v56 = vsel %vm67_vm0, %v5145_v11, 0.0  ;;  %v14649_v22 = vpop.f32.mrf.mxu1 }
 0x461   :  { %v14593_v5 = vadd.f32 %v4231_v46, %v3558_v29  ;;  %v5342_v19 = vpop.xlane.xlu1 %5341  ;;  %20308 = vst [vmem:[#allocation188_spill] sm:$0xff] %v14603_v58  ;;  %v4642_v29 = vsel %vm67_vm0, %v14581_v37, 0.0  ;;  %20319 = vst [vmem:[#allocation195_spill] sm:$0xff] %v14649_v22 }
 0x462   :  { %v3560_v27 = vpop.f32.mrf.mxu0  ;;  %v14609_v46 = vmul.f32 0.020408163, %v5342_v19  ;;  %4640 = vadd.xlane.f32.xlu0 %v4639_v48 }
 0x463   :  { %20306 = vst [vmem:[#allocation186_spill] sm:$0xff] %v14593_v5  ;;  %v5333_v18 = vpop.xlane.xlu0 %5332  ;;  %v5146_v27 = vmul.f32 %v14564_v9, %v14564_v9  ;;  %v14617_v5 = vmul.f32 %v14589_v17, %v14589_v17  ;;  %v5143_v9 = vmul.f32 %v14575_v39, %v14575_v39  ;;  %v14631_v17 = vmul.f32 %v14605_v21, %v14605_v21 }
 0x464   :  { %v3563_v50 = vpop.f32.mrf.mxu0  ;;  %v14621_v42 = vmul.f32 0.020408163, %v5333_v18  ;;  %4643 = vadd.xlane.f32.xlu1 %v4642_v29 }
 0x465   :  { %20310 = vst [vmem:[#allocation190_spill] sm:$0xff] %v14617_v5  ;;  %v14624_v19 = vadd.f32 %v14510_v12, %v3563_v50  ;;  %v5336_v48 = vpop.xlane.xlu1 %5335  ;;  %20313 = vst [vmem:[#allocation193_spill] sm:$0xff] %v14631_v17  ;;  %v20315_v12 = vld [vmem:[#allocation100_spill] sm:$0xff]  ;;  %v20316_v50 = vld [vmem:[#allocation106_spill] sm:$0xff] }
 0x466   :  { %20311 = vst [vmem:[#allocation191_spill] sm:$0xff] %v14621_v42  ;;  %v3565_v6 = vpop.f32.mrf.mxu0  ;;  %v14635_v1 = vmul.f32 0.020408163, %v5336_v48  ;;  %5446 = vadd.xlane.f32.xlu0 %v5445_v56  ;;  %v14639_v29 = vadd.f32 %v20316_v50, %v20315_v12  ;;  %v5439_v48 = vsel %vm67_vm0, %v5143_v9, 0.0  ;;  %v20320_v12 = vld [vmem:[#allocation103_spill] sm:$0xff]  ;;  %v20325_v9 = vld [vmem:[#allocation94_spill] sm:$0xff] }
 0x467   :  { %20312 = vst [vmem:[#allocation192_spill] sm:$0xff] %v14624_v19  ;;  %v4551_v11 = vpop.xlane.xlu0 %4550  ;;  %v5448_v19 = vsel %vm67_vm0, %v5146_v27, 0.0  ;;  %v5144_v6 = vmul.f32 %v14581_v37, %v14581_v37  ;;  %v20321_v50 = vld [vmem:[#allocation111_spill] sm:$0xff] }
 0x468   :  { %20314 = vst [vmem:[#allocation194_spill] sm:$0xff] %v14635_v1  ;;  %20317 = vst [vmem:[#allocation100_spill] sm:$0xff] %v14639_v29  ;;  %v14644_v39 = vpop.f32.mrf.mxu0  ;;  %5449 = vadd.xlane.f32.xlu1 %v5448_v19  ;;  %v14653_v59 = vadd.f32 %v20321_v50, %v20320_v12  ;;  %v14658_v21 = vmul.f32 0.020408163, %v4551_v11  ;;  %v4247_v12 = vpop.f32.mrf.mxu1  ;;  %v20330_v1 = vld [vmem:[#allocation114_spill] sm:$0xff] }
 0x469   :  { %20318 = vst [vmem:[#allocation106_spill] sm:$0xff] %v14644_v39  ;;  %v4554_v18 = vpop.xlane.xlu1 %4553  ;;  %v5442_v37 = vsel %vm67_vm0, %v5144_v6, 0.0  ;;  %v4657_v39 = vsel %vm67_vm0, %v14639_v29, 0.0  ;;  %v20329_v6 = vld [vmem:[#allocation97_spill] sm:$0xff] }
 0x46a   :  { %v3568_v56 = vpop.f32.mrf.mxu0  ;;  %5440 = vadd.xlane.f32.xlu0 %v5439_v48  ;;  %20322 = vst [vmem:[#allocation103_spill] sm:$0xff] %v14653_v59  ;;  %20323 = vst [vmem:[#allocation111_spill] sm:$0xff] %v14658_v21  ;;  %v14666_v50 = vmul.f32 0.020408163, %v4554_v18  ;;  %v14670_v42 = vadd.f32 %v20330_v1, %v20329_v6 }
 0x46b   :  { %v4545_v27 = vpop.xlane.xlu0 %4544  ;;  %v20326_v56 = vld [vmem:[#allocation109_spill] sm:$0xff] }
 0x46c   :  { %v3571_v5 = vpop.f32.mrf.mxu0  ;;  %5443 = vadd.xlane.f32.xlu1 %v5442_v37  ;;  %v14664_v22 = vadd.f32 %v20326_v56, %v20325_v9  ;;  %20328 = vst [vmem:[#allocation109_spill] sm:$0xff] %v14666_v50  ;;  %20331 = vst [vmem:[#allocation97_spill] sm:$0xff] %v14670_v42  ;;  %v4660_v37 = vsel %vm67_vm0, %v14653_v59, 0.0  ;;  %v14678_v11 = vmul.f32 0.020408163, %v4545_v27  ;;  %v5149_v9 = vmul.f32 %v14639_v29, %v14639_v29 }
 0x46d   :  { %v14660_v19 = vadd.f32 %v4244_v20, %v3571_v5  ;;  %v4548_v48 = vpop.xlane.xlu1 %4547  ;;  %v14676_v5 = vmul.f32 %v14658_v21, %v14658_v21  ;;  %v14690_v6 = vmul.f32 %v14666_v50, %v14666_v50  ;;  %v5150_v29 = vmul.f32 %v14653_v59, %v14653_v59 }
 0x46e   :  { %20327 = vst [vmem:[#allocation94_spill] sm:$0xff] %v14664_v22  ;;  %v3573_v17 = vpop.f32.mrf.mxu0  ;;  %4658 = vadd.xlane.f32.xlu0 %v4657_v39  ;;  %20333 = vst [vmem:[#allocation197_spill] sm:$0xff] %v14678_v11  ;;  %v4651_v1 = vsel %vm67_vm0, %v14664_v22, 0.0 }
 0x46f   :  { %20324 = vst [vmem:[#allocation196_spill] sm:$0xff] %v14660_v19  ;;  %v5351_v58 = vpop.xlane.xlu0 %5350  ;;  %20332 = vst [vmem:[#allocation114_spill] sm:$0xff] %v14676_v5  ;;  %v14692_v19 = vmul.f32 0.020408163, %v4548_v48  ;;  %v20342_v48 = vld [vmem:[#allocation107_spill] sm:$0xff] }
 0x470   :  { %v3574_v20 = vpop.f32.mrf.mxu0  ;;  %v14680_v17 = vmul.f32 0.020408163, %v5351_v58  ;;  %4661 = vadd.xlane.f32.xlu1 %v4660_v37  ;;  %20335 = vst [vmem:[#allocation199_spill] sm:$0xff] %v14690_v6  ;;  %v20339_v37 = vld [vmem:[#allocation115_spill] sm:$0xff]  ;;  %v14710_v21 = vadd.f32 %v13910_v53, %v20342_v48  ;;  %v5457_v48 = vsel %vm67_vm0, %v5149_v9, 0.0  ;;  %v5460_v9 = vsel %vm67_vm0, %v5150_v29, 0.0 }
 0x471   :  { %v14682_v18 = vadd.f32 %v4247_v12, %v3574_v20  ;;  %v5354_v39 = vpop.xlane.xlu1 %5353  ;;  %20336 = vst [vmem:[#allocation200_spill] sm:$0xff] %v14692_v19  ;;  %v20338_v12 = vld [vmem:[#allocation116_spill] sm:$0xff] }
 0x472   :  { %v3576_v56 = vpop.f32.mrf.mxu0  ;;  %v14696_v27 = vmul.f32 0.020408163, %v5354_v39  ;;  %4652 = vadd.xlane.f32.xlu0 %v4651_v1  ;;  %v14700_v20 = vadd.f32 %v20339_v37, %v20338_v12  ;;  %20343 = vst [vmem:[#allocation107_spill] sm:$0xff] %v14710_v21  ;;  %v14714_v39 = vmul.f32 %v14678_v11, %v14678_v11  ;;  %v20346_v37 = vld [vmem:[#allocation112_spill] sm:$0xff]  ;;  %v5147_v11 = vmul.f32 %v14664_v22, %v14664_v22 }
 0x473   :  { %20334 = vst [vmem:[#allocation198_spill] sm:$0xff] %v14682_v18  ;;  %v5345_v18 = vpop.xlane.xlu0 %5344  ;;  %v4654_v56 = vsel %vm67_vm0, %v14670_v42, 0.0  ;;  %v14722_v58 = vadd.f32 %v13928_v45, %v20346_v37  ;;  %v5151_v1 = vmul.f32 %v14710_v21, %v14710_v21 }
 0x474   :  { %20337 = vst [vmem:[#allocation201_spill] sm:$0xff] %v14696_v27  ;;  %20340 = vst [vmem:[#allocation116_spill] sm:$0xff] %v14700_v20  ;;  %v14706_v50 = vpop.f32.mrf.mxu0  ;;  %v14718_v12 = vmul.f32 0.020408163, %v5345_v18  ;;  %4655 = vadd.xlane.f32.xlu1 %v4654_v56  ;;  %v14733_v18 = vmul.f32 %v14692_v19, %v14692_v19  ;;  %v20354_v19 = vld [vmem:[#allocation122_spill] sm:$0xff] }
 0x475   :  { %20341 = vst [vmem:[#allocation115_spill] sm:$0xff] %v14706_v50  ;;  %20344 = vst [vmem:[#allocation202_spill] sm:$0xff] %v14714_v39  ;;  %v20348_v50 = vld [vmem:[#allocation117_spill] sm:$0xff]  ;;  %v5348_v53 = vpop.xlane.xlu1 %5347 }
 0x476   :  { %20345 = vst [vmem:[#allocation203_spill] sm:$0xff] %v14718_v12  ;;  %20347 = vst [vmem:[#allocation112_spill] sm:$0xff] %v14722_v58  ;;  %v14726_v59 = vadd.f32 %v20348_v50, %v13919_v26  ;;  %v3581_v5 = vpop.f32.mrf.mxu0  ;;  %v14737_v45 = vmul.f32 0.020408163, %v5348_v53  ;;  %5458 = vadd.xlane.f32.xlu0 %v5457_v48  ;;  %v5148_v26 = vmul.f32 %v14670_v42, %v14670_v42  ;;  %v5451_v53 = vsel %vm67_vm0, %v5147_v11, 0.0  ;;  %v20353_v42 = vld [vmem:[#allocation120_spill] sm:$0xff] }
 0x477   :  { %20350 = vst [vmem:[#allocation204_spill] sm:$0xff] %v14733_v18  ;;  %v4563_v50 = vpop.xlane.xlu0 %4562  ;;  %v5152_v48 = vmul.f32 %v14722_v58, %v14722_v58  ;;  %v14753_v39 = vadd.f32 %v20354_v19, %v20353_v42  ;;  %v20357_v18 = vld [vmem:[#allocation127_spill] sm:$0xff]  ;;  %v20362_v42 = vld [vmem:[#allocation124_spill] sm:$0xff] }
 0x478   :  { %20349 = vst [vmem:[#allocation117_spill] sm:$0xff] %v14726_v59  ;;  %20351 = vst [vmem:[#allocation205_spill] sm:$0xff] %v14737_v45  ;;  %v14742_v37 = vpop.f32.mrf.mxu0  ;;  %5461 = vadd.xlane.f32.xlu1 %v5460_v9  ;;  %v5454_v29 = vsel %vm67_vm0, %v5148_v26, 0.0  ;;  %v5153_v9 = vmul.f32 %v14700_v20, %v14700_v20  ;;  %v5154_v5 = vmul.f32 %v14726_v59, %v14726_v59  ;;  %v20359_v45 = vld [vmem:[#allocation130_spill] sm:$0xff]  ;;  %v20360_v12 = vld [vmem:[#allocation119_spill] sm:$0xff]  ;;  %v4669_v26 = vsel %vm67_vm0, %v14700_v20, 0.0 }
 0x479   :  { %20352 = vst [vmem:[#allocation206_spill] sm:$0xff] %v14742_v37  ;;  %v4566_v22 = vpop.xlane.xlu1 %4565  ;;  %20355 = vst [vmem:[#allocation120_spill] sm:$0xff] %v14753_v39  ;;  %v20356_v37 = vld [vmem:[#allocation125_spill] sm:$0xff]  ;;  %v14770_v19 = vadd.f32 %v20362_v42, %v14001_v63  ;;  %v14776_v27 = vmul.f32 0.020408163, %v4563_v50  ;;  %v14787_v63 = vadd.f32 %v13999_v28, %v14019_v7  ;;  %v14796_v42 = vsel %vm67_vm0, %v5152_v48, 0.0 }
 0x47a   :  { %v3584_v56 = vpop.f32.mrf.mxu0  ;;  %5452 = vadd.xlane.f32.xlu0 %v5451_v53  ;;  %v14762_v11 = vadd.f32 %v20357_v18, %v20356_v37  ;;  %v4663_v18 = vsel %vm67_vm0, %v14710_v21, 0.0  ;;  %v14791_v37 = vadd.f32 %v14036_v41, %v14040_v35  ;;  %v14802_v21 = vmul.f32 0.020408163, %v4566_v22 }
 0x47b   :  { %v14766_v56 = vadd.f32 %v20360_v12, %v20359_v45  ;;  %20363 = vst [vmem:[#allocation127_spill] sm:$0xff] %v14770_v19  ;;  %v4557_v53 = vpop.xlane.xlu0 %4556  ;;  %v4666_v12 = vsel %vm67_vm0, %v14722_v58, 0.0  ;;  %v14783_v45 = vsel %vm67_vm0, %v5151_v1, 0.0  ;;  %20365 = vst [vmem:[#allocation119_spill] sm:$0xff] %v14787_v63  ;;  %v20367_v58 = vld [vmem:[#allocation129_spill] sm:$0xff]  ;;  %v5469_v28 = vsel %vm67_vm0, %v5153_v9, 0.0 }
 0x47c   :  { %20358 = vst [vmem:[#allocation122_spill] sm:$0xff] %v14762_v11  ;;  %v14774_v6 = vpop.f32.mrf.mxu0  ;;  %5455 = vadd.xlane.f32.xlu1 %v5454_v29  ;;  %20366 = vst [vmem:[#allocation124_spill] sm:$0xff] %v14791_v37  ;;  %v4672_v29 = vsel %vm67_vm0, %v14726_v59, 0.0  ;;  %v14800_v1 = vadd.f32 %v20367_v58, %v14064_v34  ;;  %v5472_v7 = vsel %vm67_vm0, %v5154_v5, 0.0  ;;  %v20370_v41 = vsub.f32 %v14306_v32, %v14302_v52 }
 0x47d   :  { %20361 = vst [vmem:[#allocation125_spill] sm:$0xff] %v14766_v56  ;;  %20364 = vst [vmem:[#allocation130_spill] sm:$0xff] %v14774_v6  ;;  %v4560_v50 = vpop.xlane.xlu1 %4559  ;;  %v14811_v48 = vadd.f32 %v14017_v62, %v14085_v0  ;;  %v14819_v22 = vsel %vm67_vm0, %v14753_v39, 0.0  ;;  %v14825_v5 = vmul.f32 %v14776_v27, %v14776_v27  ;;  %v14827_v52 = vmul.f32 0.020408163, %v4557_v53 }
 0x47e   :  { %v3589_v6 = vpop.f32.mrf.mxu0  ;;  %20368 = vst [vmem:[#allocation129_spill] sm:$0xff] %v14800_v1  ;;  %20369 = vst [vmem:[#allocation207_spill] sm:$0xff] %v14802_v21  ;;  %4670 = vadd.xlane.f32.xlu0 %v4669_v26  ;;  %v6377_v35 = vadd.f32 1e-05, %v20370_v41  ;;  %v14833_v62 = vsel %vm67_vm0, %v14762_v11, 0.0  ;;  %v5155_v9 = vmul.f32 %v14753_v39, %v14753_v39  ;;  %v5156_v26 = vmul.f32 %v14762_v11, %v14762_v11  ;;  %v20421_v59 = vld [vmem:[#allocation204_spill] sm:$0xff] }
 0x47f   :  { %20371 = vst [vmem:[#allocation208_spill] sm:$0xff] %v14811_v48  ;;  %v14815_v6 = vadd.f32 %v14083_v8, %v14104_v60  ;;  %v5363_v34 = vpop.xlane.xlu0 %5362  ;;  %v20374_v8 = vsub.f32 %v14322_v43, %v14316_v14  ;;  %v14844_v53 = vsel %vm67_vm0, %v14766_v56, 0.0  ;;  %v14848_v41 = vmul.f32 %v14802_v21, %v14802_v21 }
 0x480   :  { %v14821_v58 = vpop.f32.mrf.mxu0  ;;  %v14829_v32 = vmul.f32 0.020408163, %v5363_v34  ;;  %4673 = vadd.xlane.f32.xlu1 %v4672_v29  ;;  %v14850_v34 = vmul.f32 0.020408163, %v4560_v50  ;;  %10286 = vrsqrt.f32 %v6377_v35  ;;  %v5157_v50 = vmul.f32 %v14766_v56, %v14766_v56  ;;  %v20420_v56 = vld [vmem:[#allocation205_spill] sm:$0xff] }
 0x481   :  { %20372 = vst [vmem:[#allocation209_spill] sm:$0xff] %v14815_v6  ;;  %20373 = vst [vmem:[#allocation210_spill] sm:$0xff] %v14821_v58  ;;  %v6378_v0 = vadd.f32 1e-05, %v20374_v8  ;;  %v5366_v60 = vpop.xlane.xlu1 %5365  ;;  %v20375_v8 = vsub.f32 %v14338_v38, %v14334_v54 }
 0x482   :  { %v3592_v29 = vpop.f32.mrf.mxu0  ;;  %v14854_v43 = vmul.f32 0.020408163, %v5366_v60  ;;  %4664 = vadd.xlane.f32.xlu0 %v4663_v18  ;;  %v20378_v60 = vsub.f32 %v14359_v55, %v14355_v33  ;;  %v14872_v18 = vmul.f32 %v14827_v52, %v14827_v52  ;;  %v5158_v33 = vmul.f32 %v14770_v19, %v14770_v19 }
 0x483   :  { %v6375_v58 = vadd.f32 1e-05, %v20375_v8  ;;  %v14861_v29 = vadd.f32 %v14120_v24, %v14124_v23  ;;  %v5357_v11 = vpop.xlane.xlu0 %5356  ;;  %10288 = vrsqrt.f32 %v6378_v0  ;;  %v20379_v24 = vsub.f32 %v14414_v47, %v14410_v57  ;;  %v20409_v57 = vld [vmem:[#allocation199_spill] sm:$0xff] }
 0x484   :  { %v14865_v39 = vpop.f32.mrf.mxu0  ;;  %v6376_v14 = vadd.f32 1e-05, %v20378_v60  ;;  %v14876_v38 = vmul.f32 0.020408163, %v5357_v11  ;;  %4667 = vadd.xlane.f32.xlu1 %v4666_v12  ;;  %v14882_v8 = vsel %vm67_vm0, %v5155_v9, 0.0  ;;  %v20380_v60 = vsub.f32 %v14430_v36, %v14424_v51 }
 0x485   :  { %20376 = vst [vmem:[#allocation211_spill] sm:$0xff] %v14861_v29  ;;  %20377 = vst [vmem:[#allocation212_spill] sm:$0xff] %v14865_v39  ;;  %v6381_v23 = vadd.f32 1e-05, %v20379_v24  ;;  %v5360_v35 = vpop.xlane.xlu1 %5359  ;;  %v14891_v11 = vmul.f32 %v14850_v34, %v14850_v34  ;;  %10290 = vrsqrt.f32 %v6375_v58  ;;  %v20381_v12 = vsub.f32 %v14444_v16, %v14440_v10 }
 0x486   :  { %v3597_v55 = vpop.f32.mrf.mxu0  ;;  %v6382_v54 = vadd.f32 1e-05, %v20380_v60  ;;  %v14895_v47 = vmul.f32 0.020408163, %v5360_v35  ;;  %5470 = vadd.xlane.f32.xlu0 %v5469_v28  ;;  %v14901_v24 = vsel %vm67_vm0, %v5156_v26, 0.0  ;;  %v14905_v51 = vsel %vm67_vm0, %v14770_v19, 0.0 }
 0x487   :  { %v6379_v0 = vadd.f32 1e-05, %v20381_v12  ;;  %v4575_v9 = vpop.xlane.xlu0 %4574  ;;  %10292 = vrsqrt.f32 %v6376_v14  ;;  %v20383_v35 = vsub.f32 %v14457_v13, %v14453_v25  ;;  %v14915_v10 = vsel %vm67_vm0, %v5157_v50, 0.0  ;;  %v20386_v50 = vld [vmem:[#allocation80_spill] sm:$0xff]  ;;  %v20387_v12 = vld [vmem:[#allocation89_spill] sm:$0xff] }
 0x488   :  { %v14907_v36 = vpop.f32.mrf.mxu0  ;;  %5473 = vadd.xlane.f32.xlu1 %v5472_v7  ;;  %10294 = vrsqrt.f32 %v6381_v23  ;;  %v20384_v16 = vsub.f32 %v14504_v40, %v14500_v3  ;;  %v14921_v60 = vsel %vm67_vm0, %v5158_v33, 0.0  ;;  %v5159_v25 = vmul.f32 %v14787_v63, %v14787_v63 }
 0x489   :  { %20382 = vst [vmem:[#allocation213_spill] sm:$0xff] %v14907_v36  ;;  %v6380_v28 = vadd.f32 1e-05, %v20383_v35  ;;  %v4578_v55 = vpop.xlane.xlu1 %4577  ;;  %10296 = vrsqrt.f32 %v6382_v54  ;;  %v20385_v7 = vsub.f32 %v14520_v49, %v14514_v4  ;;  %v14930_v23 = vadd.f32 %v20387_v12, %v20386_v50 }
 0x48a   :  { %v6385_v26 = vadd.f32 1e-05, %v20384_v16  ;;  %v3600_v13 = vpop.f32.mrf.mxu0  ;;  %5464 = vadd.xlane.f32.xlu0 %v14783_v45  ;;  %v5160_v3 = vmul.f32 %v14791_v37, %v14791_v37  ;;  %10298 = vrsqrt.f32 %v6379_v0  ;;  %v20389_v40 = vsub.f32 %v14532_v44, %v14528_v30 }
 0x48b   :  { %v6386_v14 = vadd.f32 1e-05, %v20385_v7  ;;  %20388 = vst [vmem:[#allocation80_spill] sm:$0xff] %v14930_v23  ;;  %v4569_v35 = vpop.xlane.xlu0 %4568  ;;  %v14940_v54 = vsel %vm67_vm0, %v14787_v63, 0.0  ;;  %v5161_v4 = vmul.f32 %v14800_v1, %v14800_v1  ;;  %10300 = vrsqrt.f32 %v6380_v28  ;;  %v20419_v63 = vld [vmem:[#allocation60_spill] sm:$0xff] }
 0x48c   :  { %v6383_v33 = vadd.f32 1e-05, %v20389_v40  ;;  %v20390_v49 = vsub.f32 %v14546_v15, %v14542_v2  ;;  %v14947_v16 = vmul.f32 0.020408163, %v4575_v9  ;;  %5467 = vadd.xlane.f32.xlu1 %v14796_v42  ;;  %v14952_v30 = vsel %vm67_vm0, %v14791_v37, 0.0 }
 0x48d   :  { %10302 = vrsqrt.f32 %v6385_v26  ;;  %v20391_v44 = vsub.f32 %v14591_v61, %v14587_v31  ;;  %v4572_v13 = vpop.xlane.xlu1 %4571  ;;  %v14958_v28 = vsel %vm67_vm0, %v5159_v25, 0.0  ;;  %v5162_v2 = vmul.f32 %v14811_v48, %v14811_v48  ;;  %v20393_v31 = vld [vmem:[#allocation188_spill] sm:$0xff] }
 0x48e   :  { %v6384_v45 = vadd.f32 1e-05, %v20390_v49  ;;  %10304 = vrsqrt.f32 %v6386_v14  ;;  %v14962_v15 = vmul.f32 0.020408163, %v4578_v55  ;;  %4676 = vadd.xlane.f32.xlu0 %v14819_v22  ;;  %v14966_v42 = vsel %vm67_vm0, %v5160_v3, 0.0  ;;  %v14982_v22 = vpop.eup %10286  ;;  %v20397_v3 = vld [vmem:[#allocation190_spill] sm:$0xff] }
 0x48f   :  { %v6389_v0 = vadd.f32 1e-05, %v20391_v44  ;;  %v14970_v9 = vsel %vm67_vm0, %v14800_v1, 0.0  ;;  %10306 = vrsqrt.f32 %v6383_v33  ;;  %v20394_v61 = vsub.f32 %v14609_v46, %v20393_v31  ;;  %v5375_v25 = vpop.xlane.xlu0 %5374  ;;  %v20396_v46 = vld [vmem:[#allocation191_spill] sm:$0xff] }
 0x490   :  { %20392 = vst [vmem:[#allocation89_spill] sm:$0xff] %v14962_v15  ;;  %v14977_v7 = vsel %vm67_vm0, %v14811_v48, 0.0  ;;  %v14980_v55 = vsel %vm67_vm0, %v5161_v4, 0.0  ;;  %10308 = vrsqrt.f32 %v6384_v45  ;;  %v14986_v14 = vmul.f32 %v14947_v16, %v14947_v16  ;;  %4679 = vadd.xlane.f32.xlu1 %v14833_v62  ;;  %v15001_v44 = vpop.eup %10288 }
 0x491   :  { %v6390_v26 = vadd.f32 1e-05, %v20394_v61  ;;  %v14988_v50 = vmul.f32 0.020408163, %v4569_v35  ;;  %v14990_v12 = vmul.f32 0.020408163, %v5375_v25  ;;  %10310 = vrsqrt.f32 %v6389_v0  ;;  %v5378_v4 = vpop.xlane.xlu1 %5377 }
 0x492   :  { %v20398_v40 = vsub.f32 %v20396_v46, %v20397_v3  ;;  %v14997_v49 = vsel %vm67_vm0, %v5162_v2, 0.0  ;;  %v5163_v45 = vmul.f32 %v14815_v6, %v14815_v6  ;;  %v15005_v35 = vmul.f32 %v14962_v15, %v14962_v15  ;;  %5476 = vadd.xlane.f32.xlu0 %v14882_v8  ;;  %v20401_v2 = vld [vmem:[#allocation194_spill] sm:$0xff]  ;;  %v20402_v61 = vld [vmem:[#allocation193_spill] sm:$0xff]  ;;  %v15025_v58 = vpop.eup %10290 }
 0x493   :  { %20395 = vst [vmem:[#allocation188_spill] sm:$0xff] %v14988_v50  ;;  %20399 = vst [vmem:[#allocation191_spill] sm:$0xff] %v14997_v49  ;;  %v15007_v31 = vmul.f32 0.020408163, %v4572_v13  ;;  %v6081_v62 = vsub.f32 %v14990_v12, %v14986_v14  ;;  %v15011_v0 = vmul.f32 0.020408163, %v5378_v4  ;;  %10312 = vrsqrt.f32 %v6390_v26  ;;  %v5369_v3 = vpop.xlane.xlu0 %5368 }
 0x494   :  { %v6387_v33 = vadd.f32 1e-05, %v20398_v40  ;;  %v20403_v25 = vsub.f32 %v20401_v2, %v20402_v61  ;;  %v15019_v40 = vsel %vm67_vm0, %v14815_v6, 0.0  ;;  %v15023_v13 = vsel %vm67_vm0, %v14861_v29, 0.0  ;;  %v20406_v14 = vld [vmem:[#allocation114_spill] sm:$0xff]  ;;  %5479 = vadd.xlane.f32.xlu1 %v14901_v24  ;;  %v15035_v61 = vpop.eup %10292  ;;  %v20459_v49 = vld [vmem:[#allocation96_spill] sm:$0xff] }
 0x495   :  { %20400 = vst [vmem:[#allocation190_spill] sm:$0xff] %v15007_v31  ;;  %20404 = vst [vmem:[#allocation194_spill] sm:$0xff] %v15019_v40  ;;  %v20407_v12 = vsub.f32 %v14680_v17, %v20406_v14  ;;  %v5919_v26 = vmul.f32 %v14988_v50, %v14988_v50  ;;  %v5759_v2 = vmul.f32 0.020408163, %v5369_v3  ;;  %v5372_v6 = vpop.xlane.xlu1 %5371  ;;  %v15041_v17 = vsel %vm67_vm0, %v5163_v45, 0.0  ;;  %v20413_v3 = vld [vmem:[#allocation203_spill] sm:$0xff] }
 0x496   :  { %v6388_v46 = vadd.f32 1e-05, %v20403_v25  ;;  %20405 = vst [vmem:[#allocation193_spill] sm:$0xff] %v15023_v13  ;;  %10314 = vrsqrt.f32 %v6387_v33  ;;  %v20408_v25 = vld [vmem:[#allocation201_spill] sm:$0xff]  ;;  %20411 = vst [vmem:[#allocation114_spill] sm:$0xff] %v15041_v17  ;;  %v15045_v14 = vmul.f32 %v14861_v29, %v14861_v29  ;;  %v20414_v4 = vld [vmem:[#allocation202_spill] sm:$0xff]  ;;  %v5920_v33 = vmul.f32 %v15007_v31, %v15007_v31  ;;  %4682 = vadd.xlane.f32.xlu0 %v14844_v53 }
 0x497   :  { %v6393_v8 = vadd.f32 1e-05, %v20407_v12  ;;  %v20410_v36 = vsub.f32 %v20408_v25, %v20409_v57  ;;  %v15047_v12 = vpop.eup %10294  ;;  %v20415_v24 = vsub.f32 %v20413_v3, %v20414_v4  ;;  %v6079_v1 = vsub.f32 %v5759_v2, %v5919_v26  ;;  %v20416_v45 = vld [vmem:[#allocation154_spill] sm:$0xff]  ;;  %v20417_v25 = vld [vmem:[#allocation61_spill] sm:$0xff]  ;;  %v20418_v29 = vld [vmem:[#allocation155_spill] sm:$0xff] }
 0x498   :  { %20412 = vst [vmem:[#allocation201_spill] sm:$0xff] %v15045_v14  ;;  %v5760_v57 = vmul.f32 0.020408163, %v5372_v6  ;;  %10316 = vrsqrt.f32 %v6388_v46  ;;  %v20422_v4 = vsub.f32 %v20420_v56, %v20421_v59  ;;  %v20423_v26 = vld [vmem:[#allocation158_spill] sm:$0xff]  ;;  %v20424_v6 = vld [vmem:[#allocation65_spill] sm:$0xff]  ;;  %v20425_v53 = vsub.f32 %v14829_v32, %v14825_v5  ;;  %4685 = vadd.xlane.f32.xlu1 %v14905_v51  ;;  %v20426_v46 = vld [vmem:[#allocation160_spill] sm:$0xff] }
 0x499   :  { %v6394_v39 = vadd.f32 1e-05, %v20410_v36  ;;  %v6391_v48 = vadd.f32 1e-05, %v20415_v24  ;;  %v15055_v36 = vpop.eup %10296  ;;  %v4587_v24 = vpop.xlane.xlu0 %4586  ;;  %10318 = vrsqrt.f32 %v6393_v8  ;;  %v20427_v14 = vld [vmem:[#allocation59_spill] sm:$0xff]  ;;  %v20428_v56 = vld [vmem:[#allocation165_spill] sm:$0xff]  ;;  %v20430_v2 = vsub.f32 %v14854_v43, %v14848_v41 }
 0x49a   :  { %v6392_v3 = vadd.f32 1e-05, %v20422_v4  ;;  %v15064_v20 = vpop.eup %10298  ;;  %v6397_v23 = vadd.f32 1e-05, %v20425_v53  ;;  %v6080_v37 = vsub.f32 %v5760_v57, %v5920_v33  ;;  %v20429_v4 = vld [vmem:[#allocation12_spill] sm:$0xff]  ;;  %v4590_v13 = vpop.xlane.xlu1 %4589  ;;  %v20433_v32 = vld [vmem:[#allocation38_spill] sm:$0xff]  ;;  %v20436_v59 = vsub.f32 %v14876_v38, %v14872_v18  ;;  %5482 = vadd.xlane.f32.xlu0 %v14915_v10 }
 0x49b   :  { %v15072_v19 = vpop.eup %10300  ;;  %10320 = vrsqrt.f32 %v6394_v39  ;;  %v6398_v8 = vadd.f32 1e-05, %v20430_v2  ;;  %v20432_v5 = vld [vmem:[#allocation168_spill] sm:$0xff]  ;;  %v20434_v51 = vld [vmem:[#allocation170_spill] sm:$0xff]  ;;  %v20438_v41 = vld [vmem:[#allocation171_spill] sm:$0xff]  ;;  %v20442_v33 = vsub.f32 %v14895_v47, %v14891_v11 }
 0x49c   :  { %v15081_v40 = vpop.eup %10302  ;;  %v20435_v57 = vld [vmem:[#allocation14_spill] sm:$0xff]  ;;  %10322 = vrsqrt.f32 %v6391_v48  ;;  %v6395_v31 = vadd.f32 1e-05, %v20436_v59  ;;  %v20439_v43 = vld [vmem:[#allocation11_spill] sm:$0xff]  ;;  %v6401_v10 = vadd.f32 1e-05, %v6081_v62  ;;  %5485 = vadd.xlane.f32.xlu1 %v14921_v60 }
 0x49d   :  { %20431 = vst [vmem:[#allocation199_spill] sm:$0xff] %v15081_v40  ;;  %v15091_v39 = vpop.eup %10304  ;;  %10324 = vrsqrt.f32 %v6392_v3  ;;  %v6396_v53 = vadd.f32 1e-05, %v20442_v33  ;;  %v4581_v48 = vpop.xlane.xlu0 %4580  ;;  %v20449_v3 = vld [vmem:[#allocation4_spill] sm:$0xff]  ;;  %v20451_v11 = vld [vmem:[#allocation91_spill] sm:$0xff]  ;;  %v20464_v17 = vld [vmem:[#allocation98_spill] sm:$0xff] }
 0x49e   :  { %20437 = vst [vmem:[#allocation203_spill] sm:$0xff] %v15091_v39  ;;  %v15100_v40 = vpop.eup %10306  ;;  %10326 = vrsqrt.f32 %v6397_v23  ;;  %v15104_v39 = vmul.f32 0.020408163, %v4587_v24  ;;  %v6399_v33 = vadd.f32 1e-05, %v6079_v1  ;;  %v20454_v23 = vld [vmem:[#allocation93_spill] sm:$0xff]  ;;  %4688 = vadd.xlane.f32.xlu0 %v14940_v54  ;;  %v20460_v1 = vsub.f32 %v15011_v0, %v15005_v35 }
 0x49f   :  { %20443 = vst [vmem:[#allocation202_spill] sm:$0xff] %v15100_v40  ;;  %v15107_v2 = vpop.eup %10308  ;;  %10328 = vrsqrt.f32 %v6398_v8  ;;  %v4584_v40 = vpop.xlane.xlu1 %4583  ;;  %v6400_v24 = vadd.f32 1e-05, %v6080_v37  ;;  %v15117_v18 = vmul.f32 0.020408163, %v4590_v13  ;;  %v20463_v13 = vld [vmem:[#allocation189_spill] sm:$0xff] }
 0x4a0   :  { %20446 = vst [vmem:[#allocation154_spill] sm:$0xff] %v15104_v39  ;;  %20447 = vst [vmem:[#allocation61_spill] sm:$0xff] %v15107_v2  ;;  %v15113_v15 = vpop.eup %10310  ;;  %10330 = vrsqrt.f32 %v6395_v31  ;;  %v20458_v2 = vld [vmem:[#allocation105_spill] sm:$0xff]  ;;  %v6402_v8 = vadd.f32 1e-05, %v20460_v1  ;;  %v5925_v37 = vmul.f32 %v15104_v39, %v15104_v39  ;;  %4691 = vadd.xlane.f32.xlu1 %v14952_v30  ;;  %v20471_v39 = vld [vmem:[#allocation110_spill] sm:$0xff] }
 0x4a1   :  { %20452 = vst [vmem:[#allocation155_spill] sm:$0xff] %v15113_v15  ;;  %20455 = vst [vmem:[#allocation60_spill] sm:$0xff] %v15117_v18  ;;  %10332 = vrsqrt.f32 %v6396_v53  ;;  %v5387_v15 = vpop.xlane.xlu0 %5386  ;;  %v15127_v50 = vpop.eup %10312  ;;  %v15131_v31 = vmul.f32 0.020408163, %v4581_v48  ;;  %v15138_v35 = vmul.f32 0.020408163, %v4584_v40  ;;  %v5926_v48 = vmul.f32 %v15117_v18, %v15117_v18 }
 0x4a2   :  { %20461 = vst [vmem:[#allocation205_spill] sm:$0xff] %v15127_v50  ;;  %10334 = vrsqrt.f32 %v6401_v10  ;;  %v5765_v54 = vmul.f32 0.020408163, %v5387_v15  ;;  %5488 = vadd.xlane.f32.xlu0 %v14958_v28  ;;  %v20469_v50 = vld [vmem:[#allocation108_spill] sm:$0xff]  ;;  %v20470_v38 = vld [vmem:[#allocation197_spill] sm:$0xff]  ;;  %v20478_v30 = vld [vmem:[#allocation123_spill] sm:$0xff] }
 0x4a3   :  { %20462 = vst [vmem:[#allocation204_spill] sm:$0xff] %v15131_v31  ;;  %10336 = vrsqrt.f32 %v6399_v33  ;;  %20467 = vst [vmem:[#allocation158_spill] sm:$0xff] %v15138_v35  ;;  %v5390_v0 = vpop.xlane.xlu1 %5389  ;;  %v15140_v1 = vpop.eup %10314  ;;  %v20472_v33 = vld [vmem:[#allocation200_spill] sm:$0xff]  ;;  %v20473_v40 = vld [vmem:[#allocation113_spill] sm:$0xff]  ;;  %v6235_v21 = vsub.f32 %v20478_v30, %v14827_v52 }
 0x4a4   :  { %10338 = vrsqrt.f32 %v6400_v24  ;;  %v6085_v10 = vsub.f32 %v5765_v54, %v5925_v37  ;;  %v5766_v15 = vmul.f32 0.020408163, %v5390_v0  ;;  %v5923_v24 = vmul.f32 %v15131_v31, %v15131_v31  ;;  %5491 = vadd.xlane.f32.xlu1 %v14966_v42  ;;  %v20474_v0 = vld [vmem:[#allocation118_spill] sm:$0xff] }
 0x4a5   :  { %10340 = vrsqrt.f32 %v6402_v8  ;;  %v5381_v47 = vpop.xlane.xlu0 %5380  ;;  %v10317_v59 = vpop.eup %10316  ;;  %v5924_v8 = vmul.f32 %v15138_v35, %v15138_v35  ;;  %v20476_v31 = vsub.f32 %v20424_v6, %v20423_v26  ;;  %v20479_v35 = vsub.f32 %v20427_v14, %v20426_v46 }
 0x4a6   :  { %v6405_v18 = vadd.f32 1e-05, %v6085_v10  ;;  %v6086_v37 = vsub.f32 %v5766_v15, %v5926_v48  ;;  %v5763_v54 = vmul.f32 0.020408163, %v5381_v47  ;;  %v15154_v28 = vpop.eup %10318  ;;  %4694 = vadd.xlane.f32.xlu0 %v14970_v9  ;;  %v20483_v9 = vsub.f32 %v20419_v63, %v20418_v29 }
 0x4a7   :  { %v5384_v53 = vpop.xlane.xlu1 %5383  ;;  %v15166_v48 = vmul.f32 %v15025_v58, %v20476_v31  ;;  %v15175_v26 = vmul.f32 %v15035_v61, %v20479_v35  ;;  %v20481_v58 = vsub.f32 %v20417_v25, %v20416_v45  ;;  %v20485_v31 = vld [vmem:[#allocation126_spill] sm:$0xff]  ;;  %v20488_v63 = vsub.f32 %v20439_v43, %v20438_v41 }
 0x4a8   :  { %v10321_v47 = vpop.eup %10320  ;;  %10342 = vrsqrt.f32 %v6405_v18  ;;  %v6406_v42 = vadd.f32 1e-05, %v6086_v37  ;;  %v6083_v10 = vsub.f32 %v5763_v54, %v5923_v24  ;;  %v5764_v15 = vmul.f32 0.020408163, %v5384_v53  ;;  %4697 = vadd.xlane.f32.xlu1 %v14977_v7  ;;  %v20501_v37 = vld [vmem:[#allocation181_spill] sm:$0xff] }
 0x4a9   :  { %20477 = vst [vmem:[#allocation65_spill] sm:$0xff] %v15166_v48  ;;  %v10323_v62 = vpop.eup %10322  ;;  %v4599_v60 = vpop.xlane.xlu0 %4598  ;;  %20480 = vst [vmem:[#allocation160_spill] sm:$0xff] %v15175_v26  ;;  %v15181_v6 = vmul.f32 %v14982_v22, %v20481_v58  ;;  %v15187_v18 = vmul.f32 %v15001_v44, %v20483_v9  ;;  %v6236_v53 = vsub.f32 %v20485_v31, %v14850_v34  ;;  %v20503_v54 = vld [vmem:[#allocation61_spill] sm:$0xff]  ;;  %v20511_v31 = vld [vmem:[#allocation83_spill] sm:$0xff] }
 0x4aa   :  { %v10325_v52 = vpop.eup %10324  ;;  %10344 = vrsqrt.f32 %v6406_v42  ;;  %v6403_v14 = vadd.f32 1e-05, %v6083_v10  ;;  %v6084_v61 = vsub.f32 %v5764_v15, %v5924_v8  ;;  %v20486_v22 = vsub.f32 %v20435_v57, %v20434_v51  ;;  %v20494_v57 = vld [vmem:[#allocation132_spill] sm:$0xff]  ;;  %5494 = vadd.xlane.f32.xlu0 %v14980_v55  ;;  %v20508_v10 = vld [vmem:[#allocation199_spill] sm:$0xff] }
 0x4ab   :  { %20482 = vst [vmem:[#allocation59_spill] sm:$0xff] %v15181_v6  ;;  %20484 = vst [vmem:[#allocation165_spill] sm:$0xff] %v15187_v18  ;;  %v10327_v46 = vpop.eup %10326  ;;  %v4602_v45 = vpop.xlane.xlu1 %4601  ;;  %v15202_v29 = vmul.f32 %v15072_v19, %v20488_v63  ;;  %v20490_v34 = vsub.f32 %v20429_v4, %v20428_v56  ;;  %v20492_v7 = vsub.f32 %v20433_v32, %v20432_v5  ;;  %v15218_v19 = vmul.f32 0.020408163, %v4599_v60  ;;  %v20495_v4 = vld [vmem:[#allocation89_spill] sm:$0xff]  ;;  %v20497_v5 = vld [vmem:[#allocation180_spill] sm:$0xff] }
 0x4ac   :  { %v15196_v25 = vmul.f32 %v15064_v20, %v20486_v22  ;;  %v10329_v20 = vpop.eup %10328  ;;  %v6241_v35 = vsub.f32 %v20494_v57, %v14947_v16  ;;  %10346 = vrsqrt.f32 %v6403_v14  ;;  %v6404_v41 = vadd.f32 1e-05, %v6084_v61  ;;  %v20505_v60 = vld [vmem:[#allocation6_spill] sm:$0xff]  ;;  %v20506_v42 = vld [vmem:[#allocation176_spill] sm:$0xff]  ;;  %v20514_v22 = vld [vmem:[#allocation203_spill] sm:$0xff] }
 0x4ad   :  { %20489 = vst [vmem:[#allocation168_spill] sm:$0xff] %v15202_v29  ;;  %v15208_v44 = vmul.f32 %v15047_v12, %v20490_v34  ;;  %v15214_v51 = vmul.f32 %v15055_v36, %v20492_v7  ;;  %v10331_v56 = vpop.eup %10330  ;;  %v20496_v12 = vld [vmem:[#allocation134_spill] sm:$0xff]  ;;  %v4593_v30 = vpop.xlane.xlu0 %4592  ;;  %v20498_v32 = vsub.f32 %v20449_v3, %v20497_v5  ;;  %v20502_v16 = vsub.f32 %v20451_v11, %v20501_v37  ;;  %v20510_v3 = vld [vmem:[#allocation191_spill] sm:$0xff]  ;;  %v20518_v57 = vld [vmem:[#allocation188_spill] sm:$0xff] }
 0x4ae   :  { %20487 = vst [vmem:[#allocation12_spill] sm:$0xff] %v15196_v25  ;;  %v6242_v43 = vsub.f32 %v20496_v12, %v20495_v4  ;;  %v20499_v36 = vld [vmem:[#allocation202_spill] sm:$0xff]  ;;  %v20507_v55 = vsub.f32 %v20505_v60, %v20506_v42  ;;  %v10333_v58 = vpop.eup %10332  ;;  %10348 = vrsqrt.f32 %v6404_v41  ;;  %v15241_v9 = vmul.f32 0.020408163, %v4602_v45  ;;  %5497 = vadd.xlane.f32.xlu1 %v20510_v3  ;;  %v20519_v4 = vld [vmem:[#allocation136_spill] sm:$0xff]  ;;  %v20521_v12 = vld [vmem:[#allocation137_spill] sm:$0xff] }
 0x4af   :  { %20491 = vst [vmem:[#allocation38_spill] sm:$0xff] %v15208_v44  ;;  %20493 = vst [vmem:[#allocation170_spill] sm:$0xff] %v15214_v51  ;;  %v15227_v24 = vmul.f32 %v20499_v36, %v20498_v32  ;;  %v15233_v8 = vmul.f32 %v20503_v54, %v20502_v16  ;;  %v20512_v14 = vld [vmem:[#allocation178_spill] sm:$0xff]  ;;  %v20516_v63 = vsub.f32 %v20459_v49, %v20458_v2  ;;  %v10335_v7 = vpop.eup %10334  ;;  %v4596_v32 = vpop.xlane.xlu1 %4595  ;;  %v20526_v49 = vld [vmem:[#allocation155_spill] sm:$0xff]  ;;  %v15275_v3 = vmul.f32 0.020408163, %v4593_v30 }
 0x4b0   :  { %v15239_v15 = vmul.f32 %v20508_v10, %v20507_v55  ;;  %v20513_v61 = vsub.f32 %v20511_v31, %v20512_v14  ;;  %v6239_v41 = vsub.f32 %v20519_v4, %v20518_v57  ;;  %v20520_v45 = vld [vmem:[#allocation190_spill] sm:$0xff]  ;;  %v20522_v36 = vsub.f32 %v20464_v17, %v20463_v13  ;;  %v20529_v42 = vld [vmem:[#allocation88_spill] sm:$0xff]  ;;  %v20531_v17 = vld [vmem:[#allocation95_spill] sm:$0xff] }
 0x4b1   :  { %20500 = vst [vmem:[#allocation14_spill] sm:$0xff] %v15227_v24  ;;  %20504 = vst [vmem:[#allocation171_spill] sm:$0xff] %v15233_v8  ;;  %v15254_v34 = vmul.f32 %v15140_v1, %v20516_v63  ;;  %v6240_v5 = vsub.f32 %v20521_v12, %v20520_v45  ;;  %v20524_v16 = vld [vmem:[#allocation102_spill] sm:$0xff]  ;;  %v10337_v1 = vpop.eup %10336  ;;  %v5929_v10 = vmul.f32 %v15218_v19, %v15218_v19  ;;  %v20534_v14 = vld [vmem:[#allocation205_spill] sm:$0xff] }
 0x4b2   :  { %20509 = vst [vmem:[#allocation11_spill] sm:$0xff] %v15239_v15  ;;  %v15248_v11 = vmul.f32 %v20514_v22, %v20513_v61  ;;  %v15263_v37 = vmul.f32 %v10317_v59, %v20522_v36  ;;  %v20525_v54 = vsub.f32 %v20454_v23, %v20524_v16  ;;  %v20528_v60 = vld [vmem:[#allocation154_spill] sm:$0xff]  ;;  %v20532_v59 = vld [vmem:[#allocation101_spill] sm:$0xff]  ;;  %v10339_v23 = vpop.eup %10338  ;;  %v5399_v22 = vpop.xlane.xlu0 %5398  ;;  %v20536_v63 = vsub.f32 %v20471_v39, %v20470_v38  ;;  %v20540_v45 = vld [vmem:[#allocation104_spill] sm:$0xff] }
 0x4b3   :  { %20517 = vst [vmem:[#allocation91_spill] sm:$0xff] %v15254_v34  ;;  %v6245_v55 = vsub.f32 %v20529_v42, %v20528_v60  ;;  %v20530_v31 = vld [vmem:[#allocation194_spill] sm:$0xff]  ;;  %v20533_v13 = vsub.f32 %v20531_v17, %v20532_v59  ;;  %v20538_v4 = vsub.f32 %v20473_v40, %v20472_v33  ;;  %v20541_v12 = vld [vmem:[#allocation111_spill] sm:$0xff]  ;;  %v10341_v42 = vpop.eup %10340  ;;  %v15305_v39 = vpop.f32.mrf.mxu1  ;;  %v5930_v38 = vmul.f32 %v15241_v9, %v15241_v9  ;;  %v20547_v40 = vld [vmem:[#allocation193_spill] sm:$0xff] }
 0x4b4   :  { %20515 = vst [vmem:[#allocation4_spill] sm:$0xff] %v15248_v11  ;;  %20523 = vst [vmem:[#allocation93_spill] sm:$0xff] %v15263_v37  ;;  %v15269_v2 = vmul.f32 %v20526_v49, %v20525_v54  ;;  %4700 = vadd.xlane.f32.xlu0 %v20530_v31  ;;  %v15287_v57 = vmul.f32 %v10323_v62, %v20536_v63  ;;  %v20542_v36 = vsub.f32 %v20540_v45, %v20541_v12  ;;  %v20544_v54 = vld [vmem:[#allocation109_spill] sm:$0xff]  ;;  %v20553_v59 = vld [vmem:[#allocation207_spill] sm:$0xff] }
 0x4b5   :  { %v15282_v61 = vmul.f32 %v20534_v14, %v20533_v13  ;;  %v15292_v30 = vmul.f32 %v10325_v52, %v20538_v4  ;;  %v20545_v49 = vsub.f32 %v20469_v50, %v20544_v54  ;;  %v15309_v62 = vmul.f32 0.020408163, %v4596_v32  ;;  %4703 = vadd.xlane.f32.xlu1 %v20547_v40  ;;  %v20552_v17 = vld [vmem:[#allocation121_spill] sm:$0xff]  ;;  %v20557_v4 = vld [vmem:[#allocation114_spill] sm:$0xff]  ;;  %v20566_v54 = vld [vmem:[#allocation8_spill] sm:$0xff] }
 0x4b6   :  { %20527 = vst [vmem:[#allocation105_spill] sm:$0xff] %v15269_v2  ;;  %20537 = vst [vmem:[#allocation189_spill] sm:$0xff] %v15287_v57  ;;  %v15298_v16 = vmul.f32 %v15154_v28, %v20542_v36  ;;  %v5769_v33 = vmul.f32 0.020408163, %v5399_v22  ;;  %v15312_v52 = vmul.f32 %v10331_v56, %v6235_v21  ;;  %v5402_v28 = vpop.xlane.xlu1 %5401  ;;  %v15314_v31 = vmul.f32 %v10333_v58, %v6236_v53  ;;  %v10343_v56 = vpop.eup %10342  ;;  %v20560_v58 = vld [vmem:[#allocation86_spill] sm:$0xff]  ;;  %v20562_v45 = vld [vmem:[#allocation201_spill] sm:$0xff] }
 0x4b7   :  { %20535 = vst [vmem:[#allocation96_spill] sm:$0xff] %v15282_v61  ;;  %20539 = vst [vmem:[#allocation98_spill] sm:$0xff] %v15292_v30  ;;  %v15303_v60 = vmul.f32 %v10321_v47, %v20545_v49  ;;  %v20550_v50 = vsub.f32 %v20474_v0, %v14776_v27  ;;  %v20554_v13 = vsub.f32 %v20552_v17, %v20553_v59  ;;  %v5770_v63 = vmul.f32 0.020408163, %v5402_v28  ;;  %v20561_v27 = vld [vmem:[#allocation68_spill] sm:$0xff]  ;;  %v10345_v12 = vpop.eup %10344 }
 0x4b8   :  { %20543 = vst [vmem:[#allocation108_spill] sm:$0xff] %v15298_v16  ;;  %20548 = vst [vmem:[#allocation110_spill] sm:$0xff] %v15312_v52  ;;  %v15326_v32 = vmul.f32 %v10337_v1, %v6239_v41  ;;  %v6089_v22 = vsub.f32 %v5769_v33, %v5929_v10  ;;  %5500 = vadd.xlane.f32.xlu0 %v20557_v4  ;;  %v15329_v21 = vmul.f32 %v10339_v23, %v6240_v5  ;;  %v15343_v10 = vpop.f32.mrf.mxu1  ;;  %v20565_v36 = vld [vmem:[#allocation60_spill] sm:$0xff] }
 0x4b9   :  { %20546 = vst [vmem:[#allocation197_spill] sm:$0xff] %v15303_v60  ;;  %20549 = vst [vmem:[#allocation200_spill] sm:$0xff] %v15314_v31  ;;  %v15319_v47 = vmul.f32 %v10327_v46, %v20550_v50  ;;  %v15324_v14 = vmul.f32 %v10329_v20, %v20554_v13  ;;  %v15331_v53 = vmul.f32 %v10335_v7, %v6241_v35  ;;  %v5393_v20 = vpop.xlane.xlu0 %5392  ;;  %v5502_v41 = vsel %vm67_vm0, %v20562_v45, 0.0  ;;  %v20567_v28 = vld [vmem:[#allocation80_spill] sm:$0xff]  ;;  %v20569_v13 = vld [vmem:[#allocation10_spill] sm:$0xff] }
 0x4ba   :  { %20556 = vst [vmem:[#allocation123_spill] sm:$0xff] %v15326_v32  ;;  %20558 = vst [vmem:[#allocation126_spill] sm:$0xff] %v15329_v21  ;;  %v15335_v0 = vadd.f32 %v20561_v27, %v20560_v58  ;;  %v5927_v46 = vmul.f32 %v15275_v3, %v15275_v3  ;;  %v15341_v1 = vmul.f32 %v10341_v42, %v6242_v43  ;;  %v6409_v5 = vadd.f32 1e-05, %v6089_v22  ;;  %v5396_v40 = vpop.xlane.xlu1 %5395  ;;  %v20568_v59 = vld [vmem:[#allocation204_spill] sm:$0xff]  ;;  %v15363_v27 = vpop.f32.mrf.mxu1 }
 0x4bb   :  { %20551 = vst [vmem:[#allocation113_spill] sm:$0xff] %v15319_v47  ;;  %20555 = vst [vmem:[#allocation118_spill] sm:$0xff] %v15324_v14  ;;  %v6090_v23 = vsub.f32 %v5770_v63, %v5930_v38  ;;  %v5767_v35 = vmul.f32 0.020408163, %v5393_v20  ;;  %5503 = vadd.xlane.f32.xlu1 %v5502_v41  ;;  %v15345_v7 = vmul.f32 %v10343_v56, %v6245_v55  ;;  %v4705_v43 = vsel %vm67_vm0, %v20567_v28, 0.0  ;;  %v10347_v55 = vpop.eup %10346  ;;  %v20571_v41 = vld [vmem:[#allocation145_spill] sm:$0xff] }
 0x4bc   :  { %20559 = vst [vmem:[#allocation132_spill] sm:$0xff] %v15331_v53  ;;  %20563 = vst [vmem:[#allocation89_spill] sm:$0xff] %v15341_v1  ;;  %v6246_v49 = vsub.f32 %v20566_v54, %v20565_v36  ;;  %v5928_v33 = vmul.f32 %v15309_v62, %v15309_v62  ;;  %v5165_v42 = vmul.f32 %v20567_v28, %v20567_v28  ;;  %10350 = vrsqrt.f32 %v6409_v5  ;;  %v10349_v45 = vpop.eup %10348  ;;  %v20572_v5 = vld [vmem:[#allocation141_spill] sm:$0xff]  ;;  %v20574_v36 = vld [vmem:[#allocation2_spill] sm:$0xff] }
 0x4bd   :  { %20564 = vst [vmem:[#allocation134_spill] sm:$0xff] %v15345_v7  ;;  %v6410_v38 = vadd.f32 1e-05, %v6090_v23  ;;  %v6087_v50 = vsub.f32 %v5767_v35, %v5927_v46  ;;  %v5768_v17 = vmul.f32 0.020408163, %v5396_v40  ;;  %4706 = vadd.xlane.f32.xlu0 %v4705_v43  ;;  %v6243_v22 = vsub.f32 %v20569_v13, %v20568_v59  ;;  %v4611_v63 = vpop.xlane.xlu0 %4610  ;;  %v20573_v35 = vld [vmem:[#allocation158_spill] sm:$0xff] }
 0x4be   :  { %v4708_v4 = vsel %vm67_vm0, %v15335_v0, 0.0  ;;  %v5166_v56 = vmul.f32 %v15335_v0, %v15335_v0  ;;  %v15361_v58 = vmul.f32 %v10345_v12, %v6246_v49  ;;  %v15367_v23 = vadd.f32 %v20572_v5, %v20571_v41  ;;  %v4614_v40 = vpop.xlane.xlu1 %4613  ;;  %v20576_v49 = vld [vmem:[#allocation146_spill] sm:$0xff]  ;;  %v20599_v31 = vld [vmem:[#allocation152_spill] sm:$0xff] }
 0x4bf   :  { %10352 = vrsqrt.f32 %v6410_v38  ;;  %v6407_v20 = vadd.f32 1e-05, %v6087_v50  ;;  %v6088_v46 = vsub.f32 %v5768_v17, %v5928_v33  ;;  %4709 = vadd.xlane.f32.xlu1 %v4708_v4  ;;  %v6244_v54 = vsub.f32 %v20574_v36, %v20573_v35  ;;  %v20577_v38 = vld [vmem:[#allocation76_spill] sm:$0xff]  ;;  %v15381_v4 = vpop.f32.mrf.mxu1 }
 0x4c0   :  { %20570 = vst [vmem:[#allocation180_spill] sm:$0xff] %v15361_v58  ;;  %v5505_v43 = vsel %vm67_vm0, %v5165_v42, 0.0  ;;  %v15372_v59 = vmul.f32 %v10347_v55, %v6243_v22  ;;  %v15376_v33 = vadd.f32 %v20577_v38, %v20576_v49  ;;  %v5508_v17 = vsel %vm67_vm0, %v5166_v56, 0.0 }
 0x4c1   :  { %10354 = vrsqrt.f32 %v6407_v20  ;;  %v6408_v12 = vadd.f32 1e-05, %v6088_v46  ;;  %5506 = vadd.xlane.f32.xlu0 %v5505_v43  ;;  %v4605_v50 = vpop.xlane.xlu0 %4604  ;;  %v15379_v13 = vmul.f32 %v10349_v45, %v6244_v54  ;;  %v15383_v41 = vmul.f32 0.020408163, %v4611_v63  ;;  %v15397_v5 = vpop.f32.mrf.mxu1  ;;  %v20579_v54 = vld [vmem:[#allocation149_spill] sm:$0xff] }
 0x4c2   :  { %20575 = vst [vmem:[#allocation202_spill] sm:$0xff] %v15372_v59  ;;  %v4608_v42 = vpop.xlane.xlu1 %4607  ;;  %v4711_v55 = vsel %vm67_vm0, %v15367_v23, 0.0  ;;  %v5167_v22 = vmul.f32 %v15367_v23, %v15367_v23  ;;  %v15389_v20 = vmul.f32 0.020408163, %v4614_v40  ;;  %v15391_v46 = vmul.f32 0.020408163, %v4605_v50 }
 0x4c3   :  { %20578 = vst [vmem:[#allocation181_spill] sm:$0xff] %v15379_v13  ;;  %10356 = vrsqrt.f32 %v6408_v12  ;;  %5509 = vadd.xlane.f32.xlu1 %v5508_v17  ;;  %v4714_v45 = vsel %vm67_vm0, %v15376_v33, 0.0  ;;  %v5168_v63 = vmul.f32 %v15376_v33, %v15376_v33  ;;  %v5933_v35 = vmul.f32 %v15383_v41, %v15383_v41  ;;  %v20580_v40 = vld [vmem:[#allocation140_spill] sm:$0xff]  ;;  %v20581_v50 = vld [vmem:[#allocation75_spill] sm:$0xff] }
 0x4c4   :  { %v15403_v43 = vadd.f32 %v20580_v40, %v20579_v54  ;;  %v15405_v12 = vmul.f32 0.020408163, %v4608_v42  ;;  %v5511_v38 = vsel %vm67_vm0, %v5167_v22, 0.0  ;;  %v6249_v17 = vsub.f32 %v20581_v50, %v15218_v19  ;;  %v20583_v13 = vld [vmem:[#allocation144_spill] sm:$0xff]  ;;  %v15419_v40 = vpop.f32.mrf.mxu1 }
 0x4c5   :  { %4712 = vadd.xlane.f32.xlu0 %v4711_v55  ;;  %v5411_v56 = vpop.xlane.xlu0 %5410  ;;  %v5934_v55 = vmul.f32 %v15389_v20, %v15389_v20  ;;  %v5931_v42 = vmul.f32 %v15391_v46, %v15391_v46  ;;  %v5514_v22 = vsel %vm67_vm0, %v5168_v63, 0.0 }
 0x4c6   :  { %v5773_v36 = vmul.f32 0.020408163, %v5411_v56  ;;  %v5414_v49 = vpop.xlane.xlu1 %5413  ;;  %v4717_v53 = vsel %vm67_vm0, %v15403_v43, 0.0  ;;  %v5169_v63 = vmul.f32 %v15403_v43, %v15403_v43  ;;  %v15439_v21 = vpop.f32.mrf.mxu1 }
 0x4c7   :  { %4715 = vadd.xlane.f32.xlu1 %v4714_v45  ;;  %v5774_v7 = vmul.f32 0.020408163, %v5414_v49  ;;  %v20582_v45 = vld [vmem:[#allocation84_spill] sm:$0xff]  ;;  %v20585_v49 = vld [vmem:[#allocation82_spill] sm:$0xff] }
 0x4c8   :  { %v6093_v58 = vsub.f32 %v5773_v36, %v5933_v35  ;;  %v15414_v59 = vadd.f32 %v20583_v13, %v20582_v45  ;;  %v5932_v13 = vmul.f32 %v15405_v12, %v15405_v12  ;;  %v5517_v14 = vsel %vm67_vm0, %v5169_v63, 0.0 }
 0x4c9   :  { %5512 = vadd.xlane.f32.xlu0 %v5511_v38  ;;  %v10351_v56 = vpop.eup %10350  ;;  %v5405_v54 = vpop.xlane.xlu0 %5404  ;;  %v6094_v50 = vsub.f32 %v5774_v7, %v5934_v55  ;;  %v6250_v38 = vsub.f32 %v20585_v49, %v15241_v9 }
 0x4ca   :  { %v6413_v19 = vadd.f32 1e-05, %v6093_v58  ;;  %v5771_v1 = vmul.f32 0.020408163, %v5405_v54  ;;  %v15421_v35 = vmul.f32 %v10351_v56, %v6249_v17  ;;  %v5408_v45 = vpop.xlane.xlu1 %5407  ;;  %v20586_v56 = vld [vmem:[#allocation7_spill] sm:$0xff]  ;;  %v5170_v49 = vmul.f32 %v15414_v59, %v15414_v59 }
 0x4cb   :  { %5515 = vadd.xlane.f32.xlu1 %v5514_v22  ;;  %v6414_v7 = vadd.f32 1e-05, %v6094_v50  ;;  %v5772_v55 = vmul.f32 0.020408163, %v5408_v45  ;;  %v6247_v54 = vsub.f32 %v20586_v56, %v15275_v3  ;;  %v4720_v22 = vsel %vm67_vm0, %v15414_v59, 0.0  ;;  %v20589_v50 = vld [vmem:[#allocation67_spill] sm:$0xff] }
 0x4cc   :  { %20584 = vst [vmem:[#allocation61_spill] sm:$0xff] %v15421_v35  ;;  %v10353_v36 = vpop.eup %10352  ;;  %10358 = vrsqrt.f32 %v6413_v19  ;;  %v6091_v58 = vsub.f32 %v5771_v1, %v5931_v42  ;;  %v20588_v42 = vld [vmem:[#allocation153_spill] sm:$0xff] }
 0x4cd   :  { %4718 = vadd.xlane.f32.xlu0 %v4717_v53  ;;  %v4623_v9 = vpop.xlane.xlu0 %4622  ;;  %v15437_v35 = vmul.f32 %v10353_v36, %v6250_v38  ;;  %10360 = vrsqrt.f32 %v6414_v7  ;;  %v6092_v1 = vsub.f32 %v5772_v55, %v5932_v13  ;;  %v15443_v45 = vadd.f32 %v20589_v50, %v20588_v42  ;;  %v20590_v3 = vld [vmem:[#allocation5_spill] sm:$0xff]  ;;  %v20592_v38 = vld [vmem:[#allocation156_spill] sm:$0xff]  ;;  %v20593_v7 = vld [vmem:[#allocation58_spill] sm:$0xff]  ;;  %v15457_v42 = vpop.f32.mrf.mxu1 }
 0x4ce   :  { %v10355_v17 = vpop.eup %10354  ;;  %v6411_v19 = vadd.f32 1e-05, %v6091_v58  ;;  %v6248_v56 = vsub.f32 %v20590_v3, %v15309_v62  ;;  %v4626_v32 = vpop.xlane.xlu1 %4625  ;;  %v15452_v13 = vadd.f32 %v20593_v7, %v20592_v38  ;;  %v5520_v55 = vsel %vm67_vm0, %v5170_v49, 0.0 }
 0x4cf   :  { %20587 = vst [vmem:[#allocation6_spill] sm:$0xff] %v15437_v35  ;;  %4721 = vadd.xlane.f32.xlu1 %v4720_v22  ;;  %v15448_v47 = vmul.f32 %v10355_v17, %v6247_v54  ;;  %v6412_v36 = vadd.f32 1e-05, %v6092_v1  ;;  %v15459_v62 = vmul.f32 0.020408163, %v4623_v9  ;;  %v4723_v17 = vsel %vm67_vm0, %v15443_v45, 0.0 }
 0x4d0   :  { %v10357_v53 = vpop.eup %10356  ;;  %10362 = vrsqrt.f32 %v6411_v19  ;;  %v15465_v54 = vmul.f32 0.020408163, %v4626_v32  ;;  %v4726_v1 = vsel %vm67_vm0, %v15452_v13, 0.0  ;;  %v5172_v9 = vmul.f32 %v15452_v13, %v15452_v13  ;;  %v20596_v32 = vld [vmem:[#allocation148_spill] sm:$0xff] }
 0x4d1   :  { %20591 = vst [vmem:[#allocation176_spill] sm:$0xff] %v15448_v47  ;;  %5518 = vadd.xlane.f32.xlu0 %v5517_v14  ;;  %v4617_v58 = vpop.xlane.xlu0 %4616  ;;  %v15455_v22 = vmul.f32 %v10357_v53, %v6248_v56  ;;  %10364 = vrsqrt.f32 %v6412_v36  ;;  %v5171_v14 = vmul.f32 %v15443_v45, %v15443_v45  ;;  %v15473_v53 = vpop.f32.mrf.mxu1  ;;  %v5937_v50 = vmul.f32 %v15459_v62, %v15459_v62  ;;  %v20595_v56 = vld [vmem:[#allocation13_spill] sm:$0xff] }
 0x4d2   :  { %v4620_v63 = vpop.xlane.xlu1 %4619  ;;  %v15467_v19 = vmul.f32 0.020408163, %v4617_v58  ;;  %v15479_v36 = vadd.f32 %v20596_v32, %v20595_v56  ;;  %v5938_v35 = vmul.f32 %v15465_v54, %v15465_v54 }
 0x4d3   :  { %20594 = vst [vmem:[#allocation199_spill] sm:$0xff] %v15455_v22  ;;  %5521 = vadd.xlane.f32.xlu1 %v5520_v55  ;;  %v15481_v38 = vmul.f32 0.020408163, %v4620_v63  ;;  %v5523_v58 = vsel %vm67_vm0, %v5171_v14, 0.0  ;;  %v20597_v55 = vld [vmem:[#allocation62_spill] sm:$0xff]  ;;  %v5526_v14 = vsel %vm67_vm0, %v5172_v9, 0.0  ;;  %v15495_v32 = vpop.f32.mrf.mxu1 }
 0x4d4   :  { %v5935_v63 = vmul.f32 %v15467_v19, %v15467_v19  ;;  %v4729_v16 = vsel %vm67_vm0, %v15479_v36, 0.0  ;;  %v5173_v9 = vmul.f32 %v15479_v36, %v15479_v36 }
 0x4d5   :  { %4724 = vadd.xlane.f32.xlu0 %v4723_v17  ;;  %v5423_v49 = vpop.xlane.xlu0 %5422  ;;  %v6253_v17 = vsub.f32 %v20597_v55, %v15383_v41  ;;  %v15515_v30 = vpop.f32.mrf.mxu1 }
 0x4d6   :  { %v5777_v3 = vmul.f32 0.020408163, %v5423_v49  ;;  %v5426_v7 = vpop.xlane.xlu1 %5425  ;;  %v5529_v61 = vsel %vm67_vm0, %v5173_v9, 0.0  ;;  %v20611_v9 = vld [vmem:[#allocation69_spill] sm:$0xff] }
 0x4d7   :  { %4727 = vadd.xlane.f32.xlu1 %v4726_v1  ;;  %v5778_v47 = vmul.f32 0.020408163, %v5426_v7  ;;  %v20598_v1 = vld [vmem:[#allocation79_spill] sm:$0xff] }
 0x4d8   :  { %v6097_v22 = vsub.f32 %v5777_v3, %v5937_v50  ;;  %v15490_v52 = vadd.f32 %v20599_v31, %v20598_v1  ;;  %v20601_v7 = vld [vmem:[#allocation71_spill] sm:$0xff]  ;;  %v5936_v31 = vmul.f32 %v15481_v38, %v15481_v38 }
 0x4d9   :  { %5524 = vadd.xlane.f32.xlu0 %v5523_v58  ;;  %v10359_v49 = vpop.eup %10358  ;;  %v5417_v56 = vpop.xlane.xlu0 %5416  ;;  %v6098_v55 = vsub.f32 %v5778_v47, %v5938_v35  ;;  %v6254_v58 = vsub.f32 %v20601_v7, %v15389_v20 }
 0x4da   :  { %v6417_v41 = vadd.f32 1e-05, %v6097_v22  ;;  %v5775_v60 = vmul.f32 0.020408163, %v5417_v56  ;;  %v15497_v50 = vmul.f32 %v10359_v49, %v6253_v17  ;;  %v10361_v3 = vpop.eup %10360  ;;  %v5420_v1 = vpop.xlane.xlu1 %5419  ;;  %v20602_v49 = vld [vmem:[#allocation50_spill] sm:$0xff]  ;;  %v5174_v7 = vmul.f32 %v15490_v52, %v15490_v52 }
 0x4db   :  { %5527 = vadd.xlane.f32.xlu1 %v5526_v14  ;;  %v6418_v47 = vadd.f32 1e-05, %v6098_v55  ;;  %v5776_v22 = vmul.f32 0.020408163, %v5420_v1  ;;  %v6251_v56 = vsub.f32 %v20602_v49, %v15391_v46  ;;  %v4732_v14 = vsel %vm67_vm0, %v15490_v52, 0.0  ;;  %v20605_v55 = vld [vmem:[#allocation161_spill] sm:$0xff] }
 0x4dc   :  { %20600 = vst [vmem:[#allocation191_spill] sm:$0xff] %v15497_v50  ;;  %10366 = vrsqrt.f32 %v6417_v41  ;;  %v6095_v35 = vsub.f32 %v5775_v60, %v5935_v63  ;;  %v15513_v50 = vmul.f32 %v10361_v3, %v6254_v58  ;;  %v20604_v63 = vld [vmem:[#allocation57_spill] sm:$0xff]  ;;  %v20606_v46 = vld [vmem:[#allocation63_spill] sm:$0xff] }
 0x4dd   :  { %4730 = vadd.xlane.f32.xlu0 %v4729_v16  ;;  %v10363_v17 = vpop.eup %10362  ;;  %v4635_v20 = vpop.xlane.xlu0 %4634  ;;  %10368 = vrsqrt.f32 %v6418_v47  ;;  %v6096_v60 = vsub.f32 %v5776_v22, %v5936_v31  ;;  %v15519_v1 = vadd.f32 %v20605_v55, %v20604_v63  ;;  %v6252_v49 = vsub.f32 %v20606_v46, %v15405_v12  ;;  %v20608_v58 = vld [vmem:[#allocation169_spill] sm:$0xff]  ;;  %v20609_v47 = vld [vmem:[#allocation167_spill] sm:$0xff] }
 0x4de   :  { %20603 = vst [vmem:[#allocation83_spill] sm:$0xff] %v15513_v50  ;;  %v6415_v41 = vadd.f32 1e-05, %v6095_v35  ;;  %v10365_v16 = vpop.eup %10364  ;;  %v4638_v57 = vpop.xlane.xlu1 %4637  ;;  %v15524_v2 = vmul.f32 %v10363_v17, %v6251_v56  ;;  %v15528_v31 = vadd.f32 %v20609_v47, %v20608_v58  ;;  %v5532_v22 = vsel %vm67_vm0, %v5174_v7, 0.0  ;;  %v20613_v7 = vld [vmem:[#allocation70_spill] sm:$0xff] }
 0x4df   :  { %4733 = vadd.xlane.f32.xlu1 %v4732_v14  ;;  %v6416_v3 = vadd.f32 1e-05, %v6096_v60  ;;  %v15531_v14 = vmul.f32 %v10365_v16, %v6252_v49  ;;  %v15533_v63 = vpop.f32.mrf.mxu1  ;;  %v15535_v12 = vmul.f32 0.020408163, %v4635_v20  ;;  %v15539_v17 = vadd.f32 %v15397_v5, %v20611_v9 }
 0x4e0   :  { %20607 = vst [vmem:[#allocation178_spill] sm:$0xff] %v15524_v2  ;;  %10370 = vrsqrt.f32 %v6415_v41  ;;  %v4735_v56 = vsel %vm67_vm0, %v15519_v1, 0.0  ;;  %v15543_v41 = vmul.f32 0.020408163, %v4638_v57  ;;  %v15547_v60 = vadd.f32 %v15439_v21, %v20613_v7  ;;  %v20615_v57 = vld [vmem:[#allocation15_spill] sm:$0xff] }
 0x4e1   :  { %5530 = vadd.xlane.f32.xlu0 %v5529_v61  ;;  %v4629_v35 = vpop.xlane.xlu0 %4628  ;;  %20610 = vst [vmem:[#allocation203_spill] sm:$0xff] %v15531_v14  ;;  %10372 = vrsqrt.f32 %v6416_v3  ;;  %20612 = vst [vmem:[#allocation188_spill] sm:$0xff] %v15539_v17  ;;  %v4738_v55 = vsel %vm67_vm0, %v15528_v31, 0.0  ;;  %v15553_v46 = vpop.f32.mrf.mxu1  ;;  %v5941_v5 = vmul.f32 %v15535_v12, %v15535_v12  ;;  %v15559_v3 = vadd.f32 %v15419_v40, %v20615_v57 }
 0x4e2   :  { %v4632_v61 = vpop.xlane.xlu1 %4631  ;;  %20614 = vst [vmem:[#allocation136_spill] sm:$0xff] %v15547_v60  ;;  %v15549_v16 = vmul.f32 0.020408163, %v4629_v35  ;;  %v4801_v47 = vsel %vm67_vm0, %v15539_v17, 0.0  ;;  %v20617_v35 = vld [vmem:[#allocation40_spill] sm:$0xff]  ;;  %v5942_v9 = vmul.f32 %v15543_v41, %v15543_v41  ;;  %v4804_v50 = vsel %vm67_vm0, %v15547_v60, 0.0 }
 0x4e3   :  { %5533 = vadd.xlane.f32.xlu1 %v5532_v22  ;;  %20616 = vst [vmem:[#allocation190_spill] sm:$0xff] %v15559_v3  ;;  %v15561_v58 = vmul.f32 0.020408163, %v4632_v61  ;;  %v6257_v22 = vsub.f32 %v20617_v35, %v15459_v62  ;;  %v15577_v14 = vpop.f32.mrf.mxu1  ;;  %v4795_v37 = vsel %vm67_vm0, %v15559_v3, 0.0  ;;  %v5175_v34 = vmul.f32 %v15519_v1, %v15519_v1 }
 0x4e4   :  { %v5939_v61 = vmul.f32 %v15549_v16, %v15549_v16 }
 0x4e5   :  { %4736 = vadd.xlane.f32.xlu0 %v4735_v56  ;;  %v5435_v20 = vpop.xlane.xlu0 %5434  ;;  %v15597_v11 = vpop.f32.mrf.mxu1  ;;  %v5535_v8 = vsel %vm67_vm0, %v5175_v34, 0.0  ;;  %v20633_v34 = vld [vmem:[#allocation36_spill] sm:$0xff] }
 0x4e6   :  { %v5781_v49 = vmul.f32 0.020408163, %v5435_v20  ;;  %v5438_v21 = vpop.xlane.xlu1 %5437 }
 0x4e7   :  { %4739 = vadd.xlane.f32.xlu1 %v4738_v55  ;;  %v5782_v7 = vmul.f32 0.020408163, %v5438_v21  ;;  %v20618_v55 = vld [vmem:[#allocation16_spill] sm:$0xff] }
 0x4e8   :  { %v6101_v56 = vsub.f32 %v5781_v49, %v5941_v5  ;;  %v15571_v40 = vadd.f32 %v15457_v42, %v20618_v55  ;;  %v20621_v21 = vld [vmem:[#allocation44_spill] sm:$0xff] }
 0x4e9   :  { %4802 = vadd.xlane.f32.xlu0 %v4801_v47  ;;  %v10367_v20 = vpop.eup %10366  ;;  %v5429_v57 = vpop.xlane.xlu0 %5428  ;;  %v6102_v35 = vsub.f32 %v5782_v7, %v5942_v9  ;;  %v6258_v42 = vsub.f32 %v20621_v21, %v15465_v54  ;;  %v5940_v47 = vmul.f32 %v15561_v58, %v15561_v58  ;;  %v20622_v7 = vld [vmem:[#allocation42_spill] sm:$0xff]  ;;  %v5176_v21 = vmul.f32 %v15528_v31, %v15528_v31 }
 0x4ea   :  { %20619 = vst [vmem:[#allocation137_spill] sm:$0xff] %v15571_v40  ;;  %v6421_v62 = vadd.f32 1e-05, %v6101_v56  ;;  %v5779_v2 = vmul.f32 0.020408163, %v5429_v57  ;;  %v15579_v5 = vmul.f32 %v10367_v20, %v6257_v22  ;;  %v10369_v49 = vpop.eup %10368  ;;  %v5432_v55 = vpop.xlane.xlu1 %5431  ;;  %v6255_v20 = vsub.f32 %v20622_v7, %v15467_v19  ;;  %v20627_v19 = vld [vmem:[#allocation66_spill] sm:$0xff] }
 0x4eb   :  { %4805 = vadd.xlane.f32.xlu1 %v4804_v50  ;;  %v6422_v9 = vadd.f32 1e-05, %v6102_v35  ;;  %v5780_v50 = vmul.f32 0.020408163, %v5432_v55  ;;  %v4798_v57 = vsel %vm67_vm0, %v15571_v40, 0.0  ;;  %v20625_v35 = vld [vmem:[#allocation159_spill] sm:$0xff]  ;;  %v6256_v7 = vsub.f32 %v20627_v19, %v15481_v38 }
 0x4ec   :  { %20620 = vst [vmem:[#allocation102_spill] sm:$0xff] %v15579_v5  ;;  %10374 = vrsqrt.f32 %v6421_v62  ;;  %v6099_v56 = vsub.f32 %v5779_v2, %v5939_v61  ;;  %v15595_v5 = vmul.f32 %v10369_v49, %v6258_v42  ;;  %v20624_v61 = vld [vmem:[#allocation172_spill] sm:$0xff]  ;;  %v20629_v42 = vld [vmem:[#allocation174_spill] sm:$0xff] }
 0x4ed   :  { %4796 = vadd.xlane.f32.xlu0 %v4795_v37  ;;  %v10371_v22 = vpop.eup %10370  ;;  %v4647_v54 = vpop.xlane.xlu0 %4646  ;;  %10376 = vrsqrt.f32 %v6422_v9  ;;  %v6100_v2 = vsub.f32 %v5780_v50, %v5940_v47  ;;  %v15601_v55 = vadd.f32 %v20625_v35, %v20624_v61  ;;  %v20630_v9 = vld [vmem:[#allocation164_spill] sm:$0xff]  ;;  %v5538_v50 = vsel %vm67_vm0, %v5176_v21, 0.0  ;;  %v20635_v21 = vld [vmem:[#allocation19_spill] sm:$0xff] }
 0x4ee   :  { %20623 = vst [vmem:[#allocation155_spill] sm:$0xff] %v15595_v5  ;;  %v6419_v62 = vadd.f32 1e-05, %v6099_v56  ;;  %v10373_v37 = vpop.eup %10372  ;;  %v4650_v15 = vpop.xlane.xlu1 %4649  ;;  %v15606_v24 = vmul.f32 %v10371_v22, %v6255_v20  ;;  %v15610_v47 = vadd.f32 %v20630_v9, %v20629_v42  ;;  %v15617_v38 = vmul.f32 0.020408163, %v4647_v54 }
 0x4ef   :  { %4799 = vadd.xlane.f32.xlu1 %v4798_v57  ;;  %20626 = vst [vmem:[#allocation154_spill] sm:$0xff] %v15601_v55  ;;  %v6420_v49 = vadd.f32 1e-05, %v6100_v2  ;;  %v15613_v57 = vmul.f32 %v10373_v37, %v6256_v7  ;;  %v15615_v61 = vpop.f32.mrf.mxu1  ;;  %v15621_v22 = vadd.f32 %v15473_v53, %v20633_v34  ;;  %v4741_v20 = vsel %vm67_vm0, %v15601_v55, 0.0 }
 0x4f0   :  { %20628 = vst [vmem:[#allocation88_spill] sm:$0xff] %v15606_v24  ;;  %10378 = vrsqrt.f32 %v6419_v62  ;;  %20631 = vst [vmem:[#allocation194_spill] sm:$0xff] %v15610_v47  ;;  %v15625_v62 = vmul.f32 0.020408163, %v4650_v15  ;;  %v15629_v2 = vadd.f32 %v15515_v30, %v20635_v21  ;;  %v4744_v35 = vsel %vm67_vm0, %v15610_v47, 0.0  ;;  %v20637_v15 = vld [vmem:[#allocation17_spill] sm:$0xff] }
 0x4f1   :  { %5536 = vadd.xlane.f32.xlu0 %v5535_v8  ;;  %v4641_v56 = vpop.xlane.xlu0 %4640  ;;  %20632 = vst [vmem:[#allocation95_spill] sm:$0xff] %v15613_v57  ;;  %10380 = vrsqrt.f32 %v6420_v49  ;;  %20634 = vst [vmem:[#allocation101_spill] sm:$0xff] %v15621_v22  ;;  %v15635_v19 = vpop.f32.mrf.mxu1  ;;  %v5945_v53 = vmul.f32 %v15617_v38, %v15617_v38  ;;  %v15641_v49 = vadd.f32 %v15495_v32, %v20637_v15  ;;  %v4813_v9 = vsel %vm67_vm0, %v15621_v22, 0.0 }
 0x4f2   :  { %v4644_v8 = vpop.xlane.xlu1 %4643  ;;  %20636 = vst [vmem:[#allocation205_spill] sm:$0xff] %v15629_v2  ;;  %v15631_v37 = vmul.f32 0.020408163, %v4641_v56  ;;  %v20639_v56 = vld [vmem:[#allocation9_spill] sm:$0xff]  ;;  %v5946_v34 = vmul.f32 %v15625_v62, %v15625_v62  ;;  %v4816_v5 = vsel %vm67_vm0, %v15629_v2, 0.0  ;;  %v5177_v44 = vmul.f32 %v15601_v55, %v15601_v55 }
 0x4f3   :  { %5539 = vadd.xlane.f32.xlu1 %v5538_v50  ;;  %20638 = vst [vmem:[#allocation104_spill] sm:$0xff] %v15641_v49  ;;  %v15643_v42 = vmul.f32 0.020408163, %v4644_v8  ;;  %v6261_v50 = vsub.f32 %v20639_v56, %v15535_v12  ;;  %v15659_v57 = vpop.f32.mrf.mxu1  ;;  %v4807_v51 = vsel %vm67_vm0, %v15641_v49, 0.0 }
 0x4f4   :  { %v5943_v8 = vmul.f32 %v15631_v37, %v15631_v37  ;;  %v5541_v18 = vsel %vm67_vm0, %v5177_v44, 0.0  ;;  %v20655_v44 = vld [vmem:[#allocation34_spill] sm:$0xff] }
 0x4f5   :  { %4742 = vadd.xlane.f32.xlu0 %v4741_v20  ;;  %v5447_v54 = vpop.xlane.xlu0 %5446  ;;  %v15679_v29 = vpop.f32.mrf.mxu1 }
 0x4f6   :  { %v5785_v7 = vmul.f32 0.020408163, %v5447_v54  ;;  %v5450_v30 = vpop.xlane.xlu1 %5449 }
 0x4f7   :  { %4745 = vadd.xlane.f32.xlu1 %v4744_v35  ;;  %v5786_v21 = vmul.f32 0.020408163, %v5450_v30  ;;  %v20640_v35 = vld [vmem:[#allocation18_spill] sm:$0xff]  ;;  %v20643_v30 = vld [vmem:[#allocation85_spill] sm:$0xff] }
 0x4f8   :  { %v6105_v20 = vsub.f32 %v5785_v7, %v5945_v53  ;;  %v15653_v32 = vadd.f32 %v15533_v63, %v20640_v35  ;;  %v6262_v63 = vsub.f32 %v20643_v30, %v15543_v41  ;;  %v5178_v30 = vmul.f32 %v15610_v47, %v15610_v47 }
 0x4f9   :  { %4814 = vadd.xlane.f32.xlu0 %v4813_v9  ;;  %v10375_v54 = vpop.eup %10374  ;;  %v5441_v15 = vpop.xlane.xlu0 %5440  ;;  %v6106_v56 = vsub.f32 %v5786_v21, %v5946_v34  ;;  %v5944_v9 = vmul.f32 %v15643_v42, %v15643_v42  ;;  %v20644_v21 = vld [vmem:[#allocation90_spill] sm:$0xff] }
 0x4fa   :  { %20641 = vst [vmem:[#allocation111_spill] sm:$0xff] %v15653_v32  ;;  %v6425_v12 = vadd.f32 1e-05, %v6105_v20  ;;  %v5783_v24 = vmul.f32 0.020408163, %v5441_v15  ;;  %v15661_v53 = vmul.f32 %v10375_v54, %v6261_v50  ;;  %v10377_v7 = vpop.eup %10376  ;;  %v5444_v35 = vpop.xlane.xlu1 %5443  ;;  %v6259_v54 = vsub.f32 %v20644_v21, %v15549_v16  ;;  %v20649_v16 = vld [vmem:[#allocation87_spill] sm:$0xff] }
 0x4fb   :  { %4817 = vadd.xlane.f32.xlu1 %v4816_v5  ;;  %v6426_v34 = vadd.f32 1e-05, %v6106_v56  ;;  %v5784_v5 = vmul.f32 0.020408163, %v5444_v35  ;;  %v4810_v15 = vsel %vm67_vm0, %v15653_v32, 0.0  ;;  %v20647_v56 = vld [vmem:[#allocation173_spill] sm:$0xff]  ;;  %v6260_v21 = vsub.f32 %v20649_v16, %v15561_v58 }
 0x4fc   :  { %20642 = vst [vmem:[#allocation109_spill] sm:$0xff] %v15661_v53  ;;  %10382 = vrsqrt.f32 %v6425_v12  ;;  %v6103_v20 = vsub.f32 %v5783_v24, %v5943_v8  ;;  %v15677_v53 = vmul.f32 %v10377_v7, %v6262_v63  ;;  %v20646_v8 = vld [vmem:[#allocation175_spill] sm:$0xff] }
 0x4fd   :  { %4808 = vadd.xlane.f32.xlu0 %v4807_v51  ;;  %v10379_v50 = vpop.eup %10378  ;;  %v4659_v41 = vpop.xlane.xlu0 %4658  ;;  %10384 = vrsqrt.f32 %v6426_v34  ;;  %v6104_v24 = vsub.f32 %v5784_v5, %v5944_v9  ;;  %v15683_v35 = vadd.f32 %v20647_v56, %v20646_v8  ;;  %v20651_v63 = vld [vmem:[#allocation179_spill] sm:$0xff]  ;;  %v20652_v34 = vld [vmem:[#allocation177_spill] sm:$0xff]  ;;  %v5544_v5 = vsel %vm67_vm0, %v5178_v30, 0.0  ;;  %v20657_v30 = vld [vmem:[#allocation56_spill] sm:$0xff] }
 0x4fe   :  { %20645 = vst [vmem:[#allocation193_spill] sm:$0xff] %v15677_v53  ;;  %v6423_v12 = vadd.f32 1e-05, %v6103_v20  ;;  %v10381_v51 = vpop.eup %10380  ;;  %v4662_v25 = vpop.xlane.xlu1 %4661  ;;  %v15688_v6 = vmul.f32 %v10379_v50, %v6259_v54  ;;  %v15692_v9 = vadd.f32 %v20652_v34, %v20651_v63  ;;  %v15699_v58 = vmul.f32 0.020408163, %v4659_v41 }
 0x4ff   :  { %4811 = vadd.xlane.f32.xlu1 %v4810_v15  ;;  %20648 = vst [vmem:[#allocation121_spill] sm:$0xff] %v15683_v35  ;;  %v6424_v7 = vadd.f32 1e-05, %v6104_v24  ;;  %v15695_v15 = vmul.f32 %v10381_v51, %v6260_v21  ;;  %v15697_v8 = vpop.f32.mrf.mxu1  ;;  %v15703_v50 = vadd.f32 %v15553_v46, %v20655_v44  ;;  %v4747_v54 = vsel %vm67_vm0, %v15683_v35, 0.0 }
 0x500   :  { %20650 = vst [vmem:[#allocation207_spill] sm:$0xff] %v15688_v6  ;;  %10386 = vrsqrt.f32 %v6423_v12  ;;  %20653 = vst [vmem:[#allocation114_spill] sm:$0xff] %v15692_v9  ;;  %v15707_v12 = vmul.f32 0.020408163, %v4662_v25  ;;  %v15711_v24 = vadd.f32 %v15597_v11, %v20657_v30  ;;  %v4750_v56 = vsel %vm67_vm0, %v15692_v9, 0.0  ;;  %v20659_v25 = vld [vmem:[#allocation43_spill] sm:$0xff] }
 0x501   :  { %5542 = vadd.xlane.f32.xlu0 %v5541_v18  ;;  %v4653_v20 = vpop.xlane.xlu0 %4652  ;;  %20654 = vst [vmem:[#allocation86_spill] sm:$0xff] %v15695_v15  ;;  %10388 = vrsqrt.f32 %v6424_v7  ;;  %20656 = vst [vmem:[#allocation68_spill] sm:$0xff] %v15703_v50  ;;  %v15717_v16 = vpop.f32.mrf.mxu1  ;;  %v5949_v46 = vmul.f32 %v15699_v58, %v15699_v58  ;;  %v15723_v7 = vadd.f32 %v15577_v14, %v20659_v25  ;;  %v4825_v34 = vsel %vm67_vm0, %v15703_v50, 0.0 }
 0x502   :  { %v4656_v18 = vpop.xlane.xlu1 %4655  ;;  %20658 = vst [vmem:[#allocation201_spill] sm:$0xff] %v15711_v24  ;;  %v15713_v51 = vmul.f32 0.020408163, %v4653_v20  ;;  %v20661_v20 = vld [vmem:[#allocation99_spill] sm:$0xff]  ;;  %v5950_v44 = vmul.f32 %v15707_v12, %v15707_v12  ;;  %v4828_v53 = vsel %vm67_vm0, %v15711_v24, 0.0  ;;  %v5179_v48 = vmul.f32 %v15683_v35, %v15683_v35 }
 0x503   :  { %5545 = vadd.xlane.f32.xlu1 %v5544_v5  ;;  %20660 = vst [vmem:[#allocation60_spill] sm:$0xff] %v15723_v7  ;;  %v15725_v63 = vmul.f32 0.020408163, %v4656_v18  ;;  %v6265_v5 = vsub.f32 %v20661_v20, %v15617_v38  ;;  %v15741_v15 = vpop.f32.mrf.mxu1  ;;  %v4819_v26 = vsel %vm67_vm0, %v15723_v7, 0.0 }
 0x504   :  { %v5947_v18 = vmul.f32 %v15713_v51, %v15713_v51 }
 0x505   :  { %4748 = vadd.xlane.f32.xlu0 %v4747_v54  ;;  %v5459_v41 = vpop.xlane.xlu0 %5458  ;;  %v15761_v47 = vpop.f32.mrf.mxu1 }
 0x506   :  { %v5789_v21 = vmul.f32 0.020408163, %v5459_v41  ;;  %v5462_v11 = vpop.xlane.xlu1 %5461 }
 0x507   :  { %4751 = vadd.xlane.f32.xlu1 %v4750_v56  ;;  %v5790_v30 = vmul.f32 0.020408163, %v5462_v11  ;;  %v20662_v56 = vld [vmem:[#allocation47_spill] sm:$0xff]  ;;  %v20665_v11 = vld [vmem:[#allocation92_spill] sm:$0xff] }
 0x508   :  { %v6109_v54 = vsub.f32 %v5789_v21, %v5949_v46  ;;  %v15735_v14 = vadd.f32 %v15615_v61, %v20662_v56  ;;  %v6266_v61 = vsub.f32 %v20665_v11, %v15625_v62  ;;  %v5180_v11 = vmul.f32 %v15692_v9, %v15692_v9 }
 0x509   :  { %4826 = vadd.xlane.f32.xlu0 %v4825_v34  ;;  %v10383_v41 = vpop.eup %10382  ;;  %v5453_v25 = vpop.xlane.xlu0 %5452  ;;  %v6110_v20 = vsub.f32 %v5790_v30, %v5950_v44  ;;  %v5948_v34 = vmul.f32 %v15725_v63, %v15725_v63  ;;  %v20666_v30 = vld [vmem:[#allocation73_spill] sm:$0xff] }
 0x50a   :  { %20663 = vst [vmem:[#allocation8_spill] sm:$0xff] %v15735_v14  ;;  %v6429_v38 = vadd.f32 1e-05, %v6109_v54  ;;  %v5787_v6 = vmul.f32 0.020408163, %v5453_v25  ;;  %v15743_v46 = vmul.f32 %v10383_v41, %v6265_v5  ;;  %v10385_v21 = vpop.eup %10384  ;;  %v5456_v56 = vpop.xlane.xlu1 %5455  ;;  %v6263_v41 = vsub.f32 %v20666_v30, %v15631_v37 }
 0x50b   :  { %4829 = vadd.xlane.f32.xlu1 %v4828_v53  ;;  %v6430_v44 = vadd.f32 1e-05, %v6110_v20  ;;  %v5788_v53 = vmul.f32 0.020408163, %v5456_v56  ;;  %v4822_v25 = vsel %vm67_vm0, %v15735_v14, 0.0  ;;  %v5547_v56 = vsel %vm67_vm0, %v5179_v48, 0.0 }
 0x50c   :  { %20664 = vst [vmem:[#allocation80_spill] sm:$0xff] %v15743_v46  ;;  %10390 = vrsqrt.f32 %v6429_v38  ;;  %v6107_v54 = vsub.f32 %v5787_v6, %v5947_v18  ;;  %v15759_v46 = vmul.f32 %v10385_v21, %v6266_v61  ;;  %v20668_v18 = vld [vmem:[#allocation81_spill] sm:$0xff]  ;;  %v5550_v61 = vsel %vm67_vm0, %v5180_v11, 0.0 }
 0x50d   :  { %4820 = vadd.xlane.f32.xlu0 %v4819_v26  ;;  %v10387_v5 = vpop.eup %10386  ;;  %v4671_v62 = vpop.xlane.xlu0 %4670  ;;  %10392 = vrsqrt.f32 %v6430_v44  ;;  %v6108_v6 = vsub.f32 %v5788_v53, %v5948_v34  ;;  %v6264_v20 = vsub.f32 %v20668_v18, %v15643_v42  ;;  %v20671_v42 = vld [vmem:[#allocation32_spill] sm:$0xff]  ;;  %v20673_v53 = vld [vmem:[#allocation182_spill] sm:$0xff] }
 0x50e   :  { %20667 = vst [vmem:[#allocation204_spill] sm:$0xff] %v15759_v46  ;;  %v6427_v38 = vadd.f32 1e-05, %v6107_v54  ;;  %v10389_v26 = vpop.eup %10388  ;;  %v4674_v37 = vpop.xlane.xlu1 %4673  ;;  %v15766_v30 = vmul.f32 %v10387_v5, %v6263_v41  ;;  %v15773_v34 = vmul.f32 0.020408163, %v4671_v62  ;;  %v15777_v54 = vadd.f32 %v15635_v19, %v20671_v42  ;;  %v20676_v62 = vld [vmem:[#allocation183_spill] sm:$0xff] }
 0x50f   :  { %4823 = vadd.xlane.f32.xlu1 %v4822_v25  ;;  %v6428_v35 = vadd.f32 1e-05, %v6108_v6  ;;  %v15769_v9 = vmul.f32 %v10389_v26, %v6264_v20  ;;  %v15771_v44 = vpop.f32.mrf.mxu1  ;;  %v4753_v5 = vsel %vm67_vm0, %v20673_v53, 0.0  ;;  %v15781_v41 = vmul.f32 0.020408163, %v4674_v37  ;;  %v20674_v25 = vld [vmem:[#allocation54_spill] sm:$0xff] }
 0x510   :  { %20669 = vst [vmem:[#allocation10_spill] sm:$0xff] %v15766_v30  ;;  %10394 = vrsqrt.f32 %v6427_v38  ;;  %20672 = vst [vmem:[#allocation141_spill] sm:$0xff] %v15777_v54  ;;  %v15785_v11 = vadd.f32 %v15679_v29, %v20674_v25  ;;  %v4756_v6 = vsel %vm67_vm0, %v20676_v62, 0.0  ;;  %v5953_v19 = vmul.f32 %v15773_v34, %v15773_v34  ;;  %v20677_v20 = vld [vmem:[#allocation41_spill] sm:$0xff] }
 0x511   :  { %5548 = vadd.xlane.f32.xlu0 %v5547_v56  ;;  %v4665_v21 = vpop.xlane.xlu0 %4664  ;;  %20670 = vst [vmem:[#allocation145_spill] sm:$0xff] %v15769_v9  ;;  %10396 = vrsqrt.f32 %v6428_v35  ;;  %v15791_v26 = vpop.f32.mrf.mxu1  ;;  %v15797_v37 = vadd.f32 %v15659_v57, %v20677_v20 }
 0x512   :  { %v4668_v48 = vpop.xlane.xlu1 %4667  ;;  %20675 = vst [vmem:[#allocation158_spill] sm:$0xff] %v15785_v11  ;;  %v15787_v38 = vmul.f32 0.020408163, %v4665_v21  ;;  %v4837_v21 = vsel %vm67_vm0, %v15777_v54, 0.0  ;;  %v4840_v9 = vsel %vm67_vm0, %v15785_v11, 0.0 }
 0x513   :  { %5551 = vadd.xlane.f32.xlu1 %v5550_v61  ;;  %20678 = vst [vmem:[#allocation2_spill] sm:$0xff] %v15797_v37  ;;  %v15799_v56 = vmul.f32 0.020408163, %v4668_v48  ;;  %v20679_v61 = vld [vmem:[#allocation100_spill] sm:$0xff]  ;;  %v15815_v30 = vpop.f32.mrf.mxu1  ;;  %v4831_v54 = vsel %vm67_vm0, %v15797_v37, 0.0 }
 0x514   :  { %v6269_v42 = vsub.f32 %v20679_v61, %v15699_v58  ;;  %v5951_v48 = vmul.f32 %v15787_v38, %v15787_v38 }
 0x515   :  { %4754 = vadd.xlane.f32.xlu0 %v4753_v5  ;;  %v5471_v35 = vpop.xlane.xlu0 %5470  ;;  %v5954_v5 = vmul.f32 %v15781_v41, %v15781_v41 }
 0x516   :  { %v5793_v18 = vmul.f32 0.020408163, %v5471_v35  ;;  %v5474_v29 = vpop.xlane.xlu1 %5473 }
 0x517   :  { %4757 = vadd.xlane.f32.xlu1 %v4756_v6  ;;  %v5794_v46 = vmul.f32 0.020408163, %v5474_v29  ;;  %v20680_v6 = vld [vmem:[#allocation55_spill] sm:$0xff] }
 0x518   :  { %v6113_v25 = vsub.f32 %v5793_v18, %v5953_v19  ;;  %v15809_v57 = vadd.f32 %v15697_v8, %v20680_v6  ;;  %v20683_v29 = vld [vmem:[#allocation103_spill] sm:$0xff] }
 0x519   :  { %4838 = vadd.xlane.f32.xlu0 %v4837_v21  ;;  %v10391_v35 = vpop.eup %10390  ;;  %v5465_v20 = vpop.xlane.xlu0 %5464  ;;  %v6114_v61 = vsub.f32 %v5794_v46, %v5954_v5  ;;  %v6270_v8 = vsub.f32 %v20683_v29, %v15707_v12  ;;  %v5952_v21 = vmul.f32 %v15799_v56, %v15799_v56 }
 0x51a   :  { %20681 = vst [vmem:[#allocation146_spill] sm:$0xff] %v15809_v57  ;;  %v6433_v58 = vadd.f32 1e-05, %v6113_v25  ;;  %v5791_v55 = vmul.f32 0.020408163, %v5465_v20  ;;  %v15817_v19 = vmul.f32 %v10391_v35, %v6269_v42  ;;  %v10393_v18 = vpop.eup %10392  ;;  %v5468_v6 = vpop.xlane.xlu1 %5467  ;;  %v4834_v12 = vsel %vm67_vm0, %v15809_v57, 0.0 }
 0x51b   :  { %4841 = vadd.xlane.f32.xlu1 %v4840_v9  ;;  %v6434_v11 = vadd.f32 1e-05, %v6114_v61  ;;  %v5792_v25 = vmul.f32 0.020408163, %v5468_v6  ;;  %v20684_v9 = vld [vmem:[#allocation94_spill] sm:$0xff]  ;;  %v15829_v35 = vmul.f32 %v10393_v18, %v6270_v8  ;;  %v15831_v20 = vpop.f32.mrf.mxu1 }
 0x51c   :  { %20682 = vst [vmem:[#allocation76_spill] sm:$0xff] %v15817_v19  ;;  %10398 = vrsqrt.f32 %v6433_v58  ;;  %v6111_v24 = vsub.f32 %v5791_v55, %v5951_v48  ;;  %v6267_v42 = vsub.f32 %v20684_v9, %v15713_v51  ;;  %v20688_v51 = vld [vmem:[#allocation97_spill] sm:$0xff] }
 0x51d   :  { %4832 = vadd.xlane.f32.xlu0 %v4831_v54  ;;  %v10395_v46 = vpop.eup %10394  ;;  %v4677_v5 = vpop.xlane.xlu0 %4676  ;;  %20685 = vst [vmem:[#allocation149_spill] sm:$0xff] %v15829_v35  ;;  %10400 = vrsqrt.f32 %v6434_v11  ;;  %v6112_v19 = vsub.f32 %v5792_v25, %v5952_v21  ;;  %v20686_v54 = vld [vmem:[#allocation45_spill] sm:$0xff]  ;;  %v6268_v61 = vsub.f32 %v20688_v51, %v15725_v63 }
 0x51e   :  { %v6431_v29 = vadd.f32 1e-05, %v6111_v24  ;;  %v15833_v58 = vmul.f32 0.020408163, %v4677_v5  ;;  %v10397_v55 = vpop.eup %10396  ;;  %v15837_v48 = vadd.f32 %v15717_v16, %v20686_v54  ;;  %v4680_v6 = vpop.xlane.xlu1 %4679  ;;  %v20689_v9 = vld [vmem:[#allocation185_spill] sm:$0xff]  ;;  %v15843_v8 = vmul.f32 %v10395_v46, %v6267_v42  ;;  %v20693_v5 = vld [vmem:[#allocation186_spill] sm:$0xff] }
 0x51f   :  { %4835 = vadd.xlane.f32.xlu1 %v4834_v12  ;;  %v4759_v18 = vsel %vm67_vm0, %v20689_v9, 0.0  ;;  %v6432_v24 = vadd.f32 1e-05, %v6112_v19  ;;  %v20691_v11 = vld [vmem:[#allocation53_spill] sm:$0xff]  ;;  %v15849_v25 = vmul.f32 0.020408163, %v4680_v6  ;;  %v15853_v63 = vmul.f32 %v10397_v55, %v6268_v61  ;;  %v15855_v54 = vpop.f32.mrf.mxu1 }
 0x520   :  { %20687 = vst [vmem:[#allocation140_spill] sm:$0xff] %v15837_v48  ;;  %20690 = vst [vmem:[#allocation75_spill] sm:$0xff] %v15843_v8  ;;  %10402 = vrsqrt.f32 %v6431_v29  ;;  %v15847_v21 = vadd.f32 %v15761_v47, %v20691_v11  ;;  %v4762_v12 = vsel %vm67_vm0, %v20693_v5, 0.0  ;;  %v5955_v46 = vmul.f32 %v15833_v58, %v15833_v58  ;;  %v20695_v42 = vld [vmem:[#allocation20_spill] sm:$0xff] }
 0x521   :  { %4760 = vadd.xlane.f32.xlu0 %v4759_v18  ;;  %v5477_v16 = vpop.xlane.xlu0 %5476  ;;  %20694 = vst [vmem:[#allocation144_spill] sm:$0xff] %v15853_v63  ;;  %10404 = vrsqrt.f32 %v6432_v24  ;;  %v15861_v47 = vadd.f32 %v15741_v15, %v20695_v42  ;;  %v4849_v51 = vsel %vm67_vm0, %v15837_v48, 0.0  ;;  %v5956_v55 = vmul.f32 %v15849_v25, %v15849_v25  ;;  %v20697_v18 = vld [vmem:[#allocation39_spill] sm:$0xff]  ;;  %v15873_v15 = vpop.f32.mrf.mxu1  ;;  %v20701_v8 = vld [vmem:[#allocation184_spill] sm:$0xff] }
 0x522   :  { %20692 = vst [vmem:[#allocation84_spill] sm:$0xff] %v15847_v21  ;;  %v5795_v19 = vmul.f32 0.020408163, %v5477_v16  ;;  %v5480_v29 = vpop.xlane.xlu1 %5479  ;;  %v15869_v24 = vadd.f32 %v15771_v44, %v20697_v18  ;;  %v4852_v16 = vsel %vm67_vm0, %v15847_v21, 0.0  ;;  %v20700_v18 = vld [vmem:[#allocation106_spill] sm:$0xff] }
 0x523   :  { %4763 = vadd.xlane.f32.xlu1 %v4762_v12  ;;  %20696 = vst [vmem:[#allocation82_spill] sm:$0xff] %v15861_v47  ;;  %v5796_v6 = vmul.f32 0.020408163, %v5480_v29  ;;  %v15883_v21 = vadd.f32 %v20701_v8, %v20700_v18  ;;  %v15891_v48 = vpop.f32.mrf.mxu1 }
 0x524   :  { %v6115_v61 = vsub.f32 %v5795_v19, %v5955_v46  ;;  %20698 = vst [vmem:[#allocation7_spill] sm:$0xff] %v15869_v24  ;;  %v4843_v46 = vsel %vm67_vm0, %v15861_v47, 0.0  ;;  %v20699_v19 = vld [vmem:[#allocation116_spill] sm:$0xff] }
 0x525   :  { %4850 = vadd.xlane.f32.xlu0 %v4849_v51  ;;  %v4683_v11 = vpop.xlane.xlu0 %4682  ;;  %v6116_v42 = vsub.f32 %v5796_v6, %v5956_v55  ;;  %v6273_v29 = vsub.f32 %v20699_v19, %v15773_v34  ;;  %20702 = vst [vmem:[#allocation153_spill] sm:$0xff] %v15883_v21  ;;  %v20703_v55 = vld [vmem:[#allocation117_spill] sm:$0xff] }
 0x526   :  { %v6435_v12 = vadd.f32 1e-05, %v6115_v61  ;;  %v15875_v35 = vmul.f32 0.020408163, %v4683_v11  ;;  %v4686_v63 = vpop.xlane.xlu1 %4685  ;;  %v6274_v61 = vsub.f32 %v20703_v55, %v15781_v41  ;;  %v20708_v55 = vld [vmem:[#allocation192_spill] sm:$0xff] }
 0x527   :  { %4853 = vadd.xlane.f32.xlu1 %v4852_v16  ;;  %v6436_v44 = vadd.f32 1e-05, %v6116_v42  ;;  %v15887_v6 = vmul.f32 0.020408163, %v4686_v63  ;;  %v4846_v16 = vsel %vm67_vm0, %v15869_v24, 0.0  ;;  %v20707_v63 = vld [vmem:[#allocation107_spill] sm:$0xff] }
 0x528   :  { %10406 = vrsqrt.f32 %v6435_v12  ;;  %v5957_v34 = vmul.f32 %v15875_v35, %v15875_v35  ;;  %v6271_v19 = vsub.f32 %v20707_v63, %v15787_v38  ;;  %v4765_v24 = vsel %vm67_vm0, %v20708_v55, 0.0  ;;  %v9798_v63 = vpop.f32.mrf.mxu1 }
 0x529   :  { %4844 = vadd.xlane.f32.xlu0 %v4843_v46  ;;  %v10399_v51 = vpop.eup %10398  ;;  %v5483_v11 = vpop.xlane.xlu0 %5482  ;;  %10408 = vrsqrt.f32 %v6436_v44  ;;  %v20705_v46 = vld [vmem:[#allocation52_spill] sm:$0xff]  ;;  %v5958_v44 = vmul.f32 %v15887_v6, %v15887_v6  ;;  %v4768_v38 = vsel %vm67_vm0, %v15883_v21, 0.0 }
 0x52a   :  { %v5797_v12 = vmul.f32 0.020408163, %v5483_v11  ;;  %v15895_v42 = vmul.f32 %v10399_v51, %v6273_v29  ;;  %v10401_v8 = vpop.eup %10400  ;;  %v15899_v41 = vadd.f32 %v15791_v26, %v20705_v46  ;;  %v5486_v18 = vpop.xlane.xlu1 %5485 }
 0x52b   :  { %4847 = vadd.xlane.f32.xlu1 %v4846_v16  ;;  %v5798_v11 = vmul.f32 0.020408163, %v5486_v18  ;;  %v15907_v29 = vmul.f32 %v10401_v8, %v6274_v61  ;;  %v20710_v16 = vld [vmem:[#allocation21_spill] sm:$0xff]  ;;  %v20713_v61 = vld [vmem:[#allocation30_spill] sm:$0xff] }
 0x52c   :  { %20704 = vst [vmem:[#allocation67_spill] sm:$0xff] %v15895_v42  ;;  %20706 = vst [vmem:[#allocation5_spill] sm:$0xff] %v15899_v41  ;;  %v6117_v47 = vsub.f32 %v5797_v12, %v5957_v34  ;;  %v15911_v26 = vadd.f32 %v15831_v20, %v20710_v16  ;;  %v15921_v12 = vadd.f32 %v15815_v30, %v20713_v61  ;;  %v20715_v20 = vld [vmem:[#allocation112_spill] sm:$0xff]  ;;  %v4861_v16 = vsel %vm67_vm0, %v15899_v41, 0.0 }
 0x52d   :  { %4766 = vadd.xlane.f32.xlu0 %v4765_v24  ;;  %20709 = vst [vmem:[#allocation156_spill] sm:$0xff] %v15907_v29  ;;  %v10403_v51 = vpop.eup %10402  ;;  %v4689_v46 = vpop.xlane.xlu0 %4688  ;;  %v6118_v57 = vsub.f32 %v5798_v11, %v5958_v44  ;;  %v6272_v8 = vsub.f32 %v20715_v20, %v15799_v56  ;;  %v20716_v44 = vld [vmem:[#allocation46_spill] sm:$0xff]  ;;  %v20719_v61 = vld [vmem:[#allocation120_spill] sm:$0xff] }
 0x52e   :  { %20711 = vst [vmem:[#allocation58_spill] sm:$0xff] %v15911_v26  ;;  %v6437_v42 = vadd.f32 1e-05, %v6117_v47  ;;  %v15915_v37 = vmul.f32 0.020408163, %v4689_v46  ;;  %v15917_v34 = vmul.f32 %v10403_v51, %v6271_v19  ;;  %v10405_v24 = vpop.eup %10404  ;;  %20714 = vst [vmem:[#allocation148_spill] sm:$0xff] %v15921_v12  ;;  %v4692_v18 = vpop.xlane.xlu1 %4691  ;;  %v15929_v11 = vadd.f32 %v15855_v54, %v20716_v44 }
 0x52f   :  { %4769 = vadd.xlane.f32.xlu1 %v4768_v38  ;;  %v6438_v47 = vadd.f32 1e-05, %v6118_v57  ;;  %v15931_v19 = vmul.f32 0.020408163, %v4692_v18  ;;  %v4864_v30 = vsel %vm67_vm0, %v15911_v26, 0.0  ;;  %v15935_v46 = vmul.f32 %v10405_v24, %v6272_v8  ;;  %v4375_v56 = vpop.f32.mrf.mxu1 }
 0x530   :  { %20712 = vst [vmem:[#allocation13_spill] sm:$0xff] %v15917_v34  ;;  %10410 = vrsqrt.f32 %v6437_v42  ;;  %20717 = vst [vmem:[#allocation62_spill] sm:$0xff] %v15929_v11  ;;  %v5959_v38 = vmul.f32 %v15915_v37, %v15915_v37  ;;  %v4855_v54 = vsel %vm67_vm0, %v15921_v12, 0.0  ;;  %v6275_v20 = vsub.f32 %v20719_v61, %v15833_v58  ;;  %v20721_v61 = vld [vmem:[#allocation51_spill] sm:$0xff] }
 0x531   :  { %4862 = vadd.xlane.f32.xlu0 %v4861_v16  ;;  %v5489_v51 = vpop.xlane.xlu0 %5488  ;;  %20718 = vst [vmem:[#allocation79_spill] sm:$0xff] %v15935_v46  ;;  %10412 = vrsqrt.f32 %v6438_v47  ;;  %v5960_v18 = vmul.f32 %v15931_v19, %v15931_v19  ;;  %v4858_v44 = vsel %vm67_vm0, %v15929_v11, 0.0  ;;  %v15953_v26 = vadd.f32 %v15873_v15, %v20721_v61 }
 0x532   :  { %v5799_v42 = vmul.f32 0.020408163, %v5489_v51  ;;  %v5492_v57 = vpop.xlane.xlu1 %5491  ;;  %v9801_v51 = vpop.f32.mrf.mxu1 }
 0x533   :  { %4865 = vadd.xlane.f32.xlu1 %v4864_v30  ;;  %v5800_v24 = vmul.f32 0.020408163, %v5492_v57  ;;  %20722 = vst [vmem:[#allocation71_spill] sm:$0xff] %v15953_v26 }
 0x534   :  { %v6119_v16 = vsub.f32 %v5799_v42, %v5959_v38  ;;  %v20723_v38 = vld [vmem:[#allocation122_spill] sm:$0xff]  ;;  %v4388_v61 = vpop.f32.mrf.mxu1 }
 0x535   :  { %4856 = vadd.xlane.f32.xlu0 %v4855_v54  ;;  %v10407_v8 = vpop.eup %10406  ;;  %v4695_v47 = vpop.xlane.xlu0 %4694  ;;  %v6120_v29 = vsub.f32 %v5800_v24, %v5960_v18  ;;  %v6276_v42 = vsub.f32 %v20723_v38, %v15849_v25  ;;  %v20724_v54 = vld [vmem:[#allocation196_spill] sm:$0xff]  ;;  %v20725_v18 = vld [vmem:[#allocation37_spill] sm:$0xff] }
 0x536   :  { %v6439_v30 = vadd.f32 1e-05, %v6119_v16  ;;  %v15947_v46 = vmul.f32 0.020408163, %v4695_v47  ;;  %v15949_v34 = vmul.f32 %v10407_v8, %v6275_v20  ;;  %v10409_v58 = vpop.eup %10408  ;;  %v4698_v57 = vpop.xlane.xlu1 %4697  ;;  %v4771_v41 = vsel %vm67_vm0, %v20724_v54, 0.0  ;;  %v20727_v47 = vld [vmem:[#allocation198_spill] sm:$0xff] }
 0x537   :  { %4859 = vadd.xlane.f32.xlu1 %v4858_v44  ;;  %v6440_v16 = vadd.f32 1e-05, %v6120_v29  ;;  %v15960_v24 = vadd.f32 %v9798_v63, %v20725_v18  ;;  %v15962_v20 = vmul.f32 0.020408163, %v4698_v57  ;;  %v4774_v15 = vsel %vm67_vm0, %v20727_v47, 0.0  ;;  %v20729_v29 = vld [vmem:[#allocation35_spill] sm:$0xff] }
 0x538   :  { %20720 = vst [vmem:[#allocation152_spill] sm:$0xff] %v15949_v34  ;;  %10414 = vrsqrt.f32 %v6439_v30  ;;  %v15966_v44 = vmul.f32 %v10409_v58, %v6276_v42  ;;  %v5961_v25 = vmul.f32 %v15947_v46, %v15947_v46  ;;  %v4873_v30 = vsel %vm67_vm0, %v15953_v26, 0.0  ;;  %v20731_v57 = vld [vmem:[#allocation125_spill] sm:$0xff] }
 0x539   :  { %4772 = vadd.xlane.f32.xlu0 %v4771_v41  ;;  %20726 = vst [vmem:[#allocation50_spill] sm:$0xff] %v15960_v24  ;;  %v5495_v8 = vpop.xlane.xlu0 %5494  ;;  %10416 = vrsqrt.f32 %v6440_v16  ;;  %v15972_v41 = vadd.f32 %v15891_v48, %v20729_v29  ;;  %v6277_v18 = vsub.f32 %v20731_v57, %v15875_v35  ;;  %v5962_v58 = vmul.f32 %v15962_v20, %v15962_v20  ;;  %v9802_v29 = vpop.f32.mrf.mxu1 }
 0x53a   :  { %20728 = vst [vmem:[#allocation57_spill] sm:$0xff] %v15966_v44  ;;  %v5801_v38 = vmul.f32 0.020408163, %v5495_v8  ;;  %v5498_v63 = vpop.xlane.xlu1 %5497  ;;  %v20732_v8 = vld [vmem:[#allocation48_spill] sm:$0xff]  ;;  %v4876_v48 = vsel %vm67_vm0, %v15960_v24, 0.0 }
 0x53b   :  { %4775 = vadd.xlane.f32.xlu1 %v4774_v15  ;;  %20730 = vst [vmem:[#allocation161_spill] sm:$0xff] %v15972_v41  ;;  %v5802_v16 = vmul.f32 0.020408163, %v5498_v63  ;;  %v15981_v15 = vadd.f32 %v4375_v56, %v20732_v8  ;;  %v20738_v56 = vld [vmem:[#allocation127_spill] sm:$0xff]  ;;  %v4867_v24 = vsel %vm67_vm0, %v15972_v41, 0.0 }
 0x53c   :  { %v6121_v42 = vsub.f32 %v5801_v38, %v5961_v25  ;;  %v20735_v25 = vld [vmem:[#allocation115_spill] sm:$0xff] }
 0x53d   :  { %4874 = vadd.xlane.f32.xlu0 %v4873_v30  ;;  %v10411_v44 = vpop.eup %10410  ;;  %20733 = vst [vmem:[#allocation63_spill] sm:$0xff] %v15981_v15  ;;  %v4701_v34 = vpop.xlane.xlu0 %4700  ;;  %v6122_v26 = vsub.f32 %v5802_v16, %v5962_v58  ;;  %v20736_v38 = vld [vmem:[#allocation187_spill] sm:$0xff]  ;;  %v6278_v30 = vsub.f32 %v20738_v56, %v15887_v6 }
 0x53e   :  { %v6441_v11 = vadd.f32 1e-05, %v6121_v42  ;;  %v15985_v12 = vmul.f32 0.020408163, %v4701_v34  ;;  %v15987_v35 = vmul.f32 %v10411_v44, %v6277_v18  ;;  %v10413_v57 = vpop.eup %10412  ;;  %v15991_v63 = vadd.f32 %v20736_v38, %v20735_v25  ;;  %v4704_v8 = vpop.xlane.xlu1 %4703  ;;  %v20739_v34 = vld [vmem:[#allocation206_spill] sm:$0xff]  ;;  %v20740_v58 = vld [vmem:[#allocation195_spill] sm:$0xff] }
 0x53f   :  { %4877 = vadd.xlane.f32.xlu1 %v4876_v48  ;;  %v6442_v42 = vadd.f32 1e-05, %v6122_v26  ;;  %v15999_v16 = vadd.f32 %v20740_v58, %v20739_v34  ;;  %v16001_v44 = vmul.f32 0.020408163, %v4704_v8  ;;  %v4870_v48 = vsel %vm67_vm0, %v15981_v15, 0.0  ;;  %v4391_v6 = vpop.f32.mrf.mxu1  ;;  %v20743_v26 = vld [vmem:[#allocation23_spill] sm:$0xff] }
 0x540   :  { %20734 = vst [vmem:[#allocation169_spill] sm:$0xff] %v15987_v35  ;;  %20737 = vst [vmem:[#allocation167_spill] sm:$0xff] %v15991_v63  ;;  %10418 = vrsqrt.f32 %v6441_v11  ;;  %v16005_v25 = vmul.f32 %v10413_v57, %v6278_v30  ;;  %v5963_v38 = vmul.f32 %v15985_v12, %v15985_v12  ;;  %v4777_v8 = vsel %vm67_vm0, %v15991_v63, 0.0  ;;  %v20745_v34 = vld [vmem:[#allocation119_spill] sm:$0xff] }
 0x541   :  { %4868 = vadd.xlane.f32.xlu0 %v4867_v24  ;;  %20741 = vst [vmem:[#allocation69_spill] sm:$0xff] %v15999_v16  ;;  %v5501_v18 = vpop.xlane.xlu0 %5500  ;;  %10420 = vrsqrt.f32 %v6442_v42  ;;  %v16010_v24 = vadd.f32 %v9801_v51, %v20743_v26  ;;  %v6279_v58 = vsub.f32 %v20745_v34, %v15915_v37  ;;  %v5964_v57 = vmul.f32 %v16001_v44, %v16001_v44  ;;  %v20746_v35 = vld [vmem:[#allocation31_spill] sm:$0xff]  ;;  %v9805_v26 = vpop.f32.mrf.mxu1 }
 0x542   :  { %20742 = vst [vmem:[#allocation70_spill] sm:$0xff] %v16005_v25  ;;  %v5803_v11 = vmul.f32 0.020408163, %v5501_v18  ;;  %v16019_v18 = vadd.f32 %v9802_v29, %v20746_v35  ;;  %v4780_v51 = vsel %vm67_vm0, %v15999_v16, 0.0 }
 0x543   :  { %4871 = vadd.xlane.f32.xlu1 %v4870_v48  ;;  %20744 = vst [vmem:[#allocation15_spill] sm:$0xff] %v16010_v24 }
 0x544   :  { %v5504_v56 = vpop.xlane.xlu1 %5503  ;;  %v6123_v30 = vsub.f32 %v5803_v11, %v5963_v38  ;;  %20747 = vst [vmem:[#allocation40_spill] sm:$0xff] %v16019_v18  ;;  %v20749_v38 = vld [vmem:[#allocation49_spill] sm:$0xff] }
 0x545   :  { %v5804_v42 = vmul.f32 0.020408163, %v5504_v56  ;;  %4778 = vadd.xlane.f32.xlu0 %v4777_v8  ;;  %v10415_v25 = vpop.eup %10414  ;;  %v16028_v11 = vadd.f32 %v4388_v61, %v20749_v38  ;;  %v20751_v56 = vld [vmem:[#allocation124_spill] sm:$0xff]  ;;  %v4885_v8 = vsel %vm67_vm0, %v16010_v24, 0.0  ;;  %v4888_v61 = vsel %vm67_vm0, %v16019_v18, 0.0 }
 0x546   :  { %v4707_v48 = vpop.xlane.xlu0 %4706  ;;  %v6443_v15 = vadd.f32 1e-05, %v6123_v30  ;;  %v16025_v37 = vmul.f32 %v10415_v25, %v6279_v58  ;;  %v10417_v34 = vpop.eup %10416  ;;  %v6280_v29 = vsub.f32 %v20751_v56, %v15931_v19  ;;  %v20757_v56 = vld [vmem:[#allocation129_spill] sm:$0xff] }
 0x547   :  { %v6124_v41 = vsub.f32 %v5804_v42, %v5964_v57  ;;  %v16023_v50 = vmul.f32 0.020408163, %v4707_v48  ;;  %4781 = vadd.xlane.f32.xlu1 %v4780_v51  ;;  %20750 = vst [vmem:[#allocation44_spill] sm:$0xff] %v16028_v11  ;;  %v20752_v57 = vld [vmem:[#allocation22_spill] sm:$0xff]  ;;  %v4404_v48 = vpop.f32.mrf.mxu1  ;;  %v4879_v38 = vsel %vm67_vm0, %v16028_v11, 0.0 }
 0x548   :  { %20748 = vst [vmem:[#allocation16_spill] sm:$0xff] %v16025_v37  ;;  %v4710_v35 = vpop.xlane.xlu1 %4709  ;;  %10422 = vrsqrt.f32 %v6443_v15  ;;  %v16035_v30 = vadd.f32 %v4391_v6, %v20752_v57  ;;  %v16041_v58 = vmul.f32 %v10417_v34, %v6280_v29  ;;  %v20758_v57 = vld [vmem:[#allocation210_spill] sm:$0xff] }
 0x549   :  { %v6444_v14 = vadd.f32 1e-05, %v6124_v41  ;;  %4886 = vadd.xlane.f32.xlu0 %v4885_v8  ;;  %v16037_v42 = vmul.f32 0.020408163, %v4710_v35  ;;  %v5965_v19 = vmul.f32 %v16023_v50, %v16023_v50  ;;  %v20755_v41 = vld [vmem:[#allocation130_spill] sm:$0xff]  ;;  %v6281_v35 = vsub.f32 %v20757_v56, %v15947_v46 }
 0x54a   :  { %20753 = vst [vmem:[#allocation42_spill] sm:$0xff] %v16035_v30  ;;  %v5507_v25 = vpop.xlane.xlu0 %5506  ;;  %20754 = vst [vmem:[#allocation172_spill] sm:$0xff] %v16041_v58  ;;  %v16047_v15 = vadd.f32 %v15343_v10, %v20755_v41  ;;  %v9806_v41 = vpop.f32.mrf.mxu1 }
 0x54b   :  { %10424 = vrsqrt.f32 %v6444_v14  ;;  %v5805_v51 = vmul.f32 0.020408163, %v5507_v25  ;;  %4889 = vadd.xlane.f32.xlu1 %v4888_v61  ;;  %v5966_v34 = vmul.f32 %v16037_v42, %v16037_v42  ;;  %v16057_v25 = vadd.f32 %v15381_v4, %v20758_v57 }
 0x54c   :  { %20756 = vst [vmem:[#allocation159_spill] sm:$0xff] %v16047_v15  ;;  %v5510_v6 = vpop.xlane.xlu1 %5509  ;;  %v4882_v61 = vsel %vm67_vm0, %v16035_v30, 0.0  ;;  %v4783_v57 = vsel %vm67_vm0, %v16047_v15, 0.0 }
 0x54d   :  { %v6125_v14 = vsub.f32 %v5805_v51, %v5965_v19  ;;  %v5806_v29 = vmul.f32 0.020408163, %v5510_v6  ;;  %4880 = vadd.xlane.f32.xlu0 %v4879_v38  ;;  %v10419_v8 = vpop.eup %10418  ;;  %20759 = vst [vmem:[#allocation66_spill] sm:$0xff] %v16057_v25  ;;  %v20761_v51 = vld [vmem:[#allocation29_spill] sm:$0xff]  ;;  %v20763_v38 = vld [vmem:[#allocation208_spill] sm:$0xff] }
 0x54e   :  { %v4713_v10 = vpop.xlane.xlu0 %4712  ;;  %v16063_v46 = vmul.f32 %v10419_v8, %v6281_v35  ;;  %v10421_v19 = vpop.eup %10420  ;;  %v16066_v6 = vadd.f32 %v9805_v26, %v20761_v51  ;;  %v6282_v4 = vsub.f32 %v20763_v38, %v15962_v20  ;;  %v4786_v26 = vsel %vm67_vm0, %v16057_v25, 0.0  ;;  %v20769_v38 = vld [vmem:[#allocation209_spill] sm:$0xff] }
 0x54f   :  { %v6445_v58 = vadd.f32 1e-05, %v6125_v14  ;;  %v6126_v37 = vsub.f32 %v5806_v29, %v5966_v34  ;;  %v16061_v18 = vmul.f32 0.020408163, %v4713_v10  ;;  %4883 = vadd.xlane.f32.xlu1 %v4882_v61  ;;  %v20764_v34 = vld [vmem:[#allocation26_spill] sm:$0xff]  ;;  %v4407_v10 = vpop.f32.mrf.mxu1 }
 0x550   :  { %20760 = vst [vmem:[#allocation174_spill] sm:$0xff] %v16063_v46  ;;  %20762 = vst [vmem:[#allocation164_spill] sm:$0xff] %v16066_v6  ;;  %v4716_v56 = vpop.xlane.xlu1 %4715  ;;  %v16073_v14 = vadd.f32 %v9806_v41, %v20764_v34  ;;  %v16079_v8 = vmul.f32 %v10421_v19, %v6282_v4  ;;  %v4897_v51 = vsel %vm67_vm0, %v16066_v6, 0.0  ;;  %v20770_v34 = vld [vmem:[#allocation27_spill] sm:$0xff] }
 0x551   :  { %10426 = vrsqrt.f32 %v6445_v58  ;;  %v6446_v24 = vadd.f32 1e-05, %v6126_v37  ;;  %4784 = vadd.xlane.f32.xlu0 %v4783_v57  ;;  %v16075_v29 = vmul.f32 0.020408163, %v4716_v56  ;;  %v5967_v20 = vmul.f32 %v16061_v18, %v16061_v18  ;;  %v20767_v37 = vld [vmem:[#allocation33_spill] sm:$0xff] }
 0x552   :  { %20765 = vst [vmem:[#allocation36_spill] sm:$0xff] %v16073_v14  ;;  %v5513_v35 = vpop.xlane.xlu0 %5512  ;;  %20766 = vst [vmem:[#allocation19_spill] sm:$0xff] %v16079_v8  ;;  %v16084_v58 = vadd.f32 %v4404_v48, %v20767_v37  ;;  %v6283_v56 = vsub.f32 %v20769_v38, %v15985_v12  ;;  %v4900_v48 = vsel %vm67_vm0, %v16073_v14, 0.0  ;;  %v9809_v37 = vpop.f32.mrf.mxu1 }
 0x553   :  { %10428 = vrsqrt.f32 %v6446_v24  ;;  %v5807_v61 = vmul.f32 0.020408163, %v5513_v35  ;;  %4787 = vadd.xlane.f32.xlu1 %v4786_v26  ;;  %v5968_v19 = vmul.f32 %v16075_v29, %v16075_v29  ;;  %v16093_v35 = vadd.f32 %v4407_v10, %v20770_v34  ;;  %v20775_v10 = vld [vmem:[#allocation211_spill] sm:$0xff] }
 0x554   :  { %20768 = vst [vmem:[#allocation17_spill] sm:$0xff] %v16084_v58  ;;  %v5516_v41 = vpop.xlane.xlu1 %5515  ;;  %v4891_v34 = vsel %vm67_vm0, %v16084_v58, 0.0 }
 0x555   :  { %v6127_v4 = vsub.f32 %v5807_v61, %v5967_v20  ;;  %v5808_v24 = vmul.f32 0.020408163, %v5516_v41  ;;  %4898 = vadd.xlane.f32.xlu0 %v4897_v51  ;;  %v10423_v57 = vpop.eup %10422  ;;  %20771 = vst [vmem:[#allocation9_spill] sm:$0xff] %v16093_v35  ;;  %v20773_v20 = vld [vmem:[#allocation212_spill] sm:$0xff]  ;;  %v6284_v41 = vsub.f32 %v20775_v10, %v16001_v44 }
 0x556   :  { %v4719_v26 = vpop.xlane.xlu0 %4718  ;;  %v16099_v12 = vmul.f32 %v10423_v57, %v6283_v56  ;;  %v16103_v61 = vadd.f32 %v15305_v39, %v20773_v20  ;;  %v4894_v56 = vsel %vm67_vm0, %v16093_v35, 0.0  ;;  %v5182_v39 = vmul.f32 %v20676_v62, %v20676_v62 }
 0x557   :  { %v6447_v8 = vadd.f32 1e-05, %v6127_v4  ;;  %v6128_v46 = vsub.f32 %v5808_v24, %v5968_v19  ;;  %v16097_v6 = vmul.f32 0.020408163, %v4719_v26  ;;  %4901 = vadd.xlane.f32.xlu1 %v4900_v48  ;;  %v4420_v26 = vpop.f32.mrf.mxu1 }
 0x558   :  { %20772 = vst [vmem:[#allocation18_spill] sm:$0xff] %v16099_v12  ;;  %v10425_v38 = vpop.eup %10424  ;;  %20774 = vst [vmem:[#allocation85_spill] sm:$0xff] %v16103_v61  ;;  %v4722_v51 = vpop.xlane.xlu1 %4721  ;;  %v4789_v10 = vsel %vm67_vm0, %v16103_v61, 0.0 }
 0x559   :  { %10430 = vrsqrt.f32 %v6447_v8  ;;  %v6448_v4 = vadd.f32 1e-05, %v6128_v46  ;;  %4892 = vadd.xlane.f32.xlu0 %v4891_v34  ;;  %v16109_v19 = vmul.f32 0.020408163, %v4722_v51  ;;  %v16115_v57 = vmul.f32 %v10425_v38, %v6284_v41  ;;  %v20777_v46 = vld [vmem:[#allocation25_spill] sm:$0xff] }
 0x55a   :  { %v5519_v24 = vpop.xlane.xlu0 %5518  ;;  %v5969_v44 = vmul.f32 %v16097_v6, %v16097_v6  ;;  %v16120_v8 = vadd.f32 %v9809_v37, %v20777_v46  ;;  %v6285_v51 = vsub.f32 %v20567_v28, %v16023_v50  ;;  %v9810_v46 = vpop.f32.mrf.mxu1 }
 0x55b   :  { %20776 = vst [vmem:[#allocation90_spill] sm:$0xff] %v16115_v57  ;;  %10432 = vrsqrt.f32 %v6448_v4  ;;  %v5809_v48 = vmul.f32 0.020408163, %v5519_v24  ;;  %4895 = vadd.xlane.f32.xlu1 %v4894_v56  ;;  %v5970_v38 = vmul.f32 %v16109_v19, %v16109_v19  ;;  %v20779_v57 = vld [vmem:[#allocation213_spill] sm:$0xff]  ;;  %v5556_v56 = vsel %vm67_vm0, %v5182_v39, 0.0 }
 0x55c   :  { %20778 = vst [vmem:[#allocation175_spill] sm:$0xff] %v16120_v8  ;;  %v5522_v20 = vpop.xlane.xlu1 %5521  ;;  %v16130_v24 = vadd.f32 %v15363_v27, %v20779_v57  ;;  %v4909_v57 = vsel %vm67_vm0, %v16120_v8, 0.0 }
 0x55d   :  { %v6129_v41 = vsub.f32 %v5809_v48, %v5969_v44  ;;  %v5810_v34 = vmul.f32 0.020408163, %v5522_v20  ;;  %4790 = vadd.xlane.f32.xlu0 %v4789_v10  ;;  %v20782_v44 = vld [vmem:[#allocation24_spill] sm:$0xff]  ;;  %v6286_v20 = vsub.f32 %v15335_v0, %v16037_v42 }
 0x55e   :  { %v10427_v4 = vpop.eup %10426  ;;  %20780 = vst [vmem:[#allocation173_spill] sm:$0xff] %v16130_v24  ;;  %v4725_v37 = vpop.xlane.xlu0 %4724  ;;  %v16138_v48 = vadd.f32 %v4420_v26, %v20782_v44  ;;  %v20784_v10 = vld [vmem:[#allocation72_spill] sm:$0xff]  ;;  %v4792_v26 = vsel %vm67_vm0, %v16130_v24, 0.0 }
 0x55f   :  { %v6449_v12 = vadd.f32 1e-05, %v6129_v41  ;;  %v6130_v62 = vsub.f32 %v5810_v34, %v5970_v38  ;;  %v16133_v14 = vmul.f32 0.020408163, %v4725_v37  ;;  %5557 = vadd.xlane.f32.xlu1 %v5556_v56  ;;  %v16135_v28 = vmul.f32 %v10427_v4, %v6285_v51  ;;  %v4423_v4 = vpop.f32.mrf.mxu1 }
 0x560   :  { %v10429_v50 = vpop.eup %10428  ;;  %20783 = vst [vmem:[#allocation179_spill] sm:$0xff] %v16138_v48  ;;  %v4728_v27 = vpop.xlane.xlu1 %4727  ;;  %v16145_v38 = vadd.f32 %v9810_v46, %v20784_v10  ;;  %v5181_v37 = vmul.f32 %v20673_v53, %v20673_v53  ;;  %v6287_v56 = vsub.f32 %v15367_v23, %v16061_v18 }
 0x561   :  { %20781 = vst [vmem:[#allocation87_spill] sm:$0xff] %v16135_v28  ;;  %10434 = vrsqrt.f32 %v6449_v12  ;;  %v6450_v39 = vadd.f32 1e-05, %v6130_v62  ;;  %4910 = vadd.xlane.f32.xlu0 %v4909_v57  ;;  %v16147_v41 = vmul.f32 0.020408163, %v4728_v27  ;;  %v16151_v34 = vmul.f32 %v10429_v50, %v6286_v20  ;;  %v20787_v27 = vld [vmem:[#allocation28_spill] sm:$0xff] }
 0x562   :  { %20785 = vst [vmem:[#allocation177_spill] sm:$0xff] %v16145_v38  ;;  %v5525_v51 = vpop.xlane.xlu0 %5524  ;;  %v5971_v0 = vmul.f32 %v16133_v14, %v16133_v14  ;;  %v4903_v12 = vsel %vm67_vm0, %v16138_v48, 0.0  ;;  %v16164_v57 = vadd.f32 %v4423_v4, %v20787_v27  ;;  %v4912_v10 = vsel %vm67_vm0, %v16145_v38, 0.0 }
 0x563   :  { %20786 = vst [vmem:[#allocation34_spill] sm:$0xff] %v16151_v34  ;;  %10436 = vrsqrt.f32 %v6450_v39  ;;  %v5811_v42 = vmul.f32 0.020408163, %v5525_v51  ;;  %4793 = vadd.xlane.f32.xlu1 %v4792_v26  ;;  %v5972_v46 = vmul.f32 %v16147_v41, %v16147_v41  ;;  %v5183_v4 = vmul.f32 %v20689_v9, %v20689_v9 }
 0x564   :  { %v5528_v62 = vpop.xlane.xlu1 %5527  ;;  %20788 = vst [vmem:[#allocation56_spill] sm:$0xff] %v16164_v57 }
 0x565   :  { %v6131_v50 = vsub.f32 %v5811_v42, %v5971_v0  ;;  %v5812_v44 = vmul.f32 0.020408163, %v5528_v62  ;;  %4904 = vadd.xlane.f32.xlu0 %v4903_v12  ;;  %v6288_v0 = vsub.f32 %v15376_v33, %v16075_v29  ;;  %v5553_v62 = vsel %vm67_vm0, %v5181_v37, 0.0 }
 0x566   :  { %v10431_v20 = vpop.eup %10430  ;;  %v4731_v39 = vpop.xlane.xlu0 %4730  ;;  %v5559_v27 = vsel %vm67_vm0, %v5183_v4, 0.0 }
 0x567   :  { %v6451_v51 = vadd.f32 1e-05, %v6131_v50  ;;  %v6132_v26 = vsub.f32 %v5812_v44, %v5972_v46  ;;  %v16168_v34 = vmul.f32 0.020408163, %v4731_v39  ;;  %4913 = vadd.xlane.f32.xlu1 %v4912_v10  ;;  %v16170_v23 = vmul.f32 %v10431_v20, %v6287_v56 }
 0x568   :  { %v10433_v18 = vpop.eup %10432  ;;  %v4734_v42 = vpop.xlane.xlu1 %4733  ;;  %v4906_v56 = vsel %vm67_vm0, %v16164_v57, 0.0  ;;  %v5184_v44 = vmul.f32 %v20693_v5, %v20693_v5  ;;  %v5185_v39 = vmul.f32 %v20708_v55, %v20708_v55  ;;  %v6289_v10 = vsub.f32 %v15403_v43, %v16097_v6 }
 0x569   :  { %20789 = vst [vmem:[#allocation43_spill] sm:$0xff] %v16170_v23  ;;  %10438 = vrsqrt.f32 %v6451_v51  ;;  %v6452_v12 = vadd.f32 1e-05, %v6132_v26  ;;  %5554 = vadd.xlane.f32.xlu0 %v5553_v62  ;;  %v16177_v50 = vmul.f32 0.020408163, %v4734_v42  ;;  %v16183_v20 = vmul.f32 %v10433_v18, %v6288_v0  ;;  %v20834_v23 = vld [vmem:[#allocation84_spill] sm:$0xff] }
 0x56a   :  { %v5531_v46 = vpop.xlane.xlu0 %5530  ;;  %v5973_v33 = vmul.f32 %v16168_v34, %v16168_v34  ;;  %v5562_v62 = vsel %vm67_vm0, %v5184_v44, 0.0  ;;  %v6290_v43 = vsub.f32 %v15414_v59, %v16109_v19 }
 0x56b   :  { %20790 = vst [vmem:[#allocation99_spill] sm:$0xff] %v16183_v20  ;;  %10440 = vrsqrt.f32 %v6452_v12  ;;  %v5813_v29 = vmul.f32 0.020408163, %v5531_v46  ;;  %4907 = vadd.xlane.f32.xlu1 %v4906_v56  ;;  %v5974_v51 = vmul.f32 %v16177_v50, %v16177_v50  ;;  %v5186_v12 = vmul.f32 %v15883_v21, %v15883_v21  ;;  %v20829_v21 = vld [vmem:[#allocation7_spill] sm:$0xff] }
 0x56c   :  { %v5534_v37 = vpop.xlane.xlu1 %5533 }
 0x56d   :  { %v6133_v26 = vsub.f32 %v5813_v29, %v5973_v33  ;;  %v5814_v18 = vmul.f32 0.020408163, %v5534_v37  ;;  %5560 = vadd.xlane.f32.xlu0 %v5559_v27  ;;  %v5565_v33 = vsel %vm67_vm0, %v5185_v39, 0.0  ;;  %v5187_v29 = vmul.f32 %v20724_v54, %v20724_v54 }
 0x56e   :  { %v10435_v0 = vpop.eup %10434  ;;  %v4737_v42 = vpop.xlane.xlu0 %4736  ;;  %v5568_v27 = vsel %vm67_vm0, %v5186_v12, 0.0  ;;  %v5189_v39 = vmul.f32 %v15991_v63, %v15991_v63  ;;  %v6292_v12 = vsub.f32 %v15452_v13, %v16147_v41  ;;  %v5192_v41 = vmul.f32 %v16057_v25, %v16057_v25 }
 0x56f   :  { %v6453_v4 = vadd.f32 1e-05, %v6133_v26  ;;  %v6134_v46 = vsub.f32 %v5814_v18, %v5974_v51  ;;  %5563 = vadd.xlane.f32.xlu1 %v5562_v62  ;;  %v16197_v56 = vmul.f32 %v10435_v0, %v6289_v10  ;;  %v5188_v10 = vmul.f32 %v20727_v47, %v20727_v47  ;;  %v20820_v47 = vld [vmem:[#allocation141_spill] sm:$0xff] }
 0x570   :  { %v10437_v20 = vpop.eup %10436  ;;  %v4740_v6 = vpop.xlane.xlu1 %4739  ;;  %v5571_v19 = vsel %vm67_vm0, %v5187_v29, 0.0  ;;  %v6291_v26 = vsub.f32 %v15443_v45, %v16133_v14  ;;  %v5577_v45 = vsel %vm67_vm0, %v5189_v39, 0.0  ;;  %v5191_v14 = vmul.f32 %v16047_v15, %v16047_v15 }
 0x571   :  { %20791 = vst [vmem:[#allocation47_spill] sm:$0xff] %v16197_v56  ;;  %10442 = vrsqrt.f32 %v6453_v4  ;;  %v6454_v44 = vadd.f32 1e-05, %v6134_v46  ;;  %5566 = vadd.xlane.f32.xlu0 %v5565_v33  ;;  %v16209_v51 = vmul.f32 %v10437_v20, %v6290_v43  ;;  %v5574_v62 = vsel %vm67_vm0, %v5188_v10, 0.0 }
 0x572   :  { %v16204_v37 = vpop.xlane.xlu0 %4802  ;;  %v5190_v20 = vmul.f32 %v15999_v16, %v15999_v16  ;;  %v16225_v4 = vmul.f32 0.020408163, %v4737_v42  ;;  %v16234_v29 = vmul.f32 0.020408163, %v4740_v6  ;;  %v5583_v39 = vsel %vm67_vm0, %v5191_v14, 0.0 }
 0x573   :  { %20792 = vst [vmem:[#allocation92_spill] sm:$0xff] %v16204_v37  ;;  %20793 = vst [vmem:[#allocation73_spill] sm:$0xff] %v16209_v51  ;;  %10444 = vrsqrt.f32 %v6454_v44  ;;  %5569 = vadd.xlane.f32.xlu1 %v5568_v27  ;;  %v5193_v6 = vmul.f32 %v16103_v61, %v16103_v61 }
 0x574   :  { %v16211_v59 = vpop.xlane.xlu1 %4805  ;;  %v5580_v13 = vsel %vm67_vm0, %v5190_v20, 0.0  ;;  %v5975_v42 = vmul.f32 %v16225_v4, %v16225_v4 }
 0x575   :  { %20794 = vst [vmem:[#allocation81_spill] sm:$0xff] %v16211_v59  ;;  %5572 = vadd.xlane.f32.xlu0 %v5571_v19 }
 0x576   :  { %v10439_v18 = vpop.eup %10438  ;;  %v16218_v0 = vpop.xlane.xlu0 %4796 }
 0x577   :  { %20795 = vst [vmem:[#allocation32_spill] sm:$0xff] %v16218_v0  ;;  %5575 = vadd.xlane.f32.xlu1 %v5574_v62  ;;  %v16227_v46 = vmul.f32 %v10439_v18, %v6291_v26  ;;  %v6293_v26 = vsub.f32 %v15479_v36, %v16168_v34  ;;  %v5976_v18 = vmul.f32 %v16234_v29, %v16234_v29 }
 0x578   :  { %v10441_v43 = vpop.eup %10440  ;;  %v16229_v33 = vpop.xlane.xlu1 %4799  ;;  %v6294_v36 = vsub.f32 %v15490_v52, %v16177_v50 }
 0x579   :  { %20796 = vst [vmem:[#allocation54_spill] sm:$0xff] %v16227_v46  ;;  %20797 = vst [vmem:[#allocation41_spill] sm:$0xff] %v16229_v33  ;;  %5578 = vadd.xlane.f32.xlu0 %v5577_v45  ;;  %v16236_v44 = vmul.f32 %v10441_v43, %v6292_v12  ;;  %v5586_v45 = vsel %vm67_vm0, %v5192_v41, 0.0 }
 0x57a   :  { %v5537_v27 = vpop.xlane.xlu0 %5536 }
 0x57b   :  { %20798 = vst [vmem:[#allocation100_spill] sm:$0xff] %v16236_v44  ;;  %v5815_v10 = vmul.f32 0.020408163, %v5537_v27  ;;  %5581 = vadd.xlane.f32.xlu1 %v5580_v13  ;;  %v5194_v27 = vmul.f32 %v16130_v24, %v16130_v24 }
 0x57c   :  { %v5540_v19 = vpop.xlane.xlu1 %5539 }
 0x57d   :  { %v6135_v62 = vsub.f32 %v5815_v10, %v5975_v42  ;;  %v5816_v20 = vmul.f32 0.020408163, %v5540_v19  ;;  %5584 = vadd.xlane.f32.xlu0 %v5583_v39  ;;  %v5589_v42 = vsel %vm67_vm0, %v5193_v6, 0.0  ;;  %v5195_v10 = vmul.f32 %v15559_v3, %v15559_v3 }
 0x57e   :  { %v10443_v12 = vpop.eup %10442  ;;  %v4743_v43 = vpop.xlane.xlu0 %4742  ;;  %v5592_v39 = vsel %vm67_vm0, %v5194_v27, 0.0  ;;  %v5197_v6 = vmul.f32 %v15539_v17, %v15539_v17 }
 0x57f   :  { %v6455_v14 = vadd.f32 1e-05, %v6135_v62  ;;  %v6136_v13 = vsub.f32 %v5816_v20, %v5976_v18  ;;  %5587 = vadd.xlane.f32.xlu1 %v5586_v45  ;;  %v16253_v61 = vmul.f32 %v10443_v12, %v6293_v26  ;;  %v5196_v26 = vmul.f32 %v15571_v40, %v15571_v40 }
 0x580   :  { %v10445_v25 = vpop.eup %10444  ;;  %v4746_v34 = vpop.xlane.xlu1 %4745  ;;  %v5595_v50 = vsel %vm67_vm0, %v5195_v10, 0.0  ;;  %v5198_v12 = vmul.f32 %v15547_v60, %v15547_v60  ;;  %v16277_v45 = vmul.f32 0.020408163, %v4743_v43  ;;  %v5601_v27 = vsel %vm67_vm0, %v5197_v6, 0.0 }
 0x581   :  { %20799 = vst [vmem:[#allocation55_spill] sm:$0xff] %v16253_v61  ;;  %10446 = vrsqrt.f32 %v6455_v14  ;;  %v6456_v41 = vadd.f32 1e-05, %v6136_v13  ;;  %5590 = vadd.xlane.f32.xlu0 %v5589_v42  ;;  %v16265_v18 = vmul.f32 %v10445_v25, %v6294_v36  ;;  %v5598_v20 = vsel %vm67_vm0, %v5196_v26, 0.0  ;;  %v20823_v61 = vld [vmem:[#allocation158_spill] sm:$0xff] }
 0x582   :  { %v16260_v19 = vpop.xlane.xlu0 %4814  ;;  %v5199_v14 = vmul.f32 %v15641_v49, %v15641_v49  ;;  %v16284_v13 = vmul.f32 0.020408163, %v4746_v34  ;;  %v5604_v42 = vsel %vm67_vm0, %v5198_v12, 0.0  ;;  %v5200_v10 = vmul.f32 %v15653_v32, %v15653_v32 }
 0x583   :  { %20800 = vst [vmem:[#allocation103_spill] sm:$0xff] %v16260_v19  ;;  %20801 = vst [vmem:[#allocation94_spill] sm:$0xff] %v16265_v18  ;;  %10448 = vrsqrt.f32 %v6456_v41  ;;  %5593 = vadd.xlane.f32.xlu1 %v5592_v39  ;;  %v5977_v43 = vmul.f32 %v16277_v45, %v16277_v45  ;;  %v6295_v34 = vsub.f32 %v15519_v1, %v16225_v4 }
 0x584   :  { %v16267_v52 = vpop.xlane.xlu1 %4817  ;;  %v5607_v26 = vsel %vm67_vm0, %v5199_v14, 0.0  ;;  %v5978_v6 = vmul.f32 %v16284_v13, %v16284_v13  ;;  %v5202_v14 = vmul.f32 %v15629_v2, %v15629_v2  ;;  %v6296_v4 = vsub.f32 %v15528_v31, %v16234_v29 }
 0x585   :  { %20802 = vst [vmem:[#allocation45_spill] sm:$0xff] %v16267_v52  ;;  %5596 = vadd.xlane.f32.xlu0 %v5595_v50  ;;  %v5201_v50 = vmul.f32 %v15621_v22, %v15621_v22  ;;  %v5210_v54 = vmul.f32 %v20823_v61, %v20823_v61 }
 0x586   :  { %v16272_v62 = vpop.xlane.xlu0 %4808 }
 0x587   :  { %20803 = vst [vmem:[#allocation97_spill] sm:$0xff] %v16272_v62  ;;  %5599 = vadd.xlane.f32.xlu1 %v5598_v20 }
 0x588   :  { %v16279_v25 = vpop.xlane.xlu1 %4811 }
 0x589   :  { %20804 = vst [vmem:[#allocation53_spill] sm:$0xff] %v16279_v25  ;;  %5602 = vadd.xlane.f32.xlu0 %v5601_v27 }
 0x58a   :  { %v5543_v36 = vpop.xlane.xlu0 %5542 }
 0x58b   :  { %v5817_v41 = vmul.f32 0.020408163, %v5543_v36  ;;  %5605 = vadd.xlane.f32.xlu1 %v5604_v42  ;;  %v5610_v36 = vsel %vm67_vm0, %v5200_v10, 0.0 }
 0x58c   :  { %v5546_v39 = vpop.xlane.xlu1 %5545 }
 0x58d   :  { %v6137_v20 = vsub.f32 %v5817_v41, %v5977_v43  ;;  %v5818_v12 = vmul.f32 0.020408163, %v5546_v39  ;;  %5608 = vadd.xlane.f32.xlu0 %v5607_v26  ;;  %v5613_v41 = vsel %vm67_vm0, %v5201_v50, 0.0  ;;  %v5203_v39 = vmul.f32 %v15723_v7, %v15723_v7  ;;  %v20812_v50 = vld [vmem:[#allocation68_spill] sm:$0xff] }
 0x58e   :  { %v10447_v27 = vpop.eup %10446  ;;  %v16298_v24 = vpop.xlane.xlu0 %4748 }
 0x58f   :  { %20805 = vst [vmem:[#allocation20_spill] sm:$0xff] %v16298_v24  ;;  %v6457_v42 = vadd.f32 1e-05, %v6137_v20  ;;  %v6138_v15 = vsub.f32 %v5818_v12, %v5978_v6  ;;  %5611 = vadd.xlane.f32.xlu1 %v5610_v36  ;;  %v16303_v16 = vmul.f32 %v10447_v27, %v6295_v34  ;;  %v5616_v6 = vsel %vm67_vm0, %v5202_v14, 0.0  ;;  %v20809_v34 = vld [vmem:[#allocation8_spill] sm:$0xff]  ;;  %v20814_v14 = vld [vmem:[#allocation201_spill] sm:$0xff] }
 0x590   :  { %v10449_v1 = vpop.eup %10448  ;;  %v16307_v43 = vpop.xlane.xlu1 %4751  ;;  %v5204_v20 = vmul.f32 %v20809_v34, %v20809_v34  ;;  %v5619_v29 = vsel %vm67_vm0, %v5203_v39, 0.0  ;;  %v5205_v27 = vmul.f32 %v20812_v50, %v20812_v50 }
 0x591   :  { %20806 = vst [vmem:[#allocation39_spill] sm:$0xff] %v16303_v16  ;;  %20807 = vst [vmem:[#allocation116_spill] sm:$0xff] %v16307_v43  ;;  %10450 = vrsqrt.f32 %v6457_v42  ;;  %v6458_v10 = vadd.f32 1e-05, %v6138_v15  ;;  %5614 = vadd.xlane.f32.xlu0 %v5613_v41  ;;  %v16317_v12 = vmul.f32 %v10449_v1, %v6296_v4  ;;  %v5206_v42 = vmul.f32 %v20814_v14, %v20814_v14  ;;  %v20816_v41 = vld [vmem:[#allocation2_spill] sm:$0xff] }
 0x592   :  { %v16312_v26 = vpop.xlane.xlu0 %4826  ;;  %v5622_v36 = vsel %vm67_vm0, %v5204_v20, 0.0  ;;  %v5625_v4 = vsel %vm67_vm0, %v5205_v27, 0.0  ;;  %v20821_v27 = vld [vmem:[#allocation154_spill] sm:$0xff] }
 0x593   :  { %20808 = vst [vmem:[#allocation106_spill] sm:$0xff] %v16312_v26  ;;  %20810 = vst [vmem:[#allocation184_spill] sm:$0xff] %v16317_v12  ;;  %10452 = vrsqrt.f32 %v6458_v10  ;;  %5617 = vadd.xlane.f32.xlu1 %v5616_v6  ;;  %v5207_v10 = vmul.f32 %v20816_v41, %v20816_v41  ;;  %v5628_v6 = vsel %vm67_vm0, %v5206_v42, 0.0  ;;  %v5209_v12 = vmul.f32 %v20820_v47, %v20820_v47 }
 0x594   :  { %v16319_v31 = vpop.xlane.xlu1 %4829  ;;  %v6297_v16 = vsub.f32 %v20821_v27, %v16277_v45 }
 0x595   :  { %20811 = vst [vmem:[#allocation117_spill] sm:$0xff] %v16319_v31  ;;  %5620 = vadd.xlane.f32.xlu0 %v5619_v29  ;;  %v20818_v29 = vld [vmem:[#allocation146_spill] sm:$0xff]  ;;  %v5637_v45 = vsel %vm67_vm0, %v5209_v12, 0.0 }
 0x596   :  { %v16324_v15 = vpop.xlane.xlu0 %4820  ;;  %v5208_v63 = vmul.f32 %v20818_v29, %v20818_v29 }
 0x597   :  { %20813 = vst [vmem:[#allocation52_spill] sm:$0xff] %v16324_v15  ;;  %5623 = vadd.xlane.f32.xlu1 %v5622_v36  ;;  %v5631_v36 = vsel %vm67_vm0, %v5207_v10, 0.0  ;;  %v20825_v10 = vld [vmem:[#allocation194_spill] sm:$0xff] }
 0x598   :  { %v16329_v1 = vpop.xlane.xlu1 %4823  ;;  %v5634_v42 = vsel %vm67_vm0, %v5208_v63, 0.0  ;;  %v6298_v46 = vsub.f32 %v20825_v10, %v16284_v13  ;;  %v5640_v63 = vsel %vm67_vm0, %v5210_v54, 0.0  ;;  %v20832_v10 = vld [vmem:[#allocation140_spill] sm:$0xff]  ;;  %v5214_v54 = vmul.f32 %v20834_v23, %v20834_v23 }
 0x599   :  { %20815 = vst [vmem:[#allocation107_spill] sm:$0xff] %v16329_v1  ;;  %5626 = vadd.xlane.f32.xlu0 %v5625_v4  ;;  %v5213_v12 = vmul.f32 %v20832_v10, %v20832_v10 }
 0x59a   :  { %v16334_v39 = vpop.xlane.xlu0 %5548 }
 0x59b   :  { %20817 = vst [vmem:[#allocation21_spill] sm:$0xff] %v16334_v39  ;;  %5629 = vadd.xlane.f32.xlu1 %v5628_v6 }
 0x59c   :  { %v16339_v20 = vpop.xlane.xlu1 %5551 }
 0x59d   :  { %20819 = vst [vmem:[#allocation30_spill] sm:$0xff] %v16339_v20  ;;  %5632 = vadd.xlane.f32.xlu0 %v5631_v36  ;;  %v20827_v36 = vld [vmem:[#allocation82_spill] sm:$0xff] }
 0x59e   :  { %v10451_v4 = vpop.eup %10450  ;;  %v16346_v18 = vpop.xlane.xlu0 %4754  ;;  %v5211_v27 = vmul.f32 %v20827_v36, %v20827_v36  ;;  %v20840_v36 = vld [vmem:[#allocation5_spill] sm:$0xff] }
 0x59f   :  { %20822 = vst [vmem:[#allocation112_spill] sm:$0xff] %v16346_v18  ;;  %5635 = vadd.xlane.f32.xlu1 %v5634_v42  ;;  %v16351_v6 = vmul.f32 %v10451_v4, %v6297_v16  ;;  %v5212_v16 = vmul.f32 %v20829_v21, %v20829_v21  ;;  %v5217_v23 = vmul.f32 %v20840_v36, %v20840_v36  ;;  %v20846_v36 = vld [vmem:[#allocation63_spill] sm:$0xff] }
 0x5a0   :  { %v10453_v44 = vpop.eup %10452  ;;  %v16355_v51 = vpop.xlane.xlu1 %4757  ;;  %v5643_v13 = vsel %vm67_vm0, %v5211_v27, 0.0  ;;  %v5220_v5 = vmul.f32 %v20846_v36, %v20846_v36  ;;  %v5223_v36 = vmul.f32 %v16028_v11, %v16028_v11  ;;  %v20856_v11 = vld [vmem:[#allocation40_spill] sm:$0xff] }
 0x5a1   :  { %20824 = vst [vmem:[#allocation46_spill] sm:$0xff] %v16351_v6  ;;  %20826 = vst [vmem:[#allocation120_spill] sm:$0xff] %v16355_v51  ;;  %5638 = vadd.xlane.f32.xlu0 %v5637_v45  ;;  %v16365_v4 = vmul.f32 %v10453_v44, %v6298_v46  ;;  %v5646_v45 = vsel %vm67_vm0, %v5212_v16, 0.0  ;;  %v5649_v46 = vsel %vm67_vm0, %v5213_v12, 0.0  ;;  %v20836_v44 = vld [vmem:[#allocation148_spill] sm:$0xff] }
 0x5a2   :  { %v16360_v56 = vpop.xlane.xlu0 %4838 }
 0x5a3   :  { %20828 = vst [vmem:[#allocation51_spill] sm:$0xff] %v16360_v56  ;;  %20830 = vst [vmem:[#allocation122_spill] sm:$0xff] %v16365_v4  ;;  %5641 = vadd.xlane.f32.xlu1 %v5640_v63  ;;  %v5215_v63 = vmul.f32 %v20836_v44, %v20836_v44  ;;  %v20838_v4 = vld [vmem:[#allocation62_spill] sm:$0xff] }
 0x5a4   :  { %v16367_v42 = vpop.xlane.xlu1 %4841  ;;  %v5216_v21 = vmul.f32 %v20838_v4, %v20838_v4  ;;  %v20842_v44 = vld [vmem:[#allocation58_spill] sm:$0xff]  ;;  %v20844_v4 = vld [vmem:[#allocation161_spill] sm:$0xff] }
 0x5a5   :  { %20831 = vst [vmem:[#allocation37_spill] sm:$0xff] %v16367_v42  ;;  %5644 = vadd.xlane.f32.xlu0 %v5643_v13  ;;  %v5652_v13 = vsel %vm67_vm0, %v5214_v54, 0.0  ;;  %v5218_v28 = vmul.f32 %v20842_v44, %v20842_v44  ;;  %v5219_v10 = vmul.f32 %v20844_v4, %v20844_v4  ;;  %v20848_v44 = vld [vmem:[#allocation71_spill] sm:$0xff]  ;;  %v20850_v4 = vld [vmem:[#allocation50_spill] sm:$0xff] }
 0x5a6   :  { %v16372_v6 = vpop.xlane.xlu0 %4832  ;;  %v5221_v9 = vmul.f32 %v20848_v44, %v20848_v44  ;;  %v5224_v44 = vmul.f32 %v16035_v30, %v16035_v30  ;;  %v5227_v30 = vmul.f32 %v16084_v58, %v16084_v58  ;;  %v20862_v58 = vld [vmem:[#allocation36_spill] sm:$0xff] }
 0x5a7   :  { %20833 = vst [vmem:[#allocation35_spill] sm:$0xff] %v16372_v6  ;;  %5647 = vadd.xlane.f32.xlu1 %v5646_v45  ;;  %v5655_v45 = vsel %vm67_vm0, %v5215_v63, 0.0 }
 0x5a8   :  { %v16377_v55 = vpop.xlane.xlu1 %4835 }
 0x5a9   :  { %20835 = vst [vmem:[#allocation125_spill] sm:$0xff] %v16377_v55  ;;  %5650 = vadd.xlane.f32.xlu0 %v5649_v46  ;;  %v5658_v46 = vsel %vm67_vm0, %v5216_v21, 0.0 }
 0x5aa   :  { %v16382_v27 = vpop.xlane.xlu0 %4760 }
 0x5ab   :  { %20837 = vst [vmem:[#allocation48_spill] sm:$0xff] %v16382_v27  ;;  %5653 = vadd.xlane.f32.xlu1 %v5652_v13  ;;  %v5661_v13 = vsel %vm67_vm0, %v5217_v23, 0.0 }
 0x5ac   :  { %v16387_v16 = vpop.xlane.xlu1 %4763 }
 0x5ad   :  { %20839 = vst [vmem:[#allocation115_spill] sm:$0xff] %v16387_v16  ;;  %5656 = vadd.xlane.f32.xlu0 %v5655_v45  ;;  %v5664_v45 = vsel %vm67_vm0, %v5218_v28, 0.0 }
 0x5ae   :  { %v16392_v12 = vpop.xlane.xlu0 %4850 }
 0x5af   :  { %20841 = vst [vmem:[#allocation187_spill] sm:$0xff] %v16392_v12  ;;  %5659 = vadd.xlane.f32.xlu1 %v5658_v46  ;;  %v5667_v46 = vsel %vm67_vm0, %v5219_v10, 0.0 }
 0x5b0   :  { %v16397_v54 = vpop.xlane.xlu1 %4853 }
 0x5b1   :  { %20843 = vst [vmem:[#allocation127_spill] sm:$0xff] %v16397_v54  ;;  %5662 = vadd.xlane.f32.xlu0 %v5661_v13  ;;  %v5670_v13 = vsel %vm67_vm0, %v5220_v5, 0.0 }
 0x5b2   :  { %v16402_v63 = vpop.xlane.xlu0 %4844 }
 0x5b3   :  { %20845 = vst [vmem:[#allocation206_spill] sm:$0xff] %v16402_v63  ;;  %5665 = vadd.xlane.f32.xlu1 %v5664_v45  ;;  %v5222_v63 = vmul.f32 %v20850_v4, %v20850_v4  ;;  %v5673_v45 = vsel %vm67_vm0, %v5221_v9, 0.0  ;;  %v20854_v4 = vld [vmem:[#allocation15_spill] sm:$0xff] }
 0x5b4   :  { %v16407_v21 = vpop.xlane.xlu1 %4847 }
 0x5b5   :  { %20847 = vst [vmem:[#allocation195_spill] sm:$0xff] %v16407_v21  ;;  %5668 = vadd.xlane.f32.xlu0 %v5667_v46  ;;  %v5676_v46 = vsel %vm67_vm0, %v5222_v63, 0.0 }
 0x5b6   :  { %v16412_v23 = vpop.xlane.xlu0 %4766 }
 0x5b7   :  { %20849 = vst [vmem:[#allocation23_spill] sm:$0xff] %v16412_v23  ;;  %5671 = vadd.xlane.f32.xlu1 %v5670_v13  ;;  %v5679_v13 = vsel %vm67_vm0, %v5223_v36, 0.0 }
 0x5b8   :  { %v16417_v28 = vpop.xlane.xlu1 %4769 }
 0x5b9   :  { %20851 = vst [vmem:[#allocation119_spill] sm:$0xff] %v16417_v28  ;;  %5674 = vadd.xlane.f32.xlu0 %v5673_v45  ;;  %v5225_v28 = vmul.f32 %v20854_v4, %v20854_v4  ;;  %v5682_v45 = vsel %vm67_vm0, %v5224_v44, 0.0  ;;  %v5228_v4 = vmul.f32 %v16093_v35, %v16093_v35  ;;  %v5231_v35 = vmul.f32 %v16138_v48, %v16138_v48 }
 0x5ba   :  { %v16422_v10 = vpop.xlane.xlu0 %4862  ;;  %v5234_v48 = vmul.f32 %v16145_v38, %v16145_v38 }
 0x5bb   :  { %20852 = vst [vmem:[#allocation31_spill] sm:$0xff] %v16422_v10  ;;  %5677 = vadd.xlane.f32.xlu1 %v5676_v46  ;;  %v5226_v10 = vmul.f32 %v20856_v11, %v20856_v11  ;;  %v5685_v46 = vsel %vm67_vm0, %v5225_v28, 0.0  ;;  %v20860_v11 = vld [vmem:[#allocation164_spill] sm:$0xff] }
 0x5bc   :  { %v16427_v5 = vpop.xlane.xlu1 %4865 }
 0x5bd   :  { %20853 = vst [vmem:[#allocation49_spill] sm:$0xff] %v16427_v5  ;;  %5680 = vadd.xlane.f32.xlu0 %v5679_v13  ;;  %v5688_v13 = vsel %vm67_vm0, %v5226_v10, 0.0 }
 0x5be   :  { %v16432_v9 = vpop.xlane.xlu0 %4856 }
 0x5bf   :  { %20855 = vst [vmem:[#allocation124_spill] sm:$0xff] %v16432_v9  ;;  %5683 = vadd.xlane.f32.xlu1 %v5682_v45  ;;  %v5691_v45 = vsel %vm67_vm0, %v5227_v30, 0.0 }
 0x5c0   :  { %v16437_v63 = vpop.xlane.xlu1 %4859 }
 0x5c1   :  { %20857 = vst [vmem:[#allocation22_spill] sm:$0xff] %v16437_v63  ;;  %5686 = vadd.xlane.f32.xlu0 %v5685_v46  ;;  %v5229_v63 = vmul.f32 %v20860_v11, %v20860_v11  ;;  %v5694_v46 = vsel %vm67_vm0, %v5228_v4, 0.0  ;;  %v5232_v11 = vmul.f32 %v16164_v57, %v16164_v57 }
 0x5c2   :  { %v16442_v36 = vpop.xlane.xlu0 %4772 }
 0x5c3   :  { %20858 = vst [vmem:[#allocation130_spill] sm:$0xff] %v16442_v36  ;;  %5689 = vadd.xlane.f32.xlu1 %v5688_v13  ;;  %v5230_v36 = vmul.f32 %v20862_v58, %v20862_v58  ;;  %v5697_v13 = vsel %vm67_vm0, %v5229_v63, 0.0  ;;  %v5233_v58 = vmul.f32 %v16120_v8, %v16120_v8 }
 0x5c4   :  { %v16447_v44 = vpop.xlane.xlu1 %4775 }
 0x5c5   :  { %20859 = vst [vmem:[#allocation129_spill] sm:$0xff] %v16447_v44  ;;  %5692 = vadd.xlane.f32.xlu0 %v5691_v45  ;;  %v5700_v45 = vsel %vm67_vm0, %v5230_v36, 0.0 }
 0x5c6   :  { %v16452_v28 = vpop.xlane.xlu0 %4874 }
 0x5c7   :  { %20861 = vst [vmem:[#allocation210_spill] sm:$0xff] %v16452_v28  ;;  %5695 = vadd.xlane.f32.xlu1 %v5694_v46  ;;  %v5703_v46 = vsel %vm67_vm0, %v5231_v35, 0.0  ;;  %v5712_v35 = vsel %vm67_vm0, %v5234_v48, 0.0 }
 0x5c8   :  { %v16457_v10 = vpop.xlane.xlu1 %4877 }
 0x5c9   :  { %20863 = vst [vmem:[#allocation29_spill] sm:$0xff] %v16457_v10  ;;  %5698 = vadd.xlane.f32.xlu0 %v5697_v13  ;;  %v5706_v13 = vsel %vm67_vm0, %v5232_v11, 0.0 }
 0x5ca   :  { %v16462_v30 = vpop.xlane.xlu0 %4868 }
 0x5cb   :  { %20864 = vst [vmem:[#allocation208_spill] sm:$0xff] %v16462_v30  ;;  %5701 = vadd.xlane.f32.xlu1 %v5700_v45  ;;  %v5709_v45 = vsel %vm67_vm0, %v5233_v58, 0.0  ;;  %v6836_v58 = vld [vmem:[%s19495_s5 + $0x8] sm:$0xff] }
 0x5cc   :  { %v16467_v4 = vpop.xlane.xlu1 %4871 }
 0x5cd   :  { %20865 = vst [vmem:[#allocation26_spill] sm:$0xff] %v16467_v4  ;;  %5704 = vadd.xlane.f32.xlu0 %v5703_v46 }
 0x5ce   :  { %v16472_v63 = vpop.xlane.xlu0 %4778 }
 0x5cf   :  { %20866 = vst [vmem:[#allocation33_spill] sm:$0xff] %v16472_v63  ;;  %5707 = vadd.xlane.f32.xlu1 %v5706_v13 }
 0x5d0   :  { %v16477_v36 = vpop.xlane.xlu1 %4781 }
 0x5d1   :  { %20867 = vst [vmem:[#allocation209_spill] sm:$0xff] %v16477_v36  ;;  %5710 = vadd.xlane.f32.xlu0 %v5709_v45 }
 0x5d2   :  { %v16480_v57 = vpop.xlane.xlu0 %4886 }
 0x5d3   :  { %20868 = vst [vmem:[#allocation27_spill] sm:$0xff] %v16480_v57  ;;  %5713 = vadd.xlane.f32.xlu1 %v5712_v35  ;;  %v6835_v35 = vld [vmem:[%s19495_s5] sm:$0xff] }
 0x5d4   :  { %v16483_v8 = vpop.xlane.xlu1 %4889 }
 0x5d5   :  { %20869 = vst [vmem:[#allocation212_spill] sm:$0xff] %v16483_v8 }
 0x5d6   :  { %v16485_v46 = vpop.xlane.xlu0 %4880 }
 0x5d7   :  { %20870 = vst [vmem:[#allocation211_spill] sm:$0xff] %v16485_v46 }
 0x5d8   :  { %v16487_v4 = vpop.xlane.xlu1 %4883 }
 0x5d9   :  { %20871 = vst [vmem:[#allocation25_spill] sm:$0xff] %v16487_v4  ;;  %v6837_v4 = vld [vmem:[%s19495_s5 + $0x10] sm:$0xff] }
 0x5da   :  { %v16489_v11 = vpop.xlane.xlu0 %4784 }
 0x5db   :  { %20872 = vst [vmem:[#allocation213_spill] sm:$0xff] %v16489_v11 }
 0x5dc   :  { %v16491_v38 = vpop.xlane.xlu1 %4787 }
 0x5dd   :  { %20873 = vst [vmem:[#allocation24_spill] sm:$0xff] %v16491_v38 }
 0x5de   :  { %v16493_v13 = vpop.xlane.xlu0 %4898 }
 0x5df   :  { %20874 = vst [vmem:[#allocation72_spill] sm:$0xff] %v16493_v13 }
 0x5e0   :  { %v16495_v30 = vpop.xlane.xlu1 %4901 }
 0x5e1   :  { %20875 = vst [vmem:[#allocation28_spill] sm:$0xff] %v16495_v30 }
 0x5e2   :  { %v16500_v48 = vpop.xlane.xlu0 %4892 }
 0x5e3   :  { %20876 = vst [vmem:[#allocation154_spill] sm:$0xff] %v16500_v48 }
 0x5e4   :  { %7002 = vperm.xlu1 %9845, %v6836_v58   ;;  %v16502_v45 = vpop.xlane.xlu1 %4895  ;;  %v6838_v58 = vld [vmem:[%s19495_s5 + $0x18] sm:$0xff] }
 0x5e5   :  { %20877 = vst [vmem:[#allocation194_spill] sm:$0xff] %v16502_v45  ;;  %v6839_v45 = vld [vmem:[%s19495_s5 + $0x20] sm:$0xff] }
 0x5e6   :  { %v16510_v13 = vpop.xlane.xlu0 %4790 }
 0x5e7   :  { %20878 = vst [vmem:[#allocation214_spill] sm:$0xff] %v16510_v13  ;;  %6997 = vperm.xlu0 %9844, %v6835_v35   ;;  %v6841_v35 = vld [vmem:[%s19495_s5 + $0x30] sm:$0xff] }
 0x5e8   :  { %7007 = vperm.xlu1 %9845, %v6837_v4   ;;  %v16512_v30 = vpop.xlane.xlu1 %5557  ;;  %v6840_v4 = vld [vmem:[%s19495_s5 + $0x28] sm:$0xff] }
 0x5e9   :  { %20879 = vst [vmem:[#allocation215_spill] sm:$0xff] %v16512_v30 }
 0x5ea   :  { %v16520_v48 = vpop.xlane.xlu0 %4910 }
 0x5eb   :  { %20880 = vst [vmem:[#allocation216_spill] sm:$0xff] %v16520_v48  ;;  %7012 = vperm.xlu0 %9844, %v6838_v58   ;;  %v6843_v58 = vld [vmem:[%s19495_s5 + $0x40] sm:$0xff] }
 0x5ec   :  { %7017 = vperm.xlu1 %9845, %v6839_v45   ;;  %v16522_v46 = vpop.xlane.xlu1 %4793  ;;  %v6842_v45 = vld [vmem:[%s19495_s5 + $0x38] sm:$0xff] }
 0x5ed   :  { %20881 = vst [vmem:[#allocation217_spill] sm:$0xff] %v16522_v46 }
 0x5ee   :  { %v16530_v8 = vpop.xlane.xlu0 %4904 }
 0x5ef   :  { %20882 = vst [vmem:[#allocation218_spill] sm:$0xff] %v16530_v8  ;;  %7022 = vperm.xlu0 %9844, %v6840_v4   ;;  %v6844_v4 = vld [vmem:[%s19495_s5 + $0x48] sm:$0xff] }
 0x5f0   :  { %7027 = vperm.xlu1 %9845, %v6841_v35   ;;  %v16532_v57 = vpop.xlane.xlu1 %4913  ;;  %v6845_v35 = vld [vmem:[%s19495_s5 + $0x50] sm:$0xff] }
 0x5f1   :  { %20883 = vst [vmem:[#allocation219_spill] sm:$0xff] %v16532_v57 }
 0x5f2   :  { %v16540_v48 = vpop.xlane.xlu0 %5554 }
 0x5f3   :  { %20884 = vst [vmem:[#allocation220_spill] sm:$0xff] %v16540_v48  ;;  %7032 = vperm.xlu0 %9844, %v6842_v45   ;;  %v6846_v45 = vld [vmem:[%s19495_s5 + $0x58] sm:$0xff] }
 0x5f4   :  { %7037 = vperm.xlu1 %9845, %v6843_v58   ;;  %v16542_v10 = vpop.xlane.xlu1 %4907  ;;  %v6847_v58 = vld [vmem:[%s19495_s5 + $0x60] sm:$0xff] }
 0x5f5   :  { %20885 = vst [vmem:[#allocation221_spill] sm:$0xff] %v16542_v10 }
 0x5f6   :  { %v16550_v57 = vpop.xlane.xlu0 %5560 }
 0x5f7   :  { %20886 = vst [vmem:[#allocation222_spill] sm:$0xff] %v16550_v57  ;;  %7042 = vperm.xlu0 %9844, %v6844_v4   ;;  %v6848_v4 = vld [vmem:[%s19495_s5 + $0x68] sm:$0xff] }
 0x5f8   :  { %7047 = vperm.xlu1 %9845, %v6845_v35   ;;  %v16552_v8 = vpop.xlane.xlu1 %5563  ;;  %v6849_v35 = vld [vmem:[%s19495_s5 + $0x70] sm:$0xff] }
 0x5f9   :  { %20887 = vst [vmem:[#allocation223_spill] sm:$0xff] %v16552_v8 }
 0x5fa   :  { %v16560_v10 = vpop.xlane.xlu0 %5566 }
 0x5fb   :  { %20888 = vst [vmem:[#allocation224_spill] sm:$0xff] %v16560_v10  ;;  %7052 = vperm.xlu0 %9844, %v6846_v45   ;;  %v6850_v45 = vld [vmem:[%s19495_s5 + $0x78] sm:$0xff] }
 0x5fc   :  { %7057 = vperm.xlu1 %9845, %v6847_v58   ;;  %v16562_v28 = vpop.xlane.xlu1 %5569  ;;  %v6851_v58 = vld [vmem:[%s19495_s5 + $0x80] sm:$0xff] }
 0x5fd   :  { %20889 = vst [vmem:[#allocation225_spill] sm:$0xff] %v16562_v28 }
 0x5fe   :  { %v16570_v46 = vpop.xlane.xlu0 %5572 }
 0x5ff   :  { %20890 = vst [vmem:[#allocation226_spill] sm:$0xff] %v16570_v46  ;;  %7062 = vperm.xlu0 %9844, %v6848_v4   ;;  %v6852_v4 = vld [vmem:[%s19495_s5 + $0x88] sm:$0xff] }
 0x600   :  { %7067 = vperm.xlu1 %9845, %v6849_v35   ;;  %v16572_v13 = vpop.xlane.xlu1 %5575  ;;  %v6853_v35 = vld [vmem:[%s19495_s5 + $0x90] sm:$0xff] }
 0x601   :  { %20891 = vst [vmem:[#allocation227_spill] sm:$0xff] %v16572_v13 }
 0x602   :  { %v16580_v38 = vpop.xlane.xlu0 %5578 }
 0x603   :  { %20892 = vst [vmem:[#allocation228_spill] sm:$0xff] %v16580_v38  ;;  %7072 = vperm.xlu0 %9844, %v6850_v45   ;;  %v6854_v45 = vld [vmem:[%s19495_s5 + $0x98] sm:$0xff] }
 0x604   :  { %7077 = vperm.xlu1 %9845, %v6851_v58   ;;  %v16582_v11 = vpop.xlane.xlu1 %5581  ;;  %v6855_v58 = vld [vmem:[%s19495_s5 + $0xa0] sm:$0xff] }
 0x605   :  { %20893 = vst [vmem:[#allocation229_spill] sm:$0xff] %v16582_v11 }
 0x606   :  { %v16590_v36 = vpop.xlane.xlu0 %5584 }
 0x607   :  { %20894 = vst [vmem:[#allocation230_spill] sm:$0xff] %v16590_v36  ;;  %7082 = vperm.xlu0 %9844, %v6852_v4   ;;  %v6856_v4 = vld [vmem:[%s19495_s5 + $0xa8] sm:$0xff] }
 0x608   :  { %7087 = vperm.xlu1 %9845, %v6853_v35   ;;  %v16592_v13 = vpop.xlane.xlu1 %5587  ;;  %v6857_v35 = vld [vmem:[%s19495_s5 + $0xb0] sm:$0xff] }
 0x609   :  { %20895 = vst [vmem:[#allocation231_spill] sm:$0xff] %v16592_v13 }
 0x60a   :  { %v16600_v11 = vpop.xlane.xlu0 %5590 }
 0x60b   :  { %20896 = vst [vmem:[#allocation232_spill] sm:$0xff] %v16600_v11  ;;  %7092 = vperm.xlu0 %9844, %v6854_v45   ;;  %v6858_v45 = vld [vmem:[%s19495_s5 + $0xb8] sm:$0xff] }
 0x60c   :  { %7097 = vperm.xlu1 %9845, %v6855_v58   ;;  %v16602_v38 = vpop.xlane.xlu1 %5593  ;;  %v6859_v58 = vld [vmem:[%s19495_s5 + $0xc0] sm:$0xff] }
 0x60d   :  { %20897 = vst [vmem:[#allocation233_spill] sm:$0xff] %v16602_v38 }
 0x60e   :  { %v16610_v13 = vpop.xlane.xlu0 %5596 }
 0x60f   :  { %20898 = vst [vmem:[#allocation234_spill] sm:$0xff] %v16610_v13  ;;  %7102 = vperm.xlu0 %9844, %v6856_v4   ;;  %v6860_v4 = vld [vmem:[%s19495_s5 + $0xc8] sm:$0xff] }
 0x610   :  { %7107 = vperm.xlu1 %9845, %v6857_v35   ;;  %v16612_v36 = vpop.xlane.xlu1 %5599  ;;  %v6861_v35 = vld [vmem:[%s19495_s5 + $0xd0] sm:$0xff] }
 0x611   :  { %20899 = vst [vmem:[#allocation235_spill] sm:$0xff] %v16612_v36 }
 0x612   :  { %v16620_v38 = vpop.xlane.xlu0 %5602 }
 0x613   :  { %20900 = vst [vmem:[#allocation236_spill] sm:$0xff] %v16620_v38  ;;  %7112 = vperm.xlu0 %9844, %v6858_v45   ;;  %v6862_v45 = vld [vmem:[%s19495_s5 + $0xd8] sm:$0xff] }
 0x614   :  { %7117 = vperm.xlu1 %9845, %v6859_v58   ;;  %v16622_v11 = vpop.xlane.xlu1 %5605  ;;  %v6863_v58 = vld [vmem:[%s19495_s5 + $0xe0] sm:$0xff] }
 0x615   :  { %20901 = vst [vmem:[#allocation237_spill] sm:$0xff] %v16622_v11 }
 0x616   :  { %v16630_v36 = vpop.xlane.xlu0 %5608 }
 0x617   :  { %20902 = vst [vmem:[#allocation238_spill] sm:$0xff] %v16630_v36  ;;  %7122 = vperm.xlu0 %9844, %v6860_v4   ;;  %v6864_v4 = vld [vmem:[%s19495_s5 + $0xe8] sm:$0xff] }
 0x618   :  { %7127 = vperm.xlu1 %9845, %v6861_v35   ;;  %v16632_v13 = vpop.xlane.xlu1 %5611  ;;  %v6865_v35 = vld [vmem:[%s19495_s5 + $0xf0] sm:$0xff] }
 0x619   :  { %20903 = vst [vmem:[#allocation239_spill] sm:$0xff] %v16632_v13 }
 0x61a   :  { %v16640_v11 = vpop.xlane.xlu0 %5614 }
 0x61b   :  { %20904 = vst [vmem:[#allocation240_spill] sm:$0xff] %v16640_v11  ;;  %7132 = vperm.xlu0 %9844, %v6862_v45   ;;  %v6866_v45 = vld [vmem:[%s19495_s5 + $0xf8] sm:$0xff] }
 0x61c   :  { %7137 = vperm.xlu1 %9845, %v6863_v58   ;;  %v16642_v38 = vpop.xlane.xlu1 %5617  ;;  %v6867_v58 = vld [vmem:[%s19495_s5 + $0x100] sm:$0xff] }
 0x61d   :  { %20905 = vst [vmem:[#allocation241_spill] sm:$0xff] %v16642_v38 }
 0x61e   :  { %v16650_v13 = vpop.xlane.xlu0 %5620 }
 0x61f   :  { %20906 = vst [vmem:[#allocation242_spill] sm:$0xff] %v16650_v13  ;;  %7142 = vperm.xlu0 %9844, %v6864_v4   ;;  %v6868_v4 = vld [vmem:[%s19495_s5 + $0x108] sm:$0xff] }
 0x620   :  { %7147 = vperm.xlu1 %9845, %v6865_v35   ;;  %v16652_v36 = vpop.xlane.xlu1 %5623  ;;  %v6869_v35 = vld [vmem:[%s19495_s5 + $0x110] sm:$0xff] }
 0x621   :  { %20907 = vst [vmem:[#allocation243_spill] sm:$0xff] %v16652_v36 }
 0x622   :  { %v16660_v38 = vpop.xlane.xlu0 %5626 }
 0x623   :  { %20908 = vst [vmem:[#allocation244_spill] sm:$0xff] %v16660_v38  ;;  %7152 = vperm.xlu0 %9844, %v6866_v45   ;;  %v6870_v45 = vld [vmem:[%s19495_s5 + $0x118] sm:$0xff] }
 0x624   :  { %7157 = vperm.xlu1 %9845, %v6867_v58   ;;  %v16662_v11 = vpop.xlane.xlu1 %5629  ;;  %v6871_v58 = vld [vmem:[%s19495_s5 + $0x120] sm:$0xff] }
 0x625   :  { %20909 = vst [vmem:[#allocation245_spill] sm:$0xff] %v16662_v11 }
 0x626   :  { %v16670_v36 = vpop.xlane.xlu0 %5632 }
 0x627   :  { %20910 = vst [vmem:[#allocation246_spill] sm:$0xff] %v16670_v36  ;;  %7162 = vperm.xlu0 %9844, %v6868_v4   ;;  %v6872_v4 = vld [vmem:[%s19495_s5 + $0x128] sm:$0xff] }
 0x628   :  { %7167 = vperm.xlu1 %9845, %v6869_v35   ;;  %v16672_v13 = vpop.xlane.xlu1 %5635  ;;  %v6873_v35 = vld [vmem:[%s19495_s5 + $0x130] sm:$0xff] }
 0x629   :  { %20911 = vst [vmem:[#allocation247_spill] sm:$0xff] %v16672_v13 }
 0x62a   :  { %v16680_v11 = vpop.xlane.xlu0 %5638 }
 0x62b   :  { %20912 = vst [vmem:[#allocation248_spill] sm:$0xff] %v16680_v11  ;;  %7172 = vperm.xlu0 %9844, %v6870_v45   ;;  %v6874_v45 = vld [vmem:[%s19495_s5 + $0x138] sm:$0xff] }
 0x62c   :  { %7177 = vperm.xlu1 %9845, %v6871_v58   ;;  %v16682_v38 = vpop.xlane.xlu1 %5641  ;;  %v6875_v58 = vld [vmem:[%s19495_s5 + $0x140] sm:$0xff] }
 0x62d   :  { %20913 = vst [vmem:[#allocation249_spill] sm:$0xff] %v16682_v38 }
 0x62e   :  { %v16690_v13 = vpop.xlane.xlu0 %5644 }
 0x62f   :  { %20914 = vst [vmem:[#allocation250_spill] sm:$0xff] %v16690_v13  ;;  %7182 = vperm.xlu0 %9844, %v6872_v4   ;;  %v6876_v4 = vld [vmem:[%s19495_s5 + $0x148] sm:$0xff] }
 0x630   :  { %7187 = vperm.xlu1 %9845, %v6873_v35   ;;  %v16692_v36 = vpop.xlane.xlu1 %5647  ;;  %v6877_v35 = vld [vmem:[%s19495_s5 + $0x150] sm:$0xff] }
 0x631   :  { %20915 = vst [vmem:[#allocation251_spill] sm:$0xff] %v16692_v36 }
 0x632   :  { %v16700_v38 = vpop.xlane.xlu0 %5650 }
 0x633   :  { %20916 = vst [vmem:[#allocation252_spill] sm:$0xff] %v16700_v38  ;;  %7192 = vperm.xlu0 %9844, %v6874_v45   ;;  %v6878_v45 = vld [vmem:[%s19495_s5 + $0x158] sm:$0xff] }
 0x634   :  { %7197 = vperm.xlu1 %9845, %v6875_v58   ;;  %v16702_v11 = vpop.xlane.xlu1 %5653  ;;  %v6879_v58 = vld [vmem:[%s19495_s5 + $0x160] sm:$0xff] }
 0x635   :  { %20917 = vst [vmem:[#allocation253_spill] sm:$0xff] %v16702_v11 }
 0x636   :  { %v16710_v36 = vpop.xlane.xlu0 %5656 }
 0x637   :  { %20918 = vst [vmem:[#allocation254_spill] sm:$0xff] %v16710_v36  ;;  %7202 = vperm.xlu0 %9844, %v6876_v4   ;;  %v6880_v4 = vld [vmem:[%s19495_s5 + $0x168] sm:$0xff] }
 0x638   :  { %7207 = vperm.xlu1 %9845, %v6877_v35   ;;  %v16712_v13 = vpop.xlane.xlu1 %5659  ;;  %v6881_v35 = vld [vmem:[%s19495_s5 + $0x170] sm:$0xff] }
 0x639   :  { %20919 = vst [vmem:[#allocation255_spill] sm:$0xff] %v16712_v13 }
 0x63a   :  { %v16720_v11 = vpop.xlane.xlu0 %5662 }
 0x63b   :  { %20920 = vst [vmem:[#allocation256_spill] sm:$0xff] %v16720_v11  ;;  %7212 = vperm.xlu0 %9844, %v6878_v45   ;;  %v6882_v45 = vld [vmem:[%s19495_s5 + $0x178] sm:$0xff] }
 0x63c   :  { %7217 = vperm.xlu1 %9845, %v6879_v58   ;;  %v16722_v38 = vpop.xlane.xlu1 %5665  ;;  %v6883_v58 = vld [vmem:[%s19495_s5 + $0x180] sm:$0xff] }
 0x63d   :  { %20921 = vst [vmem:[#allocation257_spill] sm:$0xff] %v16722_v38 }
 0x63e   :  { %v16730_v13 = vpop.xlane.xlu0 %5668 }
 0x63f   :  { %20922 = vst [vmem:[#allocation258_spill] sm:$0xff] %v16730_v13  ;;  %7222 = vperm.xlu0 %9844, %v6880_v4   ;;  %v6884_v4 = vld [vmem:[%s19495_s5 + $0x188] sm:$0xff] }
 0x640   :  { %7227 = vperm.xlu1 %9845, %v6881_v35   ;;  %v16732_v36 = vpop.xlane.xlu1 %5671  ;;  %v6885_v35 = vld [vmem:[%s19495_s5 + $0x190] sm:$0xff] }
 0x641   :  { %20923 = vst [vmem:[#allocation259_spill] sm:$0xff] %v16732_v36 }
 0x642   :  { %v16740_v38 = vpop.xlane.xlu0 %5674 }
 0x643   :  { %20924 = vst [vmem:[#allocation260_spill] sm:$0xff] %v16740_v38  ;;  %7232 = vperm.xlu0 %9844, %v6882_v45   ;;  %v6886_v45 = vld [vmem:[%s19495_s5 + $0x198] sm:$0xff] }
 0x644   :  { %7237 = vperm.xlu1 %9845, %v6883_v58   ;;  %v16742_v11 = vpop.xlane.xlu1 %5677  ;;  %v6887_v58 = vld [vmem:[%s19495_s5 + $0x1a0] sm:$0xff] }
 0x645   :  { %20925 = vst [vmem:[#allocation261_spill] sm:$0xff] %v16742_v11 }
 0x646   :  { %v16750_v36 = vpop.xlane.xlu0 %5680 }
 0x647   :  { %20926 = vst [vmem:[#allocation262_spill] sm:$0xff] %v16750_v36  ;;  %7242 = vperm.xlu0 %9844, %v6884_v4   ;;  %v6888_v4 = vld [vmem:[%s19495_s5 + $0x1a8] sm:$0xff] }
 0x648   :  { %7247 = vperm.xlu1 %9845, %v6885_v35   ;;  %v16752_v13 = vpop.xlane.xlu1 %5683  ;;  %v6889_v35 = vld [vmem:[%s19495_s5 + $0x1b0] sm:$0xff] }
 0x649   :  { %20927 = vst [vmem:[#allocation263_spill] sm:$0xff] %v16752_v13 }
 0x64a   :  { %v16760_v11 = vpop.xlane.xlu0 %5686 }
 0x64b   :  { %20928 = vst [vmem:[#allocation264_spill] sm:$0xff] %v16760_v11  ;;  %7252 = vperm.xlu0 %9844, %v6886_v45   ;;  %v6890_v45 = vld [vmem:[%s19495_s5 + $0x1b8] sm:$0xff] }
 0x64c   :  { %7257 = vperm.xlu1 %9845, %v6887_v58   ;;  %v16762_v38 = vpop.xlane.xlu1 %5689  ;;  %v6891_v58 = vld [vmem:[%s19495_s5 + $0x1c0] sm:$0xff] }
 0x64d   :  { %20929 = vst [vmem:[#allocation265_spill] sm:$0xff] %v16762_v38 }
 0x64e   :  { %v16770_v13 = vpop.xlane.xlu0 %5692 }
 0x64f   :  { %20930 = vst [vmem:[#allocation266_spill] sm:$0xff] %v16770_v13  ;;  %7262 = vperm.xlu0 %9844, %v6888_v4   ;;  %v6892_v4 = vld [vmem:[%s19495_s5 + $0x1c8] sm:$0xff] }
 0x650   :  { %7267 = vperm.xlu1 %9845, %v6889_v35   ;;  %v16772_v36 = vpop.xlane.xlu1 %5695  ;;  %v6893_v35 = vld [vmem:[%s19495_s5 + $0x1d0] sm:$0xff] }
 0x651   :  { %20931 = vst [vmem:[#allocation267_spill] sm:$0xff] %v16772_v36 }
 0x652   :  { %v16780_v38 = vpop.xlane.xlu0 %5698 }
 0x653   :  { %20932 = vst [vmem:[#allocation268_spill] sm:$0xff] %v16780_v38  ;;  %7272 = vperm.xlu0 %9844, %v6890_v45   ;;  %v6894_v45 = vld [vmem:[%s19495_s5 + $0x1d8] sm:$0xff] }
 0x654   :  { %7277 = vperm.xlu1 %9845, %v6891_v58   ;;  %v16782_v11 = vpop.xlane.xlu1 %5701  ;;  %v6895_v58 = vld [vmem:[%s19495_s5 + $0x1e0] sm:$0xff] }
 0x655   :  { %20933 = vst [vmem:[#allocation269_spill] sm:$0xff] %v16782_v11 }
 0x656   :  { %v16790_v36 = vpop.xlane.xlu0 %5704 }
 0x657   :  { %7282 = vperm.xlu0 %9844, %v6892_v4   ;;  %20934 = vst [vmem:[#allocation270_spill] sm:$0xff] %v16790_v36  ;;  %v6896_v4 = vld [vmem:[%s19495_s5 + $0x1e8] sm:$0xff] }
 0x658   :  { %7287 = vperm.xlu1 %9845, %v6893_v35   ;;  %v16792_v13 = vpop.xlane.xlu1 %5707  ;;  %v6897_v35 = vld [vmem:[%s19495_s5 + $0x1f0] sm:$0xff] }
 0x659   :  { %20935 = vst [vmem:[#allocation271_spill] sm:$0xff] %v16792_v13 }
 0x65a   :  { %v16808_v13 = vpop.xlane.xlu0 %5710 }
 0x65b   :  { %7292 = vperm.xlu0 %9844, %v6894_v45   ;;  %20937 = vst [vmem:[#allocation273_spill] sm:$0xff] %v16808_v13  ;;  %v6898_v45 = vld [vmem:[%s19495_s5 + $0x1f8] sm:$0xff] }
 0x65c   :  { %7297 = vperm.xlu1 %9845, %v6895_v58   ;;  %v16800_v11 = vpop.xlane.xlu1 %5713  ;;  %v6899_v58 = vld [vmem:[%s19495_s5 + $0x200] sm:$0xff] }
 0x65d   :  { %20936 = vst [vmem:[#allocation272_spill] sm:$0xff] %v16800_v11 }
 0x65f   :  { %7302 = vperm.xlu0 %9844, %v6896_v4   ;;  %v6900_v4 = vld [vmem:[%s19495_s5 + $0x208] sm:$0xff] }
 0x660   :  { %7307 = vperm.xlu1 %9845, %v6897_v35   ;;  %v16810_v36 = vpop.permute.xlu1 %7002  ;;  %v6901_v35 = vld [vmem:[%s19495_s5 + $0x210] sm:$0xff] }
 0x662   :  { %v16818_v11 = vpop.permute.xlu0 %6997 }
 0x663   :  { %7312 = vperm.xlu0 %9844, %v6898_v45   ;;  %v6902_v45 = vld [vmem:[%s19495_s5 + $0x218] sm:$0xff] }
 0x664   :  { %7317 = vperm.xlu1 %9845, %v6899_v58   ;;  %v16820_v38 = vpop.permute.xlu1 %7007  ;;  %v6903_v58 = vld [vmem:[%s19495_s5 + $0x220] sm:$0xff] }
 0x666   :  { %v16828_v13 = vpop.permute.xlu0 %7012 }
 0x667   :  { %7322 = vperm.xlu0 %9844, %v6900_v4   ;;  %v6904_v4 = vld [vmem:[%s19495_s5 + $0x228] sm:$0xff] }
 0x668   :  { %7327 = vperm.xlu1 %9845, %v6901_v35   ;;  %v16830_v63 = vpop.permute.xlu1 %7017  ;;  %v6905_v35 = vld [vmem:[%s19495_s5 + $0x230] sm:$0xff] }
 0x66a   :  { %v16838_v46 = vpop.permute.xlu0 %7022 }
 0x66b   :  { %7332 = vperm.xlu0 %9844, %v6902_v45   ;;  %v6906_v45 = vld [vmem:[%s19495_s5 + $0x238] sm:$0xff] }
 0x66c   :  { %7337 = vperm.xlu1 %9845, %v6903_v58   ;;  %v16840_v44 = vpop.permute.xlu1 %7027  ;;  %v6907_v58 = vld [vmem:[%s19495_s5 + $0x240] sm:$0xff] }
 0x66e   :  { %v16848_v28 = vpop.permute.xlu0 %7032 }
 0x66f   :  { %7342 = vperm.xlu0 %9844, %v6904_v4   ;;  %v6908_v4 = vld [vmem:[%s19495_s5 + $0x248] sm:$0xff] }
 0x670   :  { %7347 = vperm.xlu1 %9845, %v6905_v35   ;;  %v16850_v10 = vpop.permute.xlu1 %7037  ;;  %v6909_v35 = vld [vmem:[%s19495_s5 + $0x250] sm:$0xff] }
 0x672   :  { %v16858_v8 = vpop.permute.xlu0 %7042 }
 0x673   :  { %7352 = vperm.xlu0 %9844, %v6906_v45   ;;  %v6910_v45 = vld [vmem:[%s19495_s5 + $0x258] sm:$0xff] }
 0x674   :  { %7357 = vperm.xlu1 %9845, %v6907_v58   ;;  %v16860_v57 = vpop.permute.xlu1 %7047  ;;  %v6911_v58 = vld [vmem:[%s19495_s5 + $0x260] sm:$0xff] }
 0x676   :  { %v16868_v9 = vpop.permute.xlu0 %7052 }
 0x677   :  { %7362 = vperm.xlu0 %9844, %v6908_v4   ;;  %v6912_v4 = vld [vmem:[%s19495_s5 + $0x268] sm:$0xff] }
 0x678   :  { %7367 = vperm.xlu1 %9845, %v6909_v35   ;;  %v16870_v5 = vpop.permute.xlu1 %7057  ;;  %v6913_v35 = vld [vmem:[%s19495_s5 + $0x270] sm:$0xff] }
 0x67a   :  { %v16878_v30 = vpop.permute.xlu0 %7062 }
 0x67b   :  { %7372 = vperm.xlu0 %9844, %v6910_v45   ;;  %v6914_v45 = vld [vmem:[%s19495_s5 + $0x278] sm:$0xff] }
 0x67c   :  { %7377 = vperm.xlu1 %9845, %v6911_v58   ;;  %v16880_v48 = vpop.permute.xlu1 %7067  ;;  %v6915_v58 = vld [vmem:[%s19495_s5 + $0x280] sm:$0xff] }
 0x67e   :  { %v16888_v23 = vpop.permute.xlu0 %7072 }
 0x67f   :  { %7382 = vperm.xlu0 %9844, %v6912_v4   ;;  %v6916_v4 = vld [vmem:[%s19495_s5 + $0x288] sm:$0xff] }
 0x680   :  { %7387 = vperm.xlu1 %9845, %v6913_v35   ;;  %v16890_v21 = vpop.permute.xlu1 %7077  ;;  %v6917_v35 = vld [vmem:[%s19495_s5 + $0x290] sm:$0xff] }
 0x682   :  { %v16898_v54 = vpop.permute.xlu0 %7082 }
 0x683   :  { %7392 = vperm.xlu0 %9844, %v6914_v45   ;;  %v6918_v45 = vld [vmem:[%s19495_s5 + $0x298] sm:$0xff] }
 0x684   :  { %7397 = vperm.xlu1 %9845, %v6915_v58   ;;  %v16900_v29 = vpop.permute.xlu1 %7087  ;;  %v6919_v58 = vld [vmem:[%s19495_s5 + $0x2a0] sm:$0xff] }
 0x686   :  { %v16908_v12 = vpop.permute.xlu0 %7092 }
 0x687   :  { %7402 = vperm.xlu0 %9844, %v6916_v4   ;;  %v6920_v4 = vld [vmem:[%s19495_s5 + $0x2a8] sm:$0xff] }
 0x688   :  { %7407 = vperm.xlu1 %9845, %v6917_v35   ;;  %v16910_v41 = vpop.permute.xlu1 %7097  ;;  %v6921_v35 = vld [vmem:[%s19495_s5 + $0x2b0] sm:$0xff] }
 0x68a   :  { %v16918_v61 = vpop.permute.xlu0 %7102 }
 0x68b   :  { %7412 = vperm.xlu0 %9844, %v6918_v45   ;;  %v6922_v45 = vld [vmem:[%s19495_s5 + $0x2b8] sm:$0xff] }
 0x68c   :  { %7417 = vperm.xlu1 %9845, %v6919_v58   ;;  %v16920_v16 = vpop.permute.xlu1 %7107  ;;  %v6923_v58 = vld [vmem:[%s19495_s5 + $0x2c0] sm:$0xff] }
 0x68e   :  { %v16928_v27 = vpop.permute.xlu0 %7112 }
 0x68f   :  { %7422 = vperm.xlu0 %9844, %v6920_v4   ;;  %v6924_v4 = vld [vmem:[%s19495_s5 + $0x2c8] sm:$0xff] }
 0x690   :  { %7427 = vperm.xlu1 %9845, %v6921_v35   ;;  %v16930_v47 = vpop.permute.xlu1 %7117  ;;  %v6925_v35 = vld [vmem:[%s19495_s5 + $0x2d0] sm:$0xff] }
 0x692   :  { %v16938_v55 = vpop.permute.xlu0 %7122 }
 0x693   :  { %7432 = vperm.xlu0 %9844, %v6922_v45   ;;  %v6926_v45 = vld [vmem:[%s19495_s5 + $0x2d8] sm:$0xff] }
 0x694   :  { %7437 = vperm.xlu1 %9845, %v6923_v58   ;;  %v16940_v6 = vpop.permute.xlu1 %7127  ;;  %v6927_v58 = vld [vmem:[%s19495_s5 + $0x2e0] sm:$0xff] }
 0x696   :  { %v16948_v53 = vpop.permute.xlu0 %7132 }
 0x697   :  { %7442 = vperm.xlu0 %9844, %v6924_v4   ;;  %v6928_v4 = vld [vmem:[%s19495_s5 + $0x2e8] sm:$0xff] }
 0x698   :  { %7447 = vperm.xlu1 %9845, %v6925_v35   ;;  %v16950_v42 = vpop.permute.xlu1 %7137  ;;  %v6929_v35 = vld [vmem:[%s19495_s5 + $0x2f0] sm:$0xff] }
 0x69a   :  { %v16958_v34 = vpop.permute.xlu0 %7142 }
 0x69b   :  { %7452 = vperm.xlu0 %9844, %v6926_v45   ;;  %v6930_v45 = vld [vmem:[%s19495_s5 + $0x2f8] sm:$0xff] }
 0x69c   :  { %7457 = vperm.xlu1 %9845, %v6927_v58   ;;  %v16960_v56 = vpop.permute.xlu1 %7147  ;;  %v6931_v58 = vld [vmem:[%s19495_s5 + $0x300] sm:$0xff] }
 0x69e   :  { %v16968_v7 = vpop.permute.xlu0 %7152 }
 0x69f   :  { %7462 = vperm.xlu0 %9844, %v6928_v4   ;;  %v6932_v4 = vld [vmem:[%s19495_s5 + $0x308] sm:$0xff] }
 0x6a0   :  { %7467 = vperm.xlu1 %9845, %v6929_v35   ;;  %v16970_v51 = vpop.permute.xlu1 %7157  ;;  %v6933_v35 = vld [vmem:[%s19495_s5 + $0x310] sm:$0xff] }
 0x6a2   :  { %v16978_v14 = vpop.permute.xlu0 %7162 }
 0x6a3   :  { %7472 = vperm.xlu0 %9844, %v6930_v45   ;;  %v6934_v45 = vld [vmem:[%s19495_s5 + $0x318] sm:$0xff] }
 0x6a4   :  { %7477 = vperm.xlu1 %9845, %v6931_v58   ;;  %v16980_v18 = vpop.permute.xlu1 %7167  ;;  %v6935_v58 = vld [vmem:[%s19495_s5 + $0x320] sm:$0xff] }
 0x6a6   :  { %v16988_v50 = vpop.permute.xlu0 %7172 }
 0x6a7   :  { %7482 = vperm.xlu0 %9844, %v6932_v4   ;;  %v6936_v4 = vld [vmem:[%s19495_s5 + $0x328] sm:$0xff] }
 0x6a8   :  { %7487 = vperm.xlu1 %9845, %v6933_v35   ;;  %v16990_v1 = vpop.permute.xlu1 %7177  ;;  %v6937_v35 = vld [vmem:[%s19495_s5 + $0x330] sm:$0xff] }
 0x6aa   :  { %v16998_v15 = vpop.permute.xlu0 %7182 }
 0x6ab   :  { %7492 = vperm.xlu0 %9844, %v6934_v45   ;;  %v6938_v45 = vld [vmem:[%s19495_s5 + $0x338] sm:$0xff] }
 0x6ac   :  { %7497 = vperm.xlu1 %9845, %v6935_v58   ;;  %v17000_v32 = vpop.permute.xlu1 %7187  ;;  %v6939_v58 = vld [vmem:[%s19495_s5 + $0x340] sm:$0xff] }
 0x6ae   :  { %v17008_v49 = vpop.permute.xlu0 %7192 }
 0x6af   :  { %7502 = vperm.xlu0 %9844, %v6936_v4   ;;  %v6940_v4 = vld [vmem:[%s19495_s5 + $0x348] sm:$0xff] }
 0x6b0   :  { %7507 = vperm.xlu1 %9845, %v6937_v35   ;;  %v17010_v31 = vpop.permute.xlu1 %7197  ;;  %v6941_v35 = vld [vmem:[%s19495_s5 + $0x350] sm:$0xff] }
 0x6b2   :  { %v17018_v26 = vpop.permute.xlu0 %7202 }
 0x6b3   :  { %7512 = vperm.xlu0 %9844, %v6938_v45   ;;  %v6942_v45 = vld [vmem:[%s19495_s5 + $0x358] sm:$0xff] }
 0x6b4   :  { %7517 = vperm.xlu1 %9845, %v6939_v58   ;;  %v17020_v2 = vpop.permute.xlu1 %7207  ;;  %v6943_v58 = vld [vmem:[%s19495_s5 + $0x360] sm:$0xff] }
 0x6b6   :  { %v17028_v25 = vpop.permute.xlu0 %7212 }
 0x6b7   :  { %7522 = vperm.xlu0 %9844, %v6940_v4   ;;  %v6944_v4 = vld [vmem:[%s19495_s5 + $0x368] sm:$0xff] }
 0x6b8   :  { %7527 = vperm.xlu1 %9845, %v6941_v35   ;;  %v17030_v22 = vpop.permute.xlu1 %7217  ;;  %v6945_v35 = vld [vmem:[%s19495_s5 + $0x370] sm:$0xff] }
 0x6ba   :  { %v17038_v40 = vpop.permute.xlu0 %7222 }
 0x6bb   :  { %7532 = vperm.xlu0 %9844, %v6942_v45   ;;  %v6946_v45 = vld [vmem:[%s19495_s5 + $0x378] sm:$0xff] }
 0x6bc   :  { %7537 = vperm.xlu1 %9845, %v6943_v58   ;;  %v17040_v62 = vpop.permute.xlu1 %7227  ;;  %v6947_v58 = vld [vmem:[%s19495_s5 + $0x380] sm:$0xff] }
 0x6be   :  { %v17048_v3 = vpop.permute.xlu0 %7232 }
 0x6bf   :  { %7542 = vperm.xlu0 %9844, %v6944_v4   ;;  %v6948_v4 = vld [vmem:[%s19495_s5 + $0x388] sm:$0xff] }
 0x6c0   :  { %7547 = vperm.xlu1 %9845, %v6945_v35   ;;  %v17050_v60 = vpop.permute.xlu1 %7237  ;;  %v6949_v35 = vld [vmem:[%s19495_s5 + $0x390] sm:$0xff] }
 0x6c2   :  { %v17058_v52 = vpop.permute.xlu0 %7242 }
 0x6c3   :  { %7552 = vperm.xlu0 %9844, %v6946_v45   ;;  %v6950_v45 = vld [vmem:[%s19495_s5 + $0x398] sm:$0xff] }
 0x6c4   :  { %7557 = vperm.xlu1 %9845, %v6947_v58   ;;  %v17060_v19 = vpop.permute.xlu1 %7247  ;;  %v6951_v58 = vld [vmem:[%s19495_s5 + $0x3a0] sm:$0xff] }
 0x6c6   :  { %v17068_v17 = vpop.permute.xlu0 %7252 }
 0x6c7   :  { %20938 = vst [vmem:[#allocation274_spill] sm:$0xff] %v17068_v17  ;;  %7562 = vperm.xlu0 %9844, %v6948_v4   ;;  %v6952_v4 = vld [vmem:[%s19495_s5 + $0x3a8] sm:$0xff] }
 0x6c8   :  { %7567 = vperm.xlu1 %9845, %v6949_v35   ;;  %v17070_v33 = vpop.permute.xlu1 %7257  ;;  %v6953_v35 = vld [vmem:[%s19495_s5 + $0x3b0] sm:$0xff] }
 0x6c9   :  { %20939 = vst [vmem:[#allocation275_spill] sm:$0xff] %v17070_v33 }
 0x6ca   :  { %v17078_v0 = vpop.permute.xlu0 %7262 }
 0x6cb   :  { %20940 = vst [vmem:[#allocation276_spill] sm:$0xff] %v17078_v0  ;;  %7572 = vperm.xlu0 %9844, %v6950_v45   ;;  %v6954_v45 = vld [vmem:[%s19495_s5 + $0x3b8] sm:$0xff]  ;;  %v8019_v0 = vld [vmem:[%s19496_s6 + $0x200] sm:$0xff] }
 0x6cc   :  { %7577 = vperm.xlu1 %9845, %v6951_v58   ;;  %v17080_v59 = vpop.permute.xlu1 %7267  ;;  %v6955_v58 = vld [vmem:[%s19495_s5 + $0x3c0] sm:$0xff] }
 0x6cd   :  { %20941 = vst [vmem:[#allocation277_spill] sm:$0xff] %v17080_v59 }
 0x6ce   :  { %v17088_v37 = vpop.permute.xlu0 %7272 }
 0x6cf   :  { %20942 = vst [vmem:[#allocation278_spill] sm:$0xff] %v17088_v37  ;;  %7582 = vperm.xlu0 %9844, %v6952_v4   ;;  %v6956_v4 = vld [vmem:[%s19495_s5 + $0x3c8] sm:$0xff] }
 0x6d0   :  { %7587 = vperm.xlu1 %9845, %v6953_v35   ;;  %v17090_v20 = vpop.permute.xlu1 %7277  ;;  %v6957_v35 = vld [vmem:[%s19495_s5 + $0x3d0] sm:$0xff] }
 0x6d1   :  { %20943 = vst [vmem:[#allocation279_spill] sm:$0xff] %v17090_v20 }
 0x6d2   :  { %v17098_v39 = vpop.permute.xlu0 %7282 }
 0x6d3   :  { %20944 = vst [vmem:[#allocation280_spill] sm:$0xff] %v17098_v39  ;;  %7592 = vperm.xlu0 %9844, %v6954_v45   ;;  %v6958_v45 = vld [vmem:[%s19495_s5 + $0x3d8] sm:$0xff] }
 0x6d4   :  { %7597 = vperm.xlu1 %9845, %v6955_v58   ;;  %v17100_v43 = vpop.permute.xlu1 %7287  ;;  %v6959_v58 = vld [vmem:[%s19495_s5 + $0x3e0] sm:$0xff] }
 0x6d5   :  { %20945 = vst [vmem:[#allocation281_spill] sm:$0xff] %v17100_v43 }
 0x6d6   :  { %v17108_v24 = vpop.permute.xlu0 %7292 }
 0x6d7   :  { %20946 = vst [vmem:[#allocation282_spill] sm:$0xff] %v17108_v24  ;;  %7602 = vperm.xlu0 %9844, %v6956_v4   ;;  %v6960_v4 = vld [vmem:[%s19495_s5 + $0x3e8] sm:$0xff] }
 0x6d8   :  { %7607 = vperm.xlu1 %9845, %v6957_v35   ;;  %v17110_v20 = vpop.permute.xlu1 %7297  ;;  %v6961_v35 = vld [vmem:[%s19495_s5 + $0x3f0] sm:$0xff] }
 0x6d9   :  { %20947 = vst [vmem:[#allocation283_spill] sm:$0xff] %v17110_v20 }
 0x6da   :  { %v17118_v43 = vpop.permute.xlu0 %7302 }
 0x6db   :  { %20948 = vst [vmem:[#allocation284_spill] sm:$0xff] %v17118_v43  ;;  %7612 = vperm.xlu0 %9844, %v6958_v45   ;;  %v6962_v45 = vld [vmem:[%s19495_s5 + $0x3f8] sm:$0xff] }
 0x6dc   :  { %7617 = vperm.xlu1 %9845, %v6959_v58   ;;  %v17120_v39 = vpop.permute.xlu1 %7307  ;;  %v6963_v58 = vld [vmem:[%s19495_s5 + $0x400] sm:$0xff] }
 0x6dd   :  { %20949 = vst [vmem:[#allocation285_spill] sm:$0xff] %v17120_v39 }
 0x6de   :  { %v17128_v20 = vpop.permute.xlu0 %7312 }
 0x6df   :  { %20950 = vst [vmem:[#allocation286_spill] sm:$0xff] %v17128_v20  ;;  %7622 = vperm.xlu0 %9844, %v6960_v4   ;;  %v6964_v4 = vld [vmem:[%s19495_s5 + $0x408] sm:$0xff] }
 0x6e0   :  { %7627 = vperm.xlu1 %9845, %v6961_v35   ;;  %v17130_v24 = vpop.permute.xlu1 %7317  ;;  %v6965_v35 = vld [vmem:[%s19495_s5 + $0x410] sm:$0xff] }
 0x6e1   :  { %20951 = vst [vmem:[#allocation287_spill] sm:$0xff] %v17130_v24 }
 0x6e2   :  { %v17138_v39 = vpop.permute.xlu0 %7322 }
 0x6e3   :  { %20952 = vst [vmem:[#allocation288_spill] sm:$0xff] %v17138_v39  ;;  %7632 = vperm.xlu0 %9844, %v6962_v45   ;;  %v6966_v45 = vld [vmem:[%s19495_s5 + $0x418] sm:$0xff] }
 0x6e4   :  { %7637 = vperm.xlu1 %9845, %v6963_v58   ;;  %v17140_v43 = vpop.permute.xlu1 %7327  ;;  %v6967_v58 = vld [vmem:[%s19495_s5 + $0x420] sm:$0xff] }
 0x6e5   :  { %20953 = vst [vmem:[#allocation289_spill] sm:$0xff] %v17140_v43 }
 0x6e6   :  { %v17148_v24 = vpop.permute.xlu0 %7332 }
 0x6e7   :  { %20954 = vst [vmem:[#allocation290_spill] sm:$0xff] %v17148_v24  ;;  %7642 = vperm.xlu0 %9844, %v6964_v4   ;;  %v6968_v4 = vld [vmem:[%s19495_s5 + $0x428] sm:$0xff] }
 0x6e8   :  { %7647 = vperm.xlu1 %9845, %v6965_v35   ;;  %v17150_v20 = vpop.permute.xlu1 %7337  ;;  %v6969_v35 = vld [vmem:[%s19495_s5 + $0x430] sm:$0xff] }
 0x6e9   :  { %20955 = vst [vmem:[#allocation291_spill] sm:$0xff] %v17150_v20 }
 0x6ea   :  { %v17158_v43 = vpop.permute.xlu0 %7342 }
 0x6eb   :  { %20956 = vst [vmem:[#allocation292_spill] sm:$0xff] %v17158_v43  ;;  %7652 = vperm.xlu0 %9844, %v6966_v45   ;;  %v6970_v45 = vld [vmem:[%s19495_s5 + $0x438] sm:$0xff] }
 0x6ec   :  { %7657 = vperm.xlu1 %9845, %v6967_v58   ;;  %v17160_v39 = vpop.permute.xlu1 %7347  ;;  %v6971_v58 = vld [vmem:[%s19495_s5 + $0x440] sm:$0xff] }
 0x6ed   :  { %20957 = vst [vmem:[#allocation293_spill] sm:$0xff] %v17160_v39 }
 0x6ee   :  { %v17168_v20 = vpop.permute.xlu0 %7352 }
 0x6ef   :  { %20958 = vst [vmem:[#allocation294_spill] sm:$0xff] %v17168_v20  ;;  %7662 = vperm.xlu0 %9844, %v6968_v4   ;;  %v6972_v4 = vld [vmem:[%s19495_s5 + $0x448] sm:$0xff] }
 0x6f0   :  { %7667 = vperm.xlu1 %9845, %v6969_v35   ;;  %v17170_v24 = vpop.permute.xlu1 %7357  ;;  %v6973_v35 = vld [vmem:[%s19495_s5 + $0x450] sm:$0xff] }
 0x6f1   :  { %20959 = vst [vmem:[#allocation295_spill] sm:$0xff] %v17170_v24 }
 0x6f2   :  { %v17178_v39 = vpop.permute.xlu0 %7362 }
 0x6f3   :  { %20960 = vst [vmem:[#allocation296_spill] sm:$0xff] %v17178_v39  ;;  %7672 = vperm.xlu0 %9844, %v6970_v45   ;;  %v6974_v45 = vld [vmem:[%s19495_s5 + $0x458] sm:$0xff] }
 0x6f4   :  { %7677 = vperm.xlu1 %9845, %v6971_v58   ;;  %v17180_v43 = vpop.permute.xlu1 %7367  ;;  %v6975_v58 = vld [vmem:[%s19495_s5 + $0x460] sm:$0xff] }
 0x6f5   :  { %20961 = vst [vmem:[#allocation297_spill] sm:$0xff] %v17180_v43 }
 0x6f6   :  { %v17188_v24 = vpop.permute.xlu0 %7372 }
 0x6f7   :  { %20962 = vst [vmem:[#allocation298_spill] sm:$0xff] %v17188_v24  ;;  %7682 = vperm.xlu0 %9844, %v6972_v4   ;;  %v6976_v4 = vld [vmem:[%s19495_s5 + $0x468] sm:$0xff] }
 0x6f8   :  { %7687 = vperm.xlu1 %9845, %v6973_v35   ;;  %v17190_v20 = vpop.permute.xlu1 %7377  ;;  %v6977_v35 = vld [vmem:[%s19495_s5 + $0x470] sm:$0xff] }
 0x6f9   :  { %20963 = vst [vmem:[#allocation299_spill] sm:$0xff] %v17190_v20 }
 0x6fa   :  { %v17198_v43 = vpop.permute.xlu0 %7382 }
 0x6fb   :  { %20964 = vst [vmem:[#allocation300_spill] sm:$0xff] %v17198_v43  ;;  %7692 = vperm.xlu0 %9844, %v6974_v45   ;;  %v6978_v45 = vld [vmem:[%s19495_s5 + $0x478] sm:$0xff] }
 0x6fc   :  { %7697 = vperm.xlu1 %9845, %v6975_v58   ;;  %v17200_v39 = vpop.permute.xlu1 %7387  ;;  %v6979_v58 = vld [vmem:[%s19495_s5 + $0x480] sm:$0xff] }
 0x6fd   :  { %20965 = vst [vmem:[#allocation301_spill] sm:$0xff] %v17200_v39 }
 0x6fe   :  { %v17208_v20 = vpop.permute.xlu0 %7392 }
 0x6ff   :  { %20966 = vst [vmem:[#allocation302_spill] sm:$0xff] %v17208_v20  ;;  %7702 = vperm.xlu0 %9844, %v6976_v4   ;;  %v6980_v4 = vld [vmem:[%s19495_s5 + $0x488] sm:$0xff] }
 0x700   :  { %7707 = vperm.xlu1 %9845, %v6977_v35   ;;  %v17210_v24 = vpop.permute.xlu1 %7397  ;;  %v6981_v35 = vld [vmem:[%s19495_s5 + $0x490] sm:$0xff] }
 0x701   :  { %20967 = vst [vmem:[#allocation303_spill] sm:$0xff] %v17210_v24 }
 0x702   :  { %v17218_v39 = vpop.permute.xlu0 %7402 }
 0x703   :  { %20968 = vst [vmem:[#allocation304_spill] sm:$0xff] %v17218_v39  ;;  %7712 = vperm.xlu0 %9844, %v6978_v45   ;;  %v6982_v45 = vld [vmem:[%s19495_s5 + $0x498] sm:$0xff] }
 0x704   :  { %7717 = vperm.xlu1 %9845, %v6979_v58   ;;  %v17220_v43 = vpop.permute.xlu1 %7407  ;;  %v6983_v58 = vld [vmem:[%s19495_s5 + $0x4a0] sm:$0xff] }
 0x705   :  { %20969 = vst [vmem:[#allocation305_spill] sm:$0xff] %v17220_v43 }
 0x706   :  { %v17228_v24 = vpop.permute.xlu0 %7412 }
 0x707   :  { %20970 = vst [vmem:[#allocation306_spill] sm:$0xff] %v17228_v24  ;;  %7722 = vperm.xlu0 %9844, %v6980_v4   ;;  %v6984_v4 = vld [vmem:[%s19495_s5 + $0x4a8] sm:$0xff] }
 0x708   :  { %7727 = vperm.xlu1 %9845, %v6981_v35   ;;  %v17230_v20 = vpop.permute.xlu1 %7417  ;;  %v6985_v35 = vld [vmem:[%s19495_s5 + $0x4b0] sm:$0xff] }
 0x709   :  { %20971 = vst [vmem:[#allocation307_spill] sm:$0xff] %v17230_v20 }
 0x70a   :  { %v17238_v43 = vpop.permute.xlu0 %7422 }
 0x70b   :  { %20972 = vst [vmem:[#allocation308_spill] sm:$0xff] %v17238_v43  ;;  %7732 = vperm.xlu0 %9844, %v6982_v45   ;;  %v6986_v45 = vld [vmem:[%s19495_s5 + $0x4b8] sm:$0xff] }
 0x70c   :  { %7737 = vperm.xlu1 %9845, %v6983_v58   ;;  %v17240_v39 = vpop.permute.xlu1 %7427  ;;  %v6987_v58 = vld [vmem:[%s19495_s5 + $0x4c0] sm:$0xff] }
 0x70d   :  { %20973 = vst [vmem:[#allocation309_spill] sm:$0xff] %v17240_v39 }
 0x70e   :  { %v17248_v20 = vpop.permute.xlu0 %7432 }
 0x70f   :  { %20974 = vst [vmem:[#allocation310_spill] sm:$0xff] %v17248_v20  ;;  %7742 = vperm.xlu0 %9844, %v6984_v4   ;;  %v6988_v4 = vld [vmem:[%s19495_s5 + $0x4c8] sm:$0xff] }
 0x710   :  { %7747 = vperm.xlu1 %9845, %v6985_v35   ;;  %v17250_v24 = vpop.permute.xlu1 %7437  ;;  %v6989_v35 = vld [vmem:[%s19495_s5 + $0x4d0] sm:$0xff] }
 0x711   :  { %20975 = vst [vmem:[#allocation311_spill] sm:$0xff] %v17250_v24 }
 0x712   :  { %v17258_v39 = vpop.permute.xlu0 %7442 }
 0x713   :  { %20976 = vst [vmem:[#allocation312_spill] sm:$0xff] %v17258_v39  ;;  %7752 = vperm.xlu0 %9844, %v6986_v45   ;;  %v6990_v45 = vld [vmem:[%s19495_s5 + $0x4d8] sm:$0xff] }
 0x714   :  { %7757 = vperm.xlu1 %9845, %v6987_v58   ;;  %v17260_v43 = vpop.permute.xlu1 %7447  ;;  %v6991_v58 = vld [vmem:[%s19495_s5 + $0x4e0] sm:$0xff] }
 0x715   :  { %20977 = vst [vmem:[#allocation313_spill] sm:$0xff] %v17260_v43 }
 0x716   :  { %v17268_v24 = vpop.permute.xlu0 %7452 }
 0x717   :  { %20978 = vst [vmem:[#allocation314_spill] sm:$0xff] %v17268_v24  ;;  %7762 = vperm.xlu0 %9844, %v6988_v4   ;;  %v6992_v4 = vld [vmem:[%s19495_s5 + $0x4e8] sm:$0xff] }
 0x718   :  { %7767 = vperm.xlu1 %9845, %v6989_v35   ;;  %v17270_v20 = vpop.permute.xlu1 %7457  ;;  %v6993_v35 = vld [vmem:[%s19495_s5 + $0x4f0] sm:$0xff] }
 0x719   :  { %20979 = vst [vmem:[#allocation315_spill] sm:$0xff] %v17270_v20 }
 0x71a   :  { %v17278_v43 = vpop.permute.xlu0 %7462 }
 0x71b   :  { %20980 = vst [vmem:[#allocation316_spill] sm:$0xff] %v17278_v43  ;;  %7772 = vperm.xlu0 %9844, %v6990_v45   ;;  %v6994_v45 = vld [vmem:[%s19495_s5 + $0x4f8] sm:$0xff] }
 0x71c   :  { %7777 = vperm.xlu1 %9845, %v6991_v58   ;;  %v17280_v39 = vpop.permute.xlu1 %7467  ;;  %v7955_v58 = vld [vmem:[%s19496_s6] sm:$0xff] }
 0x71d   :  { %20981 = vst [vmem:[#allocation317_spill] sm:$0xff] %v17280_v39 }
 0x71e   :  { %v17288_v20 = vpop.permute.xlu0 %7472 }
 0x71f   :  { %20982 = vst [vmem:[#allocation318_spill] sm:$0xff] %v17288_v20  ;;  %7782 = vperm.xlu0 %9844, %v6992_v4   ;;  %v7956_v4 = vld [vmem:[%s19496_s6 + $0x8] sm:$0xff] }
 0x720   :  { %7787 = vperm.xlu1 %9845, %v6993_v35   ;;  %v17290_v24 = vpop.permute.xlu1 %7477  ;;  %v7957_v35 = vld [vmem:[%s19496_s6 + $0x10] sm:$0xff] }
 0x721   :  { %20983 = vst [vmem:[#allocation319_spill] sm:$0xff] %v17290_v24 }
 0x722   :  { %v17298_v39 = vpop.permute.xlu0 %7482 }
 0x723   :  { %20984 = vst [vmem:[#allocation320_spill] sm:$0xff] %v17298_v39  ;;  %7792 = vperm.xlu0 %9844, %v6994_v45   ;;  %v7958_v45 = vld [vmem:[%s19496_s6 + $0x18] sm:$0xff] }
 0x724   :  { %8117 = vperm.xlu1 %9845, %v7955_v58   ;;  %v17300_v43 = vpop.permute.xlu1 %7487  ;;  %v7959_v58 = vld [vmem:[%s19496_s6 + $0x20] sm:$0xff] }
 0x725   :  { %20985 = vst [vmem:[#allocation321_spill] sm:$0xff] %v17300_v43 }
 0x726   :  { %v17308_v24 = vpop.permute.xlu0 %7492 }
 0x727   :  { %20986 = vst [vmem:[#allocation322_spill] sm:$0xff] %v17308_v24  ;;  %8122 = vperm.xlu0 %9844, %v7956_v4   ;;  %v7960_v4 = vld [vmem:[%s19496_s6 + $0x28] sm:$0xff] }
 0x728   :  { %8127 = vperm.xlu1 %9845, %v7957_v35   ;;  %v17310_v20 = vpop.permute.xlu1 %7497  ;;  %v7961_v35 = vld [vmem:[%s19496_s6 + $0x30] sm:$0xff] }
 0x729   :  { %20987 = vst [vmem:[#allocation323_spill] sm:$0xff] %v17310_v20 }
 0x72a   :  { %v17318_v43 = vpop.permute.xlu0 %7502 }
 0x72b   :  { %20988 = vst [vmem:[#allocation324_spill] sm:$0xff] %v17318_v43  ;;  %8132 = vperm.xlu0 %9844, %v7958_v45   ;;  %v7962_v45 = vld [vmem:[%s19496_s6 + $0x38] sm:$0xff] }
 0x72c   :  { %8137 = vperm.xlu1 %9845, %v7959_v58   ;;  %v17320_v39 = vpop.permute.xlu1 %7507  ;;  %v7963_v58 = vld [vmem:[%s19496_s6 + $0x40] sm:$0xff] }
 0x72d   :  { %20989 = vst [vmem:[#allocation325_spill] sm:$0xff] %v17320_v39 }
 0x72e   :  { %v17328_v20 = vpop.permute.xlu0 %7512 }
 0x72f   :  { %20990 = vst [vmem:[#allocation326_spill] sm:$0xff] %v17328_v20  ;;  %8142 = vperm.xlu0 %9844, %v7960_v4   ;;  %v7964_v4 = vld [vmem:[%s19496_s6 + $0x48] sm:$0xff] }
 0x730   :  { %8147 = vperm.xlu1 %9845, %v7961_v35   ;;  %v17330_v24 = vpop.permute.xlu1 %7517  ;;  %v7965_v35 = vld [vmem:[%s19496_s6 + $0x50] sm:$0xff] }
 0x731   :  { %20991 = vst [vmem:[#allocation327_spill] sm:$0xff] %v17330_v24 }
 0x732   :  { %v17338_v39 = vpop.permute.xlu0 %7522 }
 0x733   :  { %20992 = vst [vmem:[#allocation328_spill] sm:$0xff] %v17338_v39  ;;  %8152 = vperm.xlu0 %9844, %v7962_v45   ;;  %v7966_v45 = vld [vmem:[%s19496_s6 + $0x58] sm:$0xff] }
 0x734   :  { %8157 = vperm.xlu1 %9845, %v7963_v58   ;;  %v17340_v43 = vpop.permute.xlu1 %7527  ;;  %v7967_v58 = vld [vmem:[%s19496_s6 + $0x60] sm:$0xff] }
 0x735   :  { %20993 = vst [vmem:[#allocation329_spill] sm:$0xff] %v17340_v43 }
 0x736   :  { %v17348_v24 = vpop.permute.xlu0 %7532 }
 0x737   :  { %20994 = vst [vmem:[#allocation330_spill] sm:$0xff] %v17348_v24  ;;  %8162 = vperm.xlu0 %9844, %v7964_v4   ;;  %v7968_v4 = vld [vmem:[%s19496_s6 + $0x68] sm:$0xff] }
 0x738   :  { %8167 = vperm.xlu1 %9845, %v7965_v35   ;;  %v17350_v20 = vpop.permute.xlu1 %7537  ;;  %v7969_v35 = vld [vmem:[%s19496_s6 + $0x70] sm:$0xff] }
 0x739   :  { %20995 = vst [vmem:[#allocation331_spill] sm:$0xff] %v17350_v20 }
 0x73a   :  { %v17358_v43 = vpop.permute.xlu0 %7542 }
 0x73b   :  { %20996 = vst [vmem:[#allocation332_spill] sm:$0xff] %v17358_v43  ;;  %8172 = vperm.xlu0 %9844, %v7966_v45   ;;  %v7970_v45 = vld [vmem:[%s19496_s6 + $0x78] sm:$0xff] }
 0x73c   :  { %8177 = vperm.xlu1 %9845, %v7967_v58   ;;  %v17360_v39 = vpop.permute.xlu1 %7547  ;;  %v7971_v58 = vld [vmem:[%s19496_s6 + $0x80] sm:$0xff] }
 0x73d   :  { %20997 = vst [vmem:[#allocation333_spill] sm:$0xff] %v17360_v39 }
 0x73e   :  { %v17368_v20 = vpop.permute.xlu0 %7552 }
 0x73f   :  { %20998 = vst [vmem:[#allocation334_spill] sm:$0xff] %v17368_v20  ;;  %8182 = vperm.xlu0 %9844, %v7968_v4   ;;  %v7972_v4 = vld [vmem:[%s19496_s6 + $0x88] sm:$0xff] }
 0x740   :  { %8187 = vperm.xlu1 %9845, %v7969_v35   ;;  %v17370_v24 = vpop.permute.xlu1 %7557  ;;  %v7973_v35 = vld [vmem:[%s19496_s6 + $0x90] sm:$0xff] }
 0x741   :  { %20999 = vst [vmem:[#allocation335_spill] sm:$0xff] %v17370_v24 }
 0x742   :  { %v17378_v39 = vpop.permute.xlu0 %7562 }
 0x743   :  { %21000 = vst [vmem:[#allocation336_spill] sm:$0xff] %v17378_v39  ;;  %8192 = vperm.xlu0 %9844, %v7970_v45   ;;  %v7974_v45 = vld [vmem:[%s19496_s6 + $0x98] sm:$0xff] }
 0x744   :  { %8197 = vperm.xlu1 %9845, %v7971_v58   ;;  %v17380_v43 = vpop.permute.xlu1 %7567  ;;  %v7975_v58 = vld [vmem:[%s19496_s6 + $0xa0] sm:$0xff] }
 0x745   :  { %21001 = vst [vmem:[#allocation337_spill] sm:$0xff] %v17380_v43 }
 0x746   :  { %v17388_v24 = vpop.permute.xlu0 %7572 }
 0x747   :  { %21002 = vst [vmem:[#allocation338_spill] sm:$0xff] %v17388_v24  ;;  %8202 = vperm.xlu0 %9844, %v7972_v4   ;;  %v7976_v4 = vld [vmem:[%s19496_s6 + $0xa8] sm:$0xff] }
 0x748   :  { %8207 = vperm.xlu1 %9845, %v7973_v35   ;;  %v17390_v20 = vpop.permute.xlu1 %7577  ;;  %v7977_v35 = vld [vmem:[%s19496_s6 + $0xb0] sm:$0xff] }
 0x749   :  { %21003 = vst [vmem:[#allocation339_spill] sm:$0xff] %v17390_v20 }
 0x74a   :  { %v17398_v43 = vpop.permute.xlu0 %7582 }
 0x74b   :  { %21004 = vst [vmem:[#allocation340_spill] sm:$0xff] %v17398_v43  ;;  %8212 = vperm.xlu0 %9844, %v7974_v45   ;;  %v7978_v45 = vld [vmem:[%s19496_s6 + $0xb8] sm:$0xff] }
 0x74c   :  { %8217 = vperm.xlu1 %9845, %v7975_v58   ;;  %v17400_v39 = vpop.permute.xlu1 %7587  ;;  %v7979_v58 = vld [vmem:[%s19496_s6 + $0xc0] sm:$0xff] }
 0x74d   :  { %21005 = vst [vmem:[#allocation341_spill] sm:$0xff] %v17400_v39 }
 0x74e   :  { %v17408_v20 = vpop.permute.xlu0 %7592 }
 0x74f   :  { %21006 = vst [vmem:[#allocation342_spill] sm:$0xff] %v17408_v20  ;;  %8222 = vperm.xlu0 %9844, %v7976_v4   ;;  %v7980_v4 = vld [vmem:[%s19496_s6 + $0xc8] sm:$0xff] }
 0x750   :  { %8227 = vperm.xlu1 %9845, %v7977_v35   ;;  %v17410_v24 = vpop.permute.xlu1 %7597  ;;  %v7981_v35 = vld [vmem:[%s19496_s6 + $0xd0] sm:$0xff] }
 0x751   :  { %21007 = vst [vmem:[#allocation343_spill] sm:$0xff] %v17410_v24 }
 0x752   :  { %v17418_v39 = vpop.permute.xlu0 %7602 }
 0x753   :  { %21008 = vst [vmem:[#allocation344_spill] sm:$0xff] %v17418_v39  ;;  %8232 = vperm.xlu0 %9844, %v7978_v45   ;;  %v7982_v45 = vld [vmem:[%s19496_s6 + $0xd8] sm:$0xff] }
 0x754   :  { %8237 = vperm.xlu1 %9845, %v7979_v58   ;;  %v17420_v43 = vpop.permute.xlu1 %7607  ;;  %v7983_v58 = vld [vmem:[%s19496_s6 + $0xe0] sm:$0xff] }
 0x755   :  { %21009 = vst [vmem:[#allocation345_spill] sm:$0xff] %v17420_v43 }
 0x756   :  { %v17428_v24 = vpop.permute.xlu0 %7612 }
 0x757   :  { %21010 = vst [vmem:[#allocation346_spill] sm:$0xff] %v17428_v24  ;;  %8242 = vperm.xlu0 %9844, %v7980_v4   ;;  %v7984_v4 = vld [vmem:[%s19496_s6 + $0xe8] sm:$0xff] }
 0x758   :  { %8247 = vperm.xlu1 %9845, %v7981_v35   ;;  %v17430_v20 = vpop.permute.xlu1 %7617  ;;  %v7985_v35 = vld [vmem:[%s19496_s6 + $0xf0] sm:$0xff] }
 0x759   :  { %21011 = vst [vmem:[#allocation347_spill] sm:$0xff] %v17430_v20 }
 0x75a   :  { %v17438_v43 = vpop.permute.xlu0 %7622 }
 0x75b   :  { %21012 = vst [vmem:[#allocation348_spill] sm:$0xff] %v17438_v43  ;;  %8252 = vperm.xlu0 %9844, %v7982_v45   ;;  %v7986_v45 = vld [vmem:[%s19496_s6 + $0xf8] sm:$0xff] }
 0x75c   :  { %8257 = vperm.xlu1 %9845, %v7983_v58   ;;  %v17440_v39 = vpop.permute.xlu1 %7627  ;;  %v7987_v58 = vld [vmem:[%s19496_s6 + $0x100] sm:$0xff] }
 0x75d   :  { %21013 = vst [vmem:[#allocation349_spill] sm:$0xff] %v17440_v39 }
 0x75e   :  { %v17448_v20 = vpop.permute.xlu0 %7632 }
 0x75f   :  { %21014 = vst [vmem:[#allocation350_spill] sm:$0xff] %v17448_v20  ;;  %8262 = vperm.xlu0 %9844, %v7984_v4   ;;  %v7988_v4 = vld [vmem:[%s19496_s6 + $0x108] sm:$0xff] }
 0x760   :  { %8267 = vperm.xlu1 %9845, %v7985_v35   ;;  %v17450_v24 = vpop.permute.xlu1 %7637  ;;  %v7989_v35 = vld [vmem:[%s19496_s6 + $0x110] sm:$0xff] }
 0x761   :  { %21015 = vst [vmem:[#allocation351_spill] sm:$0xff] %v17450_v24 }
 0x762   :  { %v17458_v39 = vpop.permute.xlu0 %7642 }
 0x763   :  { %21016 = vst [vmem:[#allocation352_spill] sm:$0xff] %v17458_v39  ;;  %8272 = vperm.xlu0 %9844, %v7986_v45   ;;  %v7990_v45 = vld [vmem:[%s19496_s6 + $0x118] sm:$0xff] }
 0x764   :  { %8277 = vperm.xlu1 %9845, %v7987_v58   ;;  %v17460_v43 = vpop.permute.xlu1 %7647  ;;  %v7991_v58 = vld [vmem:[%s19496_s6 + $0x120] sm:$0xff] }
 0x765   :  { %21017 = vst [vmem:[#allocation353_spill] sm:$0xff] %v17460_v43 }
 0x766   :  { %v17468_v24 = vpop.permute.xlu0 %7652 }
 0x767   :  { %21018 = vst [vmem:[#allocation354_spill] sm:$0xff] %v17468_v24  ;;  %8282 = vperm.xlu0 %9844, %v7988_v4   ;;  %v7992_v4 = vld [vmem:[%s19496_s6 + $0x128] sm:$0xff] }
 0x768   :  { %8287 = vperm.xlu1 %9845, %v7989_v35   ;;  %v17470_v20 = vpop.permute.xlu1 %7657  ;;  %v7993_v35 = vld [vmem:[%s19496_s6 + $0x130] sm:$0xff] }
 0x769   :  { %21019 = vst [vmem:[#allocation355_spill] sm:$0xff] %v17470_v20 }
 0x76a   :  { %v17478_v43 = vpop.permute.xlu0 %7662 }
 0x76b   :  { %21020 = vst [vmem:[#allocation356_spill] sm:$0xff] %v17478_v43  ;;  %8292 = vperm.xlu0 %9844, %v7990_v45   ;;  %v7994_v45 = vld [vmem:[%s19496_s6 + $0x138] sm:$0xff] }
 0x76c   :  { %8297 = vperm.xlu1 %9845, %v7991_v58   ;;  %v17480_v39 = vpop.permute.xlu1 %7667  ;;  %v7995_v58 = vld [vmem:[%s19496_s6 + $0x140] sm:$0xff] }
 0x76d   :  { %21021 = vst [vmem:[#allocation357_spill] sm:$0xff] %v17480_v39 }
 0x76e   :  { %v17488_v20 = vpop.permute.xlu0 %7672 }
 0x76f   :  { %21022 = vst [vmem:[#allocation358_spill] sm:$0xff] %v17488_v20  ;;  %8302 = vperm.xlu0 %9844, %v7992_v4   ;;  %v7996_v4 = vld [vmem:[%s19496_s6 + $0x148] sm:$0xff] }
 0x770   :  { %8307 = vperm.xlu1 %9845, %v7993_v35   ;;  %v17490_v24 = vpop.permute.xlu1 %7677  ;;  %v7997_v35 = vld [vmem:[%s19496_s6 + $0x150] sm:$0xff] }
 0x771   :  { %21023 = vst [vmem:[#allocation359_spill] sm:$0xff] %v17490_v24 }
 0x772   :  { %v17498_v39 = vpop.permute.xlu0 %7682 }
 0x773   :  { %21024 = vst [vmem:[#allocation360_spill] sm:$0xff] %v17498_v39  ;;  %8312 = vperm.xlu0 %9844, %v7994_v45   ;;  %v7998_v45 = vld [vmem:[%s19496_s6 + $0x158] sm:$0xff] }
 0x774   :  { %8317 = vperm.xlu1 %9845, %v7995_v58   ;;  %v17500_v43 = vpop.permute.xlu1 %7687  ;;  %v7999_v58 = vld [vmem:[%s19496_s6 + $0x160] sm:$0xff] }
 0x775   :  { %21025 = vst [vmem:[#allocation361_spill] sm:$0xff] %v17500_v43 }
 0x776   :  { %v17508_v24 = vpop.permute.xlu0 %7692 }
 0x777   :  { %21026 = vst [vmem:[#allocation362_spill] sm:$0xff] %v17508_v24  ;;  %8322 = vperm.xlu0 %9844, %v7996_v4   ;;  %v8000_v4 = vld [vmem:[%s19496_s6 + $0x168] sm:$0xff] }
 0x778   :  { %8327 = vperm.xlu1 %9845, %v7997_v35   ;;  %v17510_v20 = vpop.permute.xlu1 %7697  ;;  %v8001_v35 = vld [vmem:[%s19496_s6 + $0x170] sm:$0xff] }
 0x779   :  { %21027 = vst [vmem:[#allocation363_spill] sm:$0xff] %v17510_v20 }
 0x77a   :  { %v17518_v43 = vpop.permute.xlu0 %7702 }
 0x77b   :  { %21028 = vst [vmem:[#allocation364_spill] sm:$0xff] %v17518_v43  ;;  %8332 = vperm.xlu0 %9844, %v7998_v45   ;;  %v8002_v45 = vld [vmem:[%s19496_s6 + $0x178] sm:$0xff] }
 0x77c   :  { %8337 = vperm.xlu1 %9845, %v7999_v58   ;;  %v17520_v39 = vpop.permute.xlu1 %7707  ;;  %v8003_v58 = vld [vmem:[%s19496_s6 + $0x180] sm:$0xff] }
 0x77d   :  { %21029 = vst [vmem:[#allocation365_spill] sm:$0xff] %v17520_v39 }
 0x77e   :  { %v17528_v20 = vpop.permute.xlu0 %7712 }
 0x77f   :  { %21030 = vst [vmem:[#allocation366_spill] sm:$0xff] %v17528_v20  ;;  %8342 = vperm.xlu0 %9844, %v8000_v4   ;;  %v8004_v4 = vld [vmem:[%s19496_s6 + $0x188] sm:$0xff] }
 0x780   :  { %8347 = vperm.xlu1 %9845, %v8001_v35   ;;  %v17530_v24 = vpop.permute.xlu1 %7717  ;;  %v8005_v35 = vld [vmem:[%s19496_s6 + $0x190] sm:$0xff] }
 0x781   :  { %21031 = vst [vmem:[#allocation367_spill] sm:$0xff] %v17530_v24 }
 0x782   :  { %v17538_v39 = vpop.permute.xlu0 %7722 }
 0x783   :  { %21032 = vst [vmem:[#allocation368_spill] sm:$0xff] %v17538_v39  ;;  %8352 = vperm.xlu0 %9844, %v8002_v45   ;;  %v8006_v45 = vld [vmem:[%s19496_s6 + $0x198] sm:$0xff] }
 0x784   :  { %8357 = vperm.xlu1 %9845, %v8003_v58   ;;  %v17540_v43 = vpop.permute.xlu1 %7727  ;;  %v8007_v58 = vld [vmem:[%s19496_s6 + $0x1a0] sm:$0xff] }
 0x785   :  { %21033 = vst [vmem:[#allocation369_spill] sm:$0xff] %v17540_v43 }
 0x786   :  { %v17548_v24 = vpop.permute.xlu0 %7732 }
 0x787   :  { %21034 = vst [vmem:[#allocation370_spill] sm:$0xff] %v17548_v24  ;;  %8362 = vperm.xlu0 %9844, %v8004_v4   ;;  %v8008_v4 = vld [vmem:[%s19496_s6 + $0x1a8] sm:$0xff] }
 0x788   :  { %8367 = vperm.xlu1 %9845, %v8005_v35   ;;  %v17550_v20 = vpop.permute.xlu1 %7737  ;;  %v8009_v35 = vld [vmem:[%s19496_s6 + $0x1b0] sm:$0xff] }
 0x789   :  { %21035 = vst [vmem:[#allocation371_spill] sm:$0xff] %v17550_v20 }
 0x78a   :  { %v17558_v43 = vpop.permute.xlu0 %7742 }
 0x78b   :  { %21036 = vst [vmem:[#allocation372_spill] sm:$0xff] %v17558_v43  ;;  %8372 = vperm.xlu0 %9844, %v8006_v45   ;;  %v8010_v45 = vld [vmem:[%s19496_s6 + $0x1b8] sm:$0xff] }
 0x78c   :  { %8377 = vperm.xlu1 %9845, %v8007_v58   ;;  %v17560_v39 = vpop.permute.xlu1 %7747  ;;  %v8011_v58 = vld [vmem:[%s19496_s6 + $0x1c0] sm:$0xff] }
 0x78d   :  { %21037 = vst [vmem:[#allocation373_spill] sm:$0xff] %v17560_v39 }
 0x78e   :  { %v17568_v20 = vpop.permute.xlu0 %7752 }
 0x78f   :  { %21038 = vst [vmem:[#allocation374_spill] sm:$0xff] %v17568_v20  ;;  %8382 = vperm.xlu0 %9844, %v8008_v4   ;;  %v8012_v4 = vld [vmem:[%s19496_s6 + $0x1c8] sm:$0xff] }
 0x790   :  { %8387 = vperm.xlu1 %9845, %v8009_v35   ;;  %v17570_v24 = vpop.permute.xlu1 %7757  ;;  %v8013_v35 = vld [vmem:[%s19496_s6 + $0x1d0] sm:$0xff] }
 0x791   :  { %21039 = vst [vmem:[#allocation375_spill] sm:$0xff] %v17570_v24 }
 0x792   :  { %v17578_v39 = vpop.permute.xlu0 %7762 }
 0x793   :  { %21040 = vst [vmem:[#allocation376_spill] sm:$0xff] %v17578_v39  ;;  %8392 = vperm.xlu0 %9844, %v8010_v45   ;;  %v8014_v45 = vld [vmem:[%s19496_s6 + $0x1d8] sm:$0xff] }
 0x794   :  { %8397 = vperm.xlu1 %9845, %v8011_v58   ;;  %v17580_v43 = vpop.permute.xlu1 %7767  ;;  %v8015_v58 = vld [vmem:[%s19496_s6 + $0x1e0] sm:$0xff] }
 0x795   :  { %21041 = vst [vmem:[#allocation377_spill] sm:$0xff] %v17580_v43 }
 0x796   :  { %v17588_v24 = vpop.permute.xlu0 %7772 }
 0x797   :  { %21042 = vst [vmem:[#allocation378_spill] sm:$0xff] %v17588_v24  ;;  %8402 = vperm.xlu0 %9844, %v8012_v4   ;;  %v8016_v4 = vld [vmem:[%s19496_s6 + $0x1e8] sm:$0xff] }
 0x798   :  { %8407 = vperm.xlu1 %9845, %v8013_v35   ;;  %v17590_v20 = vpop.permute.xlu1 %7777  ;;  %v8017_v35 = vld [vmem:[%s19496_s6 + $0x1f0] sm:$0xff]  ;;  %v21047_v24 = vld [vmem:[#allocation131_spill] sm:$0xff] }
 0x799   :  { %21043 = vst [vmem:[#allocation379_spill] sm:$0xff] %v17590_v20  ;;  %v7795_v37 = vmul.f32 %v16818_v11, %v21047_v24 }
 0x79a   :  { %v17598_v43 = vpop.permute.xlu0 %7782 }
 0x79b   :  { %21044 = vst [vmem:[#allocation380_spill] sm:$0xff] %v17598_v43  ;;  %8412 = vperm.xlu0 %9844, %v8014_v45   ;;  %v8018_v45 = vld [vmem:[%s19496_s6 + $0x1f8] sm:$0xff] }
 0x79c   :  { %8417 = vperm.xlu1 %9845, %v8015_v58   ;;  %v17600_v39 = vpop.permute.xlu1 %7787  ;;  %v21048_v58 = vld [vmem:[#allocation135_spill] sm:$0xff] }
 0x79d   :  { %21045 = vst [vmem:[#allocation381_spill] sm:$0xff] %v17600_v39  ;;  %v7796_v39 = vmul.f32 %v16810_v36, %v21048_v58 }
 0x79e   :  { %v17608_v20 = vpop.permute.xlu0 %7792 }
 0x79f   :  { %21046 = vst [vmem:[#allocation382_spill] sm:$0xff] %v17608_v20  ;;  %8422 = vperm.xlu0 %9844, %v8016_v4   ;;  %v21049_v20 = vld [vmem:[#allocation128_spill] sm:$0xff]  ;;  %v21052_v4 = vld [vmem:[#allocation139_spill] sm:$0xff] }
 0x7a0   :  { %8427 = vperm.xlu1 %9845, %v8017_v35   ;;  %v8118_v43 = vpop.permute.xlu1 %8117  ;;  %v7797_v17 = vmul.f32 %v16820_v38, %v21049_v20  ;;  %v7800_v35 = vmul.f32 %v16838_v46, %v21052_v4 }
 0x7a1   :  { %v8915_v59 = vadd.f32 %v8118_v43, %v7795_v37  ;;  %v8020_v37 = vld [vmem:[%s19496_s6 + $0x208] sm:$0xff]  ;;  %v21050_v43 = vld [vmem:[#allocation133_spill] sm:$0xff] }
 0x7a2   :  { %v8123_v33 = vpop.permute.xlu0 %8122  ;;  %v7798_v36 = vmul.f32 %v16828_v13, %v21050_v43  ;;  %v8024_v43 = vld [vmem:[%s19496_s6 + $0x228] sm:$0xff] }
 0x7a3   :  { %9075 = vst.msk [vmem:[%s19497_s7] sm:$0xff] %vm67_vm0, %v8915_v59  ;;  %v8916_v24 = vadd.f32 %v8123_v33, %v7796_v39  ;;  %8432 = vperm.xlu0 %9844, %v8018_v45   ;;  %v8021_v59 = vld [vmem:[%s19496_s6 + $0x210] sm:$0xff]  ;;  %v8023_v45 = vld [vmem:[%s19496_s6 + $0x220] sm:$0xff] }
 0x7a4   :  { %8437 = vperm.xlu1 %9845, %v8019_v0   ;;  %v8128_v11 = vpop.permute.xlu1 %8127  ;;  %v21051_v0 = vld [vmem:[#allocation3_spill] sm:$0xff] }
 0x7a5   :  { %9076 = vst.msk [vmem:[%s19497_s7 + $0x8] sm:$0xff] %vm67_vm0, %v8916_v24  ;;  %v8917_v38 = vadd.f32 %v8128_v11, %v7797_v17  ;;  %v7799_v39 = vmul.f32 %v16830_v63, %v21051_v0  ;;  %v8022_v17 = vld [vmem:[%s19496_s6 + $0x218] sm:$0xff]  ;;  %v21053_v24 = vld [vmem:[#allocation138_spill] sm:$0xff]  ;;  %v21055_v0 = vld [vmem:[#allocation143_spill] sm:$0xff] }
 0x7a6   :  { %v8133_v33 = vpop.permute.xlu0 %8132  ;;  %v7801_v11 = vmul.f32 %v16840_v44, %v21053_v24 }
 0x7a7   :  { %9077 = vst.msk [vmem:[%s19497_s7 + $0x10] sm:$0xff] %vm67_vm0, %v8917_v38  ;;  %v8918_v20 = vadd.f32 %v8133_v33, %v7798_v36  ;;  %8442 = vperm.xlu0 %9844, %v8020_v37   ;;  %v21054_v36 = vld [vmem:[#allocation78_spill] sm:$0xff] }
 0x7a8   :  { %8447 = vperm.xlu1 %9845, %v8021_v59   ;;  %v8138_v13 = vpop.permute.xlu1 %8137  ;;  %v7802_v38 = vmul.f32 %v16848_v28, %v21054_v36  ;;  %v8025_v59 = vld [vmem:[%s19496_s6 + $0x230] sm:$0xff] }
 0x7a9   :  { %9078 = vst.msk [vmem:[%s19497_s7 + $0x18] sm:$0xff] %vm67_vm0, %v8918_v20  ;;  %v8919_v63 = vadd.f32 %v8138_v13, %v7799_v39  ;;  %v7803_v39 = vmul.f32 %v16850_v10, %v21055_v0  ;;  %v8026_v13 = vld [vmem:[%s19496_s6 + $0x238] sm:$0xff] }
 0x7aa   :  { %v8143_v58 = vpop.permute.xlu0 %8142  ;;  %v21060_v0 = vld [vmem:[#allocation157_spill] sm:$0xff] }
 0x7ab   :  { %9079 = vst.msk [vmem:[%s19497_s7 + $0x20] sm:$0xff] %vm67_vm0, %v8919_v63  ;;  %v8920_v46 = vadd.f32 %v8143_v58, %v7800_v35  ;;  %8452 = vperm.xlu0 %9844, %v8022_v17   ;;  %v21056_v17 = vld [vmem:[#allocation147_spill] sm:$0xff]  ;;  %v8027_v35 = vld [vmem:[%s19496_s6 + $0x240] sm:$0xff] }
 0x7ac   :  { %8457 = vperm.xlu1 %9845, %v8023_v45   ;;  %v8148_v37 = vpop.permute.xlu1 %8147  ;;  %v7804_v4 = vmul.f32 %v16858_v8, %v21056_v17  ;;  %v21057_v45 = vld [vmem:[#allocation74_spill] sm:$0xff] }
 0x7ad   :  { %9080 = vst.msk [vmem:[%s19497_s7 + $0x28] sm:$0xff] %vm67_vm0, %v8920_v46  ;;  %v8921_v44 = vadd.f32 %v8148_v37, %v7801_v11  ;;  %v7805_v58 = vmul.f32 %v16860_v57, %v21057_v45  ;;  %v8028_v11 = vld [vmem:[%s19496_s6 + $0x248] sm:$0xff]  ;;  %v21058_v46 = vld [vmem:[#allocation142_spill] sm:$0xff]  ;;  %v8033_v45 = vld [vmem:[%s19496_s6 + $0x270] sm:$0xff] }
 0x7ae   :  { %v8153_v33 = vpop.permute.xlu0 %8152  ;;  %v7806_v37 = vmul.f32 %v16868_v9, %v21058_v46  ;;  %v8034_v46 = vld [vmem:[%s19496_s6 + $0x278] sm:$0xff] }
 0x7af   :  { %9081 = vst.msk [vmem:[%s19497_s7 + $0x30] sm:$0xff] %vm67_vm0, %v8921_v44  ;;  %v8922_v28 = vadd.f32 %v8153_v33, %v7802_v38  ;;  %8462 = vperm.xlu0 %9844, %v8024_v43   ;;  %v8029_v43 = vld [vmem:[%s19496_s6 + $0x250] sm:$0xff]  ;;  %v21059_v38 = vld [vmem:[#allocation151_spill] sm:$0xff]  ;;  %v8030_v33 = vld [vmem:[%s19496_s6 + $0x258] sm:$0xff] }
 0x7b0   :  { %8467 = vperm.xlu1 %9845, %v8025_v59   ;;  %v8158_v20 = vpop.permute.xlu1 %8157  ;;  %v7807_v44 = vmul.f32 %v16870_v5, %v21059_v38  ;;  %v21065_v38 = vld [vmem:[#allocation64_spill] sm:$0xff] }
 0x7b1   :  { %9082 = vst.msk [vmem:[%s19497_s7 + $0x38] sm:$0xff] %vm67_vm0, %v8922_v28  ;;  %v8923_v10 = vadd.f32 %v8158_v20, %v7803_v39  ;;  %v7808_v39 = vmul.f32 %v16878_v30, %v21060_v0  ;;  %v8031_v28 = vld [vmem:[%s19496_s6 + $0x260] sm:$0xff] }
 0x7b2   :  { %v8163_v63 = vpop.permute.xlu0 %8162 }
 0x7b3   :  { %9083 = vst.msk [vmem:[%s19497_s7 + $0x40] sm:$0xff] %vm67_vm0, %v8923_v10  ;;  %v8924_v8 = vadd.f32 %v8163_v63, %v7804_v4  ;;  %8472 = vperm.xlu0 %9844, %v8026_v13   ;;  %v21061_v13 = vld [vmem:[#allocation77_spill] sm:$0xff]  ;;  %v8032_v10 = vld [vmem:[%s19496_s6 + $0x268] sm:$0xff] }
 0x7b4   :  { %8477 = vperm.xlu1 %9845, %v8027_v35   ;;  %v8168_v24 = vpop.permute.xlu1 %8167  ;;  %v7809_v17 = vmul.f32 %v16880_v48, %v21061_v13  ;;  %v21062_v35 = vld [vmem:[#allocation150_spill] sm:$0xff] }
 0x7b5   :  { %9084 = vst.msk [vmem:[%s19497_s7 + $0x48] sm:$0xff] %vm67_vm0, %v8924_v8  ;;  %v8925_v57 = vadd.f32 %v8168_v24, %v7805_v58  ;;  %v7810_v63 = vmul.f32 %v16888_v23, %v21062_v35  ;;  %v21063_v8 = vld [vmem:[#allocation163_spill] sm:$0xff] }
 0x7b6   :  { %v8173_v36 = vpop.permute.xlu0 %8172  ;;  %v7811_v24 = vmul.f32 %v16890_v21, %v21063_v8  ;;  %v21070_v8 = vld [vmem:[#allocation165_spill] sm:$0xff] }
 0x7b7   :  { %9085 = vst.msk [vmem:[%s19497_s7 + $0x50] sm:$0xff] %vm67_vm0, %v8925_v57  ;;  %v8926_v9 = vadd.f32 %v8173_v36, %v7806_v37  ;;  %8482 = vperm.xlu0 %9844, %v8028_v11   ;;  %v21064_v37 = vld [vmem:[#allocation166_spill] sm:$0xff] }
 0x7b8   :  { %8487 = vperm.xlu1 %9845, %v8029_v43   ;;  %v8178_v59 = vpop.permute.xlu1 %8177  ;;  %v7812_v57 = vmul.f32 %v16898_v54, %v21064_v37  ;;  %v8035_v43 = vld [vmem:[%s19496_s6 + $0x280] sm:$0xff] }
 0x7b9   :  { %9086 = vst.msk [vmem:[%s19497_s7 + $0x58] sm:$0xff] %vm67_vm0, %v8926_v9  ;;  %v8927_v5 = vadd.f32 %v8178_v59, %v7807_v44  ;;  %v7813_v44 = vmul.f32 %v16900_v29, %v21065_v38  ;;  %v8036_v59 = vld [vmem:[%s19496_s6 + $0x288] sm:$0xff]  ;;  %v8043_v38 = vld [vmem:[%s19496_s6 + $0x2c0] sm:$0xff] }
 0x7ba   :  { %v8183_v20 = vpop.permute.xlu0 %8182 }
 0x7bb   :  { %9087 = vst.msk [vmem:[%s19497_s7 + $0x60] sm:$0xff] %vm67_vm0, %v8927_v5  ;;  %v8928_v30 = vadd.f32 %v8183_v20, %v7808_v39  ;;  %8492 = vperm.xlu0 %9844, %v8030_v33   ;;  %v21066_v33 = vld [vmem:[#allocation162_spill] sm:$0xff]  ;;  %v8037_v39 = vld [vmem:[%s19496_s6 + $0x290] sm:$0xff] }
 0x7bc   :  { %8497 = vperm.xlu1 %9845, %v8031_v28   ;;  %v8188_v4 = vpop.permute.xlu1 %8187  ;;  %v7814_v0 = vmul.f32 %v16908_v12, %v21066_v33  ;;  %v21067_v28 = vld [vmem:[#allocation65_spill] sm:$0xff]  ;;  %v8044_v33 = vld [vmem:[%s19496_s6 + $0x2c8] sm:$0xff] }
 0x7bd   :  { %9088 = vst.msk [vmem:[%s19497_s7 + $0x68] sm:$0xff] %vm67_vm0, %v8928_v30  ;;  %v8929_v48 = vadd.f32 %v8188_v4, %v7809_v17  ;;  %v7815_v20 = vmul.f32 %v16910_v41, %v21067_v28  ;;  %v8038_v17 = vld [vmem:[%s19496_s6 + $0x298] sm:$0xff]  ;;  %v21068_v30 = vld [vmem:[#allocation160_spill] sm:$0xff]  ;;  %v21075_v28 = vld [vmem:[#allocation14_spill] sm:$0xff] }
 0x7be   :  { %v8193_v58 = vpop.permute.xlu0 %8192  ;;  %v7816_v4 = vmul.f32 %v16918_v61, %v21068_v30 }
 0x7bf   :  { %9089 = vst.msk [vmem:[%s19497_s7 + $0x70] sm:$0xff] %vm67_vm0, %v8929_v48  ;;  %v8930_v23 = vadd.f32 %v8193_v58, %v7810_v63  ;;  %8502 = vperm.xlu0 %9844, %v8032_v10   ;;  %v8039_v10 = vld [vmem:[%s19496_s6 + $0x2a0] sm:$0xff]  ;;  %v21069_v63 = vld [vmem:[#allocation59_spill] sm:$0xff] }
 0x7c0   :  { %8507 = vperm.xlu1 %9845, %v8033_v45   ;;  %v8198_v11 = vpop.permute.xlu1 %8197  ;;  %v7817_v48 = vmul.f32 %v16920_v16, %v21069_v63  ;;  %v8040_v58 = vld [vmem:[%s19496_s6 + $0x2a8] sm:$0xff] }
 0x7c1   :  { %9090 = vst.msk [vmem:[%s19497_s7 + $0x78] sm:$0xff] %vm67_vm0, %v8930_v23  ;;  %v8931_v21 = vadd.f32 %v8198_v11, %v7811_v24  ;;  %v7818_v24 = vmul.f32 %v16928_v27, %v21070_v8  ;;  %v8041_v23 = vld [vmem:[%s19496_s6 + $0x2b0] sm:$0xff] }
 0x7c2   :  { %v8203_v36 = vpop.permute.xlu0 %8202 }
 0x7c3   :  { %9091 = vst.msk [vmem:[%s19497_s7 + $0x80] sm:$0xff] %vm67_vm0, %v8931_v21  ;;  %v8932_v54 = vadd.f32 %v8203_v36, %v7812_v57  ;;  %8512 = vperm.xlu0 %9844, %v8034_v46   ;;  %v21071_v46 = vld [vmem:[#allocation12_spill] sm:$0xff]  ;;  %v8042_v21 = vld [vmem:[%s19496_s6 + $0x2b8] sm:$0xff] }
 0x7c4   :  { %8517 = vperm.xlu1 %9845, %v8035_v43   ;;  %v8208_v9 = vpop.permute.xlu1 %8207  ;;  %v7819_v37 = vmul.f32 %v16930_v47, %v21071_v46  ;;  %v21072_v43 = vld [vmem:[#allocation168_spill] sm:$0xff]  ;;  %v21080_v46 = vld [vmem:[#allocation93_spill] sm:$0xff] }
 0x7c5   :  { %9092 = vst.msk [vmem:[%s19497_s7 + $0x88] sm:$0xff] %vm67_vm0, %v8932_v54  ;;  %v8933_v29 = vadd.f32 %v8208_v9, %v7813_v44  ;;  %v7820_v36 = vmul.f32 %v16938_v55, %v21072_v43  ;;  %v21073_v54 = vld [vmem:[#allocation38_spill] sm:$0xff] }
 0x7c6   :  { %v8213_v5 = vpop.permute.xlu0 %8212  ;;  %v7821_v9 = vmul.f32 %v16940_v6, %v21073_v54  ;;  %v8053_v54 = vld [vmem:[%s19496_s6 + $0x310] sm:$0xff] }
 0x7c7   :  { %9093 = vst.msk [vmem:[%s19497_s7 + $0x90] sm:$0xff] %vm67_vm0, %v8933_v29  ;;  %v8934_v12 = vadd.f32 %v8213_v5, %v7814_v0  ;;  %8522 = vperm.xlu0 %9844, %v8036_v59   ;;  %v21074_v0 = vld [vmem:[#allocation170_spill] sm:$0xff] }
 0x7c8   :  { %8527 = vperm.xlu1 %9845, %v8037_v39   ;;  %v8218_v13 = vpop.permute.xlu1 %8217  ;;  %v7822_v29 = vmul.f32 %v16948_v53, %v21074_v0  ;;  %v8045_v39 = vld [vmem:[%s19496_s6 + $0x2d0] sm:$0xff]  ;;  %v8054_v0 = vld [vmem:[%s19496_s6 + $0x318] sm:$0xff] }
 0x7c9   :  { %9094 = vst.msk [vmem:[%s19497_s7 + $0x98] sm:$0xff] %vm67_vm0, %v8934_v12  ;;  %v8935_v41 = vadd.f32 %v8218_v13, %v7815_v20  ;;  %v7823_v20 = vmul.f32 %v16950_v42, %v21075_v28  ;;  %v8046_v13 = vld [vmem:[%s19496_s6 + $0x2d8] sm:$0xff]  ;;  %v21085_v28 = vld [vmem:[#allocation108_spill] sm:$0xff] }
 0x7ca   :  { %v8223_v35 = vpop.permute.xlu0 %8222 }
 0x7cb   :  { %9095 = vst.msk [vmem:[%s19497_s7 + $0xa0] sm:$0xff] %vm67_vm0, %v8935_v41  ;;  %v8936_v61 = vadd.f32 %v8223_v35, %v7816_v4  ;;  %8532 = vperm.xlu0 %9844, %v8038_v17   ;;  %v21076_v17 = vld [vmem:[#allocation171_spill] sm:$0xff]  ;;  %v8047_v4 = vld [vmem:[%s19496_s6 + $0x2e0] sm:$0xff] }
 0x7cc   :  { %8537 = vperm.xlu1 %9845, %v8039_v10   ;;  %v8228_v45 = vpop.permute.xlu1 %8227  ;;  %v7824_v30 = vmul.f32 %v16958_v34, %v21076_v17  ;;  %v21077_v10 = vld [vmem:[#allocation11_spill] sm:$0xff] }
 0x7cd   :  { %9096 = vst.msk [vmem:[%s19497_s7 + $0xa8] sm:$0xff] %vm67_vm0, %v8936_v61  ;;  %v8937_v16 = vadd.f32 %v8228_v45, %v7817_v48  ;;  %v7825_v35 = vmul.f32 %v16960_v56, %v21077_v10  ;;  %v8048_v48 = vld [vmem:[%s19496_s6 + $0x2e8] sm:$0xff]  ;;  %v21078_v61 = vld [vmem:[#allocation4_spill] sm:$0xff] }
 0x7ce   :  { %v8233_v11 = vpop.permute.xlu0 %8232  ;;  %v7826_v45 = vmul.f32 %v16968_v7, %v21078_v61 }
 0x7cf   :  { %9097 = vst.msk [vmem:[%s19497_s7 + $0xb0] sm:$0xff] %vm67_vm0, %v8937_v16  ;;  %v8938_v27 = vadd.f32 %v8233_v11, %v7818_v24  ;;  %8542 = vperm.xlu0 %9844, %v8040_v58   ;;  %v8049_v58 = vld [vmem:[%s19496_s6 + $0x2f0] sm:$0xff]  ;;  %v21079_v24 = vld [vmem:[#allocation91_spill] sm:$0xff]  ;;  %v8050_v11 = vld [vmem:[%s19496_s6 + $0x2f8] sm:$0xff] }
 0x7d0   :  { %8547 = vperm.xlu1 %9845, %v8041_v23   ;;  %v8238_v57 = vpop.permute.xlu1 %8237  ;;  %v7827_v16 = vmul.f32 %v16970_v51, %v21079_v24  ;;  %v21090_v24 = vld [vmem:[#allocation118_spill] sm:$0xff] }
 0x7d1   :  { %9098 = vst.msk [vmem:[%s19497_s7 + $0xb8] sm:$0xff] %vm67_vm0, %v8938_v27  ;;  %v8939_v47 = vadd.f32 %v8238_v57, %v7819_v37  ;;  %v7828_v37 = vmul.f32 %v16978_v14, %v21080_v46  ;;  %v8051_v27 = vld [vmem:[%s19496_s6 + $0x300] sm:$0xff] }
 0x7d2   :  { %v8243_v44 = vpop.permute.xlu0 %8242 }
 0x7d3   :  { %9099 = vst.msk [vmem:[%s19497_s7 + $0xc0] sm:$0xff] %vm67_vm0, %v8939_v47  ;;  %v8940_v55 = vadd.f32 %v8243_v44, %v7820_v36  ;;  %8552 = vperm.xlu0 %9844, %v8042_v21   ;;  %v21081_v21 = vld [vmem:[#allocation105_spill] sm:$0xff]  ;;  %v8052_v47 = vld [vmem:[%s19496_s6 + $0x308] sm:$0xff] }
 0x7d4   :  { %8557 = vperm.xlu1 %9845, %v8043_v38   ;;  %v8248_v59 = vpop.permute.xlu1 %8247  ;;  %v7829_v43 = vmul.f32 %v16980_v18, %v21081_v21  ;;  %v21082_v38 = vld [vmem:[#allocation96_spill] sm:$0xff]  ;;  %v8063_v21 = vld [vmem:[%s19496_s6 + $0x360] sm:$0xff] }
 0x7d5   :  { %9100 = vst.msk [vmem:[%s19497_s7 + $0xc8] sm:$0xff] %vm67_vm0, %v8940_v55  ;;  %v8941_v6 = vadd.f32 %v8248_v59, %v7821_v9  ;;  %v7830_v44 = vmul.f32 %v16988_v50, %v21082_v38  ;;  %v21083_v55 = vld [vmem:[#allocation189_spill] sm:$0xff]  ;;  %v8064_v38 = vld [vmem:[%s19496_s6 + $0x368] sm:$0xff] }
 0x7d6   :  { %v8253_v5 = vpop.permute.xlu0 %8252  ;;  %v7831_v59 = vmul.f32 %v16990_v1, %v21083_v55  ;;  %v21095_v55 = vld [vmem:[#allocation202_spill] sm:$0xff] }
 0x7d7   :  { %9101 = vst.msk [vmem:[%s19497_s7 + $0xd0] sm:$0xff] %vm67_vm0, %v8941_v6  ;;  %v8942_v53 = vadd.f32 %v8253_v5, %v7822_v29  ;;  %8562 = vperm.xlu0 %9844, %v8044_v33   ;;  %v21084_v29 = vld [vmem:[#allocation98_spill] sm:$0xff] }
 0x7d8   :  { %8567 = vperm.xlu1 %9845, %v8045_v39   ;;  %v8258_v12 = vpop.permute.xlu1 %8257  ;;  %v7832_v6 = vmul.f32 %v16998_v15, %v21084_v29  ;;  %v8055_v39 = vld [vmem:[%s19496_s6 + $0x320] sm:$0xff] }
 0x7d9   :  { %9102 = vst.msk [vmem:[%s19497_s7 + $0xd8] sm:$0xff] %vm67_vm0, %v8942_v53  ;;  %v8943_v42 = vadd.f32 %v8258_v12, %v7823_v20  ;;  %v7833_v20 = vmul.f32 %v17000_v32, %v21085_v28  ;;  %v8056_v12 = vld [vmem:[%s19496_s6 + $0x328] sm:$0xff] }
 0x7da   :  { %v8263_v41 = vpop.permute.xlu0 %8262 }
 0x7db   :  { %9103 = vst.msk [vmem:[%s19497_s7 + $0xe0] sm:$0xff] %vm67_vm0, %v8943_v42  ;;  %v8944_v34 = vadd.f32 %v8263_v41, %v7824_v30  ;;  %8572 = vperm.xlu0 %9844, %v8046_v13   ;;  %v21086_v13 = vld [vmem:[#allocation197_spill] sm:$0xff]  ;;  %v8057_v30 = vld [vmem:[%s19496_s6 + $0x330] sm:$0xff] }
 0x7dc   :  { %8577 = vperm.xlu1 %9845, %v8047_v4   ;;  %v8268_v63 = vpop.permute.xlu1 %8267  ;;  %v7834_v17 = vmul.f32 %v17008_v49, %v21086_v13  ;;  %v21087_v4 = vld [vmem:[#allocation110_spill] sm:$0xff]  ;;  %v8069_v13 = vld [vmem:[%s19496_s6 + $0x390] sm:$0xff] }
 0x7dd   :  { %9104 = vst.msk [vmem:[%s19497_s7 + $0xe8] sm:$0xff] %vm67_vm0, %v8944_v34  ;;  %v8945_v56 = vadd.f32 %v8268_v63, %v7825_v35  ;;  %v7835_v41 = vmul.f32 %v17010_v31, %v21087_v4  ;;  %v8058_v35 = vld [vmem:[%s19496_s6 + $0x338] sm:$0xff]  ;;  %v21088_v34 = vld [vmem:[#allocation200_spill] sm:$0xff] }
 0x7de   :  { %v8273_v8 = vpop.permute.xlu0 %8272  ;;  %v7836_v63 = vmul.f32 %v17018_v26, %v21088_v34 }
 0x7df   :  { %9105 = vst.msk [vmem:[%s19497_s7 + $0xf0] sm:$0xff] %vm67_vm0, %v8945_v56  ;;  %v8946_v7 = vadd.f32 %v8273_v8, %v7826_v45  ;;  %8582 = vperm.xlu0 %9844, %v8048_v48   ;;  %v8059_v48 = vld [vmem:[%s19496_s6 + $0x340] sm:$0xff]  ;;  %v21089_v45 = vld [vmem:[#allocation113_spill] sm:$0xff]  ;;  %v8060_v8 = vld [vmem:[%s19496_s6 + $0x348] sm:$0xff] }
 0x7e0   :  { %8587 = vperm.xlu1 %9845, %v8049_v58   ;;  %v8278_v23 = vpop.permute.xlu1 %8277  ;;  %v7837_v56 = vmul.f32 %v17020_v2, %v21089_v45  ;;  %v21105_v45 = vld [vmem:[#allocation277_spill] sm:$0xff] }
 0x7e1   :  { %9106 = vst.msk [vmem:[%s19497_s7 + $0xf8] sm:$0xff] %vm67_vm0, %v8946_v7  ;;  %v8947_v51 = vadd.f32 %v8278_v23, %v7827_v16  ;;  %v7838_v16 = vmul.f32 %v17028_v25, %v21090_v24  ;;  %v8061_v7 = vld [vmem:[%s19496_s6 + $0x350] sm:$0xff]  ;;  %v21106_v24 = vld [vmem:[#allocation6_spill] sm:$0xff] }
 0x7e2   :  { %v8283_v57 = vpop.permute.xlu0 %8282 }
 0x7e3   :  { %9107 = vst.msk [vmem:[%s19497_s7 + $0x100] sm:$0xff] %vm67_vm0, %v8947_v51  ;;  %v8948_v14 = vadd.f32 %v8283_v57, %v7828_v37  ;;  %8592 = vperm.xlu0 %9844, %v8050_v11   ;;  %v21091_v11 = vld [vmem:[#allocation123_spill] sm:$0xff]  ;;  %v8062_v51 = vld [vmem:[%s19496_s6 + $0x358] sm:$0xff] }
 0x7e4   :  { %8597 = vperm.xlu1 %9845, %v8051_v27   ;;  %v8288_v36 = vpop.permute.xlu1 %8287  ;;  %v7839_v46 = vmul.f32 %v17030_v22, %v21091_v11  ;;  %v21092_v27 = vld [vmem:[#allocation126_spill] sm:$0xff] }
 0x7e5   :  { %9108 = vst.msk [vmem:[%s19497_s7 + $0x108] sm:$0xff] %vm67_vm0, %v8948_v14  ;;  %v8949_v18 = vadd.f32 %v8288_v36, %v7829_v43  ;;  %v7840_v57 = vmul.f32 %v17038_v40, %v21092_v27  ;;  %v21093_v14 = vld [vmem:[#allocation132_spill] sm:$0xff] }
 0x7e6   :  { %v8293_v9 = vpop.permute.xlu0 %8292  ;;  %v7841_v36 = vmul.f32 %v17040_v62, %v21093_v14 }
 0x7e7   :  { %9109 = vst.msk [vmem:[%s19497_s7 + $0x110] sm:$0xff] %vm67_vm0, %v8949_v18  ;;  %v8950_v50 = vadd.f32 %v8293_v9, %v7830_v44  ;;  %8602 = vperm.xlu0 %9844, %v8052_v47   ;;  %v21094_v44 = vld [vmem:[#allocation89_spill] sm:$0xff] }
 0x7e8   :  { %8607 = vperm.xlu1 %9845, %v8053_v54   ;;  %v8298_v33 = vpop.permute.xlu1 %8297  ;;  %v7842_v18 = vmul.f32 %v17048_v3, %v21094_v44  ;;  %v8065_v54 = vld [vmem:[%s19496_s6 + $0x370] sm:$0xff] }
 0x7e9   :  { %9110 = vst.msk [vmem:[%s19497_s7 + $0x118] sm:$0xff] %vm67_vm0, %v8950_v50  ;;  %v8951_v1 = vadd.f32 %v8298_v33, %v7831_v59  ;;  %v7843_v59 = vmul.f32 %v17050_v60, %v21095_v55  ;;  %v8066_v33 = vld [vmem:[%s19496_s6 + $0x378] sm:$0xff]  ;;  %v21115_v55 = vld [vmem:[#allocation282_spill] sm:$0xff] }
 0x7ea   :  { %v8303_v5 = vpop.permute.xlu0 %8302 }
 0x7eb   :  { %9111 = vst.msk [vmem:[%s19497_s7 + $0x120] sm:$0xff] %vm67_vm0, %v8951_v1  ;;  %v8952_v15 = vadd.f32 %v8303_v5, %v7832_v6  ;;  %8612 = vperm.xlu0 %9844, %v8054_v0   ;;  %v21096_v0 = vld [vmem:[#allocation181_spill] sm:$0xff]  ;;  %v8067_v6 = vld [vmem:[%s19496_s6 + $0x380] sm:$0xff] }
 0x7ec   :  { %8617 = vperm.xlu1 %9845, %v8055_v39   ;;  %v8308_v53 = vpop.permute.xlu1 %8307  ;;  %v7844_v29 = vmul.f32 %v17058_v52, %v21096_v0  ;;  %v21097_v39 = vld [vmem:[#allocation134_spill] sm:$0xff]  ;;  %v21116_v0 = vld [vmem:[#allocation88_spill] sm:$0xff] }
 0x7ed   :  { %9112 = vst.msk [vmem:[%s19497_s7 + $0x128] sm:$0xff] %vm67_vm0, %v8952_v15  ;;  %v8953_v32 = vadd.f32 %v8308_v53, %v7833_v20  ;;  %v7845_v5 = vmul.f32 %v17060_v19, %v21097_v39  ;;  %v8068_v20 = vld [vmem:[%s19496_s6 + $0x388] sm:$0xff]  ;;  %v21098_v15 = vld [vmem:[#allocation180_spill] sm:$0xff]  ;;  %v21099_v53 = vld [vmem:[#allocation274_spill] sm:$0xff] }
 0x7ee   :  { %v8313_v42 = vpop.permute.xlu0 %8312  ;;  %v8078_v39 = vld [vmem:[%s19496_s6 + $0x3d8] sm:$0xff] }
 0x7ef   :  { %9113 = vst.msk [vmem:[%s19497_s7 + $0x130] sm:$0xff] %vm67_vm0, %v8953_v32  ;;  %v8954_v49 = vadd.f32 %v8313_v42, %v7834_v17  ;;  %8622 = vperm.xlu0 %9844, %v8056_v12   ;;  %v7846_v12 = vmul.f32 %v21099_v53, %v21098_v15  ;;  %v21100_v32 = vld [vmem:[#allocation176_spill] sm:$0xff]  ;;  %v8079_v15 = vld [vmem:[%s19496_s6 + $0x3e0] sm:$0xff] }
 0x7f0   :  { %8627 = vperm.xlu1 %9845, %v8057_v30   ;;  %v8318_v10 = vpop.permute.xlu1 %8317  ;;  %v21101_v30 = vld [vmem:[#allocation275_spill] sm:$0xff] }
 0x7f1   :  { %9114 = vst.msk [vmem:[%s19497_s7 + $0x138] sm:$0xff] %vm67_vm0, %v8954_v49  ;;  %v8955_v31 = vadd.f32 %v8318_v10, %v7835_v41  ;;  %v7847_v42 = vmul.f32 %v21101_v30, %v21100_v32  ;;  %v8070_v49 = vld [vmem:[%s19496_s6 + $0x398] sm:$0xff]  ;;  %v21102_v10 = vld [vmem:[#allocation199_spill] sm:$0xff] }
 0x7f2   :  { %v8323_v61 = vpop.permute.xlu0 %8322  ;;  %v8080_v30 = vld [vmem:[%s19496_s6 + $0x3e8] sm:$0xff] }
 0x7f3   :  { %9115 = vst.msk [vmem:[%s19497_s7 + $0x140] sm:$0xff] %vm67_vm0, %v8955_v31  ;;  %v8956_v26 = vadd.f32 %v8323_v61, %v7836_v63  ;;  %8632 = vperm.xlu0 %9844, %v8058_v35   ;;  %v21103_v35 = vld [vmem:[#allocation276_spill] sm:$0xff]  ;;  %v8071_v31 = vld [vmem:[%s19496_s6 + $0x3a0] sm:$0xff]  ;;  %v21104_v61 = vld [vmem:[#allocation61_spill] sm:$0xff] }
 0x7f4   :  { %8637 = vperm.xlu1 %9845, %v8059_v48   ;;  %v8328_v58 = vpop.permute.xlu1 %8327  ;;  %v7848_v34 = vmul.f32 %v21103_v35, %v21102_v10  ;;  %v8081_v10 = vld [vmem:[%s19496_s6 + $0x3f0] sm:$0xff] }
 0x7f5   :  { %9116 = vst.msk [vmem:[%s19497_s7 + $0x148] sm:$0xff] %vm67_vm0, %v8956_v26  ;;  %v8957_v2 = vadd.f32 %v8328_v58, %v7837_v56  ;;  %v7849_v56 = vmul.f32 %v21105_v45, %v21104_v61  ;;  %v8082_v45 = vld [vmem:[%s19496_s6 + $0x3f8] sm:$0xff] }
 0x7f6   :  { %v8333_v23 = vpop.permute.xlu0 %8332 }
 0x7f7   :  { %9117 = vst.msk [vmem:[%s19497_s7 + $0x150] sm:$0xff] %vm67_vm0, %v8957_v2  ;;  %v8958_v25 = vadd.f32 %v8333_v23, %v7838_v16  ;;  %8642 = vperm.xlu0 %9844, %v8060_v8   ;;  %v8072_v8 = vld [vmem:[%s19496_s6 + $0x3a8] sm:$0xff]  ;;  %v21107_v16 = vld [vmem:[#allocation278_spill] sm:$0xff]  ;;  %v8073_v23 = vld [vmem:[%s19496_s6 + $0x3b0] sm:$0xff] }
 0x7f8   :  { %8647 = vperm.xlu1 %9845, %v8061_v7   ;;  %v8338_v37 = vpop.permute.xlu1 %8337  ;;  %v7850_v2 = vmul.f32 %v21107_v16, %v21106_v24  ;;  %v8083_v24 = vld [vmem:[%s19496_s6 + $0x400] sm:$0xff] }
 0x7f9   :  { %9118 = vst.msk [vmem:[%s19497_s7 + $0x158] sm:$0xff] %vm67_vm0, %v8958_v25  ;;  %v8959_v22 = vadd.f32 %v8338_v37, %v7839_v46  ;;  %v21108_v46 = vld [vmem:[#allocation178_spill] sm:$0xff]  ;;  %v21109_v25 = vld [vmem:[#allocation279_spill] sm:$0xff] }
 0x7fa   :  { %v8343_v43 = vpop.permute.xlu0 %8342  ;;  %v7851_v37 = vmul.f32 %v21109_v25, %v21108_v46  ;;  %v8084_v25 = vld [vmem:[%s19496_s6 + $0x408] sm:$0xff] }
 0x7fb   :  { %9119 = vst.msk [vmem:[%s19497_s7 + $0x160] sm:$0xff] %vm67_vm0, %v8959_v22  ;;  %v8960_v40 = vadd.f32 %v8343_v43, %v7840_v57  ;;  %8652 = vperm.xlu0 %9844, %v8062_v51   ;;  %v8074_v57 = vld [vmem:[%s19496_s6 + $0x3b8] sm:$0xff]  ;;  %v21110_v22 = vld [vmem:[#allocation203_spill] sm:$0xff] }
 0x7fc   :  { %8657 = vperm.xlu1 %9845, %v8063_v21   ;;  %v8348_v47 = vpop.permute.xlu1 %8347  ;;  %v21111_v21 = vld [vmem:[#allocation280_spill] sm:$0xff] }
 0x7fd   :  { %9120 = vst.msk [vmem:[%s19497_s7 + $0x168] sm:$0xff] %vm67_vm0, %v8960_v40  ;;  %v8961_v62 = vadd.f32 %v8348_v47, %v7841_v36  ;;  %v7852_v43 = vmul.f32 %v21111_v21, %v21110_v22  ;;  %v8075_v36 = vld [vmem:[%s19496_s6 + $0x3c0] sm:$0xff]  ;;  %v21112_v47 = vld [vmem:[#allocation191_spill] sm:$0xff]  ;;  %v8085_v22 = vld [vmem:[%s19496_s6 + $0x410] sm:$0xff] }
 0x7fe   :  { %v8353_v9 = vpop.permute.xlu0 %8352 }
 0x7ff   :  { %9121 = vst.msk [vmem:[%s19497_s7 + $0x170] sm:$0xff] %vm67_vm0, %v8961_v62  ;;  %v8962_v3 = vadd.f32 %v8353_v9, %v7842_v18  ;;  %8662 = vperm.xlu0 %9844, %v8064_v38   ;;  %v21113_v38 = vld [vmem:[#allocation281_spill] sm:$0xff]  ;;  %v21114_v9 = vld [vmem:[#allocation83_spill] sm:$0xff] }
 0x800   :  { %8667 = vperm.xlu1 %9845, %v8065_v54   ;;  %v8358_v50 = vpop.permute.xlu1 %8357  ;;  %v7853_v44 = vmul.f32 %v21113_v38, %v21112_v47  ;;  %v8076_v54 = vld [vmem:[%s19496_s6 + $0x3c8] sm:$0xff]  ;;  %v8086_v38 = vld [vmem:[%s19496_s6 + $0x418] sm:$0xff] }
 0x801   :  { %9122 = vst.msk [vmem:[%s19497_s7 + $0x178] sm:$0xff] %vm67_vm0, %v8962_v3  ;;  %v8963_v60 = vadd.f32 %v8358_v50, %v7843_v59  ;;  %v7854_v59 = vmul.f32 %v21115_v55, %v21114_v9  ;;  %v8077_v50 = vld [vmem:[%s19496_s6 + $0x3d0] sm:$0xff]  ;;  %v8087_v9 = vld [vmem:[%s19496_s6 + $0x420] sm:$0xff] }
 0x802   :  { %v8363_v1 = vpop.permute.xlu0 %8362 }
 0x803   :  { %9123 = vst.msk [vmem:[%s19497_s7 + $0x180] sm:$0xff] %vm67_vm0, %v8963_v60  ;;  %v8964_v52 = vadd.f32 %v8363_v1, %v7844_v29  ;;  %8672 = vperm.xlu0 %9844, %v8066_v33   ;;  %v21117_v29 = vld [vmem:[#allocation283_spill] sm:$0xff] }
 0x804   :  { %8677 = vperm.xlu1 %9845, %v8067_v6   ;;  %v8368_v28 = vpop.permute.xlu1 %8367  ;;  %v7855_v60 = vmul.f32 %v21117_v29, %v21116_v0  ;;  %v8088_v29 = vld [vmem:[%s19496_s6 + $0x428] sm:$0xff] }
 0x805   :  { %9124 = vst.msk [vmem:[%s19497_s7 + $0x188] sm:$0xff] %vm67_vm0, %v8964_v52  ;;  %v8965_v19 = vadd.f32 %v8368_v28, %v7845_v5  ;;  %v21118_v5 = vld [vmem:[#allocation95_spill] sm:$0xff]  ;;  %v21119_v52 = vld [vmem:[#allocation284_spill] sm:$0xff] }
 0x806   :  { %v8373_v17 = vpop.permute.xlu0 %8372  ;;  %v7856_v28 = vmul.f32 %v21119_v52, %v21118_v5  ;;  %v8089_v5 = vld [vmem:[%s19496_s6 + $0x430] sm:$0xff] }
 0x807   :  { %9125 = vst.msk [vmem:[%s19497_s7 + $0x190] sm:$0xff] %vm67_vm0, %v8965_v19  ;;  %v8966_v4 = vadd.f32 %v8373_v17, %v7846_v12  ;;  %8682 = vperm.xlu0 %9844, %v8068_v20   ;;  %v21120_v12 = vld [vmem:[#allocation102_spill] sm:$0xff]  ;;  %v21121_v19 = vld [vmem:[#allocation285_spill] sm:$0xff] }
 0x808   :  { %8687 = vperm.xlu1 %9845, %v8069_v13   ;;  %v8378_v41 = vpop.permute.xlu1 %8377  ;;  %v7857_v13 = vmul.f32 %v21121_v19, %v21120_v12  ;;  %v8090_v19 = vld [vmem:[%s19496_s6 + $0x438] sm:$0xff] }
 0x809   :  { %9126 = vst.msk [vmem:[%s19497_s7 + $0x198] sm:$0xff] %vm67_vm0, %v8966_v4  ;;  %v8967_v63 = vadd.f32 %v8378_v41, %v7847_v42  ;;  %v21122_v42 = vld [vmem:[#allocation155_spill] sm:$0xff]  ;;  %v21123_v4 = vld [vmem:[#allocation286_spill] sm:$0xff] }
 0x80a   :  { %v8383_v48 = vpop.permute.xlu0 %8382  ;;  %v7858_v41 = vmul.f32 %v21123_v4, %v21122_v42  ;;  %v8091_v42 = vld [vmem:[%s19496_s6 + $0x440] sm:$0xff] }
 0x80b   :  { %9127 = vst.msk [vmem:[%s19497_s7 + $0x1a0] sm:$0xff] %vm67_vm0, %v8967_v63  ;;  %v8968_v26 = vadd.f32 %v8383_v48, %v7848_v34  ;;  %8692 = vperm.xlu0 %9844, %v8070_v49   ;;  %v21124_v34 = vld [vmem:[#allocation207_spill] sm:$0xff] }
 0x80c   :  { %8697 = vperm.xlu1 %9845, %v8071_v31   ;;  %v8388_v58 = vpop.permute.xlu1 %8387  ;;  %v21125_v63 = vld [vmem:[#allocation287_spill] sm:$0xff] }
 0x80d   :  { %9128 = vst.msk [vmem:[%s19497_s7 + $0x1a8] sm:$0xff] %vm67_vm0, %v8968_v26  ;;  %v8969_v7 = vadd.f32 %v8388_v58, %v7849_v56  ;;  %v7859_v31 = vmul.f32 %v21125_v63, %v21124_v34  ;;  %v21126_v56 = vld [vmem:[#allocation86_spill] sm:$0xff]  ;;  %v21127_v26 = vld [vmem:[#allocation288_spill] sm:$0xff] }
 0x80e   :  { %v8393_v11 = vpop.permute.xlu0 %8392  ;;  %v7860_v58 = vmul.f32 %v21127_v26, %v21126_v56  ;;  %v21148_v56 = vld [vmem:[#allocation21_spill] sm:$0xff] }
 0x80f   :  { %9129 = vst.msk [vmem:[%s19497_s7 + $0x1b0] sm:$0xff] %vm67_vm0, %v8969_v7  ;;  %v8970_v51 = vadd.f32 %v8393_v11, %v7850_v2  ;;  %8702 = vperm.xlu0 %9844, %v8072_v8   ;;  %v21128_v2 = vld [vmem:[#allocation109_spill] sm:$0xff]  ;;  %v5819_v26 = vmul.f32 0.020408163, %v21148_v56 }
 0x810   :  { %8707 = vperm.xlu1 %9845, %v8073_v23   ;;  %v8398_v27 = vpop.permute.xlu1 %8397  ;;  %v21129_v7 = vld [vmem:[#allocation289_spill] sm:$0xff] }
 0x811   :  { %9130 = vst.msk [vmem:[%s19497_s7 + $0x1b8] sm:$0xff] %vm67_vm0, %v8970_v51  ;;  %v8971_v14 = vadd.f32 %v8398_v27, %v7851_v37  ;;  %v7861_v23 = vmul.f32 %v21129_v7, %v21128_v2  ;;  %v21130_v37 = vld [vmem:[#allocation193_spill] sm:$0xff]  ;;  %v21131_v51 = vld [vmem:[#allocation290_spill] sm:$0xff]  ;;  %v8093_v2 = vld [vmem:[%s19496_s6 + $0x450] sm:$0xff] }
 0x812   :  { %v8403_v40 = vpop.permute.xlu0 %8402  ;;  %v7862_v27 = vmul.f32 %v21131_v51, %v21130_v37  ;;  %v21153_v37 = vld [vmem:[#allocation299_spill] sm:$0xff] }
 0x813   :  { %9131 = vst.msk [vmem:[%s19497_s7 + $0x1c0] sm:$0xff] %vm67_vm0, %v8971_v14  ;;  %v8972_v18 = vadd.f32 %v8403_v40, %v7852_v43  ;;  %8712 = vperm.xlu0 %9844, %v8074_v57   ;;  %v21132_v43 = vld [vmem:[#allocation10_spill] sm:$0xff]  ;;  %v21133_v14 = vld [vmem:[#allocation291_spill] sm:$0xff] }
 0x814   :  { %8717 = vperm.xlu1 %9845, %v8075_v36   ;;  %v8408_v62 = vpop.permute.xlu1 %8407  ;;  %v7863_v36 = vmul.f32 %v21133_v14, %v21132_v43 }
 0x815   :  { %9132 = vst.msk [vmem:[%s19497_s7 + $0x1c8] sm:$0xff] %vm67_vm0, %v8972_v18  ;;  %v8973_v3 = vadd.f32 %v8408_v62, %v7853_v44  ;;  %v21134_v44 = vld [vmem:[#allocation145_spill] sm:$0xff]  ;;  %v21135_v18 = vld [vmem:[#allocation292_spill] sm:$0xff] }
 0x816   :  { %v8413_v33 = vpop.permute.xlu0 %8412  ;;  %v7864_v62 = vmul.f32 %v21135_v18, %v21134_v44  ;;  %v21159_v44 = vld [vmem:[#allocation300_spill] sm:$0xff] }
 0x817   :  { %9133 = vst.msk [vmem:[%s19497_s7 + $0x1d0] sm:$0xff] %vm67_vm0, %v8973_v3  ;;  %v8974_v6 = vadd.f32 %v8413_v33, %v7854_v59  ;;  %8722 = vperm.xlu0 %9844, %v8076_v54   ;;  %v21136_v59 = vld [vmem:[#allocation80_spill] sm:$0xff]  ;;  %v21137_v3 = vld [vmem:[#allocation293_spill] sm:$0xff] }
 0x818   :  { %8727 = vperm.xlu1 %9845, %v8077_v50   ;;  %v8418_v1 = vpop.permute.xlu1 %8417  ;;  %v7865_v50 = vmul.f32 %v21137_v3, %v21136_v59  ;;  %v21161_v3 = vld [vmem:[#allocation41_spill] sm:$0xff] }
 0x819   :  { %9134 = vst.msk [vmem:[%s19497_s7 + $0x1d8] sm:$0xff] %vm67_vm0, %v8974_v6  ;;  %v8975_v20 = vadd.f32 %v8418_v1, %v7855_v60  ;;  %v21138_v60 = vld [vmem:[#allocation204_spill] sm:$0xff]  ;;  %v21139_v6 = vld [vmem:[#allocation294_spill] sm:$0xff] }
 0x81a   :  { %v8423_v53 = vpop.permute.xlu0 %8422  ;;  %v7866_v1 = vmul.f32 %v21139_v6, %v21138_v60 }
 0x81b   :  { %9135 = vst.msk [vmem:[%s19497_s7 + $0x1e0] sm:$0xff] %vm67_vm0, %v8975_v20  ;;  %v8976_v17 = vadd.f32 %v8423_v53, %v7856_v28  ;;  %8732 = vperm.xlu0 %9844, %v8078_v39   ;;  %v21140_v28 = vld [vmem:[#allocation75_spill] sm:$0xff] }
 0x81c   :  { %8737 = vperm.xlu1 %9845, %v8079_v15   ;;  %v8428_v32 = vpop.permute.xlu1 %8427  ;;  %v21141_v20 = vld [vmem:[#allocation295_spill] sm:$0xff] }
 0x81d   :  { %9136 = vst.msk [vmem:[%s19497_s7 + $0x1e8] sm:$0xff] %vm67_vm0, %v8976_v17  ;;  %v8977_v49 = vadd.f32 %v8428_v32, %v7857_v13  ;;  %v7867_v15 = vmul.f32 %v21141_v20, %v21140_v28  ;;  %v21142_v13 = vld [vmem:[#allocation144_spill] sm:$0xff]  ;;  %v21166_v28 = vld [vmem:[#allocation103_spill] sm:$0xff] }
 0x81e   :  { %v8433_v35 = vpop.permute.xlu0 %8432  ;;  %v21143_v17 = vld [vmem:[#allocation296_spill] sm:$0xff]  ;;  %v18345_v20 = vmul.f32 0.020408163, %v21166_v28 }
 0x81f   :  { %9137 = vst.msk [vmem:[%s19497_s7 + $0x1f0] sm:$0xff] %vm67_vm0, %v8977_v49  ;;  %v8978_v48 = vadd.f32 %v8433_v35, %v7858_v41  ;;  %8742 = vperm.xlu0 %9844, %v8080_v30   ;;  %v7868_v32 = vmul.f32 %v21143_v17, %v21142_v13  ;;  %v21144_v41 = vld [vmem:[#allocation20_spill] sm:$0xff]  ;;  %v21146_v35 = vld [vmem:[#allocation297_spill] sm:$0xff] }
 0x820   :  { %8747 = vperm.xlu1 %9845, %v8081_v10   ;;  %v8438_v61 = vpop.permute.xlu1 %8437  ;;  %v18269_v49 = vmul.f32 0.020408163, %v21144_v41  ;;  %v21145_v10 = vld [vmem:[#allocation76_spill] sm:$0xff]  ;;  %21167 = vst [vmem:[#allocation133_spill] sm:$0xff] %v18345_v20  ;;  %v21287_v41 = vld [vmem:[#allocation317_spill] sm:$0xff] }
 0x821   :  { %9138 = vst.msk [vmem:[%s19497_s7 + $0x1f8] sm:$0xff] %vm67_vm0, %v8978_v48  ;;  %v8979_v8 = vadd.f32 %v8438_v61, %v7859_v31  ;;  %v7869_v34 = vmul.f32 %v21146_v35, %v21145_v10  ;;  %v8092_v48 = vld [vmem:[%s19496_s6 + $0x448] sm:$0xff]  ;;  %v21147_v61 = vld [vmem:[#allocation116_spill] sm:$0xff] }
 0x822   :  { %v8443_v16 = vpop.permute.xlu0 %8442  ;;  %v21170_v17 = vld [vmem:[#allocation156_spill] sm:$0xff] }
 0x823   :  { %9139 = vst.msk [vmem:[%s19497_s7 + $0x200] sm:$0xff] %vm67_vm0, %v8979_v8  ;;  %v8980_v11 = vadd.f32 %v8443_v16, %v7860_v58  ;;  %8752 = vperm.xlu0 %9844, %v8082_v45   ;;  %v18281_v45 = vmul.f32 0.020408163, %v21147_v61  ;;  %v21149_v58 = vld [vmem:[#allocation149_spill] sm:$0xff]  ;;  %v21150_v8 = vld [vmem:[#allocation298_spill] sm:$0xff] }
 0x824   :  { %8757 = vperm.xlu1 %9845, %v8083_v24   ;;  %v8448_v46 = vpop.permute.xlu1 %8447  ;;  %v7870_v24 = vmul.f32 %v21150_v8, %v21149_v58  ;;  %v21176_v58 = vld [vmem:[#allocation152_spill] sm:$0xff]  ;;  %v21177_v8 = vld [vmem:[#allocation303_spill] sm:$0xff] }
 0x825   :  { %9140 = vst.msk [vmem:[%s19497_s7 + $0x208] sm:$0xff] %vm67_vm0, %v8980_v11  ;;  %v8981_v57 = vadd.f32 %v8448_v46, %v7861_v23  ;;  %v5979_v23 = vmul.f32 %v18269_v49, %v18269_v49  ;;  %v21151_v11 = vld [vmem:[#allocation30_spill] sm:$0xff] }
 0x826   :  { %v8453_v21 = vpop.permute.xlu0 %8452  ;;  %v5820_v46 = vmul.f32 0.020408163, %v21151_v11 }
 0x827   :  { %9141 = vst.msk [vmem:[%s19497_s7 + $0x210] sm:$0xff] %vm67_vm0, %v8981_v57  ;;  %v8982_v40 = vadd.f32 %v8453_v21, %v7862_v27  ;;  %8762 = vperm.xlu0 %9844, %v8084_v25   ;;  %v21152_v25 = vld [vmem:[#allocation13_spill] sm:$0xff]  ;;  %v21154_v57 = vld [vmem:[#allocation92_spill] sm:$0xff] }
 0x828   :  { %8767 = vperm.xlu1 %9845, %v8085_v22   ;;  %v8458_v47 = vpop.permute.xlu1 %8457  ;;  %v7871_v51 = vmul.f32 %v21153_v37, %v21152_v25  ;;  %v18303_v22 = vmul.f32 0.020408163, %v21154_v57  ;;  %v21156_v21 = vld [vmem:[#allocation81_spill] sm:$0xff] }
 0x829   :  { %9142 = vst.msk [vmem:[%s19497_s7 + $0x218] sm:$0xff] %vm67_vm0, %v8982_v40  ;;  %v8983_v54 = vadd.f32 %v8458_v47, %v7863_v36  ;;  %v18306_v43 = vmul.f32 0.020408163, %v21156_v21  ;;  %v8094_v36 = vld [vmem:[%s19496_s6 + $0x458] sm:$0xff]  ;;  %v5980_v40 = vmul.f32 %v18281_v45, %v18281_v45  ;;  %v6139_v47 = vsub.f32 %v5819_v26, %v5979_v23 }
 0x82a   :  { %v8463_v55 = vpop.permute.xlu0 %8462  ;;  %21155 = vst [vmem:[#allocation131_spill] sm:$0xff] %v18303_v22  ;;  %v18387_v23 = vmul.f32 %v18345_v20, %v18345_v20  ;;  %v21180_v25 = vld [vmem:[#allocation53_spill] sm:$0xff] }
 0x82b   :  { %9143 = vst.msk [vmem:[%s19497_s7 + $0x220] sm:$0xff] %vm67_vm0, %v8983_v54  ;;  %v8984_v33 = vadd.f32 %v8463_v55, %v7864_v62  ;;  %8772 = vperm.xlu0 %9844, %v8086_v38   ;;  %21157 = vst [vmem:[#allocation135_spill] sm:$0xff] %v18306_v43  ;;  %v21158_v38 = vld [vmem:[#allocation79_spill] sm:$0xff]  ;;  %v8095_v54 = vld [vmem:[%s19496_s6 + $0x460] sm:$0xff]  ;;  %v6459_v13 = vadd.f32 1e-05, %v6139_v47 }
 0x82c   :  { %8777 = vperm.xlu1 %9845, %v8087_v9   ;;  %v8468_v0 = vpop.permute.xlu1 %8467  ;;  %v7872_v18 = vmul.f32 %v21159_v44, %v21158_v38  ;;  %v21160_v9 = vld [vmem:[#allocation32_spill] sm:$0xff]  ;;  %v18392_v37 = vmul.f32 0.020408163, %v21180_v25  ;;  %v21182_v21 = vld [vmem:[#allocation57_spill] sm:$0xff]  ;;  %v8099_v47 = vld [vmem:[%s19496_s6 + $0x480] sm:$0xff] }
 0x82d   :  { %9144 = vst.msk [vmem:[%s19497_s7 + $0x228] sm:$0xff] %vm67_vm0, %v8984_v33  ;;  %v8985_v39 = vadd.f32 %v8468_v0, %v7865_v50  ;;  %v18323_v55 = vmul.f32 0.020408163, %v21160_v9  ;;  %v18326_v50 = vmul.f32 0.020408163, %v21161_v3  ;;  %v6140_v33 = vsub.f32 %v5820_v46, %v5980_v40  ;;  %v21163_v0 = vld [vmem:[#allocation67_spill] sm:$0xff] }
 0x82e   :  { %v8473_v52 = vpop.permute.xlu0 %8472  ;;  %21181 = vst [vmem:[#allocation138_spill] sm:$0xff] %v18392_v37  ;;  %10454 = vrsqrt.f32 %v6459_v13  ;;  %v21187_v9 = vld [vmem:[#allocation117_spill] sm:$0xff]  ;;  %v21193_v13 = vld [vmem:[#allocation52_spill] sm:$0xff] }
 0x82f   :  { %9145 = vst.msk [vmem:[%s19497_s7 + $0x230] sm:$0xff] %vm67_vm0, %v8985_v39  ;;  %v8986_v53 = vadd.f32 %v8473_v52, %v7866_v1  ;;  %8782 = vperm.xlu0 %9844, %v8088_v29   ;;  %21162 = vst [vmem:[#allocation128_spill] sm:$0xff] %v18326_v50  ;;  %v21164_v29 = vld [vmem:[#allocation301_spill] sm:$0xff]  ;;  %v18336_v1 = vmul.f32 %v18303_v22, %v18303_v22  ;;  %v18342_v52 = vmul.f32 %v18306_v43, %v18306_v43  ;;  %v21322_v39 = vld [vmem:[#allocation46_spill] sm:$0xff] }
 0x830   :  { %8787 = vperm.xlu1 %9845, %v8089_v5   ;;  %v8478_v12 = vpop.permute.xlu1 %8477  ;;  %v7873_v60 = vmul.f32 %v21164_v29, %v21163_v0  ;;  %v18366_v35 = vmul.f32 %v18323_v55, %v18323_v55  ;;  %v18375_v56 = vmul.f32 %v18326_v50, %v18326_v50  ;;  %v6460_v26 = vadd.f32 1e-05, %v6140_v33  ;;  %v21190_v29 = vld [vmem:[#allocation169_spill] sm:$0xff]  ;;  %v21221_v5 = vld [vmem:[#allocation174_spill] sm:$0xff] }
 0x831   :  { %9146 = vst.msk [vmem:[%s19497_s7 + $0x238] sm:$0xff] %vm67_vm0, %v8986_v53  ;;  %v8987_v30 = vadd.f32 %v8478_v12, %v7867_v15  ;;  %v8096_v53 = vld [vmem:[%s19496_s6 + $0x468] sm:$0xff]  ;;  %v21168_v12 = vld [vmem:[#allocation45_spill] sm:$0xff]  ;;  %v21326_v50 = vld [vmem:[#allocation210_spill] sm:$0xff] }
 0x832   :  { %v8483_v4 = vpop.permute.xlu0 %8482  ;;  %10456 = vrsqrt.f32 %v6460_v26  ;;  %v21198_v26 = vld [vmem:[#allocation114_spill] sm:$0xff] }
 0x833   :  { %9147 = vst.msk [vmem:[%s19497_s7 + $0x240] sm:$0xff] %vm67_vm0, %v8987_v30  ;;  %v8988_v63 = vadd.f32 %v8483_v4, %v7868_v32  ;;  %8792 = vperm.xlu0 %9844, %v8090_v19   ;;  %v18351_v19 = vmul.f32 0.020408163, %v21168_v12  ;;  %v21171_v32 = vld [vmem:[#allocation302_spill] sm:$0xff]  ;;  %v8097_v4 = vld [vmem:[%s19496_s6 + $0x470] sm:$0xff]  ;;  %v21216_v12 = vld [vmem:[#allocation35_spill] sm:$0xff] }
 0x834   :  { %8797 = vperm.xlu1 %9845, %v8091_v42   ;;  %v8488_v31 = vpop.permute.xlu1 %8487  ;;  %v7874_v30 = vmul.f32 %v21171_v32, %v21170_v17  ;;  %v18437_v17 = vmul.f32 0.020408163, %v21193_v13  ;;  %v21195_v32 = vld [vmem:[#allocation107_spill] sm:$0xff]  ;;  %v18519_v0 = vmul.f32 0.020408163, %v21216_v12 }
 0x835   :  { %9148 = vst.msk [vmem:[%s19497_s7 + $0x248] sm:$0xff] %vm67_vm0, %v8988_v63  ;;  %v8989_v16 = vadd.f32 %v8488_v31, %v7869_v34  ;;  %21169 = vst [vmem:[#allocation3_spill] sm:$0xff] %v18351_v19  ;;  %v21173_v34 = vld [vmem:[#allocation190_spill] sm:$0xff]  ;;  %v21174_v31 = vld [vmem:[#allocation97_spill] sm:$0xff]  ;;  %v18399_v57 = vmul.f32 %v18351_v19, %v18351_v19 }
 0x836   :  { %v8493_v7 = vpop.permute.xlu0 %8492  ;;  %21194 = vst [vmem:[#allocation147_spill] sm:$0xff] %v18437_v17  ;;  %21217 = vst [vmem:[#allocation157_spill] sm:$0xff] %v18519_v0 }
 0x837   :  { %9149 = vst.msk [vmem:[%s19497_s7 + $0x250] sm:$0xff] %vm67_vm0, %v8989_v16  ;;  %v8990_v27 = vadd.f32 %v8493_v7, %v7870_v24  ;;  %8802 = vperm.xlu0 %9844, %v8092_v48   ;;  %v18371_v48 = vmul.f32 0.020408163, %v21174_v31  ;;  %v7875_v24 = vmul.f32 %v21177_v8, %v21176_v58  ;;  %v21197_v31 = vld [vmem:[#allocation121_spill] sm:$0xff]  ;;  %v21199_v8 = vld [vmem:[#allocation70_spill] sm:$0xff] }
 0x838   :  { %8807 = vperm.xlu1 %9845, %v8093_v2   ;;  %v8498_v14 = vpop.permute.xlu1 %8497  ;;  %v21222_v7 = vld [vmem:[#allocation309_spill] sm:$0xff]  ;;  %v21230_v58 = vld [vmem:[#allocation310_spill] sm:$0xff] }
 0x839   :  { %9150 = vst.msk [vmem:[%s19497_s7 + $0x258] sm:$0xff] %vm67_vm0, %v8990_v27  ;;  %v8991_v62 = vadd.f32 %v8498_v14, %v7871_v51  ;;  %21175 = vst [vmem:[#allocation139_spill] sm:$0xff] %v18371_v48  ;;  %v8098_v27 = vld [vmem:[%s19496_s6 + $0x478] sm:$0xff]  ;;  %v21183_v14 = vld [vmem:[#allocation304_spill] sm:$0xff]  ;;  %v7881_v63 = vmul.f32 %v21222_v7, %v21221_v5 }
 0x83a   :  { %v8503_v59 = vpop.permute.xlu0 %8502 }
 0x83b   :  { %9151 = vst.msk [vmem:[%s19497_s7 + $0x260] sm:$0xff] %vm67_vm0, %v8991_v62  ;;  %v8992_v6 = vadd.f32 %v8503_v59, %v7872_v18  ;;  %8812 = vperm.xlu0 %9844, %v8094_v36   ;;  %v7876_v36 = vmul.f32 %v21183_v14, %v21182_v21  ;;  %v18414_v18 = vmul.f32 %v18371_v48, %v18371_v48  ;;  %v21185_v62 = vld [vmem:[#allocation106_spill] sm:$0xff]  ;;  %v18420_v59 = vmul.f32 0.020408163, %v21187_v9  ;;  %v21213_v14 = vld [vmem:[#allocation172_spill] sm:$0xff] }
 0x83c   :  { %8817 = vperm.xlu1 %9845, %v8095_v54   ;;  %v8508_v15 = vpop.permute.xlu1 %8507  ;;  %v18417_v54 = vmul.f32 0.020408163, %v21185_v62 }
 0x83d   :  { %9152 = vst.msk [vmem:[%s19497_s7 + $0x268] sm:$0xff] %vm67_vm0, %v8992_v6  ;;  %v8993_v42 = vadd.f32 %v8508_v15, %v7873_v60  ;;  %21188 = vst [vmem:[#allocation143_spill] sm:$0xff] %v18420_v59  ;;  %v21191_v60 = vld [vmem:[#allocation305_spill] sm:$0xff]  ;;  %v18432_v15 = vmul.f32 %v18392_v37, %v18392_v37  ;;  %v21272_v37 = vld [vmem:[#allocation315_spill] sm:$0xff] }
 0x83e   :  { %v8513_v61 = vpop.permute.xlu0 %8512  ;;  %21186 = vst [vmem:[#allocation78_spill] sm:$0xff] %v18417_v54  ;;  %v7877_v6 = vmul.f32 %v21191_v60, %v21190_v29  ;;  %v21204_v29 = vld [vmem:[#allocation120_spill] sm:$0xff] }
 0x83f   :  { %9153 = vst.msk [vmem:[%s19497_s7 + $0x270] sm:$0xff] %vm67_vm0, %v8993_v42  ;;  %v8994_v16 = vadd.f32 %v8513_v61, %v7874_v30  ;;  %8822 = vperm.xlu0 %9844, %v8096_v53   ;;  %v18440_v30 = vmul.f32 0.020408163, %v21195_v32  ;;  %v18474_v60 = vmul.f32 0.020408163, %v21204_v29  ;;  %v21208_v29 = vld [vmem:[#allocation51_spill] sm:$0xff] }
 0x840   :  { %8827 = vperm.xlu1 %9845, %v8097_v4   ;;  %v8518_v51 = vpop.permute.xlu1 %8517  ;;  %v8100_v4 = vld [vmem:[%s19496_s6 + $0x488] sm:$0xff]  ;;  %v21225_v61 = vld [vmem:[#allocation48_spill] sm:$0xff] }
 0x841   :  { %9154 = vst.msk [vmem:[%s19497_s7 + $0x278] sm:$0xff] %vm67_vm0, %v8994_v16  ;;  %v8995_v40 = vadd.f32 %v8518_v51, %v7875_v24  ;;  %21196 = vst [vmem:[#allocation74_spill] sm:$0xff] %v18440_v30  ;;  %v21200_v24 = vld [vmem:[#allocation306_spill] sm:$0xff]  ;;  %v8101_v51 = vld [vmem:[%s19496_s6 + $0x490] sm:$0xff] }
 0x842   :  { %v8523_v3 = vpop.permute.xlu0 %8522  ;;  %v7878_v16 = vmul.f32 %v21200_v24, %v21199_v8  ;;  %v21214_v24 = vld [vmem:[#allocation308_spill] sm:$0xff] }
 0x843   :  { %9155 = vst.msk [vmem:[%s19497_s7 + $0x280] sm:$0xff] %vm67_vm0, %v8995_v40  ;;  %v8996_v28 = vadd.f32 %v8523_v3, %v7876_v36  ;;  %8832 = vperm.xlu0 %9844, %v8098_v27   ;;  %v18460_v27 = vmul.f32 %v18417_v54, %v18417_v54  ;;  %v18466_v36 = vmul.f32 %v18420_v59, %v18420_v59  ;;  %v21202_v40 = vld [vmem:[#allocation112_spill] sm:$0xff]  ;;  %v18543_v59 = vmul.f32 0.020408163, %v21225_v61  ;;  %v21236_v54 = vld [vmem:[#allocation127_spill] sm:$0xff] }
 0x844   :  { %8837 = vperm.xlu1 %9845, %v8099_v47   ;;  %v8528_v42 = vpop.permute.xlu1 %8527  ;;  %v18469_v47 = vmul.f32 0.020408163, %v21202_v40  ;;  %v18490_v40 = vmul.f32 %v18440_v30, %v18440_v30  ;;  %v7880_v44 = vmul.f32 %v21214_v24, %v21213_v14  ;;  %v21218_v14 = vld [vmem:[#allocation125_spill] sm:$0xff]  ;;  %v18582_v21 = vmul.f32 0.020408163, %v21236_v54  ;;  %v21238_v30 = vld [vmem:[#allocation18_spill] sm:$0xff] }
 0x845   :  { %9156 = vst.msk [vmem:[%s19497_s7 + $0x288] sm:$0xff] %vm67_vm0, %v8996_v28  ;;  %v8997_v25 = vadd.f32 %v8528_v42, %v7877_v6  ;;  %v21205_v6 = vld [vmem:[#allocation16_spill] sm:$0xff]  ;;  %v21206_v28 = vld [vmem:[#allocation307_spill] sm:$0xff]  ;;  %v18484_v42 = vmul.f32 %v18437_v17, %v18437_v17  ;;  %v18522_v24 = vmul.f32 0.020408163, %v21218_v14 }
 0x846   :  { %v8533_v62 = vpop.permute.xlu0 %8532  ;;  %v7879_v13 = vmul.f32 %v21206_v28, %v21205_v6  ;;  %v18493_v6 = vmul.f32 0.020408163, %v21208_v29  ;;  %v8103_v29 = vld [vmem:[%s19496_s6 + $0x4a0] sm:$0xff]  ;;  %v18514_v46 = vmul.f32 %v18469_v47, %v18469_v47  ;;  %21237 = vst [vmem:[#allocation162_spill] sm:$0xff] %v18582_v21 }
 0x847   :  { %9157 = vst.msk [vmem:[%s19497_s7 + $0x290] sm:$0xff] %vm67_vm0, %v8997_v25  ;;  %v8998_v32 = vadd.f32 %v8533_v62, %v7878_v16  ;;  %8842 = vperm.xlu0 %9844, %v8100_v4   ;;  %v8102_v4 = vld [vmem:[%s19496_s6 + $0x498] sm:$0xff]  ;;  %21219 = vst [vmem:[#allocation77_spill] sm:$0xff] %v18522_v24  ;;  %v18568_v25 = vmul.f32 %v18519_v0, %v18519_v0  ;;  %v21239_v16 = vld [vmem:[#allocation311_spill] sm:$0xff] }
 0x848   :  { %21209 = vst [vmem:[#allocation142_spill] sm:$0xff] %v18493_v6  ;;  %8847 = vperm.xlu1 %9845, %v8101_v51   ;;  %v8538_v28 = vpop.permute.xlu1 %8537  ;;  %v21211_v62 = vld [vmem:[#allocation37_spill] sm:$0xff]  ;;  %v18538_v14 = vmul.f32 %v18493_v6, %v18493_v6  ;;  %v10455_v6 = vpop.eup %10454  ;;  %v7883_v17 = vmul.f32 %v21239_v16, %v21238_v30  ;;  %v21241_v30 = vld [vmem:[#allocation206_spill] sm:$0xff] }
 0x849   :  { %v18501_v3 = vmul.f32 0.020408163, %v21211_v62  ;;  %9158 = vst.msk [vmem:[%s19497_s7 + $0x298] sm:$0xff] %vm67_vm0, %v8998_v32  ;;  %v8999_v51 = vadd.f32 %v8538_v28, %v7879_v13  ;;  %v21215_v62 = vld [vmem:[#allocation182_spill] sm:$0xff]  ;;  %v18526_v13 = vmul.f32 %v18474_v60, %v18474_v60  ;;  %v21220_v32 = vld [vmem:[#allocation183_spill] sm:$0xff]  ;;  %v10457_v0 = vpop.eup %10456 }
 0x84a   :  { %v8543_v10 = vpop.permute.xlu0 %8542  ;;  %21223 = vst [vmem:[#allocation150_spill] sm:$0xff] %v18538_v14  ;;  %v21226_v28 = vld [vmem:[#allocation115_spill] sm:$0xff]  ;;  %v18601_v16 = vmul.f32 0.020408163, %v21241_v30  ;;  %v8107_v30 = vld [vmem:[%s19496_s6 + $0x4c0] sm:$0xff] }
 0x84b   :  { %21212 = vst [vmem:[#allocation151_spill] sm:$0xff] %v18501_v3  ;;  %9159 = vst.msk [vmem:[%s19497_s7 + $0x2a0] sm:$0xff] %vm67_vm0, %v8999_v51  ;;  %v9000_v12 = vadd.f32 %v8543_v10, %v7880_v44  ;;  %8852 = vperm.xlu0 %9844, %v8102_v4   ;;  %v18546_v9 = vmul.f32 0.020408163, %v21226_v28  ;;  %v8104_v10 = vld [vmem:[%s19496_s6 + $0x4a8] sm:$0xff]  ;;  %v18553_v7 = vmul.f32 %v18501_v3, %v18501_v3  ;;  %v8105_v28 = vld [vmem:[%s19496_s6 + $0x4b0] sm:$0xff] }
 0x84c   :  { %8857 = vperm.xlu1 %9845, %v8103_v29   ;;  %v8548_v5 = vpop.permute.xlu1 %8547  ;;  %v21229_v51 = vld [vmem:[#allocation19_spill] sm:$0xff]  ;;  %21242 = vst [vmem:[#allocation65_spill] sm:$0xff] %v18601_v16  ;;  %v21245_v4 = vld [vmem:[#allocation312_spill] sm:$0xff] }
 0x84d   :  { %21227 = vst [vmem:[#allocation163_spill] sm:$0xff] %v18553_v7  ;;  %v7882_v61 = vmul.f32 %v21230_v58, %v21229_v51  ;;  %9160 = vst.msk [vmem:[%s19497_s7 + $0x2a8] sm:$0xff] %vm67_vm0, %v9000_v12  ;;  %v9001_v29 = vadd.f32 %v8548_v5, %v7881_v63  ;;  %v18574_v58 = vmul.f32 %v18522_v24, %v18522_v24  ;;  %v21233_v51 = vld [vmem:[#allocation187_spill] sm:$0xff]  ;;  %v21240_v5 = vld [vmem:[#allocation185_spill] sm:$0xff] }
 0x84e   :  { %v18577_v44 = vmul.f32 0.020408163, %v21233_v51  ;;  %v8553_v63 = vpop.permute.xlu0 %8552  ;;  %v18592_v51 = vmul.f32 %v18543_v59, %v18543_v59  ;;  %v18598_v54 = vmul.f32 %v18546_v9, %v18546_v9  ;;  %v21246_v24 = vsub.f32 %v21197_v31, %v18269_v49  ;;  %v21249_v49 = vld [vmem:[#allocation195_spill] sm:$0xff] }
 0x84f   :  { %21232 = vst [vmem:[#allocation166_spill] sm:$0xff] %v18574_v58  ;;  %9161 = vst.msk [vmem:[%s19497_s7 + $0x2b0] sm:$0xff] %vm67_vm0, %v9001_v29  ;;  %v9002_v3 = vadd.f32 %v8553_v63, %v7882_v61  ;;  %8862 = vperm.xlu0 %9844, %v8104_v10   ;;  %v8106_v10 = vld [vmem:[%s19496_s6 + $0x4b8] sm:$0xff]  ;;  %v21243_v61 = vld [vmem:[#allocation186_spill] sm:$0xff]  ;;  %v18629_v31 = vmul.f32 0.020408163, %v21249_v49 }
 0x850   :  { %21234 = vst [vmem:[#allocation64_spill] sm:$0xff] %v18577_v44  ;;  %8867 = vperm.xlu1 %9845, %v8105_v28   ;;  %v8558_v12 = vpop.permute.xlu1 %8557  ;;  %v21244_v63 = vld [vmem:[#allocation90_spill] sm:$0xff]  ;;  %v18613_v19 = vmul.f32 %v10455_v6, %v21246_v24  ;;  %v18624_v29 = vmul.f32 %v18577_v44, %v18577_v44  ;;  %v21251_v6 = vld [vmem:[#allocation23_spill] sm:$0xff]  ;;  %v18653_v44 = vmul.f32 %v18601_v16, %v18601_v16 }
 0x851   :  { %v7884_v8 = vmul.f32 %v21245_v4, %v21244_v63  ;;  %9162 = vst.msk [vmem:[%s19497_s7 + $0x2b8] sm:$0xff] %vm67_vm0, %v9002_v3  ;;  %v9003_v28 = vadd.f32 %v8558_v12, %v7883_v17  ;;  %21250 = vst [vmem:[#allocation59_spill] sm:$0xff] %v18629_v31  ;;  %v18632_v24 = vmul.f32 0.020408163, %v21251_v6  ;;  %v18636_v17 = vmul.f32 %v18582_v21, %v18582_v21  ;;  %v21253_v3 = vld [vmem:[#allocation87_spill] sm:$0xff]  ;;  %v21254_v12 = vld [vmem:[#allocation313_spill] sm:$0xff] }
 0x852   :  { %21247 = vst [vmem:[#allocation160_spill] sm:$0xff] %v18624_v29  ;;  %v8563_v38 = vpop.permute.xlu0 %8562  ;;  %v7885_v20 = vmul.f32 %v21254_v12, %v21253_v3  ;;  %v21255_v29 = vsub.f32 %v21198_v26, %v18281_v45  ;;  %21257 = vst [vmem:[#allocation12_spill] sm:$0xff] %v18653_v44  ;;  %v21258_v3 = vld [vmem:[#allocation119_spill] sm:$0xff]  ;;  %v21259_v45 = vld [vmem:[#allocation220_spill] sm:$0xff] }
 0x853   :  { %21252 = vst [vmem:[#allocation165_spill] sm:$0xff] %v18636_v17  ;;  %9163 = vst.msk [vmem:[%s19497_s7 + $0x2c0] sm:$0xff] %vm67_vm0, %v9003_v28  ;;  %v9004_v49 = vadd.f32 %v8563_v38, %v7884_v8  ;;  %8872 = vperm.xlu0 %9844, %v8106_v10   ;;  %v18656_v12 = vmul.f32 0.020408163, %v21258_v3  ;;  %v21261_v10 = vld [vmem:[#allocation31_spill] sm:$0xff]  ;;  %v21263_v63 = vld [vmem:[#allocation34_spill] sm:$0xff] }
 0x854   :  { %v18643_v11 = vmul.f32 %v10457_v0, %v21255_v29  ;;  %v5821_v0 = vmul.f32 0.020408163, %v21259_v45  ;;  %8877 = vperm.xlu1 %9845, %v8107_v30   ;;  %v8568_v26 = vpop.permute.xlu1 %8567  ;;  %v8108_v29 = vld [vmem:[%s19496_s6 + $0x4c8] sm:$0xff]  ;;  %v18665_v28 = vmul.f32 0.020408163, %v21261_v10  ;;  %v21264_v21 = vld [vmem:[#allocation314_spill] sm:$0xff]  ;;  %v18678_v45 = vmul.f32 %v18629_v31, %v18629_v31 }
 0x855   :  { %v7886_v6 = vmul.f32 %v21264_v21, %v21263_v63  ;;  %9164 = vst.msk [vmem:[%s19497_s7 + $0x2c8] sm:$0xff] %vm67_vm0, %v9004_v49  ;;  %v9005_v30 = vadd.f32 %v8568_v26, %v7885_v20  ;;  %v8109_v3 = vld [vmem:[%s19496_s6 + $0x4d0] sm:$0xff]  ;;  %v18684_v21 = vmul.f32 %v18632_v24, %v18632_v24  ;;  %v21267_v63 = vld [vmem:[#allocation215_spill] sm:$0xff]  ;;  %v21269_v26 = vld [vmem:[#allocation49_spill] sm:$0xff] }
 0x856   :  { %21262 = vst [vmem:[#allocation168_spill] sm:$0xff] %v18665_v28  ;;  %21265 = vst [vmem:[#allocation38_spill] sm:$0xff] %v18678_v45  ;;  %v5822_v4 = vmul.f32 0.020408163, %v21267_v63  ;;  %v8573_v16 = vpop.permute.xlu0 %8572  ;;  %v21268_v20 = vld [vmem:[#allocation192_spill] sm:$0xff]  ;;  %v21271_v17 = vld [vmem:[#allocation43_spill] sm:$0xff]  ;;  %v18700_v63 = vmul.f32 %v18656_v12, %v18656_v12 }
 0x857   :  { %v18690_v38 = vmul.f32 0.020408163, %v21269_v26  ;;  %v7887_v53 = vmul.f32 %v21272_v37, %v21271_v17  ;;  %9165 = vst.msk [vmem:[%s19497_s7 + $0x2d0] sm:$0xff] %vm67_vm0, %v9005_v30  ;;  %v9006_v8 = vadd.f32 %v8573_v16, %v7886_v6  ;;  %8882 = vperm.xlu0 %9844, %v8108_v29   ;;  %v21273_v31 = vld [vmem:[#allocation124_spill] sm:$0xff]  ;;  %v6141_v26 = vsub.f32 %v5821_v0, %v18514_v46  ;;  %v21275_v49 = vld [vmem:[#allocation222_spill] sm:$0xff]  ;;  %v8110_v17 = vld [vmem:[%s19496_s6 + $0x4d8] sm:$0xff] }
 0x858   :  { %v18703_v10 = vmul.f32 0.020408163, %v21273_v31  ;;  %v5823_v45 = vmul.f32 0.020408163, %v21275_v49  ;;  %8887 = vperm.xlu1 %9845, %v8109_v3   ;;  %v8578_v37 = vpop.permute.xlu1 %8577  ;;  %v21276_v16 = vld [vmem:[#allocation153_spill] sm:$0xff]  ;;  %v18714_v29 = vmul.f32 %v18665_v28, %v18665_v28  ;;  %v21278_v30 = vld [vmem:[#allocation99_spill] sm:$0xff] }
 0x859   :  { %21270 = vst [vmem:[#allocation170_spill] sm:$0xff] %v18690_v38  ;;  %v21279_v31 = vld [vmem:[#allocation316_spill] sm:$0xff]  ;;  %9166 = vst.msk [vmem:[%s19497_s7 + $0x2d8] sm:$0xff] %vm67_vm0, %v9006_v8  ;;  %v9007_v46 = vadd.f32 %v8578_v37, %v7887_v53  ;;  %v8111_v0 = vld [vmem:[%s19496_s6 + $0x4e0] sm:$0xff]  ;;  %v18734_v43 = vmul.f32 %v18690_v38, %v18690_v38 }
 0x85a   :  { %21274 = vst [vmem:[#allocation14_spill] sm:$0xff] %v18703_v10  ;;  %21277 = vst [vmem:[#allocation171_spill] sm:$0xff] %v18714_v29  ;;  %v7888_v48 = vmul.f32 %v21279_v31, %v21278_v30  ;;  %v21281_v6 = vld [vmem:[#allocation22_spill] sm:$0xff]  ;;  %v6142_v29 = vsub.f32 %v5822_v4, %v18526_v13  ;;  %v21283_v44 = vld [vmem:[#allocation223_spill] sm:$0xff]  ;;  %v8583_v31 = vpop.permute.xlu0 %8582  ;;  %v18746_v13 = vmul.f32 %v18703_v10, %v18703_v10 }
 0x85b   :  { %v18728_v33 = vmul.f32 0.020408163, %v21281_v6  ;;  %v5824_v30 = vmul.f32 0.020408163, %v21283_v44  ;;  %21284 = vst [vmem:[#allocation4_spill] sm:$0xff] %v18734_v43  ;;  %v21286_v37 = vld [vmem:[#allocation47_spill] sm:$0xff]  ;;  %8892 = vperm.xlu0 %9844, %v8110_v17   ;;  %v6143_v4 = vsub.f32 %v5823_v45, %v18592_v51 }
 0x85c   :  { %v7889_v7 = vmul.f32 %v21287_v41, %v21286_v37  ;;  %9167 = vst.msk [vmem:[%s19497_s7 + $0x2e0] sm:$0xff] %vm67_vm0, %v9007_v46  ;;  %v9008_v6 = vadd.f32 %v8583_v31, %v7888_v48  ;;  %21288 = vst [vmem:[#allocation91_spill] sm:$0xff] %v18746_v13  ;;  %v6461_v44 = vadd.f32 1e-05, %v6141_v26  ;;  %v21289_v49 = vld [vmem:[#allocation224_spill] sm:$0xff]  ;;  %8897 = vperm.xlu1 %9845, %v8111_v0   ;;  %v8588_v8 = vpop.permute.xlu1 %8587  ;;  %v8112_v41 = vld [vmem:[%s19496_s6 + $0x4e8] sm:$0xff] }
 0x85d   :  { %21282 = vst [vmem:[#allocation11_spill] sm:$0xff] %v18728_v33  ;;  %v5825_v28 = vmul.f32 0.020408163, %v21289_v49  ;;  %v21291_v48 = vld [vmem:[#allocation130_spill] sm:$0xff]  ;;  %v21292_v31 = vld [vmem:[#allocation73_spill] sm:$0xff]  ;;  %v8113_v45 = vld [vmem:[%s19496_s6 + $0x4f0] sm:$0xff]  ;;  %v18769_v26 = vmul.f32 %v18728_v33, %v18728_v33  ;;  %v6144_v49 = vsub.f32 %v5824_v30, %v18598_v54 }
 0x85e   :  { %v18756_v17 = vmul.f32 0.020408163, %v21291_v48  ;;  %v21293_v38 = vld [vmem:[#allocation318_spill] sm:$0xff]  ;;  %9168 = vst.msk [vmem:[%s19497_s7 + $0x2e8] sm:$0xff] %vm67_vm0, %v9008_v6  ;;  %v9009_v51 = vadd.f32 %v8588_v8, %v7889_v7  ;;  %v6462_v0 = vadd.f32 1e-05, %v6142_v29  ;;  %10458 = vrsqrt.f32 %v6461_v44 }
 0x85f   :  { %v7890_v53 = vmul.f32 %v21293_v38, %v21292_v31  ;;  %21294 = vst [vmem:[#allocation93_spill] sm:$0xff] %v18769_v26  ;;  %v21295_v48 = vld [vmem:[#allocation225_spill] sm:$0xff]  ;;  %v8593_v38 = vpop.permute.xlu0 %8592  ;;  %v21298_v7 = vld [vmem:[#allocation54_spill] sm:$0xff]  ;;  %v21299_v8 = vld [vmem:[#allocation319_spill] sm:$0xff]  ;;  %8902 = vperm.xlu0 %9844, %v8112_v41   ;;  %v6463_v54 = vadd.f32 1e-05, %v6143_v4  ;;  %v6145_v30 = vsub.f32 %v5825_v28, %v18684_v21 }
 0x860   :  { %v5826_v46 = vmul.f32 0.020408163, %v21295_v48  ;;  %v21297_v10 = vld [vmem:[#allocation129_spill] sm:$0xff]  ;;  %v7891_v37 = vmul.f32 %v21299_v8, %v21298_v7  ;;  %9169 = vst.msk [vmem:[%s19497_s7 + $0x2f0] sm:$0xff] %vm67_vm0, %v9009_v51  ;;  %v21300_v48 = vld [vmem:[#allocation226_spill] sm:$0xff]  ;;  %8907 = vperm.xlu1 %9845, %v8113_v45   ;;  %v8598_v3 = vpop.permute.xlu1 %8597  ;;  %v5987_v7 = vmul.f32 %v18756_v17, %v18756_v17  ;;  %v21303_v41 = vld [vmem:[#allocation320_spill] sm:$0xff]  ;;  %10460 = vrsqrt.f32 %v6462_v0 }
 0x861   :  { %v18776_v6 = vmul.f32 0.020408163, %v21297_v10  ;;  %v9010_v29 = vadd.f32 %v8593_v38, %v7890_v53  ;;  %v5827_v43 = vmul.f32 0.020408163, %v21300_v48  ;;  %v8114_v10 = vld [vmem:[%s19496_s6 + $0x4f8] sm:$0xff]  ;;  %v21302_v53 = vld [vmem:[#allocation100_spill] sm:$0xff]  ;;  %10462 = vrsqrt.f32 %v6463_v54 }
 0x862   :  { %v21301_v8 = vld [vmem:[#allocation33_spill] sm:$0xff]  ;;  %v7892_v44 = vmul.f32 %v21303_v41, %v21302_v53  ;;  %v9011_v28 = vadd.f32 %v8598_v3, %v7891_v37  ;;  %v6464_v21 = vadd.f32 1e-05, %v6144_v49  ;;  %v6146_v4 = vsub.f32 %v5826_v46, %v18700_v63  ;;  %v21304_v51 = vld [vmem:[#allocation227_spill] sm:$0xff]  ;;  %v21305_v48 = vld [vmem:[#allocation196_spill] sm:$0xff] }
 0x863   :  { %v18792_v33 = vmul.f32 0.020408163, %v21301_v8  ;;  %9170 = vst.msk [vmem:[%s19497_s7 + $0x2f8] sm:$0xff] %vm67_vm0, %v9010_v29  ;;  %v5828_v45 = vmul.f32 0.020408163, %v21304_v51  ;;  %v8603_v38 = vpop.permute.xlu0 %8602  ;;  %v5988_v31 = vmul.f32 %v18776_v6, %v18776_v6  ;;  %v21306_v53 = vld [vmem:[#allocation55_spill] sm:$0xff]  ;;  %8912 = vperm.xlu0 %9844, %v8114_v10   ;;  %v6147_v0 = vsub.f32 %v5827_v43, %v5987_v7 }
 0x864   :  { %v21307_v41 = vld [vmem:[#allocation321_spill] sm:$0xff]  ;;  %9171 = vst.msk [vmem:[%s19497_s7 + $0x300] sm:$0xff] %vm67_vm0, %v9011_v28  ;;  %v9012_v3 = vadd.f32 %v8603_v38, %v7892_v44  ;;  %v6465_v46 = vadd.f32 1e-05, %v6145_v30  ;;  %v8608_v49 = vpop.permute.xlu1 %8607  ;;  %v21310_v8 = vld [vmem:[#allocation228_spill] sm:$0xff]  ;;  %10464 = vrsqrt.f32 %v6464_v21 }
 0x865   :  { %v7893_v26 = vmul.f32 %v21307_v41, %v21306_v53  ;;  %v21308_v63 = vld [vmem:[#allocation209_spill] sm:$0xff]  ;;  %v5829_v13 = vmul.f32 0.020408163, %v21310_v8  ;;  %v21311_v53 = vld [vmem:[#allocation94_spill] sm:$0xff]  ;;  %v5989_v54 = vmul.f32 %v18792_v33, %v18792_v33  ;;  %v6466_v43 = vadd.f32 1e-05, %v6146_v4 }
 0x866   :  { %v18813_v37 = vmul.f32 0.020408163, %v21308_v63  ;;  %v21309_v29 = vld [vmem:[#allocation213_spill] sm:$0xff]  ;;  %v21312_v41 = vld [vmem:[#allocation322_spill] sm:$0xff]  ;;  %9172 = vst.msk [vmem:[%s19497_s7 + $0x308] sm:$0xff] %vm67_vm0, %v9012_v3  ;;  %v6148_v30 = vsub.f32 %v5828_v45, %v5988_v31  ;;  %v21313_v44 = vld [vmem:[#allocation24_spill] sm:$0xff]  ;;  %10466 = vrsqrt.f32 %v6465_v46 }
 0x867   :  { %v18816_v51 = vmul.f32 0.020408163, %v21309_v29  ;;  %v7894_v22 = vmul.f32 %v21312_v41, %v21311_v53  ;;  %v9013_v10 = vadd.f32 %v8608_v49, %v7893_v26  ;;  %v8613_v7 = vpop.permute.xlu0 %8612  ;;  %v18828_v28 = vmul.f32 0.020408163, %v21313_v44  ;;  %v21314_v38 = vld [vmem:[#allocation229_spill] sm:$0xff]  ;;  %v21315_v63 = vld [vmem:[#allocation39_spill] sm:$0xff] }
 0x868   :  { %v5830_v8 = vmul.f32 0.020408163, %v21314_v38  ;;  %v21316_v29 = vld [vmem:[#allocation323_spill] sm:$0xff]  ;;  %v5990_v21 = vmul.f32 %v18813_v37, %v18813_v37  ;;  %v6467_v31 = vadd.f32 1e-05, %v6147_v0  ;;  %v21317_v4 = vld [vmem:[#allocation230_spill] sm:$0xff]  ;;  %v8618_v3 = vpop.permute.xlu1 %8617  ;;  %v6149_v41 = vsub.f32 %v5829_v13, %v5989_v54 }
 0x869   :  { %v7895_v53 = vmul.f32 %v21316_v29, %v21315_v63  ;;  %9173 = vst.msk [vmem:[%s19497_s7 + $0x310] sm:$0xff] %vm67_vm0, %v9013_v10  ;;  %v9014_v26 = vadd.f32 %v8613_v7, %v7894_v22  ;;  %v5831_v45 = vmul.f32 0.020408163, %v21317_v4  ;;  %v5991_v49 = vmul.f32 %v18816_v51, %v18816_v51  ;;  %v21318_v44 = vld [vmem:[#allocation184_spill] sm:$0xff]  ;;  %v21320_v10 = vld [vmem:[#allocation214_spill] sm:$0xff]  ;;  %v21321_v0 = vld [vmem:[#allocation231_spill] sm:$0xff] }
 0x86a   :  { %v21319_v38 = vld [vmem:[#allocation324_spill] sm:$0xff]  ;;  %v18849_v7 = vmul.f32 0.020408163, %v21320_v10  ;;  %10468 = vrsqrt.f32 %v6466_v43  ;;  %v6468_v46 = vadd.f32 1e-05, %v6148_v30  ;;  %v5992_v13 = vmul.f32 %v18828_v28, %v18828_v28 }
 0x86b   :  { %v7896_v63 = vmul.f32 %v21319_v38, %v21318_v44  ;;  %9174 = vst.msk [vmem:[%s19497_s7 + $0x318] sm:$0xff] %vm67_vm0, %v9014_v26  ;;  %v9015_v22 = vadd.f32 %v8618_v3, %v7895_v53  ;;  %v5832_v29 = vmul.f32 0.020408163, %v21321_v0  ;;  %v8623_v4 = vpop.permute.xlu0 %8622  ;;  %v6150_v54 = vsub.f32 %v5830_v8, %v5990_v21  ;;  %v21323_v44 = vld [vmem:[#allocation325_spill] sm:$0xff]  ;;  %v21325_v30 = vld [vmem:[#allocation232_spill] sm:$0xff]  ;;  %v10459_v14 = vpop.eup %10458 }
 0x86c   :  { %v7897_v38 = vmul.f32 %v21323_v44, %v21322_v39  ;;  %v21324_v26 = vld [vmem:[#allocation217_spill] sm:$0xff]  ;;  %10470 = vrsqrt.f32 %v6467_v31  ;;  %v6151_v43 = vsub.f32 %v5831_v45, %v5991_v49  ;;  %v5833_v10 = vmul.f32 0.020408163, %v21325_v30  ;;  %v8628_v0 = vpop.permute.xlu1 %8627  ;;  %v21327_v39 = vld [vmem:[#allocation122_spill] sm:$0xff] }
 0x86d   :  { %9175 = vst.msk [vmem:[%s19497_s7 + $0x320] sm:$0xff] %vm67_vm0, %v9015_v22  ;;  %v9016_v53 = vadd.f32 %v8623_v4, %v7896_v63  ;;  %v18861_v3 = vmul.f32 0.020408163, %v21324_v26  ;;  %v18865_v8 = vmul.f32 0.020408163, %v21326_v50  ;;  %v21328_v44 = vld [vmem:[#allocation326_spill] sm:$0xff]  ;;  %v5993_v31 = vmul.f32 %v18849_v7, %v18849_v7  ;;  %v10461_v50 = vpop.eup %10460 }
 0x86e   :  { %v6469_v21 = vadd.f32 1e-05, %v6149_v41  ;;  %v7898_v2 = vmul.f32 %v21328_v44, %v21327_v39  ;;  %v9017_v63 = vadd.f32 %v8628_v0, %v7897_v38  ;;  %10472 = vrsqrt.f32 %v6468_v46  ;;  %v21329_v49 = vld [vmem:[#allocation233_spill] sm:$0xff]  ;;  %v21330_v41 = vld [vmem:[#allocation198_spill] sm:$0xff]  ;;  %v21331_v39 = vld [vmem:[#allocation327_spill] sm:$0xff] }
 0x86f   :  { %9176 = vst.msk [vmem:[%s19497_s7 + $0x328] sm:$0xff] %vm67_vm0, %v9016_v53  ;;  %v6152_v45 = vsub.f32 %v5832_v29, %v5992_v13  ;;  %v5834_v22 = vmul.f32 0.020408163, %v21329_v49  ;;  %v8633_v4 = vpop.permute.xlu0 %8632  ;;  %v6470_v30 = vadd.f32 1e-05, %v6150_v54  ;;  %v7899_v44 = vmul.f32 %v21331_v39, %v18613_v19  ;;  %v10463_v54 = vpop.eup %10462  ;;  %v21333_v26 = vld [vmem:[#allocation234_spill] sm:$0xff] }
 0x870   :  { %9177 = vst.msk [vmem:[%s19497_s7 + $0x330] sm:$0xff] %vm67_vm0, %v9017_v63  ;;  %v9018_v38 = vadd.f32 %v8633_v4, %v7898_v2  ;;  %v5994_v46 = vmul.f32 %v18861_v3, %v18861_v3  ;;  %v6471_v29 = vadd.f32 1e-05, %v6151_v43  ;;  %v6153_v13 = vsub.f32 %v5833_v10, %v5993_v31  ;;  %v8638_v49 = vpop.permute.xlu1 %8637  ;;  %v21334_v39 = vld [vmem:[#allocation328_spill] sm:$0xff]  ;;  %v21337_v4 = vld [vmem:[#allocation329_spill] sm:$0xff] }
 0x871   :  { %v21332_v53 = vsub.f32 %v21215_v62, %v18469_v47  ;;  %10474 = vrsqrt.f32 %v6469_v21  ;;  %v5835_v19 = vmul.f32 0.020408163, %v21333_v26  ;;  %v7900_v58 = vmul.f32 %v21334_v39, %v18643_v11  ;;  %v10465_v63 = vpop.eup %10464  ;;  %v21336_v11 = vld [vmem:[#allocation235_spill] sm:$0xff] }
 0x872   :  { %9178 = vst.msk [vmem:[%s19497_s7 + $0x338] sm:$0xff] %vm67_vm0, %v9018_v38  ;;  %v9019_v2 = vadd.f32 %v8638_v49, %v7899_v44  ;;  %v18898_v43 = vmul.f32 %v18865_v8, %v18865_v8  ;;  %v6472_v47 = vadd.f32 1e-05, %v6152_v45  ;;  %v6154_v62 = vsub.f32 %v5834_v22, %v5994_v46  ;;  %v21338_v45 = vld [vmem:[#allocation71_spill] sm:$0xff]  ;;  %v21341_v49 = vld [vmem:[#allocation330_spill] sm:$0xff] }
 0x873   :  { %v6781_v0 = vmul.f32 %v10459_v14, %v21332_v53  ;;  %v21335_v14 = vsub.f32 %v21220_v32, %v18474_v60  ;;  %v8643_v21 = vpop.permute.xlu0 %8642  ;;  %10476 = vrsqrt.f32 %v6470_v30  ;;  %v5836_v31 = vmul.f32 0.020408163, %v21336_v11  ;;  %v10467_v30 = vpop.eup %10466  ;;  %v21340_v53 = vld [vmem:[#allocation236_spill] sm:$0xff] }
 0x874   :  { %9179 = vst.msk [vmem:[%s19497_s7 + $0x340] sm:$0xff] %vm67_vm0, %v9019_v2  ;;  %v9020_v44 = vadd.f32 %v8643_v21, %v7900_v58  ;;  %v6341_v22 = vsub.f32 %v21338_v45, %v18865_v8  ;;  %10478 = vrsqrt.f32 %v6471_v29  ;;  %v6473_v38 = vadd.f32 1e-05, %v6153_v13  ;;  %v21342_v29 = vld [vmem:[#allocation29_spill] sm:$0xff]  ;;  %v21345_v21 = vld [vmem:[#allocation331_spill] sm:$0xff] }
 0x875   :  { %v6782_v10 = vmul.f32 %v10461_v50, %v21335_v14  ;;  %v7901_v26 = vmul.f32 %v21337_v4, %v6781_v0  ;;  %v21339_v60 = vsub.f32 %v21240_v5, %v18543_v59  ;;  %v8648_v50 = vpop.permute.xlu1 %8647  ;;  %v6155_v46 = vsub.f32 %v5835_v19, %v18366_v35  ;;  %v21344_v14 = vld [vmem:[#allocation237_spill] sm:$0xff] }
 0x876   :  { %v5837_v0 = vmul.f32 0.020408163, %v21340_v53  ;;  %9180 = vst.msk [vmem:[%s19497_s7 + $0x348] sm:$0xff] %vm67_vm0, %v9020_v44  ;;  %v18922_v13 = vmul.f32 0.020408163, %v21342_v29  ;;  %10480 = vrsqrt.f32 %v6472_v47  ;;  %v21343_v5 = vsub.f32 %v21243_v61, %v18546_v9  ;;  %v21346_v47 = vld [vmem:[#allocation208_spill] sm:$0xff] }
 0x877   :  { %v6783_v32 = vmul.f32 %v10463_v54, %v21339_v60  ;;  %v7902_v39 = vmul.f32 %v21341_v49, %v6782_v10  ;;  %v9021_v58 = vadd.f32 %v8648_v50, %v7901_v26  ;;  %v6474_v59 = vadd.f32 1e-05, %v6154_v62  ;;  %v8653_v35 = vpop.permute.xlu0 %8652  ;;  %v10469_v19 = vpop.eup %10468  ;;  %v21347_v9 = vld [vmem:[#allocation238_spill] sm:$0xff] }
 0x878   :  { %v6784_v54 = vmul.f32 %v10465_v63, %v21343_v5  ;;  %v6156_v2 = vsub.f32 %v5836_v31, %v18375_v56  ;;  %v5838_v10 = vmul.f32 0.020408163, %v21344_v14  ;;  %v18935_v62 = vmul.f32 0.020408163, %v21346_v47  ;;  %v21355_v14 = vld [vmem:[#allocation334_spill] sm:$0xff] }
 0x879   :  { %v7903_v11 = vmul.f32 %v21345_v21, %v6783_v32  ;;  %9181 = vst.msk [vmem:[%s19497_s7 + $0x350] sm:$0xff] %vm67_vm0, %v9021_v58  ;;  %v9022_v4 = vadd.f32 %v8653_v35, %v7902_v39  ;;  %10482 = vrsqrt.f32 %v6473_v38  ;;  %v5839_v61 = vmul.f32 0.020408163, %v21347_v9  ;;  %v8658_v31 = vpop.permute.xlu1 %8657  ;;  %v10471_v26 = vpop.eup %10470  ;;  %v21349_v32 = vld [vmem:[#allocation332_spill] sm:$0xff]  ;;  %v21352_v58 = vld [vmem:[#allocation333_spill] sm:$0xff] }
 0x87a   :  { %v21348_v63 = vsub.f32 %v21268_v20, %v18632_v24  ;;  %v6475_v44 = vadd.f32 1e-05, %v6155_v46  ;;  %v6157_v60 = vsub.f32 %v5837_v0, %v18336_v1  ;;  %v7904_v50 = vmul.f32 %v21349_v32, %v6784_v54  ;;  %v21350_v24 = vld [vmem:[#allocation239_spill] sm:$0xff]  ;;  %v21357_v9 = vld [vmem:[#allocation241_spill] sm:$0xff] }
 0x87b   :  { %9182 = vst.msk [vmem:[%s19497_s7 + $0x358] sm:$0xff] %vm67_vm0, %v9022_v4  ;;  %v9023_v53 = vadd.f32 %v8658_v31, %v7903_v11  ;;  %v18949_v38 = vmul.f32 %v18922_v13, %v18922_v13  ;;  %10484 = vrsqrt.f32 %v6474_v59  ;;  %v5840_v20 = vmul.f32 0.020408163, %v21350_v24  ;;  %v8663_v1 = vpop.permute.xlu0 %8662  ;;  %v10473_v0 = vpop.eup %10472  ;;  %v21359_v31 = vld [vmem:[#allocation335_spill] sm:$0xff] }
 0x87c   :  { %v6785_v56 = vmul.f32 %v10467_v30, %v21348_v63  ;;  %v21351_v30 = vsub.f32 %v21276_v16, %v18656_v12  ;;  %v6476_v49 = vadd.f32 1e-05, %v6156_v2  ;;  %v6158_v39 = vsub.f32 %v5838_v10, %v18342_v52  ;;  %v21353_v16 = vld [vmem:[#allocation240_spill] sm:$0xff] }
 0x87d   :  { %9183 = vst.msk [vmem:[%s19497_s7 + $0x360] sm:$0xff] %vm67_vm0, %v9023_v53  ;;  %v9024_v5 = vadd.f32 %v8663_v1, %v7904_v50  ;;  %v18963_v59 = vmul.f32 %v18935_v62, %v18935_v62  ;;  %v6159_v12 = vsub.f32 %v5839_v61, %v18414_v18  ;;  %v5841_v54 = vmul.f32 0.020408163, %v21353_v16  ;;  %v21356_v18 = vld [vmem:[#allocation167_spill] sm:$0xff] }
 0x87e   :  { %v6786_v46 = vmul.f32 %v10469_v19, %v21351_v30  ;;  %v7905_v29 = vmul.f32 %v21352_v58, %v6785_v56  ;;  %v21354_v35 = vsub.f32 %v21305_v48, %v18756_v17  ;;  %v8668_v19 = vpop.permute.xlu1 %8667  ;;  %10486 = vrsqrt.f32 %v6475_v44  ;;  %v10475_v11 = vpop.eup %10474 }
 0x87f   :  { %v6477_v2 = vadd.f32 1e-05, %v6157_v60  ;;  %9184 = vst.msk [vmem:[%s19497_s7 + $0x368] sm:$0xff] %vm67_vm0, %v9024_v5  ;;  %v6309_v4 = vsub.f32 %v21356_v18, %v18792_v33  ;;  %v6160_v47 = vsub.f32 %v5840_v20, %v18432_v15  ;;  %v5842_v17 = vmul.f32 0.020408163, %v21357_v9  ;;  %v8673_v63 = vpop.permute.xlu0 %8672  ;;  %v21360_v15 = vld [vmem:[#allocation69_spill] sm:$0xff] }
 0x880   :  { %v6787_v52 = vmul.f32 %v10471_v26, %v21354_v35  ;;  %v7906_v10 = vmul.f32 %v21355_v14, %v6786_v46  ;;  %v9025_v21 = vadd.f32 %v8668_v19, %v7905_v29  ;;  %v21358_v48 = vsub.f32 %v21330_v41, %v18776_v6  ;;  %v10477_v33 = vpop.eup %10476  ;;  %v21361_v6 = vld [vmem:[#allocation242_spill] sm:$0xff]  ;;  %v21362_v20 = vld [vmem:[#allocation336_spill] sm:$0xff] }
 0x881   :  { %10488 = vrsqrt.f32 %v6476_v49  ;;  %v6478_v56 = vadd.f32 1e-05, %v6158_v39  ;;  %v6310_v60 = vsub.f32 %v21360_v15, %v18813_v37  ;;  %v6479_v32 = vadd.f32 1e-05, %v6159_v12  ;;  %v10479_v24 = vpop.eup %10478  ;;  %v21364_v39 = vld [vmem:[#allocation243_spill] sm:$0xff]  ;;  %v21365_v12 = vld [vmem:[#allocation337_spill] sm:$0xff] }
 0x882   :  { %v6788_v61 = vmul.f32 %v10473_v0, %v21358_v48  ;;  %v7907_v26 = vmul.f32 %v21359_v31, %v6787_v52  ;;  %9185 = vst.msk [vmem:[%s19497_s7 + $0x370] sm:$0xff] %vm67_vm0, %v9025_v21  ;;  %v9026_v44 = vadd.f32 %v8673_v63, %v7906_v10  ;;  %v6161_v50 = vsub.f32 %v5841_v54, %v18387_v23  ;;  %v8678_v53 = vpop.permute.xlu1 %8677  ;;  %v21363_v0 = vld [vmem:[#allocation159_spill] sm:$0xff]  ;;  %v21366_v19 = vld [vmem:[#allocation244_spill] sm:$0xff]  ;;  %v21367_v10 = vld [vmem:[#allocation66_spill] sm:$0xff] }
 0x883   :  { %v5843_v41 = vmul.f32 0.020408163, %v21361_v6  ;;  %10490 = vrsqrt.f32 %v6477_v2  ;;  %v6789_v46 = vmul.f32 %v10475_v11, %v6309_v4  ;;  %v6311_v37 = vsub.f32 %v21363_v0, %v18816_v51  ;;  %v8683_v29 = vpop.permute.xlu0 %8682  ;;  %v10481_v5 = vpop.eup %10480  ;;  %v21368_v11 = vld [vmem:[#allocation338_spill] sm:$0xff]  ;;  %v21371_v31 = vld [vmem:[#allocation339_spill] sm:$0xff]  ;;  %v21372_v15 = vld [vmem:[#allocation173_spill] sm:$0xff] }
 0x884   :  { %v7908_v30 = vmul.f32 %v21362_v20, %v6788_v61  ;;  %9186 = vst.msk [vmem:[%s19497_s7 + $0x378] sm:$0xff] %vm67_vm0, %v9026_v44  ;;  %v9027_v1 = vadd.f32 %v8678_v53, %v7907_v26  ;;  %v6480_v49 = vadd.f32 1e-05, %v6160_v47  ;;  %v6162_v23 = vsub.f32 %v5842_v17, %v18399_v57  ;;  %v21369_v17 = vld [vmem:[#allocation245_spill] sm:$0xff]  ;;  %v21373_v6 = vld [vmem:[#allocation246_spill] sm:$0xff] }
 0x885   :  { %v5844_v58 = vmul.f32 0.020408163, %v21364_v39  ;;  %10492 = vrsqrt.f32 %v6478_v56  ;;  %v7909_v16 = vmul.f32 %v21365_v12, %v6789_v46  ;;  %v6790_v54 = vmul.f32 %v10477_v33, %v6310_v60  ;;  %v21370_v56 = vld [vmem:[#allocation85_spill] sm:$0xff]  ;;  %v21375_v46 = vld [vmem:[#allocation26_spill] sm:$0xff] }
 0x886   :  { %9187 = vst.msk [vmem:[%s19497_s7 + $0x380] sm:$0xff] %vm67_vm0, %v9027_v1  ;;  %v9028_v35 = vadd.f32 %v8683_v29, %v7908_v30  ;;  %10494 = vrsqrt.f32 %v6479_v32  ;;  %v6481_v52 = vadd.f32 1e-05, %v6161_v50  ;;  %v6163_v51 = vsub.f32 %v5843_v41, %v18484_v42  ;;  %v8688_v2 = vpop.permute.xlu1 %8687  ;;  %v10483_v14 = vpop.eup %10482  ;;  %v21378_v12 = vld [vmem:[#allocation161_spill] sm:$0xff] }
 0x887   :  { %v5845_v57 = vmul.f32 0.020408163, %v21366_v19  ;;  %v6312_v21 = vsub.f32 %v21367_v10, %v18828_v28  ;;  %v7910_v18 = vmul.f32 %v21368_v11, %v6790_v54  ;;  %v6791_v4 = vmul.f32 %v10479_v24, %v6311_v37  ;;  %v8693_v61 = vpop.permute.xlu0 %8692  ;;  %v21376_v37 = vld [vmem:[#allocation247_spill] sm:$0xff]  ;;  %v21380_v19 = vld [vmem:[#allocation342_spill] sm:$0xff] }
 0x888   :  { %9188 = vst.msk [vmem:[%s19497_s7 + $0x388] sm:$0xff] %vm67_vm0, %v9028_v35  ;;  %v9029_v47 = vadd.f32 %v8688_v2, %v7909_v16  ;;  %10496 = vrsqrt.f32 %v6480_v49  ;;  %v6482_v9 = vadd.f32 1e-05, %v6162_v23  ;;  %v6164_v42 = vsub.f32 %v5844_v58, %v18490_v40  ;;  %v10485_v63 = vpop.eup %10484  ;;  %v21377_v23 = vld [vmem:[#allocation341_spill] sm:$0xff]  ;;  %v21379_v35 = vld [vmem:[#allocation248_spill] sm:$0xff] }
 0x889   :  { %v5846_v48 = vmul.f32 0.020408163, %v21369_v17  ;;  %v6313_v28 = vsub.f32 %v21370_v56, %v18849_v7  ;;  %v7911_v26 = vmul.f32 %v21371_v31, %v6791_v4  ;;  %v6792_v44 = vmul.f32 %v10481_v5, %v6312_v21  ;;  %v21374_v7 = vld [vmem:[#allocation340_spill] sm:$0xff]  ;;  %v21385_v17 = vld [vmem:[#allocation137_spill] sm:$0xff]  ;;  %v21388_v31 = vld [vmem:[#allocation27_spill] sm:$0xff] }
 0x88a   :  { %9189 = vst.msk [vmem:[%s19497_s7 + $0x390] sm:$0xff] %vm67_vm0, %v9029_v47  ;;  %v9030_v33 = vadd.f32 %v8693_v61, %v7910_v18  ;;  %v6314_v60 = vsub.f32 %v21372_v15, %v18861_v3  ;;  %10498 = vrsqrt.f32 %v6481_v52  ;;  %v6483_v40 = vadd.f32 1e-05, %v6163_v51  ;;  %v8698_v50 = vpop.permute.xlu1 %8697  ;;  %v21390_v15 = vld [vmem:[#allocation250_spill] sm:$0xff] }
 0x88b   :  { %v6165_v32 = vsub.f32 %v5845_v57, %v18460_v27  ;;  %v5847_v41 = vmul.f32 0.020408163, %v21373_v6  ;;  %v7912_v53 = vmul.f32 %v21374_v7, %v6792_v44  ;;  %v6793_v24 = vmul.f32 %v10483_v14, %v6313_v28  ;;  %v10487_v30 = vpop.eup %10486  ;;  %v8703_v0 = vpop.permute.xlu0 %8702  ;;  %v21389_v44 = vld [vmem:[#allocation150_spill] sm:$0xff]  ;;  %v21391_v6 = vld [vmem:[#allocation344_spill] sm:$0xff] }
 0x88c   :  { %9190 = vst.msk [vmem:[%s19497_s7 + $0x398] sm:$0xff] %vm67_vm0, %v9030_v33  ;;  %v9031_v20 = vadd.f32 %v8698_v50, %v7911_v26  ;;  %v19033_v1 = vmul.f32 0.020408163, %v21375_v46  ;;  %10500 = vrsqrt.f32 %v6482_v9  ;;  %v6484_v3 = vadd.f32 1e-05, %v6164_v42  ;;  %v21383_v9 = vld [vmem:[#allocation166_spill] sm:$0xff] }
 0x88d   :  { %v6166_v27 = vsub.f32 %v5846_v48, %v18466_v36  ;;  %v5848_v49 = vmul.f32 0.020408163, %v21376_v37  ;;  %v7913_v39 = vmul.f32 %v21377_v23, %v6793_v24  ;;  %v6794_v58 = vmul.f32 %v10485_v63, %v6314_v60  ;;  %v21386_v48 = vld [vmem:[#allocation128_spill] sm:$0xff]  ;;  %v21395_v46 = vld [vmem:[#allocation63_spill] sm:$0xff] }
 0x88e   :  { %9191 = vst.msk [vmem:[%s19497_s7 + $0x3a0] sm:$0xff] %vm67_vm0, %v9031_v20  ;;  %v9032_v29 = vadd.f32 %v8703_v0, %v7912_v53  ;;  %v10489_v5 = vpop.eup %10488  ;;  %v6339_v16 = vsub.f32 %v21378_v12, %v18935_v62  ;;  %10502 = vrsqrt.f32 %v6483_v40  ;;  %v6485_v54 = vadd.f32 1e-05, %v6165_v32  ;;  %v8708_v52 = vpop.permute.xlu1 %8707  ;;  %v21392_v7 = vld [vmem:[#allocation188_spill] sm:$0xff]  ;;  %v21393_v53 = vld [vmem:[#allocation131_spill] sm:$0xff] }
 0x88f   :  { %v5849_v36 = vmul.f32 0.020408163, %v21379_v35  ;;  %v6167_v51 = vsub.f32 %v5847_v41, %v18568_v25  ;;  %v7914_v57 = vmul.f32 %v21380_v19, %v6794_v58  ;;  %v21381_v2 = vsub.f32 %v21173_v34, %v18323_v55  ;;  %v21382_v25 = vld [vmem:[#allocation249_spill] sm:$0xff]  ;;  %v8713_v47 = vpop.permute.xlu0 %8712  ;;  %v21384_v55 = vld [vmem:[#allocation343_spill] sm:$0xff] }
 0x890   :  { %9192 = vst.msk [vmem:[%s19497_s7 + $0x3a8] sm:$0xff] %vm67_vm0, %v9032_v29  ;;  %v9033_v10 = vadd.f32 %v8708_v52, %v7913_v39  ;;  %v10491_v21 = vpop.eup %10490  ;;  %v19056_v11 = vmul.f32 %v19033_v1, %v19033_v1  ;;  %10504 = vrsqrt.f32 %v6484_v3  ;;  %v6486_v18 = vadd.f32 1e-05, %v6166_v27  ;;  %v21396_v27 = vld [vmem:[#allocation163_spill] sm:$0xff]  ;;  %v21398_v29 = vld [vmem:[#allocation345_spill] sm:$0xff] }
 0x891   :  { %v6795_v14 = vmul.f32 %v10487_v30, %v21381_v2  ;;  %v5850_v4 = vmul.f32 0.020408163, %v21382_v25  ;;  %v6168_v42 = vsub.f32 %v5848_v49, %v21383_v9  ;;  %v21387_v61 = vsub.f32 %v21385_v17, %v21386_v48  ;;  %v21397_v37 = vld [vmem:[#allocation251_spill] sm:$0xff]  ;;  %v21402_v2 = vld [vmem:[#allocation12_spill] sm:$0xff] }
 0x892   :  { %9193 = vst.msk [vmem:[%s19497_s7 + $0x3b0] sm:$0xff] %vm67_vm0, %v9033_v10  ;;  %v9034_v56 = vadd.f32 %v8713_v47, %v7914_v57  ;;  %v10493_v28 = vpop.eup %10492  ;;  %v19069_v26 = vmul.f32 0.020408163, %v21388_v31  ;;  %10506 = vrsqrt.f32 %v6485_v54  ;;  %v6169_v33 = vsub.f32 %v5849_v36, %v21389_v44  ;;  %v8718_v40 = vpop.permute.xlu1 %8717  ;;  %v21399_v54 = vld [vmem:[#allocation136_spill] sm:$0xff]  ;;  %v21400_v35 = vld [vmem:[#allocation135_spill] sm:$0xff]  ;;  %v21411_v44 = vld [vmem:[#allocation138_spill] sm:$0xff] }
 0x893   :  { %v7915_v34 = vmul.f32 %v21384_v55, %v6795_v14  ;;  %v6796_v63 = vmul.f32 %v10489_v5, %v21387_v61  ;;  %v5851_v60 = vmul.f32 0.020408163, %v21390_v15  ;;  %v10495_v32 = vpop.eup %10494  ;;  %v6487_v50 = vadd.f32 1e-05, %v6167_v51  ;;  %v8723_v23 = vpop.permute.xlu0 %8722  ;;  %v21403_v10 = vld [vmem:[#allocation104_spill] sm:$0xff]  ;;  %v21407_v55 = vld [vmem:[#allocation346_spill] sm:$0xff] }
 0x894   :  { %v21394_v24 = vsub.f32 %v21392_v7, %v21393_v53  ;;  %9194 = vst.msk [vmem:[%s19497_s7 + $0x3b8] sm:$0xff] %vm67_vm0, %v9034_v56  ;;  %v6340_v3 = vsub.f32 %v21395_v46, %v19033_v1  ;;  %10508 = vrsqrt.f32 %v6486_v18  ;;  %v6170_v0 = vsub.f32 %v5850_v4, %v21396_v27  ;;  %v21406_v9 = vld [vmem:[#allocation252_spill] sm:$0xff]  ;;  %v21409_v56 = vld [vmem:[#allocation38_spill] sm:$0xff]  ;;  %v21410_v31 = vld [vmem:[#allocation111_spill] sm:$0xff] }
 0x895   :  { %v7916_v41 = vmul.f32 %v21391_v6, %v6796_v63  ;;  %v9035_v30 = vadd.f32 %v8718_v40, %v7915_v34  ;;  %v5852_v49 = vmul.f32 0.020408163, %v21397_v37  ;;  %v10497_v39 = vpop.eup %10496  ;;  %v6488_v58 = vadd.f32 1e-05, %v6168_v42  ;;  %v21408_v48 = vld [vmem:[#allocation212_spill] sm:$0xff]  ;;  %v21414_v6 = vld [vmem:[#allocation347_spill] sm:$0xff] }
 0x896   :  { %v6797_v20 = vmul.f32 %v10491_v21, %v21394_v24  ;;  %v21401_v36 = vsub.f32 %v21399_v54, %v21400_v35  ;;  %v19095_v19 = vmul.f32 %v19069_v26, %v19069_v26  ;;  %v6489_v57 = vadd.f32 1e-05, %v6169_v33  ;;  %v21404_v21 = vld [vmem:[#allocation139_spill] sm:$0xff]  ;;  %v8728_v4 = vpop.permute.xlu1 %8727  ;;  %v21417_v27 = vld [vmem:[#allocation133_spill] sm:$0xff]  ;;  %v21421_v54 = vld [vmem:[#allocation348_spill] sm:$0xff] }
 0x897   :  { %9195 = vst.msk [vmem:[%s19497_s7 + $0x3c0] sm:$0xff] %vm67_vm0, %v9035_v30  ;;  %v9036_v51 = vadd.f32 %v8723_v23, %v7916_v41  ;;  %v6171_v14 = vsub.f32 %v5851_v60, %v21402_v2  ;;  %v21405_v18 = vsub.f32 %v21403_v10, %v21404_v21  ;;  %v10499_v47 = vpop.eup %10498  ;;  %10510 = vrsqrt.f32 %v6487_v50  ;;  %v8733_v60 = vpop.permute.xlu0 %8732  ;;  %v21415_v53 = vld [vmem:[#allocation211_spill] sm:$0xff]  ;;  %v21416_v30 = vld [vmem:[#allocation101_spill] sm:$0xff] }
 0x898   :  { %v7917_v5 = vmul.f32 %v21398_v29, %v6797_v20  ;;  %v6798_v52 = vmul.f32 %v10493_v28, %v21401_v36  ;;  %v5853_v42 = vmul.f32 0.020408163, %v21406_v9  ;;  %v19108_v61 = vmul.f32 0.020408163, %v21408_v48  ;;  %v21420_v29 = vld [vmem:[#allocation254_spill] sm:$0xff]  ;;  %v21423_v2 = vld [vmem:[#allocation3_spill] sm:$0xff] }
 0x899   :  { %v6799_v25 = vmul.f32 %v10495_v32, %v21405_v18  ;;  %9196 = vst.msk [vmem:[%s19497_s7 + $0x3c8] sm:$0xff] %vm67_vm0, %v9036_v51  ;;  %v6490_v63 = vadd.f32 1e-05, %v6170_v0  ;;  %v6172_v28 = vsub.f32 %v5852_v49, %v21409_v56  ;;  %v21412_v33 = vsub.f32 %v21410_v31, %v21411_v44  ;;  %v10501_v40 = vpop.eup %10500  ;;  %v21413_v32 = vld [vmem:[#allocation253_spill] sm:$0xff]  ;;  %v21428_v48 = vld [vmem:[#allocation256_spill] sm:$0xff] }
 0x89a   :  { %v7918_v34 = vmul.f32 %v21407_v55, %v6798_v52  ;;  %v9037_v17 = vadd.f32 %v8728_v4, %v7917_v5  ;;  %10512 = vrsqrt.f32 %v6488_v58  ;;  %v5854_v50 = vmul.f32 0.020408163, %v21413_v32  ;;  %v8738_v49 = vpop.permute.xlu1 %8737  ;;  %v21429_v56 = vld [vmem:[#allocation60_spill] sm:$0xff] }
 0x89b   :  { %v6800_v15 = vmul.f32 %v10497_v39, %v21412_v33  ;;  %v7919_v41 = vmul.f32 %v21414_v6, %v6799_v25  ;;  %v19121_v24 = vmul.f32 0.020408163, %v21415_v53  ;;  %10514 = vrsqrt.f32 %v6489_v57  ;;  %v10503_v23 = vpop.eup %10502  ;;  %v21419_v39 = vld [vmem:[#allocation160_spill] sm:$0xff]  ;;  %v21422_v57 = vld [vmem:[#allocation205_spill] sm:$0xff]  ;;  %v8743_v21 = vpop.permute.xlu0 %8742 }
 0x89c   :  { %9197 = vst.msk [vmem:[%s19497_s7 + $0x3d0] sm:$0xff] %vm67_vm0, %v9037_v17  ;;  %v9038_v7 = vadd.f32 %v8733_v60, %v7918_v34  ;;  %v6491_v20 = vadd.f32 1e-05, %v6171_v14  ;;  %v21418_v0 = vsub.f32 %v21416_v30, %v21417_v27  ;;  %v6173_v58 = vsub.f32 %v5853_v42, %v21419_v39  ;;  %v21425_v25 = vld [vmem:[#allocation165_spill] sm:$0xff]  ;;  %v21436_v27 = vld [vmem:[#allocation8_spill] sm:$0xff] }
 0x89d   :  { %v5855_v5 = vmul.f32 0.020408163, %v21420_v29  ;;  %v7920_v35 = vmul.f32 %v21421_v54, %v6800_v15  ;;  %v9039_v36 = vadd.f32 %v8738_v49, %v7919_v41  ;;  %v19135_v52 = vmul.f32 %v19108_v61, %v19108_v61  ;;  %v10505_v18 = vpop.eup %10504  ;;  %v21427_v42 = vld [vmem:[#allocation349_spill] sm:$0xff]  ;;  %v21440_v54 = vld [vmem:[#allocation351_spill] sm:$0xff] }
 0x89e   :  { %v6801_v37 = vmul.f32 %v10499_v47, %v21418_v0  ;;  %9198 = vst.msk [vmem:[%s19497_s7 + $0x3d8] sm:$0xff] %vm67_vm0, %v9038_v7  ;;  %10516 = vrsqrt.f32 %v6490_v63  ;;  %v6492_v51 = vadd.f32 1e-05, %v6172_v28  ;;  %v21424_v14 = vsub.f32 %v21422_v57, %v21423_v2  ;;  %v21426_v47 = vld [vmem:[#allocation255_spill] sm:$0xff]  ;;  %v8748_v33 = vpop.permute.xlu1 %8747  ;;  %v21434_v7 = vld [vmem:[#allocation25_spill] sm:$0xff]  ;;  %v21437_v0 = vld [vmem:[#allocation74_spill] sm:$0xff] }
 0x89f   :  { %v6174_v4 = vsub.f32 %v5854_v50, %v21425_v25  ;;  %v5856_v9 = vmul.f32 0.020408163, %v21426_v47  ;;  %9199 = vst.msk [vmem:[%s19497_s7 + $0x3e0] sm:$0xff] %vm67_vm0, %v9039_v36  ;;  %v9040_v34 = vadd.f32 %v8743_v21, %v7920_v35  ;;  %v19149_v17 = vmul.f32 %v19121_v24, %v19121_v24  ;;  %v21430_v28 = vld [vmem:[#allocation147_spill] sm:$0xff]  ;;  %v10507_v15 = vpop.eup %10506  ;;  %v21433_v50 = vld [vmem:[#allocation350_spill] sm:$0xff]  ;;  %v21439_v29 = vld [vmem:[#allocation93_spill] sm:$0xff] }
 0x8a0   :  { %v6802_v10 = vmul.f32 %v10501_v40, %v21424_v14  ;;  %v7921_v55 = vmul.f32 %v21427_v42, %v6801_v37  ;;  %10518 = vrsqrt.f32 %v6491_v20  ;;  %v5857_v63 = vmul.f32 0.020408163, %v21428_v48  ;;  %v21432_v40 = vld [vmem:[#allocation91_spill] sm:$0xff]  ;;  %v21435_v20 = vld [vmem:[#allocation257_spill] sm:$0xff]  ;;  %v21445_v25 = vld [vmem:[#allocation78_spill] sm:$0xff] }
 0x8a1   :  { %v21431_v31 = vsub.f32 %v21429_v56, %v21430_v28  ;;  %v6493_v60 = vadd.f32 1e-05, %v6173_v58  ;;  %v6175_v32 = vsub.f32 %v5855_v5, %v21432_v40  ;;  %9200 = vst.msk [vmem:[%s19497_s7 + $0x3e8] sm:$0xff] %vm67_vm0, %v9040_v34  ;;  %v19162_v53 = vmul.f32 0.020408163, %v21434_v7  ;;  %v10509_v39 = vpop.eup %10508  ;;  %v21442_v2 = vld [vmem:[#allocation171_spill] sm:$0xff] }
 0x8a2   :  { %v7922_v6 = vmul.f32 %v21433_v50, %v6802_v10  ;;  %v9041_v41 = vadd.f32 %v8748_v33, %v7921_v55  ;;  %10520 = vrsqrt.f32 %v6492_v51  ;;  %v5858_v30 = vmul.f32 0.020408163, %v21435_v20  ;;  %v21441_v51 = vld [vmem:[#allocation72_spill] sm:$0xff]  ;;  %v21443_v10 = vld [vmem:[#allocation258_spill] sm:$0xff] }
 0x8a3   :  { %v6803_v44 = vmul.f32 %v10503_v23, %v21431_v31  ;;  %v21438_v37 = vsub.f32 %v21436_v27, %v21437_v0  ;;  %v8753_v23 = vpop.permute.xlu0 %8752  ;;  %v6494_v58 = vadd.f32 1e-05, %v6174_v4  ;;  %v6176_v5 = vsub.f32 %v5856_v9, %v21439_v29  ;;  %v8758_v9 = vpop.permute.xlu1 %8757  ;;  %v21447_v55 = vld [vmem:[#allocation352_spill] sm:$0xff]  ;;  %v21455_v29 = vld [vmem:[#allocation354_spill] sm:$0xff] }
 0x8a4   :  { %9201 = vst.msk [vmem:[%s19497_s7 + $0x3f0] sm:$0xff] %vm67_vm0, %v9041_v41  ;;  %v9042_v36 = vadd.f32 %v8753_v23, %v7922_v6  ;;  %v19175_v57 = vmul.f32 0.020408163, %v21441_v51  ;;  %v6177_v14 = vsub.f32 %v5857_v63, %v21442_v2  ;;  %v5859_v21 = vmul.f32 0.020408163, %v21443_v10  ;;  %v10511_v56 = vpop.eup %10510  ;;  %v21448_v28 = vld [vmem:[#allocation4_spill] sm:$0xff] }
 0x8a5   :  { %v6804_v49 = vmul.f32 %v10505_v18, %v21438_v37  ;;  %v7923_v35 = vmul.f32 %v21440_v54, %v6803_v44  ;;  %v21444_v18 = vld [vmem:[#allocation68_spill] sm:$0xff]  ;;  %10522 = vrsqrt.f32 %v6493_v60  ;;  %v6495_v42 = vadd.f32 1e-05, %v6175_v32  ;;  %v21449_v44 = vld [vmem:[#allocation259_spill] sm:$0xff]  ;;  %v21453_v41 = vld [vmem:[#allocation353_spill] sm:$0xff] }
 0x8a6   :  { %v21446_v4 = vsub.f32 %v21444_v18, %v21445_v25  ;;  %9202 = vst.msk [vmem:[%s19497_s7 + $0x3f8] sm:$0xff] %vm67_vm0, %v9042_v36  ;;  %v19189_v63 = vmul.f32 %v19162_v53, %v19162_v53  ;;  %v6178_v31 = vsub.f32 %v5858_v30, %v21448_v28  ;;  %v5860_v33 = vmul.f32 0.020408163, %v21449_v44  ;;  %v21451_v60 = vld [vmem:[#allocation143_spill] sm:$0xff]  ;;  %v21456_v54 = vld [vmem:[#allocation2_spill] sm:$0xff]  ;;  %v21460_v18 = vld [vmem:[#allocation261_spill] sm:$0xff] }
 0x8a7   :  { %v7924_v34 = vmul.f32 %v21447_v55, %v6804_v49  ;;  %v9043_v48 = vadd.f32 %v8758_v9, %v7923_v35  ;;  %v8763_v50 = vpop.permute.xlu0 %8762  ;;  %10524 = vrsqrt.f32 %v6494_v58  ;;  %v6496_v6 = vadd.f32 1e-05, %v6176_v5  ;;  %v10513_v27 = vpop.eup %10512  ;;  %v21454_v49 = vld [vmem:[#allocation260_spill] sm:$0xff]  ;;  %v21457_v35 = vld [vmem:[#allocation157_spill] sm:$0xff]  ;;  %v21461_v9 = vld [vmem:[#allocation355_spill] sm:$0xff] }
 0x8a8   :  { %v6805_v47 = vmul.f32 %v10507_v15, %v21446_v4  ;;  %v21450_v15 = vld [vmem:[#allocation201_spill] sm:$0xff]  ;;  %v19203_v30 = vmul.f32 %v19175_v57, %v19175_v57  ;;  %v6497_v0 = vadd.f32 1e-05, %v6177_v14  ;;  %v6179_v37 = vsub.f32 %v5859_v21, %v18963_v59  ;;  %v10515_v58 = vpop.eup %10514  ;;  %v21459_v14 = vld [vmem:[#allocation28_spill] sm:$0xff]  ;;  %v21462_v55 = vld [vmem:[#allocation146_spill] sm:$0xff] }
 0x8a9   :  { %v21452_v40 = vsub.f32 %v21450_v15, %v21451_v60  ;;  %9203 = vst.msk [vmem:[%s19497_s7 + $0x400] sm:$0xff] %vm67_vm0, %v9043_v48  ;;  %v9044_v20 = vadd.f32 %v8763_v50, %v7924_v34  ;;  %v5861_v23 = vmul.f32 0.020408163, %v21454_v49  ;;  %10526 = vrsqrt.f32 %v6495_v42  ;;  %v21463_v34 = vld [vmem:[#allocation77_spill] sm:$0xff]  ;;  %v21465_v44 = vld [vmem:[#allocation262_spill] sm:$0xff]  ;;  %v21467_v50 = vld [vmem:[#allocation356_spill] sm:$0xff] }
 0x8aa   :  { %v7925_v7 = vmul.f32 %v21453_v41, %v6805_v47  ;;  %v21458_v36 = vsub.f32 %v21456_v54, %v21457_v35  ;;  %v19216_v10 = vmul.f32 0.020408163, %v21459_v14  ;;  %v6498_v59 = vadd.f32 1e-05, %v6178_v31  ;;  %v21468_v41 = vld [vmem:[#allocation141_spill] sm:$0xff]  ;;  %v21471_v49 = vld [vmem:[#allocation263_spill] sm:$0xff] }
 0x8ab   :  { %v6806_v32 = vmul.f32 %v10509_v39, %v21452_v40  ;;  %v8768_v39 = vpop.permute.xlu1 %8767  ;;  %9204 = vst.msk [vmem:[%s19497_s7 + $0x408] sm:$0xff] %vm67_vm0, %v9044_v20  ;;  %v6180_v21 = vsub.f32 %v5860_v33, %v19056_v11  ;;  %v5862_v25 = vmul.f32 0.020408163, %v21460_v18  ;;  %v8773_v4 = vpop.permute.xlu0 %8772  ;;  %10528 = vrsqrt.f32 %v6496_v6  ;;  %v21466_v40 = vld [vmem:[#allocation154_spill] sm:$0xff]  ;;  %v21472_v54 = vld [vmem:[#allocation357_spill] sm:$0xff] }
 0x8ac   :  { %v6807_v51 = vmul.f32 %v10511_v56, %v21458_v36  ;;  %v9045_v2 = vadd.f32 %v8768_v39, %v7925_v7  ;;  %v10517_v47 = vpop.eup %10516  ;;  %v21464_v48 = vsub.f32 %v21462_v55, %v21463_v34  ;;  %10530 = vrsqrt.f32 %v6497_v0  ;;  %v21469_v7 = vld [vmem:[#allocation142_spill] sm:$0xff]  ;;  %v21474_v36 = vld [vmem:[#allocation151_spill] sm:$0xff] }
 0x8ad   :  { %v7926_v5 = vmul.f32 %v21455_v29, %v6806_v32  ;;  %v6499_v31 = vadd.f32 1e-05, %v6179_v37  ;;  %v6181_v11 = vsub.f32 %v5861_v23, %v18898_v43  ;;  %v5863_v33 = vmul.f32 0.020408163, %v21465_v44  ;;  %v10519_v60 = vpop.eup %10518  ;;  %v21473_v35 = vld [vmem:[#allocation158_spill] sm:$0xff] }
 0x8ae   :  { %v7927_v42 = vmul.f32 %v21461_v9, %v6807_v51  ;;  %v6808_v56 = vmul.f32 %v10513_v27, %v21464_v48  ;;  %9205 = vst.msk [vmem:[%s19497_s7 + $0x410] sm:$0xff] %vm67_vm0, %v9045_v2  ;;  %v19231_v32 = vmul.f32 0.020408163, %v21466_v40  ;;  %v21470_v20 = vsub.f32 %v21468_v41, %v21469_v7  ;;  %v21476_v14 = vld [vmem:[#allocation194_spill] sm:$0xff]  ;;  %v21485_v41 = vld [vmem:[#allocation59_spill] sm:$0xff] }
 0x8af   :  { %v9046_v28 = vadd.f32 %v8773_v4, %v7926_v5  ;;  %v8778_v15 = vpop.permute.xlu1 %8777  ;;  %10532 = vrsqrt.f32 %v6498_v59  ;;  %v6500_v43 = vadd.f32 1e-05, %v6180_v21  ;;  %v6182_v37 = vsub.f32 %v5862_v25, %v18949_v38  ;;  %v8783_v39 = vpop.permute.xlu0 %8782  ;;  %v21477_v4 = vld [vmem:[#allocation264_spill] sm:$0xff]  ;;  %v21479_v34 = vld [vmem:[#allocation82_spill] sm:$0xff] }
 0x8b0   :  { %v7928_v6 = vmul.f32 %v21467_v50, %v6808_v56  ;;  %v6809_v27 = vmul.f32 %v10515_v58, %v21470_v20  ;;  %v9047_v0 = vadd.f32 %v8778_v15, %v7927_v42  ;;  %v5864_v23 = vmul.f32 0.020408163, %v21471_v49  ;;  %v10521_v29 = vpop.eup %10520  ;;  %v21478_v42 = vld [vmem:[#allocation358_spill] sm:$0xff]  ;;  %v21482_v15 = vld [vmem:[#allocation265_spill] sm:$0xff]  ;;  %v21483_v50 = vld [vmem:[#allocation359_spill] sm:$0xff] }
 0x8b1   :  { %9206 = vst.msk [vmem:[%s19497_s7 + $0x418] sm:$0xff] %vm67_vm0, %v9046_v28  ;;  %v19245_v5 = vmul.f32 %v19216_v10, %v19216_v10  ;;  %v21475_v51 = vsub.f32 %v21473_v35, %v21474_v36  ;;  %v19256_v59 = vmul.f32 0.020408163, %v21476_v14  ;;  %10534 = vrsqrt.f32 %v6499_v31  ;;  %v21490_v35 = vld [vmem:[#allocation64_spill] sm:$0xff]  ;;  %v21492_v14 = vld [vmem:[#allocation218_spill] sm:$0xff] }
 0x8b2   :  { %v7929_v58 = vmul.f32 %v21472_v54, %v6809_v27  ;;  %9207 = vst.msk [vmem:[%s19497_s7 + $0x420] sm:$0xff] %vm67_vm0, %v9047_v0  ;;  %v9048_v38 = vadd.f32 %v8783_v39, %v7928_v6  ;;  %v6501_v21 = vadd.f32 1e-05, %v6181_v11  ;;  %v6183_v18 = vsub.f32 %v5863_v33, %v19149_v17  ;;  %v10523_v44 = vpop.eup %10522  ;;  %v21488_v54 = vld [vmem:[#allocation360_spill] sm:$0xff] }
 0x8b3   :  { %v6810_v2 = vmul.f32 %v10517_v47, %v21475_v51  ;;  %v8788_v25 = vpop.permute.xlu1 %8787  ;;  %v5865_v9 = vmul.f32 0.020408163, %v21477_v4  ;;  %v21480_v47 = vld [vmem:[#allocation65_spill] sm:$0xff]  ;;  %v6027_v31 = vmul.f32 %v19231_v32, %v19231_v32  ;;  %10536 = vrsqrt.f32 %v6500_v43  ;;  %v8793_v33 = vpop.permute.xlu0 %8792 }
 0x8b4   :  { %v21481_v48 = vsub.f32 %v21479_v34, %v21480_v47  ;;  %9208 = vst.msk [vmem:[%s19497_s7 + $0x428] sm:$0xff] %vm67_vm0, %v9048_v38  ;;  %v9049_v28 = vadd.f32 %v8788_v25, %v7929_v58  ;;  %v6502_v17 = vadd.f32 1e-05, %v6182_v37  ;;  %v6184_v11 = vsub.f32 %v5864_v23, %v19189_v63  ;;  %v10525_v0 = vpop.eup %10524  ;;  %v21487_v37 = vld [vmem:[#allocation266_spill] sm:$0xff]  ;;  %v21493_v25 = vld [vmem:[#allocation267_spill] sm:$0xff]  ;;  %v21495_v34 = vld [vmem:[#allocation84_spill] sm:$0xff] }
 0x8b5   :  { %v7930_v55 = vmul.f32 %v21478_v42, %v6810_v2  ;;  %v5866_v40 = vmul.f32 0.020408163, %v21482_v15  ;;  %v6028_v43 = vmul.f32 %v19256_v59, %v19256_v59  ;;  %10538 = vrsqrt.f32 %v6501_v21  ;;  %v21494_v42 = vld [vmem:[#allocation361_spill] sm:$0xff]  ;;  %v21496_v47 = vld [vmem:[#allocation162_spill] sm:$0xff]  ;;  %v21499_v15 = vld [vmem:[#allocation268_spill] sm:$0xff] }
 0x8b6   :  { %v6811_v56 = vmul.f32 %v10519_v60, %v21481_v48  ;;  %v21484_v60 = vld [vmem:[#allocation7_spill] sm:$0xff]  ;;  %9209 = vst.msk [vmem:[%s19497_s7 + $0x430] sm:$0xff] %vm67_vm0, %v9049_v28  ;;  %v6503_v63 = vadd.f32 1e-05, %v6183_v18  ;;  %v5867_v49 = vmul.f32 0.020408163, %v21487_v37  ;;  %v6185_v39 = vsub.f32 %v5865_v9, %v19095_v19  ;;  %v10527_v38 = vpop.eup %10526 }
 0x8b7   :  { %v21486_v7 = vsub.f32 %v21484_v60, %v21485_v41  ;;  %v9050_v27 = vadd.f32 %v8793_v33, %v7930_v55  ;;  %v8798_v23 = vpop.permute.xlu1 %8797  ;;  %v19293_v21 = vmul.f32 0.020408163, %v21492_v14  ;;  %10540 = vrsqrt.f32 %v6502_v17  ;;  %v8803_v4 = vpop.permute.xlu0 %8802  ;;  %v21498_v17 = vld [vmem:[#allocation216_spill] sm:$0xff]  ;;  %v21500_v60 = vld [vmem:[#allocation362_spill] sm:$0xff] }
 0x8b8   :  { %v7931_v6 = vmul.f32 %v21483_v50, %v6811_v56  ;;  %v6504_v18 = vadd.f32 1e-05, %v6184_v11  ;;  %v5868_v19 = vmul.f32 0.020408163, %v21493_v25  ;;  %v6186_v9 = vsub.f32 %v5866_v40, %v19135_v52  ;;  %v21509_v25 = vld [vmem:[#allocation221_spill] sm:$0xff] }
 0x8b9   :  { %v6812_v20 = vmul.f32 %v10521_v29, %v21486_v7  ;;  %v21489_v29 = vld [vmem:[#allocation140_spill] sm:$0xff]  ;;  %9210 = vst.msk [vmem:[%s19497_s7 + $0x438] sm:$0xff] %vm67_vm0, %v9050_v27  ;;  %v21497_v48 = vsub.f32 %v21495_v34, %v21496_v47  ;;  %v19306_v11 = vmul.f32 0.020408163, %v21498_v17  ;;  %10542 = vrsqrt.f32 %v6503_v63 }
 0x8ba   :  { %v21491_v36 = vsub.f32 %v21489_v29, %v21490_v35  ;;  %v9051_v2 = vadd.f32 %v8798_v23, %v7931_v6  ;;  %v6187_v33 = vsub.f32 %v5867_v49, %v6027_v31  ;;  %v5869_v52 = vmul.f32 0.020408163, %v21499_v15  ;;  %v21501_v7 = vld [vmem:[#allocation148_spill] sm:$0xff]  ;;  %v21504_v49 = vld [vmem:[#allocation269_spill] sm:$0xff]  ;;  %v21505_v29 = vld [vmem:[#allocation363_spill] sm:$0xff] }
 0x8bb   :  { %v7932_v58 = vmul.f32 %v21488_v54, %v6812_v20  ;;  %v6814_v56 = vmul.f32 %v10525_v0, %v21497_v48  ;;  %v8808_v40 = vpop.permute.xlu1 %8807  ;;  %v6505_v6 = vadd.f32 1e-05, %v6185_v39  ;;  %v21502_v20 = vld [vmem:[#allocation14_spill] sm:$0xff]  ;;  %v6031_v31 = vmul.f32 %v19293_v21, %v19293_v21  ;;  %v8813_v39 = vpop.permute.xlu0 %8812 }
 0x8bc   :  { %v6813_v51 = vmul.f32 %v10523_v44, %v21491_v36  ;;  %9211 = vst.msk [vmem:[%s19497_s7 + $0x440] sm:$0xff] %vm67_vm0, %v9051_v2  ;;  %v10529_v44 = vpop.eup %10528  ;;  %v21503_v27 = vsub.f32 %v21501_v7, %v21502_v20  ;;  %10544 = vrsqrt.f32 %v6504_v18  ;;  %v6188_v63 = vsub.f32 %v5868_v19, %v6028_v43  ;;  %v21506_v36 = vld [vmem:[#allocation62_spill] sm:$0xff]  ;;  %v21519_v20 = vld [vmem:[#allocation271_spill] sm:$0xff] }
 0x8bd   :  { %v9052_v28 = vadd.f32 %v8803_v4, %v7932_v58  ;;  %v10531_v50 = vpop.eup %10530  ;;  %v7934_v41 = vmul.f32 %v21500_v60, %v6814_v56  ;;  %v5870_v23 = vmul.f32 0.020408163, %v21504_v49  ;;  %v6506_v58 = vadd.f32 1e-05, %v6186_v9  ;;  %v21510_v4 = vld [vmem:[#allocation5_spill] sm:$0xff]  ;;  %v21511_v9 = vld [vmem:[#allocation168_spill] sm:$0xff] }
 0x8be   :  { %v7933_v55 = vmul.f32 %v21494_v42, %v6813_v51  ;;  %v6815_v0 = vmul.f32 %v10527_v38, %v21503_v27  ;;  %v10533_v54 = vpop.eup %10532  ;;  %v21507_v51 = vld [vmem:[#allocation11_spill] sm:$0xff]  ;;  %v19329_v18 = vmul.f32 0.020408163, %v21509_v25  ;;  %v6507_v43 = vadd.f32 1e-05, %v6187_v33  ;;  %v21513_v48 = vld [vmem:[#allocation270_spill] sm:$0xff] }
 0x8bf   :  { %9212 = vst.msk [vmem:[%s19497_s7 + $0x448] sm:$0xff] %vm67_vm0, %v9052_v28  ;;  %v21508_v2 = vsub.f32 %v21506_v36, %v21507_v51  ;;  %v9054_v14 = vadd.f32 %v8813_v39, %v7934_v41  ;;  %v6189_v19 = vsub.f32 %v5869_v52, %v19203_v30  ;;  %v21512_v42 = vsub.f32 %v21510_v4, %v21511_v9  ;;  %v8818_v34 = vpop.permute.xlu1 %8817  ;;  %v10535_v47 = vpop.eup %10534  ;;  %v21514_v28 = vld [vmem:[#allocation364_spill] sm:$0xff]  ;;  %v21515_v33 = vld [vmem:[#allocation219_spill] sm:$0xff]  ;;  %v21522_v36 = vld [vmem:[#allocation366_spill] sm:$0xff] }
 0x8c0   :  { %v9053_v37 = vadd.f32 %v8808_v40, %v7933_v55  ;;  %v7935_v35 = vmul.f32 %v21505_v29, %v6815_v0  ;;  %10546 = vrsqrt.f32 %v6505_v6  ;;  %v5871_v56 = vmul.f32 0.020408163, %v21513_v48  ;;  %v21516_v40 = vld [vmem:[#allocation58_spill] sm:$0xff]  ;;  %v8823_v41 = vpop.permute.xlu0 %8822  ;;  %v10537_v7 = vpop.eup %10536  ;;  %v21520_v0 = vld [vmem:[#allocation365_spill] sm:$0xff]  ;;  %v21523_v25 = vld [vmem:[#allocation272_spill] sm:$0xff] }
 0x8c1   :  { %v6816_v38 = vmul.f32 %v10529_v44, %v21508_v2  ;;  %v6817_v55 = vmul.f32 %v10531_v50, %v21512_v42  ;;  %9214 = vst.msk [vmem:[%s19497_s7 + $0x458] sm:$0xff] %vm67_vm0, %v9054_v14  ;;  %v19342_v15 = vmul.f32 0.020408163, %v21515_v33  ;;  %v6508_v30 = vadd.f32 1e-05, %v6188_v63  ;;  %v21517_v50 = vld [vmem:[#allocation170_spill] sm:$0xff] }
 0x8c2   :  { %9213 = vst.msk [vmem:[%s19497_s7 + $0x450] sm:$0xff] %vm67_vm0, %v9053_v37  ;;  %v9055_v17 = vadd.f32 %v8818_v34, %v7935_v35  ;;  %v6190_v52 = vsub.f32 %v5870_v23, %v19245_v5  ;;  %v21518_v60 = vsub.f32 %v21516_v40, %v21517_v50  ;;  %10548 = vrsqrt.f32 %v6506_v58  ;;  %v21521_v29 = vld [vmem:[#allocation273_spill] sm:$0xff]  ;;  %v21525_v42 = vld [vmem:[#allocation50_spill] sm:$0xff] }
 0x8c3   :  { %v7936_v44 = vmul.f32 %v21514_v28, %v6816_v38  ;;  %v5872_v27 = vmul.f32 0.020408163, %v21519_v20  ;;  %v7937_v37 = vmul.f32 %v21520_v0, %v6817_v55  ;;  %v6032_v5 = vmul.f32 %v19329_v18, %v19329_v18  ;;  %v8828_v39 = vpop.permute.xlu1 %8827  ;;  %v21530_v20 = vld [vmem:[#allocation370_spill] sm:$0xff] }
 0x8c4   :  { %v6818_v6 = vmul.f32 %v10533_v54, %v21518_v60  ;;  %9215 = vst.msk [vmem:[%s19497_s7 + $0x460] sm:$0xff] %vm67_vm0, %v9055_v17  ;;  %10550 = vrsqrt.f32 %v6507_v43  ;;  %v6509_v63 = vadd.f32 1e-05, %v6189_v19  ;;  %v6819_v23 = vmul.f32 %v10535_v47, %v6339_v16  ;;  %v10539_v54 = vpop.eup %10538  ;;  %v8833_v12 = vpop.permute.xlu0 %8832  ;;  %v21524_v19 = vld [vmem:[#allocation367_spill] sm:$0xff]  ;;  %v21529_v60 = vld [vmem:[#allocation42_spill] sm:$0xff] }
 0x8c5   :  { %v9056_v49 = vadd.f32 %v8823_v41, %v7936_v44  ;;  %v6191_v58 = vsub.f32 %v5871_v56, %v6031_v31  ;;  %v5873_v35 = vmul.f32 0.020408163, %v21521_v29  ;;  %v9057_v2 = vadd.f32 %v8828_v39, %v7937_v37  ;;  %v10541_v16 = vpop.eup %10540  ;;  %v21526_v56 = vld [vmem:[#allocation368_spill] sm:$0xff]  ;;  %v21532_v39 = vld [vmem:[#allocation371_spill] sm:$0xff] }
 0x8c6   :  { %v7938_v51 = vmul.f32 %v21522_v36, %v6818_v6  ;;  %v6033_v38 = vmul.f32 %v19306_v11, %v19306_v11  ;;  %10552 = vrsqrt.f32 %v6508_v30  ;;  %v6510_v14 = vadd.f32 1e-05, %v6190_v52  ;;  %v10543_v34 = vpop.eup %10542  ;;  %v21527_v44 = vld [vmem:[#allocation44_spill] sm:$0xff]  ;;  %v21528_v52 = vld [vmem:[#allocation369_spill] sm:$0xff] }
 0x8c7   :  { %9216 = vst.msk [vmem:[%s19497_s7 + $0x468] sm:$0xff] %vm67_vm0, %v9056_v49  ;;  %v6820_v62 = vmul.f32 %v10537_v7, %v6340_v3  ;;  %v6192_v31 = vsub.f32 %v5872_v27, %v6032_v5  ;;  %v5874_v43 = vmul.f32 0.020408163, %v21523_v25  ;;  %v7939_v4 = vmul.f32 %v21524_v19, %v6819_v23  ;;  %9217 = vst.msk [vmem:[%s19497_s7 + $0x470] sm:$0xff] %vm67_vm0, %v9057_v2  ;;  %v8838_v3 = vpop.permute.xlu1 %8837  ;;  %v21531_v49 = vld [vmem:[#allocation15_spill] sm:$0xff] }
 0x8c8   :  { %v9058_v9 = vadd.f32 %v8833_v12, %v7938_v51  ;;  %v6342_v55 = vsub.f32 %v21525_v42, %v18922_v13  ;;  %v6034_v1 = vmul.f32 %v19342_v15, %v19342_v15  ;;  %10554 = vrsqrt.f32 %v6509_v63  ;;  %v8843_v30 = vpop.permute.xlu0 %8842  ;;  %v21535_v12 = vld [vmem:[#allocation17_spill] sm:$0xff] }
 0x8c9   :  { %v6821_v46 = vmul.f32 %v10539_v54, %v6341_v22  ;;  %v6511_v47 = vadd.f32 1e-05, %v6191_v58  ;;  %v6193_v48 = vsub.f32 %v5873_v35, %v6033_v38  ;;  %v7940_v28 = vmul.f32 %v21526_v56, %v6820_v62  ;;  %v10545_v8 = vpop.eup %10544  ;;  %v21533_v35 = vld [vmem:[#allocation40_spill] sm:$0xff] }
 0x8ca   :  { %9218 = vst.msk [vmem:[%s19497_s7 + $0x478] sm:$0xff] %vm67_vm0, %v9058_v9  ;;  %v9059_v13 = vadd.f32 %v8838_v3, %v7939_v4  ;;  %v6343_v17 = vsub.f32 %v21527_v44, %v19121_v24  ;;  %10556 = vrsqrt.f32 %v6510_v14  ;;  %v6822_v33 = vmul.f32 %v10541_v16, %v6342_v55  ;;  %v21537_v55 = vld [vmem:[#allocation9_spill] sm:$0xff]  ;;  %v21539_v56 = vld [vmem:[#allocation164_spill] sm:$0xff] }
 0x8cb   :  { %v6512_v45 = vadd.f32 1e-05, %v6192_v31  ;;  %v6194_v22 = vsub.f32 %v5874_v43, %v6034_v1  ;;  %v7941_v40 = vmul.f32 %v21528_v52, %v6821_v46  ;;  %v9060_v50 = vadd.f32 %v8843_v30, %v7940_v28  ;;  %v8848_v7 = vpop.permute.xlu1 %8847  ;;  %v21536_v43 = vld [vmem:[#allocation373_spill] sm:$0xff]  ;;  %v21538_v46 = vld [vmem:[#allocation374_spill] sm:$0xff]  ;;  %v21541_v30 = vld [vmem:[#allocation36_spill] sm:$0xff] }
 0x8cc   :  { %9219 = vst.msk [vmem:[%s19497_s7 + $0x480] sm:$0xff] %vm67_vm0, %v9059_v13  ;;  %v6344_v6 = vsub.f32 %v21529_v60, %v19162_v53  ;;  %v6823_v41 = vmul.f32 %v10543_v34, %v6343_v17  ;;  %10558 = vrsqrt.f32 %v6511_v47  ;;  %v6513_v24 = vadd.f32 1e-05, %v6193_v48  ;;  %v8853_v23 = vpop.permute.xlu0 %8852  ;;  %v21540_v13 = vld [vmem:[#allocation375_spill] sm:$0xff] }
 0x8cd   :  { %v7942_v27 = vmul.f32 %v21530_v20, %v6822_v33  ;;  %9220 = vst.msk [vmem:[%s19497_s7 + $0x488] sm:$0xff] %vm67_vm0, %v9060_v50  ;;  %v9061_v0 = vadd.f32 %v8848_v7, %v7941_v40  ;;  %v10547_v37 = vpop.eup %10546  ;;  %v6345_v5 = vsub.f32 %v21531_v49, %v19069_v26  ;;  %10560 = vrsqrt.f32 %v6512_v45  ;;  %v21534_v26 = vld [vmem:[#allocation372_spill] sm:$0xff]  ;;  %v21543_v60 = vld [vmem:[#allocation179_spill] sm:$0xff]  ;;  %v21546_v49 = vld [vmem:[#allocation378_spill] sm:$0xff] }
 0x8ce   :  { %v6824_v63 = vmul.f32 %v10545_v8, %v6344_v6  ;;  %v6514_v53 = vadd.f32 1e-05, %v6194_v22  ;;  %v7943_v54 = vmul.f32 %v21532_v39, %v6823_v41  ;;  %v6346_v36 = vsub.f32 %v21533_v35, %v19108_v61  ;;  %v21542_v45 = vld [vmem:[#allocation376_spill] sm:$0xff]  ;;  %v21544_v41 = vld [vmem:[#allocation377_spill] sm:$0xff]  ;;  %v21547_v39 = vld [vmem:[#allocation175_spill] sm:$0xff] }
 0x8cf   :  { %9221 = vst.msk [vmem:[%s19497_s7 + $0x490] sm:$0xff] %vm67_vm0, %v9061_v0  ;;  %v9062_v58 = vadd.f32 %v8853_v23, %v7942_v27  ;;  %v10549_v29 = vpop.eup %10548  ;;  %v8858_v51 = vpop.permute.xlu1 %8857  ;;  %10562 = vrsqrt.f32 %v6513_v24  ;;  %v6825_v14 = vmul.f32 %v10547_v37, %v6345_v5  ;;  %v6347_v16 = vsub.f32 %v21535_v12, %v19231_v32  ;;  %v21545_v0 = vld [vmem:[#allocation56_spill] sm:$0xff] }
 0x8d0   :  { %v7944_v38 = vmul.f32 %v21534_v26, %v6824_v63  ;;  %v9063_v62 = vadd.f32 %v8858_v51, %v7943_v54  ;;  %v8863_v31 = vpop.permute.xlu0 %8862  ;;  %10564 = vrsqrt.f32 %v6514_v53  ;;  %v6826_v19 = vmul.f32 %v10549_v29, %v6346_v36 }
 0x8d1   :  { %v10551_v2 = vpop.eup %10550  ;;  %9222 = vst.msk [vmem:[%s19497_s7 + $0x498] sm:$0xff] %vm67_vm0, %v9062_v58  ;;  %v7945_v61 = vmul.f32 %v21536_v43, %v6825_v14  ;;  %v6348_v1 = vsub.f32 %v21537_v55, %v19256_v59  ;;  %v6349_v28 = vsub.f32 %v21539_v56, %v19175_v57  ;;  %v6350_v8 = vsub.f32 %v21541_v30, %v19216_v10  ;;  %v21548_v58 = vld [vmem:[#allocation379_spill] sm:$0xff] }
 0x8d2   :  { %9223 = vst.msk [vmem:[%s19497_s7 + $0x4a0] sm:$0xff] %vm67_vm0, %v9063_v62  ;;  %v9064_v4 = vadd.f32 %v8863_v31, %v7944_v38  ;;  %v7946_v3 = vmul.f32 %v21538_v46, %v6826_v19  ;;  %v6827_v32 = vmul.f32 %v10551_v2, %v6347_v16  ;;  %v6351_v6 = vsub.f32 %v21543_v60, %v19293_v21  ;;  %v21549_v2 = vld [vmem:[#allocation177_spill] sm:$0xff]  ;;  %v21550_v38 = vld [vmem:[#allocation380_spill] sm:$0xff] }
 0x8d3   :  { %v10553_v25 = vpop.eup %10552  ;;  %v8868_v9 = vpop.permute.xlu1 %8867  ;;  %v6352_v37 = vsub.f32 %v21545_v0, %v19329_v18  ;;  %v6353_v54 = vsub.f32 %v21547_v39, %v19306_v11  ;;  %v6354_v26 = vsub.f32 %v21549_v2, %v19342_v15  ;;  %v21551_v16 = vld [vmem:[#allocation381_spill] sm:$0xff] }
 0x8d4   :  { %9224 = vst.msk [vmem:[%s19497_s7 + $0x4a8] sm:$0xff] %vm67_vm0, %v9064_v4  ;;  %v9065_v34 = vadd.f32 %v8868_v9, %v7945_v61  ;;  %v8873_v47 = vpop.permute.xlu0 %8872  ;;  %v7947_v44 = vmul.f32 %v21540_v13, %v6827_v32  ;;  %v6828_v17 = vmul.f32 %v10553_v25, %v6348_v1  ;;  %v21552_v61 = vld [vmem:[#allocation382_spill] sm:$0xff] }
 0x8d5   :  { %v10555_v42 = vpop.eup %10554  ;;  %v9066_v59 = vadd.f32 %v8873_v47, %v7946_v3 }
 0x8d6   :  { %9225 = vst.msk [vmem:[%s19497_s7 + $0x4b0] sm:$0xff] %vm67_vm0, %v9065_v34  ;;  %v7948_v22 = vmul.f32 %v21542_v45, %v6828_v17  ;;  %v6829_v52 = vmul.f32 %v10555_v42, %v6349_v28 }
 0x8d7   :  { %v10557_v48 = vpop.eup %10556  ;;  %v8878_v33 = vpop.permute.xlu1 %8877  ;;  %9226 = vst.msk [vmem:[%s19497_s7 + $0x4b8] sm:$0xff] %vm67_vm0, %v9066_v59 }
 0x8d8   :  { %v9067_v57 = vadd.f32 %v8878_v33, %v7947_v44  ;;  %v8883_v50 = vpop.permute.xlu0 %8882  ;;  %v7949_v7 = vmul.f32 %v21544_v41, %v6829_v52  ;;  %v6830_v24 = vmul.f32 %v10557_v48, %v6350_v8 }
 0x8d9   :  { %v10559_v40 = vpop.eup %10558  ;;  %v9068_v10 = vadd.f32 %v8883_v50, %v7948_v22 }
 0x8da   :  { %9227 = vst.msk [vmem:[%s19497_s7 + $0x4c0] sm:$0xff] %vm67_vm0, %v9067_v57  ;;  %v10561_v20 = vpop.eup %10560  ;;  %v7950_v5 = vmul.f32 %v21546_v49, %v6830_v24  ;;  %v6831_v63 = vmul.f32 %v10559_v40, %v6351_v6 }
 0x8db   :  { %v8888_v27 = vpop.permute.xlu1 %8887  ;;  %9228 = vst.msk [vmem:[%s19497_s7 + $0x4c8] sm:$0xff] %vm67_vm0, %v9068_v10  ;;  %v6832_v35 = vmul.f32 %v10561_v20, %v6352_v37 }
 0x8dc   :  { %v9069_v21 = vadd.f32 %v8888_v27, %v7949_v7  ;;  %v10563_v23 = vpop.eup %10562  ;;  %v8893_v53 = vpop.permute.xlu0 %8892  ;;  %v7951_v29 = vmul.f32 %v21548_v58, %v6831_v63 }
 0x8dd   :  { %v9070_v18 = vadd.f32 %v8893_v53, %v7950_v5  ;;  %v10565_v36 = vpop.eup %10564  ;;  %v7952_v14 = vmul.f32 %v21550_v38, %v6832_v35  ;;  %v6833_v62 = vmul.f32 %v10563_v23, %v6353_v54 }
 0x8de   :  { %9229 = vst.msk [vmem:[%s19497_s7 + $0x4d0] sm:$0xff] %vm67_vm0, %v9069_v21  ;;  %v6834_v25 = vmul.f32 %v10565_v36, %v6354_v26 }
 0x8df   :  { %v8898_v51 = vpop.permute.xlu1 %8897  ;;  %9230 = vst.msk [vmem:[%s19497_s7 + $0x4d8] sm:$0xff] %vm67_vm0, %v9070_v18  ;;  %v7953_v31 = vmul.f32 %v21551_v16, %v6833_v62 }
 0x8e0   :  { %v9071_v11 = vadd.f32 %v8898_v51, %v7951_v29  ;;  %v8903_v12 = vpop.permute.xlu0 %8902  ;;  %v7954_v19 = vmul.f32 %v21552_v61, %v6834_v25 }
 0x8e1   :  { %v9072_v43 = vadd.f32 %v8903_v12, %v7952_v14 }
 0x8e2   :  { %9231 = vst.msk [vmem:[%s19497_s7 + $0x4e0] sm:$0xff] %vm67_vm0, %v9071_v11 }
 0x8e3   :  { %v8908_v15 = vpop.permute.xlu1 %8907  ;;  %9232 = vst.msk [vmem:[%s19497_s7 + $0x4e8] sm:$0xff] %vm67_vm0, %v9072_v43 }
 0x8e4   :  { %v9073_v4 = vadd.f32 %v8908_v15, %v7953_v31  ;;  %v8913_v9 = vpop.permute.xlu0 %8912 }
 0x8e5   :  { %v9074_v42 = vadd.f32 %v8913_v9, %v7954_v19 }
 0x8e6   :  { %9233 = vst.msk [vmem:[%s19497_s7 + $0x4f0] sm:$0xff] %vm67_vm0, %v9073_v4 }
 0x8e7   :  { %9234 = vst.msk [vmem:[%s19497_s7 + $0x4f8] sm:$0xff] %vm67_vm0, %v9074_v42 }

</bundles_post_ra>
